<compile_context>
chip_gen: v6e
topology: v6e:2x2x1
jax: 0.10.0
libtpu: 0.0.40
codegen_flags: <defaults>
</compile_context>

<pallas_src>
import functools

import jax
import jax.numpy as jnp
from jax.experimental import pallas as pl
from jax.experimental.pallas import tpu as pltpu

VOCAB = 100          # input_size
HIDDEN = 128         # hidden_size
NUM_LAYERS = 2       # num_layers
OUT_SIZE = 2         # output_size
OUT_PAD = 128        # pad FC output to a full lane register (lane-dense store)
BP = 8               # batch padded to 8 sublanes
GROUPS = (VOCAB + 7) // 8   # dense emb_proj: 8 vocab rows per sublane group


def lstm_fc_kernel(tokens_ref,            # [B, T]  int32   (SMEM, scalar prefetch)
                   emb_proj_ref,          # [GROUPS, 8, 4H] f32 (emb@W_ih0^T+b0, gates [i,f,o,g])
                   w_hh0_ref,             # [H, 4H] bf16    (W_hh0^T)
                   b1_ref,                # [Bp, 4H] f32    (b_ih1 + b_hh1, pre-broadcast)
                   b_fc_ref,              # [Bp, OUT_PAD] f32
                   w_ih1_hbm,             # [H, 4H] bf16    (HBM, manual DMA)
                   w_hh1_hbm,             # [H, 4H] bf16    (HBM, manual DMA)
                   w_fc_hbm,              # [H, OUT_PAD] bf16 (HBM, manual DMA)
                   out_ref,               # [Bp, OUT_PAD] f32
                   w_ih1_vm,              # [H, 4H] bf16 VMEM scratch
                   w_hh1_vm,              # [H, 4H] bf16 VMEM scratch
                   w_fc_vm,               # [H, OUT_PAD] bf16 VMEM scratch
                   dma_sem):              # SemaphoreType.DMA((3,))
    B, T = tokens_ref.shape
    Bp = out_ref.shape[0]
    H = HIDDEN

    # ---- Overlapped weight DMA: layer-1 / FC weights are not needed until the
    # first layer-1 matmul / the epilogue, so hide their HBM->VMEM copies under
    # the step-0 gather and layer-0 work.
    cp_ih1 = pltpu.make_async_copy(w_ih1_hbm, w_ih1_vm, dma_sem.at[0])
    cp_hh1 = pltpu.make_async_copy(w_hh1_hbm, w_hh1_vm, dma_sem.at[1])
    cp_fc = pltpu.make_async_copy(w_fc_hbm, w_fc_vm, dma_sem.at[2])
    cp_ih1.start()
    cp_hh1.start()
    cp_fc.start()

    b1 = b1_ref[...]                          # hoisted (Bp, 4H) bias load
    sub_iota = jax.lax.broadcasted_iota(jnp.int32, (8, 1), 0)
    row_iota = jax.lax.broadcasted_iota(jnp.int32, (Bp, 1), 0)

    def gather_xp(t):
        """(Bp, 4H) layer-0 gate pre-activations for step t; padded rows are 0."""
        xp = jnp.zeros((Bp, 4 * H), jnp.float32)
        for b in range(B):                    # static; B is tiny
            tok = tokens_ref[b, t]            # SMEM scalar
            grp = emb_proj_ref[tok >> 3]      # (8, 4H) sublane group (dyn lead idx)
            row = jnp.sum(jnp.where(sub_iota == (tok & 7), grp, 0.0),
                          axis=0, keepdims=True)          # (1, 4H) selected row
            xp = xp + jnp.where(row_iota == b, row, 0.0)  # place at sublane b
        return xp

    def cell(gates, c_prev):
        # packed gate order: [i, f, o | g] -> one fused sigmoid + one tanh
        sig = jax.nn.sigmoid(gates[:, :3 * H])
        g_g = jnp.tanh(gates[:, 3 * H:])
        i_g = sig[:, :H]
        f_g = sig[:, H:2 * H]
        o_g = sig[:, 2 * H:3 * H]
        c_new = f_g * c_prev + i_g * g_g
        h_new = o_g * jnp.tanh(c_new)
        return h_new, c_new

    zero = jnp.zeros((Bp, H), jnp.float32)
    h0, c0, h1, c1 = zero, zero, zero, zero
    # Layer-1 recurrent partial h1_{t-1} @ W_hh1 (zero at t=0 since h1_{-1}=0).
    p1 = jnp.zeros((Bp, 4 * H), jnp.float32)

    for t in range(T):                        # static unroll (T small & static)
        # Layer 0: input projection precomputed; only the recurrent dot remains.
        xp_t = gather_xp(t)
        g0 = xp_t + jnp.dot(h0.astype(jnp.bfloat16), w_hh0_ref[...],
                            preferred_element_type=jnp.float32)
        h0, c0 = cell(g0, c0)

        if t == 0:
            cp_ih1.wait()
            cp_hh1.wait()

        # Layer 1: only the 128-deep h0-dependent dot is on the serial chain;
        # p1 (= h1_{t-1} @ W_hh1) was produced a whole step earlier.
        g1 = (jnp.dot(h0.astype(jnp.bfloat16), w_ih1_vm[...],
                      preferred_element_type=jnp.float32) + p1 + b1)
        h1, c1 = cell(g1, c1)

        if t + 1 < T:
            # Off-chain partial for the NEXT step (depends only on h1_t).
            p1 = jnp.dot(h1.astype(jnp.bfloat16), w_hh1_vm[...],
                         preferred_element_type=jnp.float32)

    # ---- FC on the last timestep's top-layer hidden state ----
    cp_fc.wait()
    out_ref[...] = (
        jnp.dot(h1.astype(jnp.bfloat16), w_fc_vm[...],
                preferred_element_type=jnp.float32)
        + b_fc_ref[...]
    )


@functools.partial(jax.jit, static_argnames=("seq_len",))
def chatbot_forward(tokens, params, seq_len):
    """tokens: [B, T] int32. Returns [B, OUT_SIZE] float32."""
    emb_proj, w_hh0, w_ih1, w_hh1, b1, w_fc_pad, b_fc_pad = params
    B, T = tokens.shape
    assert T == seq_len
    assert B <= BP

    out_pad = pl.pallas_call(
        lstm_fc_kernel,
        out_shape=jax.ShapeDtypeStruct((BP, OUT_PAD), jnp.float32),
        grid_spec=pltpu.PrefetchScalarGridSpec(
            num_scalar_prefetch=1,            # tokens -> SMEM
            grid=(1,),
            in_specs=[
                pl.BlockSpec((GROUPS, 8, 4 * HIDDEN), lambda i, tok: (0, 0, 0)),
                pl.BlockSpec((HIDDEN, 4 * HIDDEN), lambda i, tok: (0, 0)),
                pl.BlockSpec((BP, 4 * HIDDEN), lambda i, tok: (0, 0)),
                pl.BlockSpec((BP, OUT_PAD), lambda i, tok: (0, 0)),
                pl.BlockSpec(memory_space=pl.ANY),    # w_ih1 (manual DMA)
                pl.BlockSpec(memory_space=pl.ANY),    # w_hh1 (manual DMA)
                pl.BlockSpec(memory_space=pl.ANY),    # w_fc  (manual DMA)
            ],
            out_specs=pl.BlockSpec((BP, OUT_PAD), lambda i, tok: (0, 0)),
            scratch_shapes=[
                pltpu.VMEM((HIDDEN, 4 * HIDDEN), jnp.bfloat16),
                pltpu.VMEM((HIDDEN, 4 * HIDDEN), jnp.bfloat16),
                pltpu.VMEM((HIDDEN, OUT_PAD), jnp.bfloat16),
                pltpu.SemaphoreType.DMA((3,)),
            ],
        ),
        compiler_params=pltpu.CompilerParams(
            dimension_semantics=("arbitrary",)),
    )(tokens, emb_proj, w_hh0, b1, b_fc_pad, w_ih1, w_hh1, w_fc_pad)

    return out_pad[:B, :OUT_SIZE]


def init_params(key):
    """Deterministic synthetic parameters mirroring the PyTorch module shapes."""
    ks = jax.random.split(key, 8)
    emb = jax.random.normal(ks[0], (VOCAB, HIDDEN), jnp.float32) * 0.1
    # PyTorch LSTM: weight_ih_l{k}: (4H, H_in), weight_hh_l{k}: (4H, H),
    # biases: (4H,), gate order [i, f, g, o].
    w_ih = jax.random.normal(ks[1], (NUM_LAYERS, 4 * HIDDEN, HIDDEN), jnp.float32) * 0.05
    w_hh = jax.random.normal(ks[2], (NUM_LAYERS, 4 * HIDDEN, HIDDEN), jnp.float32) * 0.05
    b_ih = jax.random.normal(ks[3], (NUM_LAYERS, 4 * HIDDEN), jnp.float32) * 0.05
    b_hh = jax.random.normal(ks[4], (NUM_LAYERS, 4 * HIDDEN), jnp.float32) * 0.05
    # FC: weight (OUT_SIZE, HIDDEN), bias (OUT_SIZE,)
    w_fc = jax.random.normal(ks[5], (OUT_SIZE, HIDDEN), jnp.float32) * 0.05
    b_fc = jax.random.normal(ks[6], (OUT_SIZE,), jnp.float32) * 0.05

    raw_params = (emb, w_ih, w_hh, b_ih, b_hh, w_fc, b_fc)

    # ---------------- kernel-layout packing ----------------
    H = HIDDEN
    # Reorder gate blocks along the 4H axis: [i, f, g, o] -> [i, f, o, g].
    perm = jnp.concatenate([
        jnp.arange(0, H),
        jnp.arange(H, 2 * H),
        jnp.arange(3 * H, 4 * H),
        jnp.arange(2 * H, 3 * H),
    ])
    w_ih_r = jnp.take(w_ih, perm, axis=1)          # (L, 4H, H)
    w_hh_r = jnp.take(w_hh, perm, axis=1)          # (L, 4H, H)
    b_r = jnp.take(b_ih + b_hh, perm, axis=1)      # (L, 4H)

    # Layer 0: fold embedding + input projection + bias into one table, packed
    # densely (8 vocab rows per sublane group):  (GROUPS, 8, 4H) f32.
    emb_proj_flat = emb @ w_ih_r[0].T + b_r[0]                       # (VOCAB, 4H)
    pad_rows = GROUPS * 8 - VOCAB
    emb_proj = jnp.pad(emb_proj_flat, ((0, pad_rows), (0, 0))).reshape(
        GROUPS, 8, 4 * H)

    # Layer 0 recurrent weight, transposed, bf16.
    w_hh0 = jnp.transpose(w_hh_r[0]).astype(jnp.bfloat16)            # (H, 4H)

    # Layer 1: keep ih/hh as TWO (H, 4H) weights so the hh partial can run a
    # step early (no concat join on the critical chain); bf16.
    w_ih1 = jnp.transpose(w_ih_r[1]).astype(jnp.bfloat16)            # (H, 4H)
    w_hh1 = jnp.transpose(w_hh_r[1]).astype(jnp.bfloat16)            # (H, 4H)
    b1 = jnp.broadcast_to(b_r[1][None, :], (BP, 4 * H)).astype(jnp.float32)

    # FC: transposed, zero-padded to a full lane register; weights bf16.
    w_fc_pad = (jnp.zeros((H, OUT_PAD), jnp.float32)
                .at[:, :OUT_SIZE].set(w_fc.T)).astype(jnp.bfloat16)
    b_fc_pad = (jnp.zeros((BP, OUT_PAD), jnp.float32)
                .at[:, :OUT_SIZE].set(jnp.broadcast_to(b_fc, (BP, OUT_SIZE))))

    kernel_params = (emb_proj, w_hh0, w_ih1, w_hh1, b1, w_fc_pad, b_fc_pad)
    return kernel_params, raw_params


def reference_forward(tokens, raw_params):
    """Pure-JAX f32 reference matching PyTorch nn.LSTM semantics."""
    emb, w_ih, w_hh, b_ih, b_hh, w_fc, b_fc = raw_params
    x = emb[tokens]                                               # (B, T, H)
    B, T, H = x.shape
    h = jnp.zeros((NUM_LAYERS, B, H), jnp.float32)
    c = jnp.zeros((NUM_LAYERS, B, H), jnp.float32)
    for t in range(T):
        inp = x[:, t, :]
        for l in range(NUM_LAYERS):
            gates = inp @ w_ih[l].T + b_ih[l] + h[l] @ w_hh[l].T + b_hh[l]
            i_g = jax.nn.sigmoid(gates[:, 0 * H:1 * H])
            f_g = jax.nn.sigmoid(gates[:, 1 * H:2 * H])
            g_g = jnp.tanh(gates[:, 2 * H:3 * H])
            o_g = jax.nn.sigmoid(gates[:, 3 * H:4 * H])
            c = c.at[l].set(f_g * c[l] + i_g * g_g)
            h = h.at[l].set(o_g * jnp.tanh(c[l]))
            inp = h[l]
    return h[-1] @ w_fc.T + b_fc


if __name__ == "__main__":
    key = jax.random.PRNGKey(0)
    pkey, tkey = jax.random.split(key)

    kernel_params, raw_params = init_params(pkey)

    B, T = 2, 8
    tokens = jax.random.randint(tkey, (B, T), 0, VOCAB, dtype=jnp.int32)

    out = chatbot_forward(tokens, kernel_params, seq_len=T)
    out = jax.block_until_ready(out)

    ref = reference_forward(tokens, raw_params)
    assert out.shape == (B, OUT_SIZE), out.shape
    # bf16 matmul operands vs f32 reference -> looser tolerance.
    assert jnp.allclose(out, ref, atol=3e-2, rtol=3e-2), (out, ref)

    print("KERNEL_OK")
</pallas_src>

<mosaic_0001>
module attributes {stable_mosaic.version = 11 : i64} {
  func.func @lstm_fc_kernel(%arg0: i32, %arg1: memref<2x8xi32, #tpu.memory_space<smem>>, %arg2: memref<13x8x512xf32, #tpu.memory_space<vmem>>, %arg3: memref<128x512xbf16, #tpu.memory_space<vmem>>, %arg4: memref<8x512xf32, #tpu.memory_space<vmem>>, %arg5: memref<8x128xf32, #tpu.memory_space<vmem>>, %arg6: memref<128x512xbf16, #tpu.memory_space<any>>, %arg7: memref<128x512xbf16, #tpu.memory_space<any>>, %arg8: memref<128x128xbf16, #tpu.memory_space<any>>, %arg9: memref<8x128xf32, #tpu.memory_space<vmem>>, %arg10: memref<128x512xbf16, #tpu.memory_space<vmem>>, %arg11: memref<128x512xbf16, #tpu.memory_space<vmem>>, %arg12: memref<128x128xbf16, #tpu.memory_space<vmem>>, %arg13: memref<3x!tpu.dma_semaphore, #tpu.memory_space<semaphore_mem>>) attributes {dimension_semantics = [#tpu.dimension_semantics<arbitrary>], iteration_bounds = array<i64: 1>, scalar_prefetch = 1 : i64, scratch_operands = 4 : i64, tpu.core_type = #tpu.core_type<tc>, window_params = [{pipeline_mode = #tpu.pipeline_mode<synchronous>, transform_indices = @transform_0, window_bounds = array<i64: 13, 8, 512>}, {pipeline_mode = #tpu.pipeline_mode<synchronous>, transform_indices = @transform_1, window_bounds = array<i64: 128, 512>}, {pipeline_mode = #tpu.pipeline_mode<synchronous>, transform_indices = @transform_2, window_bounds = array<i64: 8, 512>}, {pipeline_mode = #tpu.pipeline_mode<synchronous>, transform_indices = @transform_3, window_bounds = array<i64: 8, 128>}, {}, {}, {}, {pipeline_mode = #tpu.pipeline_mode<synchronous>, transform_indices = @transform_7, window_bounds = array<i64: 8, 128>}]} {
    %c0_i32 = arith.constant 0 : i32
    %0 = tpu.memref_slice %arg13[%c0_i32] : memref<3x!tpu.dma_semaphore, #tpu.memory_space<semaphore_mem>> -> memref<1x!tpu.dma_semaphore, #tpu.memory_space<semaphore_mem>>
    %1 = tpu.memref_squeeze %0 : memref<1x!tpu.dma_semaphore, #tpu.memory_space<semaphore_mem>> -> memref<!tpu.dma_semaphore, #tpu.memory_space<semaphore_mem>>
    tpu.enqueue_dma source(%arg6 : memref<128x512xbf16, #tpu.memory_space<any>>) target(%arg10 : memref<128x512xbf16, #tpu.memory_space<vmem>>) target_semaphore(%1 : memref<!tpu.dma_semaphore, #tpu.memory_space<semaphore_mem>>)
    %c1_i32 = arith.constant 1 : i32
    %2 = tpu.memref_slice %arg13[%c1_i32] : memref<3x!tpu.dma_semaphore, #tpu.memory_space<semaphore_mem>> -> memref<1x!tpu.dma_semaphore, #tpu.memory_space<semaphore_mem>>
    %3 = tpu.memref_squeeze %2 : memref<1x!tpu.dma_semaphore, #tpu.memory_space<semaphore_mem>> -> memref<!tpu.dma_semaphore, #tpu.memory_space<semaphore_mem>>
    tpu.enqueue_dma source(%arg7 : memref<128x512xbf16, #tpu.memory_space<any>>) target(%arg11 : memref<128x512xbf16, #tpu.memory_space<vmem>>) target_semaphore(%3 : memref<!tpu.dma_semaphore, #tpu.memory_space<semaphore_mem>>)
    %c2_i32 = arith.constant 2 : i32
    %4 = tpu.memref_slice %arg13[%c2_i32] : memref<3x!tpu.dma_semaphore, #tpu.memory_space<semaphore_mem>> -> memref<1x!tpu.dma_semaphore, #tpu.memory_space<semaphore_mem>>
    %5 = tpu.memref_squeeze %4 : memref<1x!tpu.dma_semaphore, #tpu.memory_space<semaphore_mem>> -> memref<!tpu.dma_semaphore, #tpu.memory_space<semaphore_mem>>
    tpu.enqueue_dma source(%arg8 : memref<128x128xbf16, #tpu.memory_space<any>>) target(%arg12 : memref<128x128xbf16, #tpu.memory_space<vmem>>) target_semaphore(%5 : memref<!tpu.dma_semaphore, #tpu.memory_space<semaphore_mem>>)
    %c0 = arith.constant 0 : index
    %c0_0 = arith.constant 0 : index
    %6 = vector.load %arg4[%c0, %c0_0] : memref<8x512xf32, #tpu.memory_space<vmem>>, vector<8x512xf32>
    %7 = tpu.iota {dimensions = array<i32: 0>} : vector<8x1xi32>
    %8 = tpu.iota {dimensions = array<i32: 0>} : vector<8x1xi32>
    %cst = arith.constant 0.000000e+00 : f32
    %9 = vector.broadcast %cst : f32 to vector<8x128xf32>
    %cst_1 = arith.constant 0.000000e+00 : f32
    %10 = vector.broadcast %cst_1 : f32 to vector<8x512xf32>
    %cst_2 = arith.constant 0.000000e+00 : f32
    %11 = vector.broadcast %cst_2 : f32 to vector<8x512xf32>
    %c0_3 = arith.constant 0 : index
    %c0_4 = arith.constant 0 : index
    %12 = memref.load %arg1[%c0_3, %c0_4] : memref<2x8xi32, #tpu.memory_space<smem>>
    %c3_i32 = arith.constant 3 : i32
    %13 = arith.shrsi %12, %c3_i32 : i32
    %14 = arith.index_cast %13 : i32 to index
    %c0_5 = arith.constant 0 : index
    %c0_6 = arith.constant 0 : index
    %15 = vector.load %arg2[%14, %c0_5, %c0_6] : memref<13x8x512xf32, #tpu.memory_space<vmem>>, vector<1x8x512xf32>
    %16 = vector.shape_cast %15 : vector<1x8x512xf32> to vector<8x512xf32>
    %c7_i32 = arith.constant 7 : i32
    %17 = arith.andi %12, %c7_i32 : i32
    %18 = vector.broadcast %17 : i32 to vector<8x1xi32>
    %19 = arith.cmpi eq, %7, %18 : vector<8x1xi32>
    %cst_7 = arith.constant 0.000000e+00 : f32
    %20 = vector.shape_cast %19 : vector<8x1xi1> to vector<8x1xi1>
    %21 = vector.broadcast %20 : vector<8x1xi1> to vector<8x512xi1>
    %22 = vector.broadcast %cst_7 : f32 to vector<8x512xf32>
    %23 = arith.select %21, %16, %22 : vector<8x512xi1>, vector<8x512xf32>
    %cst_8 = arith.constant dense<0.000000e+00> : vector<512xf32>
    %24 = vector.multi_reduction <add>, %23, %cst_8 [0] : vector<8x512xf32> to vector<512xf32>
    %25 = vector.shape_cast %24 : vector<512xf32> to vector<1x512xf32>
    %c0_i32_9 = arith.constant 0 : i32
    %26 = vector.broadcast %c0_i32_9 : i32 to vector<8x1xi32>
    %27 = arith.cmpi eq, %8, %26 : vector<8x1xi32>
    %cst_10 = arith.constant 0.000000e+00 : f32
    %28 = vector.shape_cast %27 : vector<8x1xi1> to vector<8x1xi1>
    %29 = vector.broadcast %28 : vector<8x1xi1> to vector<8x512xi1>
    %30 = vector.shape_cast %25 : vector<1x512xf32> to vector<1x512xf32>
    %31 = vector.broadcast %30 : vector<1x512xf32> to vector<8x512xf32>
    %32 = vector.broadcast %cst_10 : f32 to vector<8x512xf32>
    %33 = arith.select %29, %31, %32 : vector<8x512xi1>, vector<8x512xf32>
    %34 = arith.addf %11, %33 : vector<8x512xf32>
    %c1 = arith.constant 1 : index
    %c0_11 = arith.constant 0 : index
    %35 = memref.load %arg1[%c1, %c0_11] : memref<2x8xi32, #tpu.memory_space<smem>>
    %c3_i32_12 = arith.constant 3 : i32
    %36 = arith.shrsi %35, %c3_i32_12 : i32
    %37 = arith.index_cast %36 : i32 to index
    %c0_13 = arith.constant 0 : index
    %c0_14 = arith.constant 0 : index
    %38 = vector.load %arg2[%37, %c0_13, %c0_14] : memref<13x8x512xf32, #tpu.memory_space<vmem>>, vector<1x8x512xf32>
    %39 = vector.shape_cast %38 : vector<1x8x512xf32> to vector<8x512xf32>
    %c7_i32_15 = arith.constant 7 : i32
    %40 = arith.andi %35, %c7_i32_15 : i32
    %41 = vector.broadcast %40 : i32 to vector<8x1xi32>
    %42 = arith.cmpi eq, %7, %41 : vector<8x1xi32>
    %cst_16 = arith.constant 0.000000e+00 : f32
    %43 = vector.shape_cast %42 : vector<8x1xi1> to vector<8x1xi1>
    %44 = vector.broadcast %43 : vector<8x1xi1> to vector<8x512xi1>
    %45 = vector.broadcast %cst_16 : f32 to vector<8x512xf32>
    %46 = arith.select %44, %39, %45 : vector<8x512xi1>, vector<8x512xf32>
    %cst_17 = arith.constant dense<0.000000e+00> : vector<512xf32>
    %47 = vector.multi_reduction <add>, %46, %cst_17 [0] : vector<8x512xf32> to vector<512xf32>
    %48 = vector.shape_cast %47 : vector<512xf32> to vector<1x512xf32>
    %c1_i32_18 = arith.constant 1 : i32
    %49 = vector.broadcast %c1_i32_18 : i32 to vector<8x1xi32>
    %50 = arith.cmpi eq, %8, %49 : vector<8x1xi32>
    %cst_19 = arith.constant 0.000000e+00 : f32
    %51 = vector.shape_cast %50 : vector<8x1xi1> to vector<8x1xi1>
    %52 = vector.broadcast %51 : vector<8x1xi1> to vector<8x512xi1>
    %53 = vector.shape_cast %48 : vector<1x512xf32> to vector<1x512xf32>
    %54 = vector.broadcast %53 : vector<1x512xf32> to vector<8x512xf32>
    %55 = vector.broadcast %cst_19 : f32 to vector<8x512xf32>
    %56 = arith.select %52, %54, %55 : vector<8x512xi1>, vector<8x512xf32>
    %57 = arith.addf %34, %56 : vector<8x512xf32>
    %58 = arith.truncf %9 : vector<8x128xf32> to vector<8x128xbf16>
    %c0_20 = arith.constant 0 : index
    %c0_21 = arith.constant 0 : index
    %59 = vector.load %arg3[%c0_20, %c0_21] : memref<128x512xbf16, #tpu.memory_space<vmem>>, vector<128x512xbf16>
    %cst_22 = arith.constant dense<0.000000e+00> : vector<8x512xf32>
    %60 = tpu.matmul %58, %59, %cst_22 {dimension_numbers = #tpu.dot_dimension_numbers<[1], [0], [0], [1], [0, 0, 1, 1], [], []>} : vector<8x128xbf16>, vector<128x512xbf16>, vector<8x512xf32> -> vector<8x512xf32>
    %61 = arith.addf %57, %60 : vector<8x512xf32>
    %62 = vector.extract_strided_slice %61 {offsets = [0, 0], sizes = [8, 384], strides = [1, 1]} : vector<8x512xf32> to vector<8x384xf32>
    %63 = arith.negf %62 : vector<8x384xf32>
    %64 = math.exp %63 : vector<8x384xf32>
    %cst_23 = arith.constant 1.000000e+00 : f32
    %65 = vector.broadcast %cst_23 : f32 to vector<8x384xf32>
    %66 = arith.addf %65, %64 : vector<8x384xf32>
    %67 = arith.divf %65, %66 : vector<8x384xf32>
    %68 = vector.extract_strided_slice %61 {offsets = [0, 384], sizes = [8, 128], strides = [1, 1]} : vector<8x512xf32> to vector<8x128xf32>
    %69 = math.tanh %68 : vector<8x128xf32>
    %70 = vector.extract_strided_slice %67 {offsets = [0, 0], sizes = [8, 128], strides = [1, 1]} : vector<8x384xf32> to vector<8x128xf32>
    %71 = vector.extract_strided_slice %67 {offsets = [0, 128], sizes = [8, 128], strides = [1, 1]} : vector<8x384xf32> to vector<8x128xf32>
    %72 = vector.extract_strided_slice %67 {offsets = [0, 256], sizes = [8, 128], strides = [1, 1]} : vector<8x384xf32> to vector<8x128xf32>
    %73 = arith.mulf %71, %9 : vector<8x128xf32>
    %74 = arith.mulf %70, %69 : vector<8x128xf32>
    %75 = arith.addf %73, %74 : vector<8x128xf32>
    %76 = math.tanh %75 : vector<8x128xf32>
    %77 = arith.mulf %72, %76 : vector<8x128xf32>
    %c0_i32_24 = arith.constant 0 : i32
    %78 = tpu.memref_slice %arg13[%c0_i32_24] : memref<3x!tpu.dma_semaphore, #tpu.memory_space<semaphore_mem>> -> memref<1x!tpu.dma_semaphore, #tpu.memory_space<semaphore_mem>>
    %79 = tpu.memref_squeeze %78 : memref<1x!tpu.dma_semaphore, #tpu.memory_space<semaphore_mem>> -> memref<!tpu.dma_semaphore, #tpu.memory_space<semaphore_mem>>
    tpu.wait_dma2 semaphore(%79 : memref<!tpu.dma_semaphore, #tpu.memory_space<semaphore_mem>>) src(%arg6 : memref<128x512xbf16, #tpu.memory_space<any>>) dst(%arg10 : memref<128x512xbf16, #tpu.memory_space<vmem>>)
    %c1_i32_25 = arith.constant 1 : i32
    %80 = tpu.memref_slice %arg13[%c1_i32_25] : memref<3x!tpu.dma_semaphore, #tpu.memory_space<semaphore_mem>> -> memref<1x!tpu.dma_semaphore, #tpu.memory_space<semaphore_mem>>
    %81 = tpu.memref_squeeze %80 : memref<1x!tpu.dma_semaphore, #tpu.memory_space<semaphore_mem>> -> memref<!tpu.dma_semaphore, #tpu.memory_space<semaphore_mem>>
    tpu.wait_dma2 semaphore(%81 : memref<!tpu.dma_semaphore, #tpu.memory_space<semaphore_mem>>) src(%arg7 : memref<128x512xbf16, #tpu.memory_space<any>>) dst(%arg11 : memref<128x512xbf16, #tpu.memory_space<vmem>>)
    %82 = arith.truncf %77 : vector<8x128xf32> to vector<8x128xbf16>
    %c0_26 = arith.constant 0 : index
    %c0_27 = arith.constant 0 : index
    %83 = vector.load %arg10[%c0_26, %c0_27] : memref<128x512xbf16, #tpu.memory_space<vmem>>, vector<128x512xbf16>
    %cst_28 = arith.constant dense<0.000000e+00> : vector<8x512xf32>
    %84 = tpu.matmul %82, %83, %cst_28 {dimension_numbers = #tpu.dot_dimension_numbers<[1], [0], [0], [1], [0, 0, 1, 1], [], []>} : vector<8x128xbf16>, vector<128x512xbf16>, vector<8x512xf32> -> vector<8x512xf32>
    %85 = arith.addf %84, %10 : vector<8x512xf32>
    %86 = arith.addf %85, %6 : vector<8x512xf32>
    %87 = vector.extract_strided_slice %86 {offsets = [0, 0], sizes = [8, 384], strides = [1, 1]} : vector<8x512xf32> to vector<8x384xf32>
    %88 = arith.negf %87 : vector<8x384xf32>
    %89 = math.exp %88 : vector<8x384xf32>
    %cst_29 = arith.constant 1.000000e+00 : f32
    %90 = vector.broadcast %cst_29 : f32 to vector<8x384xf32>
    %91 = arith.addf %90, %89 : vector<8x384xf32>
    %92 = arith.divf %90, %91 : vector<8x384xf32>
    %93 = vector.extract_strided_slice %86 {offsets = [0, 384], sizes = [8, 128], strides = [1, 1]} : vector<8x512xf32> to vector<8x128xf32>
    %94 = math.tanh %93 : vector<8x128xf32>
    %95 = vector.extract_strided_slice %92 {offsets = [0, 0], sizes = [8, 128], strides = [1, 1]} : vector<8x384xf32> to vector<8x128xf32>
    %96 = vector.extract_strided_slice %92 {offsets = [0, 128], sizes = [8, 128], strides = [1, 1]} : vector<8x384xf32> to vector<8x128xf32>
    %97 = vector.extract_strided_slice %92 {offsets = [0, 256], sizes = [8, 128], strides = [1, 1]} : vector<8x384xf32> to vector<8x128xf32>
    %98 = arith.mulf %96, %9 : vector<8x128xf32>
    %99 = arith.mulf %95, %94 : vector<8x128xf32>
    %100 = arith.addf %98, %99 : vector<8x128xf32>
    %101 = math.tanh %100 : vector<8x128xf32>
    %102 = arith.mulf %97, %101 : vector<8x128xf32>
    %103 = arith.truncf %102 : vector<8x128xf32> to vector<8x128xbf16>
    %c0_30 = arith.constant 0 : index
    %c0_31 = arith.constant 0 : index
    %104 = vector.load %arg11[%c0_30, %c0_31] : memref<128x512xbf16, #tpu.memory_space<vmem>>, vector<128x512xbf16>
    %cst_32 = arith.constant dense<0.000000e+00> : vector<8x512xf32>
    %105 = tpu.matmul %103, %104, %cst_32 {dimension_numbers = #tpu.dot_dimension_numbers<[1], [0], [0], [1], [0, 0, 1, 1], [], []>} : vector<8x128xbf16>, vector<128x512xbf16>, vector<8x512xf32> -> vector<8x512xf32>
    %cst_33 = arith.constant 0.000000e+00 : f32
    %106 = vector.broadcast %cst_33 : f32 to vector<8x512xf32>
    %c0_34 = arith.constant 0 : index
    %c1_35 = arith.constant 1 : index
    %107 = memref.load %arg1[%c0_34, %c1_35] : memref<2x8xi32, #tpu.memory_space<smem>>
    %c3_i32_36 = arith.constant 3 : i32
    %108 = arith.shrsi %107, %c3_i32_36 : i32
    %109 = arith.index_cast %108 : i32 to index
    %c0_37 = arith.constant 0 : index
    %c0_38 = arith.constant 0 : index
    %110 = vector.load %arg2[%109, %c0_37, %c0_38] : memref<13x8x512xf32, #tpu.memory_space<vmem>>, vector<1x8x512xf32>
    %111 = vector.shape_cast %110 : vector<1x8x512xf32> to vector<8x512xf32>
    %c7_i32_39 = arith.constant 7 : i32
    %112 = arith.andi %107, %c7_i32_39 : i32
    %113 = vector.broadcast %112 : i32 to vector<8x1xi32>
    %114 = arith.cmpi eq, %7, %113 : vector<8x1xi32>
    %cst_40 = arith.constant 0.000000e+00 : f32
    %115 = vector.shape_cast %114 : vector<8x1xi1> to vector<8x1xi1>
    %116 = vector.broadcast %115 : vector<8x1xi1> to vector<8x512xi1>
    %117 = vector.broadcast %cst_40 : f32 to vector<8x512xf32>
    %118 = arith.select %116, %111, %117 : vector<8x512xi1>, vector<8x512xf32>
    %cst_41 = arith.constant dense<0.000000e+00> : vector<512xf32>
    %119 = vector.multi_reduction <add>, %118, %cst_41 [0] : vector<8x512xf32> to vector<512xf32>
    %120 = vector.shape_cast %119 : vector<512xf32> to vector<1x512xf32>
    %c0_i32_42 = arith.constant 0 : i32
    %121 = vector.broadcast %c0_i32_42 : i32 to vector<8x1xi32>
    %122 = arith.cmpi eq, %8, %121 : vector<8x1xi32>
    %cst_43 = arith.constant 0.000000e+00 : f32
    %123 = vector.shape_cast %122 : vector<8x1xi1> to vector<8x1xi1>
    %124 = vector.broadcast %123 : vector<8x1xi1> to vector<8x512xi1>
    %125 = vector.shape_cast %120 : vector<1x512xf32> to vector<1x512xf32>
    %126 = vector.broadcast %125 : vector<1x512xf32> to vector<8x512xf32>
    %127 = vector.broadcast %cst_43 : f32 to vector<8x512xf32>
    %128 = arith.select %124, %126, %127 : vector<8x512xi1>, vector<8x512xf32>
    %129 = arith.addf %106, %128 : vector<8x512xf32>
    %c1_44 = arith.constant 1 : index
    %c1_45 = arith.constant 1 : index
    %130 = memref.load %arg1[%c1_44, %c1_45] : memref<2x8xi32, #tpu.memory_space<smem>>
    %c3_i32_46 = arith.constant 3 : i32
    %131 = arith.shrsi %130, %c3_i32_46 : i32
    %132 = arith.index_cast %131 : i32 to index
    %c0_47 = arith.constant 0 : index
    %c0_48 = arith.constant 0 : index
    %133 = vector.load %arg2[%132, %c0_47, %c0_48] : memref<13x8x512xf32, #tpu.memory_space<vmem>>, vector<1x8x512xf32>
    %134 = vector.shape_cast %133 : vector<1x8x512xf32> to vector<8x512xf32>
    %c7_i32_49 = arith.constant 7 : i32
    %135 = arith.andi %130, %c7_i32_49 : i32
    %136 = vector.broadcast %135 : i32 to vector<8x1xi32>
    %137 = arith.cmpi eq, %7, %136 : vector<8x1xi32>
    %cst_50 = arith.constant 0.000000e+00 : f32
    %138 = vector.shape_cast %137 : vector<8x1xi1> to vector<8x1xi1>
    %139 = vector.broadcast %138 : vector<8x1xi1> to vector<8x512xi1>
    %140 = vector.broadcast %cst_50 : f32 to vector<8x512xf32>
    %141 = arith.select %139, %134, %140 : vector<8x512xi1>, vector<8x512xf32>
    %cst_51 = arith.constant dense<0.000000e+00> : vector<512xf32>
    %142 = vector.multi_reduction <add>, %141, %cst_51 [0] : vector<8x512xf32> to vector<512xf32>
    %143 = vector.shape_cast %142 : vector<512xf32> to vector<1x512xf32>
    %c1_i32_52 = arith.constant 1 : i32
    %144 = vector.broadcast %c1_i32_52 : i32 to vector<8x1xi32>
    %145 = arith.cmpi eq, %8, %144 : vector<8x1xi32>
    %cst_53 = arith.constant 0.000000e+00 : f32
    %146 = vector.shape_cast %145 : vector<8x1xi1> to vector<8x1xi1>
    %147 = vector.broadcast %146 : vector<8x1xi1> to vector<8x512xi1>
    %148 = vector.shape_cast %143 : vector<1x512xf32> to vector<1x512xf32>
    %149 = vector.broadcast %148 : vector<1x512xf32> to vector<8x512xf32>
    %150 = vector.broadcast %cst_53 : f32 to vector<8x512xf32>
    %151 = arith.select %147, %149, %150 : vector<8x512xi1>, vector<8x512xf32>
    %152 = arith.addf %129, %151 : vector<8x512xf32>
    %153 = arith.truncf %77 : vector<8x128xf32> to vector<8x128xbf16>
    %c0_54 = arith.constant 0 : index
    %c0_55 = arith.constant 0 : index
    %154 = vector.load %arg3[%c0_54, %c0_55] : memref<128x512xbf16, #tpu.memory_space<vmem>>, vector<128x512xbf16>
    %cst_56 = arith.constant dense<0.000000e+00> : vector<8x512xf32>
    %155 = tpu.matmul %153, %154, %cst_56 {dimension_numbers = #tpu.dot_dimension_numbers<[1], [0], [0], [1], [0, 0, 1, 1], [], []>} : vector<8x128xbf16>, vector<128x512xbf16>, vector<8x512xf32> -> vector<8x512xf32>
    %156 = arith.addf %152, %155 : vector<8x512xf32>
    %157 = vector.extract_strided_slice %156 {offsets = [0, 0], sizes = [8, 384], strides = [1, 1]} : vector<8x512xf32> to vector<8x384xf32>
    %158 = arith.negf %157 : vector<8x384xf32>
    %159 = math.exp %158 : vector<8x384xf32>
    %cst_57 = arith.constant 1.000000e+00 : f32
    %160 = vector.broadcast %cst_57 : f32 to vector<8x384xf32>
    %161 = arith.addf %160, %159 : vector<8x384xf32>
    %162 = arith.divf %160, %161 : vector<8x384xf32>
    %163 = vector.extract_strided_slice %156 {offsets = [0, 384], sizes = [8, 128], strides = [1, 1]} : vector<8x512xf32> to vector<8x128xf32>
    %164 = math.tanh %163 : vector<8x128xf32>
    %165 = vector.extract_strided_slice %162 {offsets = [0, 0], sizes = [8, 128], strides = [1, 1]} : vector<8x384xf32> to vector<8x128xf32>
    %166 = vector.extract_strided_slice %162 {offsets = [0, 128], sizes = [8, 128], strides = [1, 1]} : vector<8x384xf32> to vector<8x128xf32>
    %167 = vector.extract_strided_slice %162 {offsets = [0, 256], sizes = [8, 128], strides = [1, 1]} : vector<8x384xf32> to vector<8x128xf32>
    %168 = arith.mulf %166, %75 : vector<8x128xf32>
    %169 = arith.mulf %165, %164 : vector<8x128xf32>
    %170 = arith.addf %168, %169 : vector<8x128xf32>
    %171 = math.tanh %170 : vector<8x128xf32>
    %172 = arith.mulf %167, %171 : vector<8x128xf32>
    %173 = arith.truncf %172 : vector<8x128xf32> to vector<8x128xbf16>
    %c0_58 = arith.constant 0 : index
    %c0_59 = arith.constant 0 : index
    %174 = vector.load %arg10[%c0_58, %c0_59] : memref<128x512xbf16, #tpu.memory_space<vmem>>, vector<128x512xbf16>
    %cst_60 = arith.constant dense<0.000000e+00> : vector<8x512xf32>
    %175 = tpu.matmul %173, %174, %cst_60 {dimension_numbers = #tpu.dot_dimension_numbers<[1], [0], [0], [1], [0, 0, 1, 1], [], []>} : vector<8x128xbf16>, vector<128x512xbf16>, vector<8x512xf32> -> vector<8x512xf32>
    %176 = arith.addf %175, %105 : vector<8x512xf32>
    %177 = arith.addf %176, %6 : vector<8x512xf32>
    %178 = vector.extract_strided_slice %177 {offsets = [0, 0], sizes = [8, 384], strides = [1, 1]} : vector<8x512xf32> to vector<8x384xf32>
    %179 = arith.negf %178 : vector<8x384xf32>
    %180 = math.exp %179 : vector<8x384xf32>
    %cst_61 = arith.constant 1.000000e+00 : f32
    %181 = vector.broadcast %cst_61 : f32 to vector<8x384xf32>
    %182 = arith.addf %181, %180 : vector<8x384xf32>
    %183 = arith.divf %181, %182 : vector<8x384xf32>
    %184 = vector.extract_strided_slice %177 {offsets = [0, 384], sizes = [8, 128], strides = [1, 1]} : vector<8x512xf32> to vector<8x128xf32>
    %185 = math.tanh %184 : vector<8x128xf32>
    %186 = vector.extract_strided_slice %183 {offsets = [0, 0], sizes = [8, 128], strides = [1, 1]} : vector<8x384xf32> to vector<8x128xf32>
    %187 = vector.extract_strided_slice %183 {offsets = [0, 128], sizes = [8, 128], strides = [1, 1]} : vector<8x384xf32> to vector<8x128xf32>
    %188 = vector.extract_strided_slice %183 {offsets = [0, 256], sizes = [8, 128], strides = [1, 1]} : vector<8x384xf32> to vector<8x128xf32>
    %189 = arith.mulf %187, %100 : vector<8x128xf32>
    %190 = arith.mulf %186, %185 : vector<8x128xf32>
    %191 = arith.addf %189, %190 : vector<8x128xf32>
    %192 = math.tanh %191 : vector<8x128xf32>
    %193 = arith.mulf %188, %192 : vector<8x128xf32>
    %194 = arith.truncf %193 : vector<8x128xf32> to vector<8x128xbf16>
    %c0_62 = arith.constant 0 : index
    %c0_63 = arith.constant 0 : index
    %195 = vector.load %arg11[%c0_62, %c0_63] : memref<128x512xbf16, #tpu.memory_space<vmem>>, vector<128x512xbf16>
    %cst_64 = arith.constant dense<0.000000e+00> : vector<8x512xf32>
    %196 = tpu.matmul %194, %195, %cst_64 {dimension_numbers = #tpu.dot_dimension_numbers<[1], [0], [0], [1], [0, 0, 1, 1], [], []>} : vector<8x128xbf16>, vector<128x512xbf16>, vector<8x512xf32> -> vector<8x512xf32>
    %cst_65 = arith.constant 0.000000e+00 : f32
    %197 = vector.broadcast %cst_65 : f32 to vector<8x512xf32>
    %c0_66 = arith.constant 0 : index
    %c2 = arith.constant 2 : index
    %198 = memref.load %arg1[%c0_66, %c2] : memref<2x8xi32, #tpu.memory_space<smem>>
    %c3_i32_67 = arith.constant 3 : i32
    %199 = arith.shrsi %198, %c3_i32_67 : i32
    %200 = arith.index_cast %199 : i32 to index
    %c0_68 = arith.constant 0 : index
    %c0_69 = arith.constant 0 : index
    %201 = vector.load %arg2[%200, %c0_68, %c0_69] : memref<13x8x512xf32, #tpu.memory_space<vmem>>, vector<1x8x512xf32>
    %202 = vector.shape_cast %201 : vector<1x8x512xf32> to vector<8x512xf32>
    %c7_i32_70 = arith.constant 7 : i32
    %203 = arith.andi %198, %c7_i32_70 : i32
    %204 = vector.broadcast %203 : i32 to vector<8x1xi32>
    %205 = arith.cmpi eq, %7, %204 : vector<8x1xi32>
    %cst_71 = arith.constant 0.000000e+00 : f32
    %206 = vector.shape_cast %205 : vector<8x1xi1> to vector<8x1xi1>
    %207 = vector.broadcast %206 : vector<8x1xi1> to vector<8x512xi1>
    %208 = vector.broadcast %cst_71 : f32 to vector<8x512xf32>
    %209 = arith.select %207, %202, %208 : vector<8x512xi1>, vector<8x512xf32>
    %cst_72 = arith.constant dense<0.000000e+00> : vector<512xf32>
    %210 = vector.multi_reduction <add>, %209, %cst_72 [0] : vector<8x512xf32> to vector<512xf32>
    %211 = vector.shape_cast %210 : vector<512xf32> to vector<1x512xf32>
    %c0_i32_73 = arith.constant 0 : i32
    %212 = vector.broadcast %c0_i32_73 : i32 to vector<8x1xi32>
    %213 = arith.cmpi eq, %8, %212 : vector<8x1xi32>
    %cst_74 = arith.constant 0.000000e+00 : f32
    %214 = vector.shape_cast %213 : vector<8x1xi1> to vector<8x1xi1>
    %215 = vector.broadcast %214 : vector<8x1xi1> to vector<8x512xi1>
    %216 = vector.shape_cast %211 : vector<1x512xf32> to vector<1x512xf32>
    %217 = vector.broadcast %216 : vector<1x512xf32> to vector<8x512xf32>
    %218 = vector.broadcast %cst_74 : f32 to vector<8x512xf32>
    %219 = arith.select %215, %217, %218 : vector<8x512xi1>, vector<8x512xf32>
    %220 = arith.addf %197, %219 : vector<8x512xf32>
    %c1_75 = arith.constant 1 : index
    %c2_76 = arith.constant 2 : index
    %221 = memref.load %arg1[%c1_75, %c2_76] : memref<2x8xi32, #tpu.memory_space<smem>>
    %c3_i32_77 = arith.constant 3 : i32
    %222 = arith.shrsi %221, %c3_i32_77 : i32
    %223 = arith.index_cast %222 : i32 to index
    %c0_78 = arith.constant 0 : index
    %c0_79 = arith.constant 0 : index
    %224 = vector.load %arg2[%223, %c0_78, %c0_79] : memref<13x8x512xf32, #tpu.memory_space<vmem>>, vector<1x8x512xf32>
    %225 = vector.shape_cast %224 : vector<1x8x512xf32> to vector<8x512xf32>
    %c7_i32_80 = arith.constant 7 : i32
    %226 = arith.andi %221, %c7_i32_80 : i32
    %227 = vector.broadcast %226 : i32 to vector<8x1xi32>
    %228 = arith.cmpi eq, %7, %227 : vector<8x1xi32>
    %cst_81 = arith.constant 0.000000e+00 : f32
    %229 = vector.shape_cast %228 : vector<8x1xi1> to vector<8x1xi1>
    %230 = vector.broadcast %229 : vector<8x1xi1> to vector<8x512xi1>
    %231 = vector.broadcast %cst_81 : f32 to vector<8x512xf32>
    %232 = arith.select %230, %225, %231 : vector<8x512xi1>, vector<8x512xf32>
    %cst_82 = arith.constant dense<0.000000e+00> : vector<512xf32>
    %233 = vector.multi_reduction <add>, %232, %cst_82 [0] : vector<8x512xf32> to vector<512xf32>
    %234 = vector.shape_cast %233 : vector<512xf32> to vector<1x512xf32>
    %c1_i32_83 = arith.constant 1 : i32
    %235 = vector.broadcast %c1_i32_83 : i32 to vector<8x1xi32>
    %236 = arith.cmpi eq, %8, %235 : vector<8x1xi32>
    %cst_84 = arith.constant 0.000000e+00 : f32
    %237 = vector.shape_cast %236 : vector<8x1xi1> to vector<8x1xi1>
    %238 = vector.broadcast %237 : vector<8x1xi1> to vector<8x512xi1>
    %239 = vector.shape_cast %234 : vector<1x512xf32> to vector<1x512xf32>
    %240 = vector.broadcast %239 : vector<1x512xf32> to vector<8x512xf32>
    %241 = vector.broadcast %cst_84 : f32 to vector<8x512xf32>
    %242 = arith.select %238, %240, %241 : vector<8x512xi1>, vector<8x512xf32>
    %243 = arith.addf %220, %242 : vector<8x512xf32>
    %244 = arith.truncf %172 : vector<8x128xf32> to vector<8x128xbf16>
    %c0_85 = arith.constant 0 : index
    %c0_86 = arith.constant 0 : index
    %245 = vector.load %arg3[%c0_85, %c0_86] : memref<128x512xbf16, #tpu.memory_space<vmem>>, vector<128x512xbf16>
    %cst_87 = arith.constant dense<0.000000e+00> : vector<8x512xf32>
    %246 = tpu.matmul %244, %245, %cst_87 {dimension_numbers = #tpu.dot_dimension_numbers<[1], [0], [0], [1], [0, 0, 1, 1], [], []>} : vector<8x128xbf16>, vector<128x512xbf16>, vector<8x512xf32> -> vector<8x512xf32>
    %247 = arith.addf %243, %246 : vector<8x512xf32>
    %248 = vector.extract_strided_slice %247 {offsets = [0, 0], sizes = [8, 384], strides = [1, 1]} : vector<8x512xf32> to vector<8x384xf32>
    %249 = arith.negf %248 : vector<8x384xf32>
    %250 = math.exp %249 : vector<8x384xf32>
    %cst_88 = arith.constant 1.000000e+00 : f32
    %251 = vector.broadcast %cst_88 : f32 to vector<8x384xf32>
    %252 = arith.addf %251, %250 : vector<8x384xf32>
    %253 = arith.divf %251, %252 : vector<8x384xf32>
    %254 = vector.extract_strided_slice %247 {offsets = [0, 384], sizes = [8, 128], strides = [1, 1]} : vector<8x512xf32> to vector<8x128xf32>
    %255 = math.tanh %254 : vector<8x128xf32>
    %256 = vector.extract_strided_slice %253 {offsets = [0, 0], sizes = [8, 128], strides = [1, 1]} : vector<8x384xf32> to vector<8x128xf32>
    %257 = vector.extract_strided_slice %253 {offsets = [0, 128], sizes = [8, 128], strides = [1, 1]} : vector<8x384xf32> to vector<8x128xf32>
    %258 = vector.extract_strided_slice %253 {offsets = [0, 256], sizes = [8, 128], strides = [1, 1]} : vector<8x384xf32> to vector<8x128xf32>
    %259 = arith.mulf %257, %170 : vector<8x128xf32>
    %260 = arith.mulf %256, %255 : vector<8x128xf32>
    %261 = arith.addf %259, %260 : vector<8x128xf32>
    %262 = math.tanh %261 : vector<8x128xf32>
    %263 = arith.mulf %258, %262 : vector<8x128xf32>
    %264 = arith.truncf %263 : vector<8x128xf32> to vector<8x128xbf16>
    %c0_89 = arith.constant 0 : index
    %c0_90 = arith.constant 0 : index
    %265 = vector.load %arg10[%c0_89, %c0_90] : memref<128x512xbf16, #tpu.memory_space<vmem>>, vector<128x512xbf16>
    %cst_91 = arith.constant dense<0.000000e+00> : vector<8x512xf32>
    %266 = tpu.matmul %264, %265, %cst_91 {dimension_numbers = #tpu.dot_dimension_numbers<[1], [0], [0], [1], [0, 0, 1, 1], [], []>} : vector<8x128xbf16>, vector<128x512xbf16>, vector<8x512xf32> -> vector<8x512xf32>
    %267 = arith.addf %266, %196 : vector<8x512xf32>
    %268 = arith.addf %267, %6 : vector<8x512xf32>
    %269 = vector.extract_strided_slice %268 {offsets = [0, 0], sizes = [8, 384], strides = [1, 1]} : vector<8x512xf32> to vector<8x384xf32>
    %270 = arith.negf %269 : vector<8x384xf32>
    %271 = math.exp %270 : vector<8x384xf32>
    %cst_92 = arith.constant 1.000000e+00 : f32
    %272 = vector.broadcast %cst_92 : f32 to vector<8x384xf32>
    %273 = arith.addf %272, %271 : vector<8x384xf32>
    %274 = arith.divf %272, %273 : vector<8x384xf32>
    %275 = vector.extract_strided_slice %268 {offsets = [0, 384], sizes = [8, 128], strides = [1, 1]} : vector<8x512xf32> to vector<8x128xf32>
    %276 = math.tanh %275 : vector<8x128xf32>
    %277 = vector.extract_strided_slice %274 {offsets = [0, 0], sizes = [8, 128], strides = [1, 1]} : vector<8x384xf32> to vector<8x128xf32>
    %278 = vector.extract_strided_slice %274 {offsets = [0, 128], sizes = [8, 128], strides = [1, 1]} : vector<8x384xf32> to vector<8x128xf32>
    %279 = vector.extract_strided_slice %274 {offsets = [0, 256], sizes = [8, 128], strides = [1, 1]} : vector<8x384xf32> to vector<8x128xf32>
    %280 = arith.mulf %278, %191 : vector<8x128xf32>
    %281 = arith.mulf %277, %276 : vector<8x128xf32>
    %282 = arith.addf %280, %281 : vector<8x128xf32>
    %283 = math.tanh %282 : vector<8x128xf32>
    %284 = arith.mulf %279, %283 : vector<8x128xf32>
    %285 = arith.truncf %284 : vector<8x128xf32> to vector<8x128xbf16>
    %c0_93 = arith.constant 0 : index
    %c0_94 = arith.constant 0 : index
    %286 = vector.load %arg11[%c0_93, %c0_94] : memref<128x512xbf16, #tpu.memory_space<vmem>>, vector<128x512xbf16>
    %cst_95 = arith.constant dense<0.000000e+00> : vector<8x512xf32>
    %287 = tpu.matmul %285, %286, %cst_95 {dimension_numbers = #tpu.dot_dimension_numbers<[1], [0], [0], [1], [0, 0, 1, 1], [], []>} : vector<8x128xbf16>, vector<128x512xbf16>, vector<8x512xf32> -> vector<8x512xf32>
    %cst_96 = arith.constant 0.000000e+00 : f32
    %288 = vector.broadcast %cst_96 : f32 to vector<8x512xf32>
    %c0_97 = arith.constant 0 : index
    %c3 = arith.constant 3 : index
    %289 = memref.load %arg1[%c0_97, %c3] : memref<2x8xi32, #tpu.memory_space<smem>>
    %c3_i32_98 = arith.constant 3 : i32
    %290 = arith.shrsi %289, %c3_i32_98 : i32
    %291 = arith.index_cast %290 : i32 to index
    %c0_99 = arith.constant 0 : index
    %c0_100 = arith.constant 0 : index
    %292 = vector.load %arg2[%291, %c0_99, %c0_100] : memref<13x8x512xf32, #tpu.memory_space<vmem>>, vector<1x8x512xf32>
    %293 = vector.shape_cast %292 : vector<1x8x512xf32> to vector<8x512xf32>
    %c7_i32_101 = arith.constant 7 : i32
    %294 = arith.andi %289, %c7_i32_101 : i32
    %295 = vector.broadcast %294 : i32 to vector<8x1xi32>
    %296 = arith.cmpi eq, %7, %295 : vector<8x1xi32>
    %cst_102 = arith.constant 0.000000e+00 : f32
    %297 = vector.shape_cast %296 : vector<8x1xi1> to vector<8x1xi1>
    %298 = vector.broadcast %297 : vector<8x1xi1> to vector<8x512xi1>
    %299 = vector.broadcast %cst_102 : f32 to vector<8x512xf32>
    %300 = arith.select %298, %293, %299 : vector<8x512xi1>, vector<8x512xf32>
    %cst_103 = arith.constant dense<0.000000e+00> : vector<512xf32>
    %301 = vector.multi_reduction <add>, %300, %cst_103 [0] : vector<8x512xf32> to vector<512xf32>
    %302 = vector.shape_cast %301 : vector<512xf32> to vector<1x512xf32>
    %c0_i32_104 = arith.constant 0 : i32
    %303 = vector.broadcast %c0_i32_104 : i32 to vector<8x1xi32>
    %304 = arith.cmpi eq, %8, %303 : vector<8x1xi32>
    %cst_105 = arith.constant 0.000000e+00 : f32
    %305 = vector.shape_cast %304 : vector<8x1xi1> to vector<8x1xi1>
    %306 = vector.broadcast %305 : vector<8x1xi1> to vector<8x512xi1>
    %307 = vector.shape_cast %302 : vector<1x512xf32> to vector<1x512xf32>
    %308 = vector.broadcast %307 : vector<1x512xf32> to vector<8x512xf32>
    %309 = vector.broadcast %cst_105 : f32 to vector<8x512xf32>
    %310 = arith.select %306, %308, %309 : vector<8x512xi1>, vector<8x512xf32>
    %311 = arith.addf %288, %310 : vector<8x512xf32>
    %c1_106 = arith.constant 1 : index
    %c3_107 = arith.constant 3 : index
    %312 = memref.load %arg1[%c1_106, %c3_107] : memref<2x8xi32, #tpu.memory_space<smem>>
    %c3_i32_108 = arith.constant 3 : i32
    %313 = arith.shrsi %312, %c3_i32_108 : i32
    %314 = arith.index_cast %313 : i32 to index
    %c0_109 = arith.constant 0 : index
    %c0_110 = arith.constant 0 : index
    %315 = vector.load %arg2[%314, %c0_109, %c0_110] : memref<13x8x512xf32, #tpu.memory_space<vmem>>, vector<1x8x512xf32>
    %316 = vector.shape_cast %315 : vector<1x8x512xf32> to vector<8x512xf32>
    %c7_i32_111 = arith.constant 7 : i32
    %317 = arith.andi %312, %c7_i32_111 : i32
    %318 = vector.broadcast %317 : i32 to vector<8x1xi32>
    %319 = arith.cmpi eq, %7, %318 : vector<8x1xi32>
    %cst_112 = arith.constant 0.000000e+00 : f32
    %320 = vector.shape_cast %319 : vector<8x1xi1> to vector<8x1xi1>
    %321 = vector.broadcast %320 : vector<8x1xi1> to vector<8x512xi1>
    %322 = vector.broadcast %cst_112 : f32 to vector<8x512xf32>
    %323 = arith.select %321, %316, %322 : vector<8x512xi1>, vector<8x512xf32>
    %cst_113 = arith.constant dense<0.000000e+00> : vector<512xf32>
    %324 = vector.multi_reduction <add>, %323, %cst_113 [0] : vector<8x512xf32> to vector<512xf32>
    %325 = vector.shape_cast %324 : vector<512xf32> to vector<1x512xf32>
    %c1_i32_114 = arith.constant 1 : i32
    %326 = vector.broadcast %c1_i32_114 : i32 to vector<8x1xi32>
    %327 = arith.cmpi eq, %8, %326 : vector<8x1xi32>
    %cst_115 = arith.constant 0.000000e+00 : f32
    %328 = vector.shape_cast %327 : vector<8x1xi1> to vector<8x1xi1>
    %329 = vector.broadcast %328 : vector<8x1xi1> to vector<8x512xi1>
    %330 = vector.shape_cast %325 : vector<1x512xf32> to vector<1x512xf32>
    %331 = vector.broadcast %330 : vector<1x512xf32> to vector<8x512xf32>
    %332 = vector.broadcast %cst_115 : f32 to vector<8x512xf32>
    %333 = arith.select %329, %331, %332 : vector<8x512xi1>, vector<8x512xf32>
    %334 = arith.addf %311, %333 : vector<8x512xf32>
    %335 = arith.truncf %263 : vector<8x128xf32> to vector<8x128xbf16>
    %c0_116 = arith.constant 0 : index
    %c0_117 = arith.constant 0 : index
    %336 = vector.load %arg3[%c0_116, %c0_117] : memref<128x512xbf16, #tpu.memory_space<vmem>>, vector<128x512xbf16>
    %cst_118 = arith.constant dense<0.000000e+00> : vector<8x512xf32>
    %337 = tpu.matmul %335, %336, %cst_118 {dimension_numbers = #tpu.dot_dimension_numbers<[1], [0], [0], [1], [0, 0, 1, 1], [], []>} : vector<8x128xbf16>, vector<128x512xbf16>, vector<8x512xf32> -> vector<8x512xf32>
    %338 = arith.addf %334, %337 : vector<8x512xf32>
    %339 = vector.extract_strided_slice %338 {offsets = [0, 0], sizes = [8, 384], strides = [1, 1]} : vector<8x512xf32> to vector<8x384xf32>
    %340 = arith.negf %339 : vector<8x384xf32>
    %341 = math.exp %340 : vector<8x384xf32>
    %cst_119 = arith.constant 1.000000e+00 : f32
    %342 = vector.broadcast %cst_119 : f32 to vector<8x384xf32>
    %343 = arith.addf %342, %341 : vector<8x384xf32>
    %344 = arith.divf %342, %343 : vector<8x384xf32>
    %345 = vector.extract_strided_slice %338 {offsets = [0, 384], sizes = [8, 128], strides = [1, 1]} : vector<8x512xf32> to vector<8x128xf32>
    %346 = math.tanh %345 : vector<8x128xf32>
    %347 = vector.extract_strided_slice %344 {offsets = [0, 0], sizes = [8, 128], strides = [1, 1]} : vector<8x384xf32> to vector<8x128xf32>
    %348 = vector.extract_strided_slice %344 {offsets = [0, 128], sizes = [8, 128], strides = [1, 1]} : vector<8x384xf32> to vector<8x128xf32>
    %349 = vector.extract_strided_slice %344 {offsets = [0, 256], sizes = [8, 128], strides = [1, 1]} : vector<8x384xf32> to vector<8x128xf32>
    %350 = arith.mulf %348, %261 : vector<8x128xf32>
    %351 = arith.mulf %347, %346 : vector<8x128xf32>
    %352 = arith.addf %350, %351 : vector<8x128xf32>
    %353 = math.tanh %352 : vector<8x128xf32>
    %354 = arith.mulf %349, %353 : vector<8x128xf32>
    %355 = arith.truncf %354 : vector<8x128xf32> to vector<8x128xbf16>
    %c0_120 = arith.constant 0 : index
    %c0_121 = arith.constant 0 : index
    %356 = vector.load %arg10[%c0_120, %c0_121] : memref<128x512xbf16, #tpu.memory_space<vmem>>, vector<128x512xbf16>
    %cst_122 = arith.constant dense<0.000000e+00> : vector<8x512xf32>
    %357 = tpu.matmul %355, %356, %cst_122 {dimension_numbers = #tpu.dot_dimension_numbers<[1], [0], [0], [1], [0, 0, 1, 1], [], []>} : vector<8x128xbf16>, vector<128x512xbf16>, vector<8x512xf32> -> vector<8x512xf32>
    %358 = arith.addf %357, %287 : vector<8x512xf32>
    %359 = arith.addf %358, %6 : vector<8x512xf32>
    %360 = vector.extract_strided_slice %359 {offsets = [0, 0], sizes = [8, 384], strides = [1, 1]} : vector<8x512xf32> to vector<8x384xf32>
    %361 = arith.negf %360 : vector<8x384xf32>
    %362 = math.exp %361 : vector<8x384xf32>
    %cst_123 = arith.constant 1.000000e+00 : f32
    %363 = vector.broadcast %cst_123 : f32 to vector<8x384xf32>
    %364 = arith.addf %363, %362 : vector<8x384xf32>
    %365 = arith.divf %363, %364 : vector<8x384xf32>
    %366 = vector.extract_strided_slice %359 {offsets = [0, 384], sizes = [8, 128], strides = [1, 1]} : vector<8x512xf32> to vector<8x128xf32>
    %367 = math.tanh %366 : vector<8x128xf32>
    %368 = vector.extract_strided_slice %365 {offsets = [0, 0], sizes = [8, 128], strides = [1, 1]} : vector<8x384xf32> to vector<8x128xf32>
    %369 = vector.extract_strided_slice %365 {offsets = [0, 128], sizes = [8, 128], strides = [1, 1]} : vector<8x384xf32> to vector<8x128xf32>
    %370 = vector.extract_strided_slice %365 {offsets = [0, 256], sizes = [8, 128], strides = [1, 1]} : vector<8x384xf32> to vector<8x128xf32>
    %371 = arith.mulf %369, %282 : vector<8x128xf32>
    %372 = arith.mulf %368, %367 : vector<8x128xf32>
    %373 = arith.addf %371, %372 : vector<8x128xf32>
    %374 = math.tanh %373 : vector<8x128xf32>
    %375 = arith.mulf %370, %374 : vector<8x128xf32>
    %376 = arith.truncf %375 : vector<8x128xf32> to vector<8x128xbf16>
    %c0_124 = arith.constant 0 : index
    %c0_125 = arith.constant 0 : index
    %377 = vector.load %arg11[%c0_124, %c0_125] : memref<128x512xbf16, #tpu.memory_space<vmem>>, vector<128x512xbf16>
    %cst_126 = arith.constant dense<0.000000e+00> : vector<8x512xf32>
    %378 = tpu.matmul %376, %377, %cst_126 {dimension_numbers = #tpu.dot_dimension_numbers<[1], [0], [0], [1], [0, 0, 1, 1], [], []>} : vector<8x128xbf16>, vector<128x512xbf16>, vector<8x512xf32> -> vector<8x512xf32>
    %cst_127 = arith.constant 0.000000e+00 : f32
    %379 = vector.broadcast %cst_127 : f32 to vector<8x512xf32>
    %c0_128 = arith.constant 0 : index
    %c4 = arith.constant 4 : index
    %380 = memref.load %arg1[%c0_128, %c4] : memref<2x8xi32, #tpu.memory_space<smem>>
    %c3_i32_129 = arith.constant 3 : i32
    %381 = arith.shrsi %380, %c3_i32_129 : i32
    %382 = arith.index_cast %381 : i32 to index
    %c0_130 = arith.constant 0 : index
    %c0_131 = arith.constant 0 : index
    %383 = vector.load %arg2[%382, %c0_130, %c0_131] : memref<13x8x512xf32, #tpu.memory_space<vmem>>, vector<1x8x512xf32>
    %384 = vector.shape_cast %383 : vector<1x8x512xf32> to vector<8x512xf32>
    %c7_i32_132 = arith.constant 7 : i32
    %385 = arith.andi %380, %c7_i32_132 : i32
    %386 = vector.broadcast %385 : i32 to vector<8x1xi32>
    %387 = arith.cmpi eq, %7, %386 : vector<8x1xi32>
    %cst_133 = arith.constant 0.000000e+00 : f32
    %388 = vector.shape_cast %387 : vector<8x1xi1> to vector<8x1xi1>
    %389 = vector.broadcast %388 : vector<8x1xi1> to vector<8x512xi1>
    %390 = vector.broadcast %cst_133 : f32 to vector<8x512xf32>
    %391 = arith.select %389, %384, %390 : vector<8x512xi1>, vector<8x512xf32>
    %cst_134 = arith.constant dense<0.000000e+00> : vector<512xf32>
    %392 = vector.multi_reduction <add>, %391, %cst_134 [0] : vector<8x512xf32> to vector<512xf32>
    %393 = vector.shape_cast %392 : vector<512xf32> to vector<1x512xf32>
    %c0_i32_135 = arith.constant 0 : i32
    %394 = vector.broadcast %c0_i32_135 : i32 to vector<8x1xi32>
    %395 = arith.cmpi eq, %8, %394 : vector<8x1xi32>
    %cst_136 = arith.constant 0.000000e+00 : f32
    %396 = vector.shape_cast %395 : vector<8x1xi1> to vector<8x1xi1>
    %397 = vector.broadcast %396 : vector<8x1xi1> to vector<8x512xi1>
    %398 = vector.shape_cast %393 : vector<1x512xf32> to vector<1x512xf32>
    %399 = vector.broadcast %398 : vector<1x512xf32> to vector<8x512xf32>
    %400 = vector.broadcast %cst_136 : f32 to vector<8x512xf32>
    %401 = arith.select %397, %399, %400 : vector<8x512xi1>, vector<8x512xf32>
    %402 = arith.addf %379, %401 : vector<8x512xf32>
    %c1_137 = arith.constant 1 : index
    %c4_138 = arith.constant 4 : index
    %403 = memref.load %arg1[%c1_137, %c4_138] : memref<2x8xi32, #tpu.memory_space<smem>>
    %c3_i32_139 = arith.constant 3 : i32
    %404 = arith.shrsi %403, %c3_i32_139 : i32
    %405 = arith.index_cast %404 : i32 to index
    %c0_140 = arith.constant 0 : index
    %c0_141 = arith.constant 0 : index
    %406 = vector.load %arg2[%405, %c0_140, %c0_141] : memref<13x8x512xf32, #tpu.memory_space<vmem>>, vector<1x8x512xf32>
    %407 = vector.shape_cast %406 : vector<1x8x512xf32> to vector<8x512xf32>
    %c7_i32_142 = arith.constant 7 : i32
    %408 = arith.andi %403, %c7_i32_142 : i32
    %409 = vector.broadcast %408 : i32 to vector<8x1xi32>
    %410 = arith.cmpi eq, %7, %409 : vector<8x1xi32>
    %cst_143 = arith.constant 0.000000e+00 : f32
    %411 = vector.shape_cast %410 : vector<8x1xi1> to vector<8x1xi1>
    %412 = vector.broadcast %411 : vector<8x1xi1> to vector<8x512xi1>
    %413 = vector.broadcast %cst_143 : f32 to vector<8x512xf32>
    %414 = arith.select %412, %407, %413 : vector<8x512xi1>, vector<8x512xf32>
    %cst_144 = arith.constant dense<0.000000e+00> : vector<512xf32>
    %415 = vector.multi_reduction <add>, %414, %cst_144 [0] : vector<8x512xf32> to vector<512xf32>
    %416 = vector.shape_cast %415 : vector<512xf32> to vector<1x512xf32>
    %c1_i32_145 = arith.constant 1 : i32
    %417 = vector.broadcast %c1_i32_145 : i32 to vector<8x1xi32>
    %418 = arith.cmpi eq, %8, %417 : vector<8x1xi32>
    %cst_146 = arith.constant 0.000000e+00 : f32
    %419 = vector.shape_cast %418 : vector<8x1xi1> to vector<8x1xi1>
    %420 = vector.broadcast %419 : vector<8x1xi1> to vector<8x512xi1>
    %421 = vector.shape_cast %416 : vector<1x512xf32> to vector<1x512xf32>
    %422 = vector.broadcast %421 : vector<1x512xf32> to vector<8x512xf32>
    %423 = vector.broadcast %cst_146 : f32 to vector<8x512xf32>
    %424 = arith.select %420, %422, %423 : vector<8x512xi1>, vector<8x512xf32>
    %425 = arith.addf %402, %424 : vector<8x512xf32>
    %426 = arith.truncf %354 : vector<8x128xf32> to vector<8x128xbf16>
    %c0_147 = arith.constant 0 : index
    %c0_148 = arith.constant 0 : index
    %427 = vector.load %arg3[%c0_147, %c0_148] : memref<128x512xbf16, #tpu.memory_space<vmem>>, vector<128x512xbf16>
    %cst_149 = arith.constant dense<0.000000e+00> : vector<8x512xf32>
    %428 = tpu.matmul %426, %427, %cst_149 {dimension_numbers = #tpu.dot_dimension_numbers<[1], [0], [0], [1], [0, 0, 1, 1], [], []>} : vector<8x128xbf16>, vector<128x512xbf16>, vector<8x512xf32> -> vector<8x512xf32>
    %429 = arith.addf %425, %428 : vector<8x512xf32>
    %430 = vector.extract_strided_slice %429 {offsets = [0, 0], sizes = [8, 384], strides = [1, 1]} : vector<8x512xf32> to vector<8x384xf32>
    %431 = arith.negf %430 : vector<8x384xf32>
    %432 = math.exp %431 : vector<8x384xf32>
    %cst_150 = arith.constant 1.000000e+00 : f32
    %433 = vector.broadcast %cst_150 : f32 to vector<8x384xf32>
    %434 = arith.addf %433, %432 : vector<8x384xf32>
    %435 = arith.divf %433, %434 : vector<8x384xf32>
    %436 = vector.extract_strided_slice %429 {offsets = [0, 384], sizes = [8, 128], strides = [1, 1]} : vector<8x512xf32> to vector<8x128xf32>
    %437 = math.tanh %436 : vector<8x128xf32>
    %438 = vector.extract_strided_slice %435 {offsets = [0, 0], sizes = [8, 128], strides = [1, 1]} : vector<8x384xf32> to vector<8x128xf32>
    %439 = vector.extract_strided_slice %435 {offsets = [0, 128], sizes = [8, 128], strides = [1, 1]} : vector<8x384xf32> to vector<8x128xf32>
    %440 = vector.extract_strided_slice %435 {offsets = [0, 256], sizes = [8, 128], strides = [1, 1]} : vector<8x384xf32> to vector<8x128xf32>
    %441 = arith.mulf %439, %352 : vector<8x128xf32>
    %442 = arith.mulf %438, %437 : vector<8x128xf32>
    %443 = arith.addf %441, %442 : vector<8x128xf32>
    %444 = math.tanh %443 : vector<8x128xf32>
    %445 = arith.mulf %440, %444 : vector<8x128xf32>
    %446 = arith.truncf %445 : vector<8x128xf32> to vector<8x128xbf16>
    %c0_151 = arith.constant 0 : index
    %c0_152 = arith.constant 0 : index
    %447 = vector.load %arg10[%c0_151, %c0_152] : memref<128x512xbf16, #tpu.memory_space<vmem>>, vector<128x512xbf16>
    %cst_153 = arith.constant dense<0.000000e+00> : vector<8x512xf32>
    %448 = tpu.matmul %446, %447, %cst_153 {dimension_numbers = #tpu.dot_dimension_numbers<[1], [0], [0], [1], [0, 0, 1, 1], [], []>} : vector<8x128xbf16>, vector<128x512xbf16>, vector<8x512xf32> -> vector<8x512xf32>
    %449 = arith.addf %448, %378 : vector<8x512xf32>
    %450 = arith.addf %449, %6 : vector<8x512xf32>
    %451 = vector.extract_strided_slice %450 {offsets = [0, 0], sizes = [8, 384], strides = [1, 1]} : vector<8x512xf32> to vector<8x384xf32>
    %452 = arith.negf %451 : vector<8x384xf32>
    %453 = math.exp %452 : vector<8x384xf32>
    %cst_154 = arith.constant 1.000000e+00 : f32
    %454 = vector.broadcast %cst_154 : f32 to vector<8x384xf32>
    %455 = arith.addf %454, %453 : vector<8x384xf32>
    %456 = arith.divf %454, %455 : vector<8x384xf32>
    %457 = vector.extract_strided_slice %450 {offsets = [0, 384], sizes = [8, 128], strides = [1, 1]} : vector<8x512xf32> to vector<8x128xf32>
    %458 = math.tanh %457 : vector<8x128xf32>
    %459 = vector.extract_strided_slice %456 {offsets = [0, 0], sizes = [8, 128], strides = [1, 1]} : vector<8x384xf32> to vector<8x128xf32>
    %460 = vector.extract_strided_slice %456 {offsets = [0, 128], sizes = [8, 128], strides = [1, 1]} : vector<8x384xf32> to vector<8x128xf32>
    %461 = vector.extract_strided_slice %456 {offsets = [0, 256], sizes = [8, 128], strides = [1, 1]} : vector<8x384xf32> to vector<8x128xf32>
    %462 = arith.mulf %460, %373 : vector<8x128xf32>
    %463 = arith.mulf %459, %458 : vector<8x128xf32>
    %464 = arith.addf %462, %463 : vector<8x128xf32>
    %465 = math.tanh %464 : vector<8x128xf32>
    %466 = arith.mulf %461, %465 : vector<8x128xf32>
    %467 = arith.truncf %466 : vector<8x128xf32> to vector<8x128xbf16>
    %c0_155 = arith.constant 0 : index
    %c0_156 = arith.constant 0 : index
    %468 = vector.load %arg11[%c0_155, %c0_156] : memref<128x512xbf16, #tpu.memory_space<vmem>>, vector<128x512xbf16>
    %cst_157 = arith.constant dense<0.000000e+00> : vector<8x512xf32>
    %469 = tpu.matmul %467, %468, %cst_157 {dimension_numbers = #tpu.dot_dimension_numbers<[1], [0], [0], [1], [0, 0, 1, 1], [], []>} : vector<8x128xbf16>, vector<128x512xbf16>, vector<8x512xf32> -> vector<8x512xf32>
    %cst_158 = arith.constant 0.000000e+00 : f32
    %470 = vector.broadcast %cst_158 : f32 to vector<8x512xf32>
    %c0_159 = arith.constant 0 : index
    %c5 = arith.constant 5 : index
    %471 = memref.load %arg1[%c0_159, %c5] : memref<2x8xi32, #tpu.memory_space<smem>>
    %c3_i32_160 = arith.constant 3 : i32
    %472 = arith.shrsi %471, %c3_i32_160 : i32
    %473 = arith.index_cast %472 : i32 to index
    %c0_161 = arith.constant 0 : index
    %c0_162 = arith.constant 0 : index
    %474 = vector.load %arg2[%473, %c0_161, %c0_162] : memref<13x8x512xf32, #tpu.memory_space<vmem>>, vector<1x8x512xf32>
    %475 = vector.shape_cast %474 : vector<1x8x512xf32> to vector<8x512xf32>
    %c7_i32_163 = arith.constant 7 : i32
    %476 = arith.andi %471, %c7_i32_163 : i32
    %477 = vector.broadcast %476 : i32 to vector<8x1xi32>
    %478 = arith.cmpi eq, %7, %477 : vector<8x1xi32>
    %cst_164 = arith.constant 0.000000e+00 : f32
    %479 = vector.shape_cast %478 : vector<8x1xi1> to vector<8x1xi1>
    %480 = vector.broadcast %479 : vector<8x1xi1> to vector<8x512xi1>
    %481 = vector.broadcast %cst_164 : f32 to vector<8x512xf32>
    %482 = arith.select %480, %475, %481 : vector<8x512xi1>, vector<8x512xf32>
    %cst_165 = arith.constant dense<0.000000e+00> : vector<512xf32>
    %483 = vector.multi_reduction <add>, %482, %cst_165 [0] : vector<8x512xf32> to vector<512xf32>
    %484 = vector.shape_cast %483 : vector<512xf32> to vector<1x512xf32>
    %c0_i32_166 = arith.constant 0 : i32
    %485 = vector.broadcast %c0_i32_166 : i32 to vector<8x1xi32>
    %486 = arith.cmpi eq, %8, %485 : vector<8x1xi32>
    %cst_167 = arith.constant 0.000000e+00 : f32
    %487 = vector.shape_cast %486 : vector<8x1xi1> to vector<8x1xi1>
    %488 = vector.broadcast %487 : vector<8x1xi1> to vector<8x512xi1>
    %489 = vector.shape_cast %484 : vector<1x512xf32> to vector<1x512xf32>
    %490 = vector.broadcast %489 : vector<1x512xf32> to vector<8x512xf32>
    %491 = vector.broadcast %cst_167 : f32 to vector<8x512xf32>
    %492 = arith.select %488, %490, %491 : vector<8x512xi1>, vector<8x512xf32>
    %493 = arith.addf %470, %492 : vector<8x512xf32>
    %c1_168 = arith.constant 1 : index
    %c5_169 = arith.constant 5 : index
    %494 = memref.load %arg1[%c1_168, %c5_169] : memref<2x8xi32, #tpu.memory_space<smem>>
    %c3_i32_170 = arith.constant 3 : i32
    %495 = arith.shrsi %494, %c3_i32_170 : i32
    %496 = arith.index_cast %495 : i32 to index
    %c0_171 = arith.constant 0 : index
    %c0_172 = arith.constant 0 : index
    %497 = vector.load %arg2[%496, %c0_171, %c0_172] : memref<13x8x512xf32, #tpu.memory_space<vmem>>, vector<1x8x512xf32>
    %498 = vector.shape_cast %497 : vector<1x8x512xf32> to vector<8x512xf32>
    %c7_i32_173 = arith.constant 7 : i32
    %499 = arith.andi %494, %c7_i32_173 : i32
    %500 = vector.broadcast %499 : i32 to vector<8x1xi32>
    %501 = arith.cmpi eq, %7, %500 : vector<8x1xi32>
    %cst_174 = arith.constant 0.000000e+00 : f32
    %502 = vector.shape_cast %501 : vector<8x1xi1> to vector<8x1xi1>
    %503 = vector.broadcast %502 : vector<8x1xi1> to vector<8x512xi1>
    %504 = vector.broadcast %cst_174 : f32 to vector<8x512xf32>
    %505 = arith.select %503, %498, %504 : vector<8x512xi1>, vector<8x512xf32>
    %cst_175 = arith.constant dense<0.000000e+00> : vector<512xf32>
    %506 = vector.multi_reduction <add>, %505, %cst_175 [0] : vector<8x512xf32> to vector<512xf32>
    %507 = vector.shape_cast %506 : vector<512xf32> to vector<1x512xf32>
    %c1_i32_176 = arith.constant 1 : i32
    %508 = vector.broadcast %c1_i32_176 : i32 to vector<8x1xi32>
    %509 = arith.cmpi eq, %8, %508 : vector<8x1xi32>
    %cst_177 = arith.constant 0.000000e+00 : f32
    %510 = vector.shape_cast %509 : vector<8x1xi1> to vector<8x1xi1>
    %511 = vector.broadcast %510 : vector<8x1xi1> to vector<8x512xi1>
    %512 = vector.shape_cast %507 : vector<1x512xf32> to vector<1x512xf32>
    %513 = vector.broadcast %512 : vector<1x512xf32> to vector<8x512xf32>
    %514 = vector.broadcast %cst_177 : f32 to vector<8x512xf32>
    %515 = arith.select %511, %513, %514 : vector<8x512xi1>, vector<8x512xf32>
    %516 = arith.addf %493, %515 : vector<8x512xf32>
    %517 = arith.truncf %445 : vector<8x128xf32> to vector<8x128xbf16>
    %c0_178 = arith.constant 0 : index
    %c0_179 = arith.constant 0 : index
    %518 = vector.load %arg3[%c0_178, %c0_179] : memref<128x512xbf16, #tpu.memory_space<vmem>>, vector<128x512xbf16>
    %cst_180 = arith.constant dense<0.000000e+00> : vector<8x512xf32>
    %519 = tpu.matmul %517, %518, %cst_180 {dimension_numbers = #tpu.dot_dimension_numbers<[1], [0], [0], [1], [0, 0, 1, 1], [], []>} : vector<8x128xbf16>, vector<128x512xbf16>, vector<8x512xf32> -> vector<8x512xf32>
    %520 = arith.addf %516, %519 : vector<8x512xf32>
    %521 = vector.extract_strided_slice %520 {offsets = [0, 0], sizes = [8, 384], strides = [1, 1]} : vector<8x512xf32> to vector<8x384xf32>
    %522 = arith.negf %521 : vector<8x384xf32>
    %523 = math.exp %522 : vector<8x384xf32>
    %cst_181 = arith.constant 1.000000e+00 : f32
    %524 = vector.broadcast %cst_181 : f32 to vector<8x384xf32>
    %525 = arith.addf %524, %523 : vector<8x384xf32>
    %526 = arith.divf %524, %525 : vector<8x384xf32>
    %527 = vector.extract_strided_slice %520 {offsets = [0, 384], sizes = [8, 128], strides = [1, 1]} : vector<8x512xf32> to vector<8x128xf32>
    %528 = math.tanh %527 : vector<8x128xf32>
    %529 = vector.extract_strided_slice %526 {offsets = [0, 0], sizes = [8, 128], strides = [1, 1]} : vector<8x384xf32> to vector<8x128xf32>
    %530 = vector.extract_strided_slice %526 {offsets = [0, 128], sizes = [8, 128], strides = [1, 1]} : vector<8x384xf32> to vector<8x128xf32>
    %531 = vector.extract_strided_slice %526 {offsets = [0, 256], sizes = [8, 128], strides = [1, 1]} : vector<8x384xf32> to vector<8x128xf32>
    %532 = arith.mulf %530, %443 : vector<8x128xf32>
    %533 = arith.mulf %529, %528 : vector<8x128xf32>
    %534 = arith.addf %532, %533 : vector<8x128xf32>
    %535 = math.tanh %534 : vector<8x128xf32>
    %536 = arith.mulf %531, %535 : vector<8x128xf32>
    %537 = arith.truncf %536 : vector<8x128xf32> to vector<8x128xbf16>
    %c0_182 = arith.constant 0 : index
    %c0_183 = arith.constant 0 : index
    %538 = vector.load %arg10[%c0_182, %c0_183] : memref<128x512xbf16, #tpu.memory_space<vmem>>, vector<128x512xbf16>
    %cst_184 = arith.constant dense<0.000000e+00> : vector<8x512xf32>
    %539 = tpu.matmul %537, %538, %cst_184 {dimension_numbers = #tpu.dot_dimension_numbers<[1], [0], [0], [1], [0, 0, 1, 1], [], []>} : vector<8x128xbf16>, vector<128x512xbf16>, vector<8x512xf32> -> vector<8x512xf32>
    %540 = arith.addf %539, %469 : vector<8x512xf32>
    %541 = arith.addf %540, %6 : vector<8x512xf32>
    %542 = vector.extract_strided_slice %541 {offsets = [0, 0], sizes = [8, 384], strides = [1, 1]} : vector<8x512xf32> to vector<8x384xf32>
    %543 = arith.negf %542 : vector<8x384xf32>
    %544 = math.exp %543 : vector<8x384xf32>
    %cst_185 = arith.constant 1.000000e+00 : f32
    %545 = vector.broadcast %cst_185 : f32 to vector<8x384xf32>
    %546 = arith.addf %545, %544 : vector<8x384xf32>
    %547 = arith.divf %545, %546 : vector<8x384xf32>
    %548 = vector.extract_strided_slice %541 {offsets = [0, 384], sizes = [8, 128], strides = [1, 1]} : vector<8x512xf32> to vector<8x128xf32>
    %549 = math.tanh %548 : vector<8x128xf32>
    %550 = vector.extract_strided_slice %547 {offsets = [0, 0], sizes = [8, 128], strides = [1, 1]} : vector<8x384xf32> to vector<8x128xf32>
    %551 = vector.extract_strided_slice %547 {offsets = [0, 128], sizes = [8, 128], strides = [1, 1]} : vector<8x384xf32> to vector<8x128xf32>
    %552 = vector.extract_strided_slice %547 {offsets = [0, 256], sizes = [8, 128], strides = [1, 1]} : vector<8x384xf32> to vector<8x128xf32>
    %553 = arith.mulf %551, %464 : vector<8x128xf32>
    %554 = arith.mulf %550, %549 : vector<8x128xf32>
    %555 = arith.addf %553, %554 : vector<8x128xf32>
    %556 = math.tanh %555 : vector<8x128xf32>
    %557 = arith.mulf %552, %556 : vector<8x128xf32>
    %558 = arith.truncf %557 : vector<8x128xf32> to vector<8x128xbf16>
    %c0_186 = arith.constant 0 : index
    %c0_187 = arith.constant 0 : index
    %559 = vector.load %arg11[%c0_186, %c0_187] : memref<128x512xbf16, #tpu.memory_space<vmem>>, vector<128x512xbf16>
    %cst_188 = arith.constant dense<0.000000e+00> : vector<8x512xf32>
    %560 = tpu.matmul %558, %559, %cst_188 {dimension_numbers = #tpu.dot_dimension_numbers<[1], [0], [0], [1], [0, 0, 1, 1], [], []>} : vector<8x128xbf16>, vector<128x512xbf16>, vector<8x512xf32> -> vector<8x512xf32>
    %cst_189 = arith.constant 0.000000e+00 : f32
    %561 = vector.broadcast %cst_189 : f32 to vector<8x512xf32>
    %c0_190 = arith.constant 0 : index
    %c6 = arith.constant 6 : index
    %562 = memref.load %arg1[%c0_190, %c6] : memref<2x8xi32, #tpu.memory_space<smem>>
    %c3_i32_191 = arith.constant 3 : i32
    %563 = arith.shrsi %562, %c3_i32_191 : i32
    %564 = arith.index_cast %563 : i32 to index
    %c0_192 = arith.constant 0 : index
    %c0_193 = arith.constant 0 : index
    %565 = vector.load %arg2[%564, %c0_192, %c0_193] : memref<13x8x512xf32, #tpu.memory_space<vmem>>, vector<1x8x512xf32>
    %566 = vector.shape_cast %565 : vector<1x8x512xf32> to vector<8x512xf32>
    %c7_i32_194 = arith.constant 7 : i32
    %567 = arith.andi %562, %c7_i32_194 : i32
    %568 = vector.broadcast %567 : i32 to vector<8x1xi32>
    %569 = arith.cmpi eq, %7, %568 : vector<8x1xi32>
    %cst_195 = arith.constant 0.000000e+00 : f32
    %570 = vector.shape_cast %569 : vector<8x1xi1> to vector<8x1xi1>
    %571 = vector.broadcast %570 : vector<8x1xi1> to vector<8x512xi1>
    %572 = vector.broadcast %cst_195 : f32 to vector<8x512xf32>
    %573 = arith.select %571, %566, %572 : vector<8x512xi1>, vector<8x512xf32>
    %cst_196 = arith.constant dense<0.000000e+00> : vector<512xf32>
    %574 = vector.multi_reduction <add>, %573, %cst_196 [0] : vector<8x512xf32> to vector<512xf32>
    %575 = vector.shape_cast %574 : vector<512xf32> to vector<1x512xf32>
    %c0_i32_197 = arith.constant 0 : i32
    %576 = vector.broadcast %c0_i32_197 : i32 to vector<8x1xi32>
    %577 = arith.cmpi eq, %8, %576 : vector<8x1xi32>
    %cst_198 = arith.constant 0.000000e+00 : f32
    %578 = vector.shape_cast %577 : vector<8x1xi1> to vector<8x1xi1>
    %579 = vector.broadcast %578 : vector<8x1xi1> to vector<8x512xi1>
    %580 = vector.shape_cast %575 : vector<1x512xf32> to vector<1x512xf32>
    %581 = vector.broadcast %580 : vector<1x512xf32> to vector<8x512xf32>
    %582 = vector.broadcast %cst_198 : f32 to vector<8x512xf32>
    %583 = arith.select %579, %581, %582 : vector<8x512xi1>, vector<8x512xf32>
    %584 = arith.addf %561, %583 : vector<8x512xf32>
    %c1_199 = arith.constant 1 : index
    %c6_200 = arith.constant 6 : index
    %585 = memref.load %arg1[%c1_199, %c6_200] : memref<2x8xi32, #tpu.memory_space<smem>>
    %c3_i32_201 = arith.constant 3 : i32
    %586 = arith.shrsi %585, %c3_i32_201 : i32
    %587 = arith.index_cast %586 : i32 to index
    %c0_202 = arith.constant 0 : index
    %c0_203 = arith.constant 0 : index
    %588 = vector.load %arg2[%587, %c0_202, %c0_203] : memref<13x8x512xf32, #tpu.memory_space<vmem>>, vector<1x8x512xf32>
    %589 = vector.shape_cast %588 : vector<1x8x512xf32> to vector<8x512xf32>
    %c7_i32_204 = arith.constant 7 : i32
    %590 = arith.andi %585, %c7_i32_204 : i32
    %591 = vector.broadcast %590 : i32 to vector<8x1xi32>
    %592 = arith.cmpi eq, %7, %591 : vector<8x1xi32>
    %cst_205 = arith.constant 0.000000e+00 : f32
    %593 = vector.shape_cast %592 : vector<8x1xi1> to vector<8x1xi1>
    %594 = vector.broadcast %593 : vector<8x1xi1> to vector<8x512xi1>
    %595 = vector.broadcast %cst_205 : f32 to vector<8x512xf32>
    %596 = arith.select %594, %589, %595 : vector<8x512xi1>, vector<8x512xf32>
    %cst_206 = arith.constant dense<0.000000e+00> : vector<512xf32>
    %597 = vector.multi_reduction <add>, %596, %cst_206 [0] : vector<8x512xf32> to vector<512xf32>
    %598 = vector.shape_cast %597 : vector<512xf32> to vector<1x512xf32>
    %c1_i32_207 = arith.constant 1 : i32
    %599 = vector.broadcast %c1_i32_207 : i32 to vector<8x1xi32>
    %600 = arith.cmpi eq, %8, %599 : vector<8x1xi32>
    %cst_208 = arith.constant 0.000000e+00 : f32
    %601 = vector.shape_cast %600 : vector<8x1xi1> to vector<8x1xi1>
    %602 = vector.broadcast %601 : vector<8x1xi1> to vector<8x512xi1>
    %603 = vector.shape_cast %598 : vector<1x512xf32> to vector<1x512xf32>
    %604 = vector.broadcast %603 : vector<1x512xf32> to vector<8x512xf32>
    %605 = vector.broadcast %cst_208 : f32 to vector<8x512xf32>
    %606 = arith.select %602, %604, %605 : vector<8x512xi1>, vector<8x512xf32>
    %607 = arith.addf %584, %606 : vector<8x512xf32>
    %608 = arith.truncf %536 : vector<8x128xf32> to vector<8x128xbf16>
    %c0_209 = arith.constant 0 : index
    %c0_210 = arith.constant 0 : index
    %609 = vector.load %arg3[%c0_209, %c0_210] : memref<128x512xbf16, #tpu.memory_space<vmem>>, vector<128x512xbf16>
    %cst_211 = arith.constant dense<0.000000e+00> : vector<8x512xf32>
    %610 = tpu.matmul %608, %609, %cst_211 {dimension_numbers = #tpu.dot_dimension_numbers<[1], [0], [0], [1], [0, 0, 1, 1], [], []>} : vector<8x128xbf16>, vector<128x512xbf16>, vector<8x512xf32> -> vector<8x512xf32>
    %611 = arith.addf %607, %610 : vector<8x512xf32>
    %612 = vector.extract_strided_slice %611 {offsets = [0, 0], sizes = [8, 384], strides = [1, 1]} : vector<8x512xf32> to vector<8x384xf32>
    %613 = arith.negf %612 : vector<8x384xf32>
    %614 = math.exp %613 : vector<8x384xf32>
    %cst_212 = arith.constant 1.000000e+00 : f32
    %615 = vector.broadcast %cst_212 : f32 to vector<8x384xf32>
    %616 = arith.addf %615, %614 : vector<8x384xf32>
    %617 = arith.divf %615, %616 : vector<8x384xf32>
    %618 = vector.extract_strided_slice %611 {offsets = [0, 384], sizes = [8, 128], strides = [1, 1]} : vector<8x512xf32> to vector<8x128xf32>
    %619 = math.tanh %618 : vector<8x128xf32>
    %620 = vector.extract_strided_slice %617 {offsets = [0, 0], sizes = [8, 128], strides = [1, 1]} : vector<8x384xf32> to vector<8x128xf32>
    %621 = vector.extract_strided_slice %617 {offsets = [0, 128], sizes = [8, 128], strides = [1, 1]} : vector<8x384xf32> to vector<8x128xf32>
    %622 = vector.extract_strided_slice %617 {offsets = [0, 256], sizes = [8, 128], strides = [1, 1]} : vector<8x384xf32> to vector<8x128xf32>
    %623 = arith.mulf %621, %534 : vector<8x128xf32>
    %624 = arith.mulf %620, %619 : vector<8x128xf32>
    %625 = arith.addf %623, %624 : vector<8x128xf32>
    %626 = math.tanh %625 : vector<8x128xf32>
    %627 = arith.mulf %622, %626 : vector<8x128xf32>
    %628 = arith.truncf %627 : vector<8x128xf32> to vector<8x128xbf16>
    %c0_213 = arith.constant 0 : index
    %c0_214 = arith.constant 0 : index
    %629 = vector.load %arg10[%c0_213, %c0_214] : memref<128x512xbf16, #tpu.memory_space<vmem>>, vector<128x512xbf16>
    %cst_215 = arith.constant dense<0.000000e+00> : vector<8x512xf32>
    %630 = tpu.matmul %628, %629, %cst_215 {dimension_numbers = #tpu.dot_dimension_numbers<[1], [0], [0], [1], [0, 0, 1, 1], [], []>} : vector<8x128xbf16>, vector<128x512xbf16>, vector<8x512xf32> -> vector<8x512xf32>
    %631 = arith.addf %630, %560 : vector<8x512xf32>
    %632 = arith.addf %631, %6 : vector<8x512xf32>
    %633 = vector.extract_strided_slice %632 {offsets = [0, 0], sizes = [8, 384], strides = [1, 1]} : vector<8x512xf32> to vector<8x384xf32>
    %634 = arith.negf %633 : vector<8x384xf32>
    %635 = math.exp %634 : vector<8x384xf32>
    %cst_216 = arith.constant 1.000000e+00 : f32
    %636 = vector.broadcast %cst_216 : f32 to vector<8x384xf32>
    %637 = arith.addf %636, %635 : vector<8x384xf32>
    %638 = arith.divf %636, %637 : vector<8x384xf32>
    %639 = vector.extract_strided_slice %632 {offsets = [0, 384], sizes = [8, 128], strides = [1, 1]} : vector<8x512xf32> to vector<8x128xf32>
    %640 = math.tanh %639 : vector<8x128xf32>
    %641 = vector.extract_strided_slice %638 {offsets = [0, 0], sizes = [8, 128], strides = [1, 1]} : vector<8x384xf32> to vector<8x128xf32>
    %642 = vector.extract_strided_slice %638 {offsets = [0, 128], sizes = [8, 128], strides = [1, 1]} : vector<8x384xf32> to vector<8x128xf32>
    %643 = vector.extract_strided_slice %638 {offsets = [0, 256], sizes = [8, 128], strides = [1, 1]} : vector<8x384xf32> to vector<8x128xf32>
    %644 = arith.mulf %642, %555 : vector<8x128xf32>
    %645 = arith.mulf %641, %640 : vector<8x128xf32>
    %646 = arith.addf %644, %645 : vector<8x128xf32>
    %647 = math.tanh %646 : vector<8x128xf32>
    %648 = arith.mulf %643, %647 : vector<8x128xf32>
    %649 = arith.truncf %648 : vector<8x128xf32> to vector<8x128xbf16>
    %c0_217 = arith.constant 0 : index
    %c0_218 = arith.constant 0 : index
    %650 = vector.load %arg11[%c0_217, %c0_218] : memref<128x512xbf16, #tpu.memory_space<vmem>>, vector<128x512xbf16>
    %cst_219 = arith.constant dense<0.000000e+00> : vector<8x512xf32>
    %651 = tpu.matmul %649, %650, %cst_219 {dimension_numbers = #tpu.dot_dimension_numbers<[1], [0], [0], [1], [0, 0, 1, 1], [], []>} : vector<8x128xbf16>, vector<128x512xbf16>, vector<8x512xf32> -> vector<8x512xf32>
    %cst_220 = arith.constant 0.000000e+00 : f32
    %652 = vector.broadcast %cst_220 : f32 to vector<8x512xf32>
    %c0_221 = arith.constant 0 : index
    %c7 = arith.constant 7 : index
    %653 = memref.load %arg1[%c0_221, %c7] : memref<2x8xi32, #tpu.memory_space<smem>>
    %c3_i32_222 = arith.constant 3 : i32
    %654 = arith.shrsi %653, %c3_i32_222 : i32
    %655 = arith.index_cast %654 : i32 to index
    %c0_223 = arith.constant 0 : index
    %c0_224 = arith.constant 0 : index
    %656 = vector.load %arg2[%655, %c0_223, %c0_224] : memref<13x8x512xf32, #tpu.memory_space<vmem>>, vector<1x8x512xf32>
    %657 = vector.shape_cast %656 : vector<1x8x512xf32> to vector<8x512xf32>
    %c7_i32_225 = arith.constant 7 : i32
    %658 = arith.andi %653, %c7_i32_225 : i32
    %659 = vector.broadcast %658 : i32 to vector<8x1xi32>
    %660 = arith.cmpi eq, %7, %659 : vector<8x1xi32>
    %cst_226 = arith.constant 0.000000e+00 : f32
    %661 = vector.shape_cast %660 : vector<8x1xi1> to vector<8x1xi1>
    %662 = vector.broadcast %661 : vector<8x1xi1> to vector<8x512xi1>
    %663 = vector.broadcast %cst_226 : f32 to vector<8x512xf32>
    %664 = arith.select %662, %657, %663 : vector<8x512xi1>, vector<8x512xf32>
    %cst_227 = arith.constant dense<0.000000e+00> : vector<512xf32>
    %665 = vector.multi_reduction <add>, %664, %cst_227 [0] : vector<8x512xf32> to vector<512xf32>
    %666 = vector.shape_cast %665 : vector<512xf32> to vector<1x512xf32>
    %c0_i32_228 = arith.constant 0 : i32
    %667 = vector.broadcast %c0_i32_228 : i32 to vector<8x1xi32>
    %668 = arith.cmpi eq, %8, %667 : vector<8x1xi32>
    %cst_229 = arith.constant 0.000000e+00 : f32
    %669 = vector.shape_cast %668 : vector<8x1xi1> to vector<8x1xi1>
    %670 = vector.broadcast %669 : vector<8x1xi1> to vector<8x512xi1>
    %671 = vector.shape_cast %666 : vector<1x512xf32> to vector<1x512xf32>
    %672 = vector.broadcast %671 : vector<1x512xf32> to vector<8x512xf32>
    %673 = vector.broadcast %cst_229 : f32 to vector<8x512xf32>
    %674 = arith.select %670, %672, %673 : vector<8x512xi1>, vector<8x512xf32>
    %675 = arith.addf %652, %674 : vector<8x512xf32>
    %c1_230 = arith.constant 1 : index
    %c7_231 = arith.constant 7 : index
    %676 = memref.load %arg1[%c1_230, %c7_231] : memref<2x8xi32, #tpu.memory_space<smem>>
    %c3_i32_232 = arith.constant 3 : i32
    %677 = arith.shrsi %676, %c3_i32_232 : i32
    %678 = arith.index_cast %677 : i32 to index
    %c0_233 = arith.constant 0 : index
    %c0_234 = arith.constant 0 : index
    %679 = vector.load %arg2[%678, %c0_233, %c0_234] : memref<13x8x512xf32, #tpu.memory_space<vmem>>, vector<1x8x512xf32>
    %680 = vector.shape_cast %679 : vector<1x8x512xf32> to vector<8x512xf32>
    %c7_i32_235 = arith.constant 7 : i32
    %681 = arith.andi %676, %c7_i32_235 : i32
    %682 = vector.broadcast %681 : i32 to vector<8x1xi32>
    %683 = arith.cmpi eq, %7, %682 : vector<8x1xi32>
    %cst_236 = arith.constant 0.000000e+00 : f32
    %684 = vector.shape_cast %683 : vector<8x1xi1> to vector<8x1xi1>
    %685 = vector.broadcast %684 : vector<8x1xi1> to vector<8x512xi1>
    %686 = vector.broadcast %cst_236 : f32 to vector<8x512xf32>
    %687 = arith.select %685, %680, %686 : vector<8x512xi1>, vector<8x512xf32>
    %cst_237 = arith.constant dense<0.000000e+00> : vector<512xf32>
    %688 = vector.multi_reduction <add>, %687, %cst_237 [0] : vector<8x512xf32> to vector<512xf32>
    %689 = vector.shape_cast %688 : vector<512xf32> to vector<1x512xf32>
    %c1_i32_238 = arith.constant 1 : i32
    %690 = vector.broadcast %c1_i32_238 : i32 to vector<8x1xi32>
    %691 = arith.cmpi eq, %8, %690 : vector<8x1xi32>
    %cst_239 = arith.constant 0.000000e+00 : f32
    %692 = vector.shape_cast %691 : vector<8x1xi1> to vector<8x1xi1>
    %693 = vector.broadcast %692 : vector<8x1xi1> to vector<8x512xi1>
    %694 = vector.shape_cast %689 : vector<1x512xf32> to vector<1x512xf32>
    %695 = vector.broadcast %694 : vector<1x512xf32> to vector<8x512xf32>
    %696 = vector.broadcast %cst_239 : f32 to vector<8x512xf32>
    %697 = arith.select %693, %695, %696 : vector<8x512xi1>, vector<8x512xf32>
    %698 = arith.addf %675, %697 : vector<8x512xf32>
    %699 = arith.truncf %627 : vector<8x128xf32> to vector<8x128xbf16>
    %c0_240 = arith.constant 0 : index
    %c0_241 = arith.constant 0 : index
    %700 = vector.load %arg3[%c0_240, %c0_241] : memref<128x512xbf16, #tpu.memory_space<vmem>>, vector<128x512xbf16>
    %cst_242 = arith.constant dense<0.000000e+00> : vector<8x512xf32>
    %701 = tpu.matmul %699, %700, %cst_242 {dimension_numbers = #tpu.dot_dimension_numbers<[1], [0], [0], [1], [0, 0, 1, 1], [], []>} : vector<8x128xbf16>, vector<128x512xbf16>, vector<8x512xf32> -> vector<8x512xf32>
    %702 = arith.addf %698, %701 : vector<8x512xf32>
    %703 = vector.extract_strided_slice %702 {offsets = [0, 0], sizes = [8, 384], strides = [1, 1]} : vector<8x512xf32> to vector<8x384xf32>
    %704 = arith.negf %703 : vector<8x384xf32>
    %705 = math.exp %704 : vector<8x384xf32>
    %cst_243 = arith.constant 1.000000e+00 : f32
    %706 = vector.broadcast %cst_243 : f32 to vector<8x384xf32>
    %707 = arith.addf %706, %705 : vector<8x384xf32>
    %708 = arith.divf %706, %707 : vector<8x384xf32>
    %709 = vector.extract_strided_slice %702 {offsets = [0, 384], sizes = [8, 128], strides = [1, 1]} : vector<8x512xf32> to vector<8x128xf32>
    %710 = math.tanh %709 : vector<8x128xf32>
    %711 = vector.extract_strided_slice %708 {offsets = [0, 0], sizes = [8, 128], strides = [1, 1]} : vector<8x384xf32> to vector<8x128xf32>
    %712 = vector.extract_strided_slice %708 {offsets = [0, 128], sizes = [8, 128], strides = [1, 1]} : vector<8x384xf32> to vector<8x128xf32>
    %713 = vector.extract_strided_slice %708 {offsets = [0, 256], sizes = [8, 128], strides = [1, 1]} : vector<8x384xf32> to vector<8x128xf32>
    %714 = arith.mulf %712, %625 : vector<8x128xf32>
    %715 = arith.mulf %711, %710 : vector<8x128xf32>
    %716 = arith.addf %714, %715 : vector<8x128xf32>
    %717 = math.tanh %716 : vector<8x128xf32>
    %718 = arith.mulf %713, %717 : vector<8x128xf32>
    %719 = arith.truncf %718 : vector<8x128xf32> to vector<8x128xbf16>
    %c0_244 = arith.constant 0 : index
    %c0_245 = arith.constant 0 : index
    %720 = vector.load %arg10[%c0_244, %c0_245] : memref<128x512xbf16, #tpu.memory_space<vmem>>, vector<128x512xbf16>
    %cst_246 = arith.constant dense<0.000000e+00> : vector<8x512xf32>
    %721 = tpu.matmul %719, %720, %cst_246 {dimension_numbers = #tpu.dot_dimension_numbers<[1], [0], [0], [1], [0, 0, 1, 1], [], []>} : vector<8x128xbf16>, vector<128x512xbf16>, vector<8x512xf32> -> vector<8x512xf32>
    %722 = arith.addf %721, %651 : vector<8x512xf32>
    %723 = arith.addf %722, %6 : vector<8x512xf32>
    %724 = vector.extract_strided_slice %723 {offsets = [0, 0], sizes = [8, 384], strides = [1, 1]} : vector<8x512xf32> to vector<8x384xf32>
    %725 = arith.negf %724 : vector<8x384xf32>
    %726 = math.exp %725 : vector<8x384xf32>
    %cst_247 = arith.constant 1.000000e+00 : f32
    %727 = vector.broadcast %cst_247 : f32 to vector<8x384xf32>
    %728 = arith.addf %727, %726 : vector<8x384xf32>
    %729 = arith.divf %727, %728 : vector<8x384xf32>
    %730 = vector.extract_strided_slice %723 {offsets = [0, 384], sizes = [8, 128], strides = [1, 1]} : vector<8x512xf32> to vector<8x128xf32>
    %731 = math.tanh %730 : vector<8x128xf32>
    %732 = vector.extract_strided_slice %729 {offsets = [0, 0], sizes = [8, 128], strides = [1, 1]} : vector<8x384xf32> to vector<8x128xf32>
    %733 = vector.extract_strided_slice %729 {offsets = [0, 128], sizes = [8, 128], strides = [1, 1]} : vector<8x384xf32> to vector<8x128xf32>
    %734 = vector.extract_strided_slice %729 {offsets = [0, 256], sizes = [8, 128], strides = [1, 1]} : vector<8x384xf32> to vector<8x128xf32>
    %735 = arith.mulf %733, %646 : vector<8x128xf32>
    %736 = arith.mulf %732, %731 : vector<8x128xf32>
    %737 = arith.addf %735, %736 : vector<8x128xf32>
    %738 = math.tanh %737 : vector<8x128xf32>
    %739 = arith.mulf %734, %738 : vector<8x128xf32>
    %c2_i32_248 = arith.constant 2 : i32
    %740 = tpu.memref_slice %arg13[%c2_i32_248] : memref<3x!tpu.dma_semaphore, #tpu.memory_space<semaphore_mem>> -> memref<1x!tpu.dma_semaphore, #tpu.memory_space<semaphore_mem>>
    %741 = tpu.memref_squeeze %740 : memref<1x!tpu.dma_semaphore, #tpu.memory_space<semaphore_mem>> -> memref<!tpu.dma_semaphore, #tpu.memory_space<semaphore_mem>>
    tpu.wait_dma2 semaphore(%741 : memref<!tpu.dma_semaphore, #tpu.memory_space<semaphore_mem>>) src(%arg8 : memref<128x128xbf16, #tpu.memory_space<any>>) dst(%arg12 : memref<128x128xbf16, #tpu.memory_space<vmem>>)
    %742 = arith.truncf %739 : vector<8x128xf32> to vector<8x128xbf16>
    %c0_249 = arith.constant 0 : index
    %c0_250 = arith.constant 0 : index
    %743 = vector.load %arg12[%c0_249, %c0_250] : memref<128x128xbf16, #tpu.memory_space<vmem>>, vector<128x128xbf16>
    %cst_251 = arith.constant dense<0.000000e+00> : vector<8x128xf32>
    %744 = tpu.matmul %742, %743, %cst_251 {dimension_numbers = #tpu.dot_dimension_numbers<[1], [0], [0], [1], [0, 0, 1, 1], [], []>} : vector<8x128xbf16>, vector<128x128xbf16>, vector<8x128xf32> -> vector<8x128xf32>
    %c0_252 = arith.constant 0 : index
    %c0_253 = arith.constant 0 : index
    %745 = vector.load %arg5[%c0_252, %c0_253] : memref<8x128xf32, #tpu.memory_space<vmem>>, vector<8x128xf32>
    %746 = arith.addf %744, %745 : vector<8x128xf32>
    %c0_254 = arith.constant 0 : index
    %c0_255 = arith.constant 0 : index
    %747 = vector.load %arg9[%c0_254, %c0_255] : memref<8x128xf32, #tpu.memory_space<vmem>>, vector<8x128xf32>
    tpu.vector_store %arg9[%c0_254, %c0_255], %746 {strides = array<i32>} : memref<8x128xf32, #tpu.memory_space<vmem>>, vector<8x128xf32>,
    return
  }
  func.func @transform_0(%arg0: i32, %arg1: memref<2x8xi32, #tpu.memory_space<smem>>) -> (i32, i32, i32) {
    %c0_i32 = arith.constant 0 : i32
    %c0_i32_0 = arith.constant 0 : i32
    %c0_i32_1 = arith.constant 0 : i32
    %c0_i32_2 = arith.constant 0 : i32
    return %c0_i32, %c0_i32_0, %c0_i32_1 : i32, i32, i32
  }
  func.func @transform_1(%arg0: i32, %arg1: memref<2x8xi32, #tpu.memory_space<smem>>) -> (i32, i32) {
    %c0_i32 = arith.constant 0 : i32
    %c0_i32_0 = arith.constant 0 : i32
    %c0_i32_1 = arith.constant 0 : i32
    return %c0_i32, %c0_i32_0 : i32, i32
  }
  func.func @transform_2(%arg0: i32, %arg1: memref<2x8xi32, #tpu.memory_space<smem>>) -> (i32, i32) {
    %c0_i32 = arith.constant 0 : i32
    %c0_i32_0 = arith.constant 0 : i32
    %c0_i32_1 = arith.constant 0 : i32
    return %c0_i32, %c0_i32_0 : i32, i32
  }
  func.func @transform_3(%arg0: i32, %arg1: memref<2x8xi32, #tpu.memory_space<smem>>) -> (i32, i32) {
    %c0_i32 = arith.constant 0 : i32
    %c0_i32_0 = arith.constant 0 : i32
    %c0_i32_1 = arith.constant 0 : i32
    return %c0_i32, %c0_i32_0 : i32, i32
  }
  func.func @transform_7(%arg0: i32, %arg1: memref<2x8xi32, #tpu.memory_space<smem>>) -> (i32, i32) {
    %c0_i32 = arith.constant 0 : i32
    %c0_i32_0 = arith.constant 0 : i32
    %c0_i32_1 = arith.constant 0 : i32
    return %c0_i32, %c0_i32_0 : i32, i32
  }
}

</mosaic_0001>

<bundles_post_ra>
// kernel: chatbot_forward.1
= control target key start
LH: loop header
LB: loop body
LE: loop exit
PB: predicated region body
PF: predicated region fallthrough
CT: control target
= control target key end

     0   :  { %s5374_s27 = smov [#allocation7]   ;;  %s7376_s0 = inlined_call_operand.hbm [shape: s32[2,8], index: 0, kind: input, shape index: {}]   ;;  %s7377_s1 = inlined_call_operand.hbm [shape: f32[13,8,512], index: 1, kind: input, shape index: {}]   ;;  %s7378_s2 = inlined_call_operand.hbm [shape: bf16[128,512], index: 2, kind: input, shape index: {}]   ;;  %s7379_s3 = inlined_call_operand.hbm [shape: f32[8,512], index: 3, kind: input, shape index: {}]   ;;  %s7380_s4 = inlined_call_operand.vmem [shape: f32[8,128], index: 4, kind: input, shape index: {}]   ;;  %s7381_s5 = inlined_call_operand.hbm [shape: bf16[128,512], index: 5, kind: input, shape index: {}]   ;;  %s7382_s6 = inlined_call_operand.hbm [shape: bf16[128,512], index: 6, kind: input, shape index: {}]   ;;  %s7383_s7 = inlined_call_operand.hbm [shape: bf16[128,128], index: 7, kind: input, shape index: {}]   ;;  %s7384_s8 = inlined_call_operand.vmem [shape: f32[8,128], index: 8, kind: output, shape index: {}]  }
   0x1   :  { %14 = dma.hbm_to_smem %s7376_s0, 32, %s5374_s27, [#allocation6] }
   0x2   :  { %5362 = dma.done.wait [#allocation6], 32 }
   0x3   :  { %5363 = vsyncadd [#allocation6], 4294967264 }
   0x4   :  { %16 = sfence }
   0x5   :  { %17 = vsyncpa [#allocation9], 0 }
   0x6   :  { %18 = vsyncpa [#allocation11], 0  ;;  %s5375_s30 = smov [#allocation10]  }
   0x7   :  { %s36_s9 = sshll.u32 %s5375_s30, 4  ;;  %s37_s9 = int_to_ptr.vmem [resolvable:$true] %s36_s9 }
   0x8   :  { %s5250_s10 = scalar_lea.vmem %s37_s9, 4096  ;;  %p5255_p1 = scmp.lt.s32.totalorder %s37_s9, %s37_s9 }
   0x9   :  { %p5251_p0 = scmp.ne.s32.totalorder %s37_s9, %s5250_s10  ;;  %p5256_p2 = scmp.lt.s32.totalorder %s5250_s10, %s5250_s10 }
   0xb   :  { %p5257_p3 = por %p5256_p2, %p5255_p1 }
   0xd   :  { %p5258_p4 = pnand %p5257_p3, %p5251_p0 }
   0xf   :  { %5261 = shalt.err (!%p5258_p4)
}
  0x10   :  { %s5376_s11 = smov 256   ;;  %s5377_s12 = smov 16  }
  0x11   :  { %42 = dma.hbm_to_vmem [thread:$0]  %s7378_s2, 4096, %s37_s9, [#allocation11], %s5376_s11, %s5376_s11, %s5377_s12  }
  0x12   :  { %s5378_s0 = smov [#allocation8]  }
  0x13   :  { %s24_s15 = sshll.u32 %s5378_s0, 4  ;;  %s25_s15 = int_to_ptr.vmem [resolvable:$true] %s24_s15 }
  0x14   :  { %s5270_s16 = scalar_lea.vmem %s25_s15, 6656  ;;  %p5275_p6 = scmp.lt.s32.totalorder %s25_s15, %s25_s15 }
  0x15   :  { %p5271_p5 = scmp.ne.s32.totalorder %s25_s15, %s5270_s16  ;;  %p5276_p7 = scmp.lt.s32.totalorder %s5270_s16, %s5270_s16 }
  0x17   :  { %p5277_p8 = por %p5276_p7, %p5275_p6 }
  0x19   :  { %p5278_p9 = pnand %p5277_p8, %p5271_p5 }
  0x1b   :  { %5281 = shalt.err (!%p5278_p9)
}
  0x1c   :  { %s5379_s17 = smov 512   ;;  %s5380_s18 = smov 32  }
  0x1d   :  { %30 = dma.hbm_to_vmem [thread:$0]  %s7377_s1, 6656, %s25_s15, [#allocation9], %s5379_s17, %s5379_s17, %s5380_s18  }
  0x1e   :  { %s5381_s21 = smov [#allocation12]  }
  0x1f   :  { %s49_s22 = sshll.u32 %s5381_s21, 4  ;;  %s50_s22 = int_to_ptr.vmem [resolvable:$true] %s49_s22 }
  0x20   :  { %s5290_s2 = scalar_lea.vmem %s50_s22, 512  ;;  %p5295_p11 = scmp.lt.s32.totalorder %s50_s22, %s50_s22 }
  0x21   :  { %p5291_p10 = scmp.ne.s32.totalorder %s50_s22, %s5290_s2  ;;  %p5296_p12 = scmp.lt.s32.totalorder %s5290_s2, %s5290_s2 }
  0x23   :  { %p5297_p13 = por %p5296_p12, %p5295_p11 }
  0x25   :  { %p5298_p0 = pnand %p5297_p13, %p5291_p10 }
  0x27   :  { %5301 = shalt.err (!%p5298_p0)
}
  0x28   :  { %52 = dma.hbm_to_vmem [thread:$0]  %s7379_s3, 512, %s50_s22, [#allocation11]  }
  0x29   :  { %5364 = dma.done.wait [#allocation9], 6656  }
  0x2a   :  { %5365 = vsyncadd [#allocation9], 4294960640 }
  0x2b   :  { %5366 = dma.done.wait [#allocation11], 4608  }
  0x2c   :  { %5367 = vsyncadd [#allocation11], 4294962688  ;;  %v7385_v0 = vmov 0   ;;  %v5447_v1 = vld [vmem:[#allocation12] sm:$0xff]  ;;  %v5449_v2 = vld [vmem:[#allocation12 + $0x8] sm:$0xff]  ;;  %s5383_s1 = smov [#allocation2]  }
  0x2d   :  { %436 = vmatprep.mubr.bf16.mxu0 %v7385_v0  ;;  %477 = vmatprep.mubr.bf16.mxu1 %v7385_v0  ;;  %7556 = vst [vmem:[#allocation27_spill] sm:$0xff] %v5449_v2  ;;  %v5451_v3 = vld [vmem:[#allocation12 + $0x10] sm:$0xff]  ;;  %v5453_v4 = vld [vmem:[#allocation12 + $0x18] sm:$0xff]  ;;  %s72_s3 = sshll.u32 %s5383_s1, 4  ;;  %s5384_s25 = smov [#allocation3]   ;;  %s73_s3 = int_to_ptr.vmem [resolvable:$true] %s72_s3 }
  0x2e   :  { %v4492_v5 = vld [vmem:[#allocation10 + $0xe4] ss:$16 sps:$4 sm:$0xff]   ;;  %v4494_v6 = vld [vmem:[#allocation10 + $0xe0] ss:$16 sps:$4 sm:$0xff]   ;;  %v4503_v10 = vld [vmem:[#allocation10 + $0xec] ss:$16 sps:$4 sm:$0xff]   ;;  %p5315_p2 = scmp.lt.s32.totalorder %s73_s3, %s73_s3 }
  0x2f   :  { %v4495_v7 = vld [vmem:[#allocation10 + $0xc4] ss:$16 sps:$4 sm:$0xff]   ;;  %404 = vmatprep.subr.bf16.mxu0 %v4492_v5  ;;  %v4497_v8 = vld [vmem:[#allocation10 + $0xc0] ss:$16 sps:$4 sm:$0xff]   ;;  %v4506_v11 = vld [vmem:[#allocation10 + $0xe8] ss:$16 sps:$4 sm:$0xff]   ;;  %445 = vmatprep.subr.bf16.mxu1 %v4503_v10 }
  0x30   :  { %405 = vmatpush1.bf16.msra.mxu0 %v4494_v6  ;;  %v4498_v9 = vld [vmem:[#allocation10 + $0xa4] ss:$16 sps:$4 sm:$0xff]   ;;  %v4500_v12 = vld [vmem:[#allocation10 + $0xa0] ss:$16 sps:$4 sm:$0xff]   ;;  %v4509_v13 = vld [vmem:[#allocation10 + $0xcc] ss:$16 sps:$4 sm:$0xff]   ;;  %446 = vmatpush1.bf16.msra.mxu1 %v4506_v11 }
  0x31   :  { %406 = vmatprep.subr.bf16.mxu0 %v4495_v7  ;;  %v4501_v14 = vld [vmem:[#allocation10 + $0x84] ss:$16 sps:$4 sm:$0xff]   ;;  %v4512_v15 = vld [vmem:[#allocation10 + $0xc8] ss:$16 sps:$4 sm:$0xff]   ;;  %447 = vmatprep.subr.bf16.mxu1 %v4509_v13  ;;  %v4505_v16 = vld [vmem:[#allocation10 + $0x80] ss:$16 sps:$4 sm:$0xff]  }
  0x32   :  { %v4515_v17 = vld [vmem:[#allocation10 + $0xac] ss:$16 sps:$4 sm:$0xff]   ;;  %v4507_v18 = vld [vmem:[#allocation10 + $0x64] ss:$16 sps:$4 sm:$0xff]   ;;  %v4518_v19 = vld [vmem:[#allocation10 + $0xa8] ss:$16 sps:$4 sm:$0xff]  }
  0x33   :  { %v4521_v20 = vld [vmem:[#allocation10 + $0x8c] ss:$16 sps:$4 sm:$0xff]   ;;  %v4511_v21 = vld [vmem:[#allocation10 + $0x60] ss:$16 sps:$4 sm:$0xff]   ;;  %v4513_v22 = vld [vmem:[#allocation10 + $0x44] ss:$16 sps:$4 sm:$0xff]  }
  0x34   :  { %407 = vmatpush1.bf16.msra.mxu0 %v4497_v8  ;;  %448 = vmatpush1.bf16.msra.mxu1 %v4512_v15  ;;  %v4524_v23 = vld [vmem:[#allocation10 + $0x88] ss:$16 sps:$4 sm:$0xff]   ;;  %v4527_v24 = vld [vmem:[#allocation10 + $0x6c] ss:$16 sps:$4 sm:$0xff]   ;;  %v4517_v25 = vld [vmem:[#allocation10 + $0x40] ss:$16 sps:$4 sm:$0xff]  }
  0x35   :  { %408 = vmatprep.subr.bf16.mxu0 %v4498_v9  ;;  %449 = vmatprep.subr.bf16.mxu1 %v4515_v17  ;;  %v4519_v26 = vld [vmem:[#allocation10 + $0x24] ss:$16 sps:$4 sm:$0xff]   ;;  %v4530_v27 = vld [vmem:[#allocation10 + $0x68] ss:$16 sps:$4 sm:$0xff]   ;;  %v4531_v28 = vld [vmem:[#allocation10 + $0x4c] ss:$16 sps:$4 sm:$0xff]  }
  0x36   :  { %v4523_v29 = vld [vmem:[#allocation10 + $0x20] ss:$16 sps:$4 sm:$0xff]   ;;  %v4525_v30 = vld [vmem:[#allocation10 + $0x4] ss:$16 sps:$4 sm:$0xff]   ;;  %v4533_v31 = vld [vmem:[#allocation10 + $0x48] ss:$16 sps:$4 sm:$0xff]  }
  0x37   :  { %v4534_v32 = vld [vmem:[#allocation10 + $0x2c] ss:$16 sps:$4 sm:$0xff]   ;;  %v4529_v33 = vld [vmem:[#allocation10] ss:$16 sps:$4 sm:$0xff]   ;;  %v4536_v34 = vld [vmem:[#allocation10 + $0x28] ss:$16 sps:$4 sm:$0xff]  }
  0x38   :  { %409 = vmatpush1.bf16.msra.mxu0 %v4500_v12  ;;  %450 = vmatpush1.bf16.msra.mxu1 %v4518_v19  ;;  %v4537_v35 = vld [vmem:[#allocation10 + $0xc] ss:$16 sps:$4 sm:$0xff]   ;;  %v4539_v36 = vld [vmem:[#allocation10 + $0x8] ss:$16 sps:$4 sm:$0xff]   ;;  %s84_s26 = sshll.u32 %s5384_s25, 4  ;;  %s5310_s27 = scalar_lea.vmem %s73_s3, 4096  ;;  %s85_s26 = int_to_ptr.vmem [resolvable:$true] %s84_s26 }
  0x39   :  { %410 = vmatprep.subr.bf16.mxu0 %v4501_v14  ;;  %451 = vmatprep.subr.bf16.mxu1 %v4521_v20  ;;  %p5311_p1 = scmp.ne.s32.totalorder %s73_s3, %s5310_s27  ;;  %p5316_p3 = scmp.lt.s32.totalorder %s5310_s27, %s5310_s27 }
  0x3b   :  { %p5317_p4 = por %p5316_p3, %p5315_p2 }
  0x3c   :  { %411 = vmatpush1.bf16.msra.mxu0 %v4505_v16  ;;  %452 = vmatpush1.bf16.msra.mxu1 %v4524_v23 }
  0x3d   :  { %412 = vmatprep.subr.bf16.mxu0 %v4507_v18  ;;  %453 = vmatprep.subr.bf16.mxu1 %v4527_v24  ;;  %p5318_p5 = pnand %p5317_p4, %p5311_p1 }
  0x40   :  { %413 = vmatpush1.bf16.msra.mxu0 %v4511_v21  ;;  %454 = vmatpush1.bf16.msra.mxu1 %v4530_v27 }
  0x41   :  { %414 = vmatprep.subr.bf16.mxu0 %v4513_v22  ;;  %455 = vmatprep.subr.bf16.mxu1 %v4531_v28 }
  0x44   :  { %415 = vmatpush1.bf16.msra.mxu0 %v4517_v25  ;;  %456 = vmatpush1.bf16.msra.mxu1 %v4533_v31 }
  0x45   :  { %416 = vmatprep.subr.bf16.mxu0 %v4519_v26  ;;  %457 = vmatprep.subr.bf16.mxu1 %v4534_v32 }
  0x48   :  { %417 = vmatpush1.bf16.msra.mxu0 %v4523_v29  ;;  %458 = vmatpush1.bf16.msra.mxu1 %v4536_v34 }
  0x49   :  { %418 = vmatprep.subr.bf16.mxu0 %v4525_v30  ;;  %459 = vmatprep.subr.bf16.mxu1 %v4537_v35 }
  0x4c   :  { %419 = vmatpush1.bf16.msra.mxu0 %v4529_v33  ;;  %460 = vmatpush1.bf16.msra.mxu1 %v4539_v36 }
  0x4f   :  { %437 = vmatmul.mubr.bf16.vlgmr.msra.gmra.mxu0 %v7385_v0  ;;  %478 = vmatmul.mubr.bf16.vlgmr.msra.gmra.mxu1 %v7385_v0 }
  0x50   :  { %5321 = shalt.err (!%p5318_p5)  }
  0x51   :  { %75 = dma.hbm_to_vmem [thread:$0]  %s7381_s5, 4096, %s73_s3, [#allocation5] }
  0x52   :  { %s5330_s30 = scalar_lea.vmem %s85_s26, 4096  ;;  %p5335_p7 = scmp.lt.s32.totalorder %s85_s26, %s85_s26 }
  0x53   :  { %p5331_p6 = scmp.ne.s32.totalorder %s85_s26, %s5330_s30  ;;  %p5336_p8 = scmp.lt.s32.totalorder %s5330_s30, %s5330_s30 }
  0x55   :  { %p5337_p9 = por %p5336_p8, %p5335_p7 }
  0x57   :  { %p5338_p10 = pnand %p5337_p9, %p5331_p6 }
  0x59   :  { %5341 = shalt.err (!%p5338_p10)  }
  0x5a   :  { %87 = dma.hbm_to_vmem [thread:$0]  %s7382_s6, 4096, %s85_s26, [#allocation5 + $0x1] }
  0x5b   :  { %s5385_s11 = smov [#allocation4]  }
  0x5c   :  { %s96_s12 = sshll.u32 %s5385_s11, 4  ;;  %s97_s12 = int_to_ptr.vmem [resolvable:$true] %s96_s12 }
  0x5d   :  { %s5350_s13 = scalar_lea.vmem %s97_s12, 1024  ;;  %p5355_p12 = scmp.lt.s32.totalorder %s97_s12, %s97_s12 }
  0x5e   :  { %p5351_p11 = scmp.ne.s32.totalorder %s97_s12, %s5350_s13  ;;  %p5356_p13 = scmp.lt.s32.totalorder %s5350_s13, %s5350_s13 }
  0x60   :  { %p5357_p0 = por %p5356_p13, %p5355_p12 }
  0x62   :  { %p5358_p1 = pnand %p5357_p0, %p5351_p11 }
  0x64   :  { %5361 = shalt.err (!%p5358_p1)  }
  0x65   :  { %99 = dma.hbm_to_vmem [thread:$0]  %s7383_s7, 1024, %s97_s12, [#allocation5 + $0x2]  ;;  %v104_v37 = vlaneseq }
  0x66   :  { %s106_s0 = sld [smem:[#allocation7]] }
  0x67   :  { %s4201_s15 = sld [smem:[#allocation7 + $0x80]]  ;;  %v5466_v38 = vshrl.u32 %v104_v37, 7 }
  0x69   :  { %vm148_vm2 = vcmp.eq.s32.totalorder %v5466_v38, 0  ;;  %vm201_vm3 = vcmp.eq.s32.totalorder %v5466_v38, 1 }
  0x6c   :  { %s107_s16 = sshra.s32 %s106_s0, 3  ;;  %s115_s18 = sand.u32 7, %s106_s0 }
  0x6d   :  { %s160_s17 = sshra.s32 %s4201_s15, 3  ;;  %s4433_s6 = sshll.u32 %s107_s16, 5  ;;  %v116_v39 = vstv %s115_s18 }
  0x6e   :  { %s4434_s19 = sshll.u32 %s160_s17, 5  ;;  %s168_s20 = sand.u32 7, %s4201_s15  ;;  %vm117_vm0 = vcmp.eq.s32.totalorder %v5466_v38, %v116_v39 }
  0x6f   :  { %v169_v40 = vstv %s168_s20  ;;  %s110_s21 = scalar_lea.vmem [#allocation8], %s4433_s6  ;;  %s163_s22 = scalar_lea.vmem [#allocation8], %s4434_s19 }
  0x70   :  { %v111_v41 = vld [vmem:[%s110_s21] sm:$0xff]  ;;  %vm170_vm1 = vcmp.eq.s32.totalorder %v5466_v38, %v169_v40  ;;  %v112_v43 = vld [vmem:[%s110_s21 + $0x8] sm:$0xff]  ;;  %v113_v55 = vld [vmem:[%s110_s21 + $0x10] sm:$0xff] }
  0x71   :  { %v164_v42 = vld [vmem:[%s163_s22] sm:$0xff]  ;;  %v165_v44 = vld [vmem:[%s163_s22 + $0x8] sm:$0xff]  ;;  %v120_v45 = vsel %vm117_vm0, %v111_v41, 0.0  ;;  %v121_v47 = vsel %vm117_vm0, %v112_v43, 0.0  ;;  %v166_v56 = vld [vmem:[%s163_s22 + $0x10] sm:$0xff]  ;;  %v122_v59 = vsel %vm117_vm0, %v113_v55, 0.0 }
  0x72   :  { %v173_v46 = vsel %vm170_vm1, %v164_v42, 0.0  ;;  %v174_v48 = vsel %vm170_vm1, %v165_v44, 0.0  ;;  %v124_v49 = vrot.slane %v120_v45, 4  ;;  %v130_v51 = vrot.slane %v121_v47, 4  ;;  %v114_v63 = vld [vmem:[%s110_s21 + $0x18] sm:$0xff] }
  0x73   :  { %v177_v50 = vrot.slane %v173_v46, 4  ;;  %v183_v52 = vrot.slane %v174_v48, 4  ;;  %v175_v60 = vsel %vm170_vm1, %v166_v56, 0.0  ;;  %v167_v5 = vld [vmem:[%s163_s22 + $0x18] sm:$0xff]  ;;  %v136_v8 = vrot.slane %v122_v59, 4 }
  0x74   :  { %v125_v53 = vadd.f32 %v124_v49, %v120_v45  ;;  %v131_v57 = vadd.f32 %v130_v51, %v121_v47  ;;  %v189_v9 = vrot.slane %v175_v60, 4  ;;  %v123_v12 = vsel %vm117_vm0, %v114_v63, 0.0 }
  0x75   :  { %v178_v54 = vadd.f32 %v177_v50, %v173_v46  ;;  %v184_v58 = vadd.f32 %v183_v52, %v174_v48  ;;  %v176_v13 = vsel %vm170_vm1, %v167_v5, 0.0  ;;  %v137_v16 = vadd.f32 %v136_v8, %v122_v59 }
  0x76   :  { %v126_v61 = vrot.slane %v125_v53, 2  ;;  %v132_v6 = vrot.slane %v131_v57, 2  ;;  %v190_v17 = vadd.f32 %v189_v9, %v175_v60  ;;  %v142_v18 = vrot.slane %v123_v12, 4 }
  0x77   :  { %v179_v62 = vrot.slane %v178_v54, 2  ;;  %v185_v7 = vrot.slane %v184_v58, 2  ;;  %v195_v19 = vrot.slane %v176_v13, 4  ;;  %v138_v24 = vrot.slane %v137_v16, 2 }
  0x78   :  { %v127_v10 = vadd.f32 %v126_v61, %v125_v53  ;;  %v133_v14 = vadd.f32 %v132_v6, %v131_v57  ;;  %v191_v25 = vrot.slane %v190_v17, 2  ;;  %v143_v26 = vadd.f32 %v142_v18, %v123_v12 }
  0x79   :  { %v180_v11 = vadd.f32 %v179_v62, %v178_v54  ;;  %v186_v15 = vadd.f32 %v185_v7, %v184_v58  ;;  %v196_v27 = vadd.f32 %v195_v19, %v176_v13  ;;  %v139_v32 = vadd.f32 %v138_v24, %v137_v16 }
  0x7a   :  { %v128_v20 = vrot.slane %v127_v10, 1  ;;  %v134_v22 = vrot.slane %v133_v14, 1  ;;  %v192_v33 = vadd.f32 %v191_v25, %v190_v17  ;;  %v144_v34 = vrot.slane %v143_v26, 2 }
  0x7b   :  { %v181_v21 = vrot.slane %v180_v11, 1  ;;  %v187_v23 = vrot.slane %v186_v15, 1  ;;  %v197_v35 = vrot.slane %v196_v27, 2  ;;  %v140_v41 = vrot.slane %v139_v32, 1 }
  0x7c   :  { %v129_v28 = vadd.f32 %v128_v20, %v127_v10  ;;  %v135_v30 = vadd.f32 %v134_v22, %v133_v14  ;;  %v193_v42 = vrot.slane %v192_v33, 1  ;;  %v145_v44 = vadd.f32 %v144_v34, %v143_v26 }
  0x7d   :  { %v182_v29 = vadd.f32 %v181_v21, %v180_v11  ;;  %v188_v31 = vadd.f32 %v187_v23, %v186_v15  ;;  %v198_v45 = vadd.f32 %v197_v35, %v196_v27  ;;  %v141_v48 = vadd.f32 %v140_v41, %v139_v32 }
  0x7e   :  { %v151_v36 = vsel %vm148_vm2, %v129_v28, 0.0  ;;  %v152_v39 = vsel %vm148_vm2, %v135_v30, 0.0  ;;  %v194_v49 = vadd.f32 %v193_v42, %v192_v33  ;;  %v146_v51 = vrot.slane %v145_v44, 1 }
  0x7f   :  { %v204_v37 = vsel %vm201_vm3, %v182_v29, 0.0  ;;  %v205_v40 = vsel %vm201_vm3, %v188_v31, 0.0  ;;  %v199_v52 = vrot.slane %v198_v45, 1  ;;  %v153_v57 = vsel %vm148_vm2, %v141_v48, 0.0 }
  0x80   :  { %v208_v43 = vadd.f32 %v204_v37, %v151_v36  ;;  %v209_v46 = vadd.f32 %v205_v40, %v152_v39  ;;  %v206_v58 = vsel %vm201_vm3, %v194_v49, 0.0  ;;  %v147_v61 = vadd.f32 %v146_v51, %v145_v44 }
  0x81   :  { %v200_v62 = vadd.f32 %v199_v52, %v198_v45  ;;  %v210_v5 = vadd.f32 %v206_v58, %v153_v57 }
  0x82   :  { %v154_v7 = vsel %vm148_vm2, %v147_v61, 0.0 }
  0x83   :  { %v207_v8 = vsel %vm201_vm3, %v200_v62, 0.0 }
  0x84   :  { %v211_v12 = vadd.f32 %v207_v8, %v154_v7 }
 0x10f   :  { %v438_v47 = vpop.f32.mrf.mxu0  ;;  %v479_v60 = vpop.f32.mrf.mxu1 }
 0x110   :  { %v486_v50 = vadd.f32 %v438_v47, %v208_v43  ;;  %v488_v10 = vadd.f32 %v479_v60, %v210_v5 }
 0x111   :  { %v440_v53 = vpop.f32.mrf.mxu0  ;;  %v481_v6 = vpop.f32.mrf.mxu1 }
 0x112   :  { %v4236_v54 = vmul.f32 -1.442695, %v486_v50  ;;  %v487_v55 = vadd.f32 %v440_v53, %v209_v46  ;;  %v4238_v13 = vmul.f32 -1.442695, %v488_v10  ;;  %v489_v14 = vadd.f32 %v481_v6, %v211_v12 }
 0x113   :  { %v442_v56 = vpop.f32.mrf.mxu0  ;;  %v483_v9 = vpop.f32.mrf.mxu1 }
 0x114   :  { %4540 = vpow2.f32 %v4236_v54  ;;  %v4237_v59 = vmul.f32 -1.442695, %v487_v55 }
 0x115   :  { %v443_v63 = vpop.f32.mrf.mxu0  ;;  %v484_v11 = vpop.f32.mrf.mxu1 }
 0x116   :  { %4542 = vpow2.f32 %v4237_v59 }
 0x117   :  { %4544 = vpow2.f32 %v4238_v13 }
 0x118   :  { %4546 = vtanh.f32 %v489_v14 }
 0x121   :  { %v4541_v15 = vpop.eup %4540 }
 0x122   :  { %v499_v16 = vadd.f32 1.0, %v4541_v15 }
 0x123   :  { %v4543_v17 = vpop.eup %4542 }
 0x124   :  { %4548 = vrcp.f32 %v499_v16  ;;  %v500_v18 = vadd.f32 1.0, %v4543_v17  ;;  %v4545_v19 = vpop.eup %4544 }
 0x125   :  { %v4547_v20 = vpop.eup %4546  ;;  %v501_v23 = vadd.f32 1.0, %v4545_v19 }
 0x126   :  { %4550 = vrcp.f32 %v500_v18 }
 0x127   :  { %4552 = vrcp.f32 %v501_v23 }
 0x131   :  { %v4549_v21 = vpop.eup %4548 }
 0x132   :  { %v510_v25 = vmul.f32 %v4549_v21, %v4547_v20 }
 0x133   :  { %v4551_v22 = vpop.eup %4550 }
 0x134   :  { %v509_v24 = vmul.f32 0.0, %v4551_v22  ;;  %v4553_v27 = vpop.eup %4552 }
 0x136   :  { %v5504_v26 = vadd.f32 %v510_v25, %v509_v24 }
 0x138   :  { %4554 = vtanh.f32 %v5504_v26 }
 0x145   :  { %v4555_v28 = vpop.eup %4554 }
 0x146   :  { %v5507_v29 = vmul.f32 %v4555_v28, %v4553_v27 }
 0x147   :  { %5368 = dma.done.wait [#allocation5], 4096 }
 0x148   :  { %5369 = vsyncadd [#allocation5], 4294963200 }
 0x149   :  { %5370 = dma.done.wait [#allocation5 + $0x1], 4096 }
 0x14a   :  { %5371 = vsyncadd [#allocation5 + $0x1], 4294963200  ;;  %745 = vmatprep.mubr.bf16.mxu0 %v7385_v0  ;;  %786 = vmatprep.mubr.bf16.mxu1 %v7385_v0  ;;  %v5511_v30 = vld [vmem:[#allocation2 + $0xe4] ss:$16 sps:$4 sm:$0xff]   ;;  %v5513_v31 = vld [vmem:[#allocation2 + $0xe0] ss:$16 sps:$4 sm:$0xff]   ;;  %v5603_v62 = vpack.c.bf16 %v5507_v29, %v5507_v29 }
 0x14b   :  { %713 = vmatprep.subr.bf16.mxu0 %v5511_v30  ;;  %v5516_v32 = vld [vmem:[#allocation2 + $0xc4] ss:$16 sps:$4 sm:$0xff]   ;;  %v5519_v33 = vld [vmem:[#allocation2 + $0xc0] ss:$16 sps:$4 sm:$0xff]   ;;  %v5524_v35 = vld [vmem:[#allocation2 + $0xec] ss:$16 sps:$4 sm:$0xff]  }
 0x14c   :  { %714 = vmatpush1.bf16.msra.mxu0 %v5513_v31  ;;  %v5522_v34 = vld [vmem:[#allocation2 + $0xa4] ss:$16 sps:$4 sm:$0xff]   ;;  %v5526_v36 = vld [vmem:[#allocation2 + $0xe8] ss:$16 sps:$4 sm:$0xff]   ;;  %v5529_v37 = vld [vmem:[#allocation2 + $0xa0] ss:$16 sps:$4 sm:$0xff]   ;;  %754 = vmatprep.subr.bf16.mxu1 %v5524_v35 }
 0x14d   :  { %715 = vmatprep.subr.bf16.mxu0 %v5516_v32  ;;  %v5533_v39 = vld [vmem:[#allocation2 + $0x84] ss:$16 sps:$4 sm:$0xff]   ;;  %755 = vmatpush1.bf16.msra.mxu1 %v5526_v36  ;;  %v5536_v40 = vld [vmem:[#allocation2 + $0xcc] ss:$16 sps:$4 sm:$0xff]   ;;  %v5538_v41 = vld [vmem:[#allocation2 + $0xc8] ss:$16 sps:$4 sm:$0xff]  }
 0x14e   :  { %756 = vmatprep.subr.bf16.mxu1 %v5536_v40  ;;  %v5542_v42 = vld [vmem:[#allocation2 + $0x80] ss:$16 sps:$4 sm:$0xff]   ;;  %v5544_v43 = vld [vmem:[#allocation2 + $0x64] ss:$16 sps:$4 sm:$0xff]   ;;  %v5546_v44 = vld [vmem:[#allocation2 + $0xac] ss:$16 sps:$4 sm:$0xff]  }
 0x14f   :  { %v5550_v45 = vld [vmem:[#allocation2 + $0xa8] ss:$16 sps:$4 sm:$0xff]   ;;  %v5553_v46 = vld [vmem:[#allocation2 + $0x8c] ss:$16 sps:$4 sm:$0xff]   ;;  %v5556_v47 = vld [vmem:[#allocation2 + $0x60] ss:$16 sps:$4 sm:$0xff]  }
 0x150   :  { %716 = vmatpush1.bf16.msra.mxu0 %v5519_v33  ;;  %v5559_v48 = vld [vmem:[#allocation2 + $0x44] ss:$16 sps:$4 sm:$0xff]   ;;  %v5562_v49 = vld [vmem:[#allocation2 + $0x88] ss:$16 sps:$4 sm:$0xff]   ;;  %v5565_v50 = vld [vmem:[#allocation2 + $0x6c] ss:$16 sps:$4 sm:$0xff]  }
 0x151   :  { %717 = vmatprep.subr.bf16.mxu0 %v5522_v34  ;;  %757 = vmatpush1.bf16.msra.mxu1 %v5538_v41  ;;  %v5568_v51 = vld [vmem:[#allocation2 + $0x40] ss:$16 sps:$4 sm:$0xff]   ;;  %v5570_v52 = vld [vmem:[#allocation2 + $0x24] ss:$16 sps:$4 sm:$0xff]   ;;  %v5574_v53 = vld [vmem:[#allocation2 + $0x68] ss:$16 sps:$4 sm:$0xff]  }
 0x152   :  { %758 = vmatprep.subr.bf16.mxu1 %v5546_v44  ;;  %v5576_v54 = vld [vmem:[#allocation2 + $0x20] ss:$16 sps:$4 sm:$0xff]   ;;  %v5579_v55 = vld [vmem:[#allocation2 + $0x4c] ss:$16 sps:$4 sm:$0xff]   ;;  %v5581_v56 = vld [vmem:[#allocation2 + $0x4] ss:$16 sps:$4 sm:$0xff]  }
 0x153   :  { %v5583_v57 = vld [vmem:[#allocation2 + $0x48] ss:$16 sps:$4 sm:$0xff]   ;;  %v5586_v58 = vld [vmem:[#allocation2 + $0x2c] ss:$16 sps:$4 sm:$0xff]   ;;  %v5590_v59 = vld [vmem:[#allocation2] ss:$16 sps:$4 sm:$0xff]  }
 0x154   :  { %718 = vmatpush1.bf16.msra.mxu0 %v5529_v37  ;;  %v5593_v60 = vld [vmem:[#allocation2 + $0x28] ss:$16 sps:$4 sm:$0xff]   ;;  %v5596_v61 = vld [vmem:[#allocation2 + $0xc] ss:$16 sps:$4 sm:$0xff]   ;;  %v5615_v5 = vld [vmem:[#allocation3 + $0xe4] ss:$16 sps:$4 sm:$0xff]  }
 0x155   :  { %719 = vmatprep.subr.bf16.mxu0 %v5533_v39  ;;  %759 = vmatpush1.bf16.msra.mxu1 %v5550_v45  ;;  %v5605_v63 = vld [vmem:[#allocation2 + $0x8] ss:$16 sps:$4 sm:$0xff]   ;;  %7557 = vst [vmem:[#allocation28_spill] sm:$0xff] %v5615_v5  ;;  %v5617_v6 = vld [vmem:[#allocation3 + $0xe0] ss:$16 sps:$4 sm:$0xff]   ;;  %s4306_s7 = sld [smem:[#allocation7 + $0x1]] }
 0x156   :  { %760 = vmatprep.subr.bf16.mxu1 %v5553_v46  ;;  %v5619_v7 = vld [vmem:[#allocation3 + $0xec] ss:$16 sps:$4 sm:$0xff]   ;;  %v5622_v8 = vld [vmem:[#allocation3 + $0xe8] ss:$16 sps:$4 sm:$0xff]   ;;  %v5627_v9 = vld [vmem:[#allocation3 + $0xc4] ss:$16 sps:$4 sm:$0xff]  }
 0x157   :  { %7558 = vst [vmem:[#allocation29_spill] sm:$0xff] %v5619_v7  ;;  %v5629_v10 = vld [vmem:[#allocation3 + $0xc0] ss:$16 sps:$4 sm:$0xff]   ;;  %v5631_v11 = vld [vmem:[#allocation3 + $0xcc] ss:$16 sps:$4 sm:$0xff]   ;;  %s4309_s2 = sld [smem:[#allocation7 + $0x81]] }
 0x158   :  { %720 = vmatpush1.bf16.msra.mxu0 %v5542_v42  ;;  %v5634_v12 = vld [vmem:[#allocation3 + $0xc8] ss:$16 sps:$4 sm:$0xff]   ;;  %v5639_v13 = vld [vmem:[#allocation3 + $0xa4] ss:$16 sps:$4 sm:$0xff]   ;;  %v5641_v14 = vld [vmem:[#allocation3 + $0xa0] ss:$16 sps:$4 sm:$0xff]  }
 0x159   :  { %721 = vmatprep.subr.bf16.mxu0 %v5544_v43  ;;  %761 = vmatpush1.bf16.msra.mxu1 %v5562_v49  ;;  %7559 = vst [vmem:[#allocation30_spill] sm:$0xff] %v5641_v14  ;;  %v5643_v15 = vld [vmem:[#allocation3 + $0xac] ss:$16 sps:$4 sm:$0xff]   ;;  %v5646_v16 = vld [vmem:[#allocation3 + $0xa8] ss:$16 sps:$4 sm:$0xff]   ;;  %s4350_s29 = sld [smem:[#allocation7 + $0x2]] }
 0x15a   :  { %762 = vmatprep.subr.bf16.mxu1 %v5565_v50  ;;  %7560 = vst [vmem:[#allocation31_spill] sm:$0xff] %v5643_v15  ;;  %7561 = vst [vmem:[#allocation32_spill] sm:$0xff] %v5646_v16  ;;  %v5651_v17 = vld [vmem:[#allocation3 + $0x84] ss:$16 sps:$4 sm:$0xff]   ;;  %v5653_v18 = vld [vmem:[#allocation3 + $0x80] ss:$16 sps:$4 sm:$0xff]  }
 0x15b   :  { %7562 = vst [vmem:[#allocation33_spill] sm:$0xff] %v5651_v17  ;;  %7563 = vst [vmem:[#allocation34_spill] sm:$0xff] %v5653_v18  ;;  %v5655_v19 = vld [vmem:[#allocation3 + $0x8c] ss:$16 sps:$4 sm:$0xff]   ;;  %v5658_v20 = vld [vmem:[#allocation3 + $0x88] ss:$16 sps:$4 sm:$0xff]  }
 0x15c   :  { %722 = vmatpush1.bf16.msra.mxu0 %v5556_v47  ;;  %7564 = vst [vmem:[#allocation35_spill] sm:$0xff] %v5655_v19  ;;  %7565 = vst [vmem:[#allocation36_spill] sm:$0xff] %v5658_v20  ;;  %v5663_v21 = vld [vmem:[#allocation3 + $0x64] ss:$16 sps:$4 sm:$0xff]   ;;  %v5665_v22 = vld [vmem:[#allocation3 + $0x60] ss:$16 sps:$4 sm:$0xff]  }
 0x15d   :  { %723 = vmatprep.subr.bf16.mxu0 %v5559_v48  ;;  %763 = vmatpush1.bf16.msra.mxu1 %v5574_v53  ;;  %7566 = vst [vmem:[#allocation37_spill] sm:$0xff] %v5663_v21  ;;  %7567 = vst [vmem:[#allocation38_spill] sm:$0xff] %v5665_v22  ;;  %v5667_v23 = vld [vmem:[#allocation3 + $0x6c] ss:$16 sps:$4 sm:$0xff]   ;;  %v5669_v24 = vld [vmem:[#allocation3 + $0x68] ss:$16 sps:$4 sm:$0xff]  }
 0x15e   :  { %764 = vmatprep.subr.bf16.mxu1 %v5579_v55  ;;  %7568 = vst [vmem:[#allocation39_spill] sm:$0xff] %v5667_v23  ;;  %7569 = vst [vmem:[#allocation40_spill] sm:$0xff] %v5669_v24  ;;  %v5672_v25 = vld [vmem:[#allocation3 + $0x44] ss:$16 sps:$4 sm:$0xff]   ;;  %v5674_v27 = vld [vmem:[#allocation3 + $0x4c] ss:$16 sps:$4 sm:$0xff]  }
 0x15f   :  { %7570 = vst [vmem:[#allocation41_spill] sm:$0xff] %v5672_v25  ;;  %7571 = vst [vmem:[#allocation42_spill] sm:$0xff] %v5674_v27  ;;  %v5678_v28 = vld [vmem:[#allocation3 + $0x40] ss:$16 sps:$4 sm:$0xff]   ;;  %v5682_v29 = vld [vmem:[#allocation3 + $0x48] ss:$16 sps:$4 sm:$0xff]  }
 0x160   :  { %724 = vmatpush1.bf16.msra.mxu0 %v5568_v51  ;;  %7572 = vst [vmem:[#allocation43_spill] sm:$0xff] %v5678_v28  ;;  %7573 = vst [vmem:[#allocation44_spill] sm:$0xff] %v5682_v29  ;;  %s1095_s23 = sshra.s32 %s4306_s7, 3  ;;  %s1145_s24 = sshra.s32 %s4309_s2, 3 }
 0x161   :  { %725 = vmatprep.subr.bf16.mxu0 %v5570_v52  ;;  %765 = vmatpush1.bf16.msra.mxu1 %v5583_v57  ;;  %s4435_s1 = sshll.u32 %s1095_s23, 5  ;;  %s1103_s3 = sand.u32 7, %s4306_s7 }
 0x162   :  { %766 = vmatprep.subr.bf16.mxu1 %v5586_v58  ;;  %s4436_s25 = sshll.u32 %s1145_s24, 5  ;;  %s1153_s26 = sand.u32 7, %s4309_s2 }
 0x163   :  { %s5854_s27 = scalar_lea.vmem [#allocation8], %s4435_s1  ;;  %s5858_s28 = scalar_lea.vmem [#allocation8], %s4436_s25 }
 0x164   :  { %726 = vmatpush1.bf16.msra.mxu0 %v5576_v54  ;;  %s4353_s30 = sld [smem:[#allocation7 + $0x82]]  ;;  %s1691_s9 = sshra.s32 %s4350_s29, 3 }
 0x165   :  { %727 = vmatprep.subr.bf16.mxu0 %v5581_v56  ;;  %767 = vmatpush1.bf16.msra.mxu1 %v5593_v60  ;;  %s4437_s11 = sshll.u32 %s1691_s9, 5  ;;  %s1699_s12 = sand.u32 7, %s4350_s29 }
 0x166   :  { %768 = vmatprep.subr.bf16.mxu1 %v5596_v61  ;;  %s6096_s14 = scalar_lea.vmem [#allocation8], %s4437_s11  ;;  %s4362_s15 = sld [smem:[#allocation7 + $0x3]] }
 0x167   :  { %s4365_s16 = sld [smem:[#allocation7 + $0x83]] }
 0x168   :  { %728 = vmatpush1.bf16.msra.mxu0 %v5590_v59  ;;  %s4374_s2 = sld [smem:[#allocation7 + $0x4]] }
 0x169   :  { %769 = vmatpush1.bf16.msra.mxu1 %v5605_v63  ;;  %1012 = vmatprep.subr.bf16.mxu0 %v5615_v5  ;;  %s4377_s23 = sld [smem:[#allocation7 + $0x84]] }
 0x16a   :  { %1053 = vmatprep.subr.bf16.mxu1 %v5619_v7  ;;  %s1741_s10 = sshra.s32 %s4353_s30, 3  ;;  %s1749_s5 = sand.u32 7, %s4353_s30 }
 0x16b   :  { %746 = vmatmul.mubr.bf16.vlgmr.msra.gmra.mxu0 %v5603_v62  ;;  %s4438_s13 = sshll.u32 %s1741_s10, 5  ;;  %s4386_s30 = sld [smem:[#allocation7 + $0x5]] }
 0x16c   :  { %1044 = vmatprep.mubr.bf16.mxu0 %v7385_v0  ;;  %787 = vmatmul.mubr.bf16.vlgmr.msra.gmra.mxu1 %v5603_v62  ;;  %s6100_s0 = scalar_lea.vmem [#allocation8], %s4438_s13  ;;  %s2095_s17 = sshra.s32 %s4362_s15, 3 }
 0x16d   :  { %1085 = vmatprep.mubr.bf16.mxu1 %v7385_v0  ;;  %1013 = vmatpush1.bf16.msra.mxu0 %v5617_v6  ;;  %v5684_v0 = vld [vmem:[#allocation3 + $0x24] ss:$16 sps:$4 sm:$0xff]   ;;  %s2145_s6 = sshra.s32 %s4365_s16, 3  ;;  %s4439_s18 = sshll.u32 %s2095_s17, 5 }
 0x16e   :  { %1054 = vmatpush1.bf16.msra.mxu1 %v5622_v8  ;;  %1014 = vmatprep.subr.bf16.mxu0 %v5627_v9  ;;  %7574 = vst [vmem:[#allocation45_spill] sm:$0xff] %v5684_v0  ;;  %s2103_s19 = sand.u32 7, %s4362_s15  ;;  %s4440_s20 = sshll.u32 %s2145_s6, 5 }
 0x16f   :  { %1055 = vmatprep.subr.bf16.mxu1 %v5631_v11  ;;  %s2153_s21 = sand.u32 7, %s4365_s16  ;;  %s6402_s22 = scalar_lea.vmem [#allocation8], %s4439_s18 }
 0x170   :  { %s6406_s7 = scalar_lea.vmem [#allocation8], %s4440_s20  ;;  %s2499_s24 = sshra.s32 %s4374_s2, 3 }
 0x171   :  { %1015 = vmatpush1.bf16.msra.mxu0 %v5629_v10  ;;  %s2549_s1 = sshra.s32 %s4377_s23, 3  ;;  %s2507_s25 = sand.u32 7, %s4374_s2 }
 0x172   :  { %1056 = vmatpush1.bf16.msra.mxu1 %v5634_v12  ;;  %1016 = vmatprep.subr.bf16.mxu0 %v5639_v13  ;;  %s4389_s9 = sld [smem:[#allocation7 + $0x85]]  ;;  %s2903_s10 = sshra.s32 %s4386_s30, 3 }
 0x173   :  { %1057 = vmatprep.subr.bf16.mxu1 %v5643_v15  ;;  %s2911_s13 = sand.u32 7, %s4386_s30  ;;  %s4398_s16 = sld [smem:[#allocation7 + $0x6]] }
 0x174   :  { %s4401_s17 = sld [smem:[#allocation7 + $0x86]] }
 0x175   :  { %1017 = vmatpush1.bf16.msra.mxu0 %v5641_v14 }
 0x176   :  { %1058 = vmatpush1.bf16.msra.mxu1 %v5646_v16  ;;  %1018 = vmatprep.subr.bf16.mxu0 %v5651_v17 }
 0x177   :  { %1059 = vmatprep.subr.bf16.mxu1 %v5655_v19 }
 0x178   :  { %s2953_s11 = sshra.s32 %s4389_s9, 3 }
 0x179   :  { %1019 = vmatpush1.bf16.msra.mxu0 %v5653_v18  ;;  %s3307_s6 = sshra.s32 %s4398_s16, 3  ;;  %s3315_s20 = sand.u32 7, %s4398_s16 }
 0x17a   :  { %1060 = vmatpush1.bf16.msra.mxu1 %v5658_v20  ;;  %1020 = vmatprep.subr.bf16.mxu0 %v5663_v21  ;;  %v5687_v21 = vld [vmem:[#allocation3 + $0x2c] ss:$16 sps:$4 sm:$0xff]   ;;  %v5690_v20 = vld [vmem:[#allocation3 + $0x20] ss:$16 sps:$4 sm:$0xff]   ;;  %s3357_s18 = sshra.s32 %s4401_s17, 3 }
 0x17b   :  { %1061 = vmatprep.subr.bf16.mxu1 %v5667_v23  ;;  %7575 = vst [vmem:[#allocation46_spill] sm:$0xff] %v5687_v21  ;;  %7576 = vst [vmem:[#allocation47_spill] sm:$0xff] %v5690_v20 }
 0x17d   :  { %1021 = vmatpush1.bf16.msra.mxu0 %v5665_v22  ;;  %v5694_v22 = vld [vmem:[#allocation3 + $0x28] ss:$16 sps:$4 sm:$0xff]  }
 0x17e   :  { %1062 = vmatpush1.bf16.msra.mxu1 %v5669_v24  ;;  %1022 = vmatprep.subr.bf16.mxu0 %v5672_v25  ;;  %7577 = vst [vmem:[#allocation48_spill] sm:$0xff] %v5694_v22  ;;  %v5696_v24 = vld [vmem:[#allocation3 + $0x4] ss:$16 sps:$4 sm:$0xff]   ;;  %v5699_v25 = vld [vmem:[#allocation3 + $0xc] ss:$16 sps:$4 sm:$0xff]  }
 0x17f   :  { %1063 = vmatprep.subr.bf16.mxu1 %v5674_v27  ;;  %7578 = vst [vmem:[#allocation49_spill] sm:$0xff] %v5696_v24  ;;  %7579 = vst [vmem:[#allocation50_spill] sm:$0xff] %v5699_v25  ;;  %v5702_v27 = vld [vmem:[#allocation3] ss:$16 sps:$4 sm:$0xff]  }
 0x180   :  { %7580 = vst [vmem:[#allocation51_spill] sm:$0xff] %v5702_v27 }
 0x181   :  { %1023 = vmatpush1.bf16.msra.mxu0 %v5678_v28  ;;  %v5706_v28 = vld [vmem:[#allocation3 + $0x8] ss:$16 sps:$4 sm:$0xff]  }
 0x182   :  { %1064 = vmatpush1.bf16.msra.mxu1 %v5682_v29  ;;  %1024 = vmatprep.subr.bf16.mxu0 %v5684_v0  ;;  %7581 = vst [vmem:[#allocation52_spill] sm:$0xff] %v5706_v28  ;;  %v5708_v29 = vld [vmem:[#allocation10 + $0xe4] ss:$16 sps:$4 sm:$0xff]  }
 0x183   :  { %1065 = vmatprep.subr.bf16.mxu1 %v5687_v21  ;;  %7582 = vst [vmem:[#allocation53_spill] sm:$0xff] %v5708_v29  ;;  %v5714_v21 = vld [vmem:[#allocation10 + $0xec] ss:$16 sps:$4 sm:$0xff]  }
 0x184   :  { %7583 = vst [vmem:[#allocation54_spill] sm:$0xff] %v5714_v21 }
 0x185   :  { %1025 = vmatpush1.bf16.msra.mxu0 %v5690_v20 }
 0x186   :  { %1066 = vmatpush1.bf16.msra.mxu1 %v5694_v22  ;;  %1026 = vmatprep.subr.bf16.mxu0 %v5696_v24 }
 0x187   :  { %1067 = vmatprep.subr.bf16.mxu1 %v5699_v25 }
 0x189   :  { %1027 = vmatpush1.bf16.msra.mxu0 %v5702_v27 }
 0x18a   :  { %1068 = vmatpush1.bf16.msra.mxu1 %v5706_v28  ;;  %1386 = vmatprep.subr.bf16.mxu0 %v5708_v29 }
 0x18b   :  { %1427 = vmatprep.subr.bf16.mxu1 %v5714_v21 }
 0x22b   :  { %v747_v20 = vpop.f32.mrf.mxu0 }
 0x22c   :  { %v748_v22 = vadd.f32 %v747_v20, %v5447_v1  ;;  %v788_v19 = vpop.f32.mrf.mxu1 }
 0x22d   :  { %v749_v24 = vpop.f32.mrf.mxu0  ;;  %v789_v29 = vadd.f32 %v788_v19, %v5451_v3 }
 0x22e   :  { %v4271_v0 = vmul.f32 -1.442695, %v748_v22  ;;  %v750_v23 = vadd.f32 %v749_v24, %v5449_v2  ;;  %v790_v28 = vpop.f32.mrf.mxu1 }
 0x22f   :  { %v751_v18 = vpop.f32.mrf.mxu0  ;;  %v4273_v14 = vmul.f32 -1.442695, %v789_v29  ;;  %v791_v21 = vadd.f32 %v790_v28, %v5453_v4  ;;  %v5724_v28 = vld [vmem:[#allocation10 + $0xe0] ss:$16 sps:$4 sm:$0xff]  }
 0x230   :  { %4700 = vpow2.f32 %v4271_v0  ;;  %v4272_v25 = vmul.f32 -1.442695, %v750_v23  ;;  %v792_v17 = vpop.f32.mrf.mxu1 }
 0x231   :  { %v752_v27 = vpop.f32.mrf.mxu0 }
 0x232   :  { %4702 = vpow2.f32 %v4272_v25  ;;  %v793_v16 = vpop.f32.mrf.mxu1 }
 0x233   :  { %4704 = vpow2.f32 %v4273_v14 }
 0x234   :  { %4706 = vtanh.f32 %v791_v21  ;;  %v5726_v21 = vld [vmem:[#allocation10 + $0xe8] ss:$16 sps:$4 sm:$0xff]  }
 0x23d   :  { %v4701_v15 = vpop.eup %4700 }
 0x23e   :  { %v804_v20 = vadd.f32 1.0, %v4701_v15 }
 0x23f   :  { %v4703_v22 = vpop.eup %4702 }
 0x240   :  { %4708 = vrcp.f32 %v804_v20  ;;  %v805_v18 = vadd.f32 1.0, %v4703_v22  ;;  %v4705_v0 = vpop.eup %4704  ;;  %v5728_v20 = vld [vmem:[#allocation10 + $0xc4] ss:$16 sps:$4 sm:$0xff]   ;;  %v5730_v22 = vld [vmem:[#allocation10 + $0xcc] ss:$16 sps:$4 sm:$0xff]  }
 0x241   :  { %v4707_v23 = vpop.eup %4706  ;;  %v806_v27 = vadd.f32 1.0, %v4705_v0  ;;  %v5739_v0 = vld [vmem:[#allocation10 + $0xa4] ss:$16 sps:$4 sm:$0xff]  }
 0x242   :  { %4710 = vrcp.f32 %v805_v18  ;;  %v5736_v18 = vld [vmem:[#allocation10 + $0xc8] ss:$16 sps:$4 sm:$0xff]   ;;  %7584 = vst [vmem:[#allocation55_spill] sm:$0xff] %v5739_v0 }
 0x243   :  { %4712 = vrcp.f32 %v806_v27  ;;  %v5750_v27 = vld [vmem:[#allocation10 + $0xa8] ss:$16 sps:$4 sm:$0xff]  }
 0x244   :  { %7588 = vst [vmem:[#allocation58_spill] sm:$0xff] %v5750_v27 }
 0x24d   :  { %v4709_v24 = vpop.eup %4708 }
 0x24e   :  { %v815_v2 = vmul.f32 %v4709_v24, %v4707_v23  ;;  %v5742_v23 = vld [vmem:[#allocation10 + $0xac] ss:$16 sps:$4 sm:$0xff]   ;;  %v7586_v24 = vmov 0  }
 0x24f   :  { %v4711_v25 = vpop.eup %4710  ;;  %7585 = vst [vmem:[#allocation56_spill] sm:$0xff] %v5742_v23 }
 0x250   :  { %v814_v17 = vmul.f32 0.0, %v4711_v25  ;;  %v4713_v16 = vpop.eup %4712  ;;  %v5747_v25 = vld [vmem:[#allocation10 + $0xa0] ss:$16 sps:$4 sm:$0xff]  }
 0x251   :  { %7587 = vst [vmem:[#allocation57_spill] sm:$0xff] %v5747_v25 }
 0x252   :  { %v5721_v19 = vadd.f32 %v815_v2, %v814_v17  ;;  %v5733_v2 = vld [vmem:[#allocation10 + $0xc0] ss:$16 sps:$4 sm:$0xff]   ;;  %v5753_v17 = vld [vmem:[#allocation10 + $0x84] ss:$16 sps:$4 sm:$0xff]  }
 0x253   :  { %7589 = vst [vmem:[#allocation59_spill] sm:$0xff] %v5753_v17 }
 0x254   :  { %4714 = vtanh.f32 %v5721_v19 }
 0x261   :  { %v4715_v15 = vpop.eup %4714 }
 0x262   :  { %v818_v14 = vmul.f32 %v4715_v15, %v4713_v16  ;;  %v5756_v16 = vld [vmem:[#allocation10 + $0x8c] ss:$16 sps:$4 sm:$0xff]   ;;  %v5759_v15 = vld [vmem:[#allocation10 + $0x80] ss:$16 sps:$4 sm:$0xff]  }
 0x263   :  { %7590 = vst [vmem:[#allocation60_spill] sm:$0xff] %v5756_v16  ;;  %7591 = vst [vmem:[#allocation61_spill] sm:$0xff] %v5759_v15 }
 0x264   :  { %v819_v29 = vpack.c.bf16 %v818_v14, %v818_v14  ;;  %v5762_v14 = vld [vmem:[#allocation10 + $0x88] ss:$16 sps:$4 sm:$0xff]  }
 0x265   :  { %7592 = vst [vmem:[#allocation62_spill] sm:$0xff] %v5762_v14 }
 0x266   :  { %1045 = vmatmul.mubr.bf16.vlgmr.msra.gmra.mxu0 %v819_v29  ;;  %1086 = vmatmul.mubr.bf16.vlgmr.msra.gmra.mxu1 %v819_v29  ;;  %v5765_v29 = vld [vmem:[#allocation10 + $0x64] ss:$16 sps:$4 sm:$0xff]  }
 0x267   :  { %1387 = vmatpush1.bf16.msra.mxu0 %v5724_v28  ;;  %1428 = vmatpush1.bf16.msra.mxu1 %v5726_v21  ;;  %7593 = vst [vmem:[#allocation63_spill] sm:$0xff] %v5765_v29 }
 0x268   :  { %1388 = vmatprep.subr.bf16.mxu0 %v5728_v20  ;;  %1429 = vmatprep.subr.bf16.mxu1 %v5730_v22 }
 0x269   :  { %1418 = vmatprep.mubr.bf16.mxu0 %v7586_v24  ;;  %1459 = vmatprep.mubr.bf16.mxu1 %v7586_v24 }
 0x26b   :  { %1389 = vmatpush1.bf16.msra.mxu0 %v5733_v2  ;;  %1430 = vmatpush1.bf16.msra.mxu1 %v5736_v18 }
 0x26c   :  { %1390 = vmatprep.subr.bf16.mxu0 %v5739_v0  ;;  %1431 = vmatprep.subr.bf16.mxu1 %v5742_v23  ;;  %v5768_v0 = vld [vmem:[#allocation10 + $0x6c] ss:$16 sps:$4 sm:$0xff]   ;;  %v5771_v23 = vld [vmem:[#allocation10 + $0x60] ss:$16 sps:$4 sm:$0xff]  }
 0x26d   :  { %7594 = vst [vmem:[#allocation64_spill] sm:$0xff] %v5768_v0  ;;  %7595 = vst [vmem:[#allocation65_spill] sm:$0xff] %v5771_v23 }
 0x26f   :  { %1391 = vmatpush1.bf16.msra.mxu0 %v5747_v25  ;;  %1432 = vmatpush1.bf16.msra.mxu1 %v5750_v27  ;;  %v5774_v25 = vld [vmem:[#allocation10 + $0x68] ss:$16 sps:$4 sm:$0xff]   ;;  %v5777_v27 = vld [vmem:[#allocation10 + $0x44] ss:$16 sps:$4 sm:$0xff]  }
 0x270   :  { %1392 = vmatprep.subr.bf16.mxu0 %v5753_v17  ;;  %1433 = vmatprep.subr.bf16.mxu1 %v5756_v16  ;;  %7596 = vst [vmem:[#allocation66_spill] sm:$0xff] %v5774_v25  ;;  %7597 = vst [vmem:[#allocation67_spill] sm:$0xff] %v5777_v27  ;;  %v5780_v17 = vld [vmem:[#allocation10 + $0x4c] ss:$16 sps:$4 sm:$0xff]   ;;  %v5783_v16 = vld [vmem:[#allocation10 + $0x40] ss:$16 sps:$4 sm:$0xff]  }
 0x271   :  { %7598 = vst [vmem:[#allocation68_spill] sm:$0xff] %v5780_v17  ;;  %7599 = vst [vmem:[#allocation69_spill] sm:$0xff] %v5783_v16 }
 0x273   :  { %1393 = vmatpush1.bf16.msra.mxu0 %v5759_v15  ;;  %1434 = vmatpush1.bf16.msra.mxu1 %v5762_v14  ;;  %v5786_v15 = vld [vmem:[#allocation10 + $0x48] ss:$16 sps:$4 sm:$0xff]   ;;  %v5789_v14 = vld [vmem:[#allocation10 + $0x24] ss:$16 sps:$4 sm:$0xff]  }
 0x274   :  { %1394 = vmatprep.subr.bf16.mxu0 %v5765_v29  ;;  %1435 = vmatprep.subr.bf16.mxu1 %v5768_v0  ;;  %v5792_v29 = vld [vmem:[#allocation10 + $0x2c] ss:$16 sps:$4 sm:$0xff]   ;;  %v5795_v0 = vld [vmem:[#allocation10 + $0x20] ss:$16 sps:$4 sm:$0xff]  }
 0x277   :  { %1395 = vmatpush1.bf16.msra.mxu0 %v5771_v23  ;;  %1436 = vmatpush1.bf16.msra.mxu1 %v5774_v25  ;;  %v5798_v23 = vld [vmem:[#allocation10 + $0x28] ss:$16 sps:$4 sm:$0xff]   ;;  %v5801_v25 = vld [vmem:[#allocation10 + $0x4] ss:$16 sps:$4 sm:$0xff]  }
 0x278   :  { %1396 = vmatprep.subr.bf16.mxu0 %v5777_v27  ;;  %1437 = vmatprep.subr.bf16.mxu1 %v5780_v17  ;;  %v5804_v27 = vld [vmem:[#allocation10 + $0xc] ss:$16 sps:$4 sm:$0xff]   ;;  %v5807_v17 = vld [vmem:[#allocation10] ss:$16 sps:$4 sm:$0xff]  }
 0x27b   :  { %1397 = vmatpush1.bf16.msra.mxu0 %v5783_v16  ;;  %1438 = vmatpush1.bf16.msra.mxu1 %v5786_v15  ;;  %v5810_v16 = vld [vmem:[#allocation10 + $0x8] ss:$16 sps:$4 sm:$0xff]  }
 0x27c   :  { %1398 = vmatprep.subr.bf16.mxu0 %v5789_v14  ;;  %1439 = vmatprep.subr.bf16.mxu1 %v5792_v29  ;;  %7600 = vst [vmem:[#allocation70_spill] sm:$0xff] %v5810_v16 }
 0x27f   :  { %1399 = vmatpush1.bf16.msra.mxu0 %v5795_v0  ;;  %1440 = vmatpush1.bf16.msra.mxu1 %v5798_v23 }
 0x280   :  { %1400 = vmatprep.subr.bf16.mxu0 %v5801_v25  ;;  %1441 = vmatprep.subr.bf16.mxu1 %v5804_v27 }
 0x283   :  { %1401 = vmatpush1.bf16.msra.mxu0 %v5807_v17  ;;  %1442 = vmatpush1.bf16.msra.mxu1 %v5810_v16 }
 0x284   :  { %1497 = vmatprep.subr.bf16.mxu0 %v5511_v30  ;;  %1538 = vmatprep.subr.bf16.mxu1 %v5524_v35  ;;  %v1104_v30 = vstv %s1103_s3  ;;  %v1150_v35 = vld [vmem:[%s5858_s28 + $0x8] sm:$0xff]  ;;  %s4441_s3 = sshll.u32 %s2499_s24, 5  ;;  %s4413_s24 = sld [smem:[#allocation7 + $0x87]] }
 0x285   :  { %vm1105_vm4 = vcmp.eq.s32.totalorder %v5466_v38, %v1104_v30 }
 0x286   :  { %1419 = vmatmul.mubr.bf16.vlgmr.msra.gmra.mxu0 %v5603_v62  ;;  %1460 = vmatmul.mubr.bf16.vlgmr.msra.gmra.mxu1 %v5603_v62 }
 0x287   :  { %1498 = vmatpush1.bf16.msra.mxu0 %v5513_v31  ;;  %1539 = vmatpush1.bf16.msra.mxu1 %v5526_v36  ;;  %v1154_v31 = vstv %s1153_s26  ;;  %s4442_s26 = sshll.u32 %s2549_s1, 5 }
 0x288   :  { %1499 = vmatprep.subr.bf16.mxu0 %v5516_v32  ;;  %1540 = vmatprep.subr.bf16.mxu1 %v5536_v40  ;;  %v1099_v32 = vld [vmem:[%s5854_s27] sm:$0xff]  ;;  %vm1155_vm5 = vcmp.eq.s32.totalorder %v5466_v38, %v1154_v31  ;;  %s6648_s29 = scalar_lea.vmem [#allocation8], %s4442_s26 }
 0x289   :  { %1529 = vmatprep.mubr.bf16.mxu0 %v7586_v24  ;;  %1570 = vmatprep.mubr.bf16.mxu1 %v7586_v24  ;;  %v1108_v36 = vsel %vm1105_vm4, %v1099_v32, 0.0  ;;  %v1152_v32 = vld [vmem:[%s5858_s28 + $0x18] sm:$0xff] }
 0x28b   :  { %1500 = vmatpush1.bf16.msra.mxu0 %v5519_v33  ;;  %1541 = vmatpush1.bf16.msra.mxu1 %v5538_v41  ;;  %v1149_v33 = vld [vmem:[%s5858_s28] sm:$0xff] }
 0x28c   :  { %1501 = vmatprep.subr.bf16.mxu0 %v5522_v34  ;;  %1542 = vmatprep.subr.bf16.mxu1 %v5546_v44  ;;  %v1100_v34 = vld [vmem:[%s5854_s27 + $0x8] sm:$0xff] }
 0x28d   :  { %v1109_v41 = vsel %vm1105_vm4, %v1100_v34, 0.0 }
 0x28f   :  { %1502 = vmatpush1.bf16.msra.mxu0 %v5529_v37  ;;  %1543 = vmatpush1.bf16.msra.mxu1 %v5550_v45  ;;  %v1158_v37 = vsel %vm1155_vm5, %v1149_v33, 0.0  ;;  %v1112_v45 = vrot.slane %v1108_v36, 4 }
 0x290   :  { %1503 = vmatprep.subr.bf16.mxu0 %v5533_v39  ;;  %1544 = vmatprep.subr.bf16.mxu1 %v5553_v46  ;;  %v1162_v46 = vrot.slane %v1158_v37, 4 }
 0x293   :  { %1504 = vmatpush1.bf16.msra.mxu0 %v5542_v42  ;;  %1545 = vmatpush1.bf16.msra.mxu1 %v5562_v49  ;;  %v1159_v42 = vsel %vm1155_vm5, %v1150_v35, 0.0  ;;  %v1118_v49 = vrot.slane %v1109_v41, 4 }
 0x294   :  { %1505 = vmatprep.subr.bf16.mxu0 %v5544_v43  ;;  %1546 = vmatprep.subr.bf16.mxu1 %v5565_v50  ;;  %v1168_v50 = vrot.slane %v1159_v42, 4 }
 0x297   :  { %1506 = vmatpush1.bf16.msra.mxu0 %v5556_v47  ;;  %1547 = vmatpush1.bf16.msra.mxu1 %v5574_v53  ;;  %v1113_v53 = vadd.f32 %v1112_v45, %v1108_v36 }
 0x298   :  { %1507 = vmatprep.subr.bf16.mxu0 %v5559_v48  ;;  %1548 = vmatprep.subr.bf16.mxu1 %v5579_v55  ;;  %v1101_v55 = vld [vmem:[%s5854_s27 + $0x10] sm:$0xff] }
 0x29b   :  { %1508 = vmatpush1.bf16.msra.mxu0 %v5568_v51  ;;  %1549 = vmatpush1.bf16.msra.mxu1 %v5583_v57  ;;  %v1119_v57 = vadd.f32 %v1118_v49, %v1109_v41 }
 0x29c   :  { %1509 = vmatprep.subr.bf16.mxu0 %v5570_v52  ;;  %1550 = vmatprep.subr.bf16.mxu1 %v5586_v58  ;;  %v1169_v58 = vadd.f32 %v1168_v50, %v1159_v42  ;;  %v1161_v42 = vsel %vm1155_vm5, %v1152_v32, 0.0 }
 0x29d   :  { %v1120_v33 = vrot.slane %v1119_v57, 2 }
 0x29e   :  { %v1170_v34 = vrot.slane %v1169_v58, 2 }
 0x29f   :  { %1510 = vmatpush1.bf16.msra.mxu0 %v5576_v54  ;;  %1551 = vmatpush1.bf16.msra.mxu1 %v5593_v60  ;;  %v1163_v54 = vadd.f32 %v1162_v46, %v1158_v37  ;;  %v1121_v45 = vadd.f32 %v1120_v33, %v1119_v57 }
 0x2a0   :  { %1511 = vmatprep.subr.bf16.mxu0 %v5581_v56  ;;  %1552 = vmatprep.subr.bf16.mxu1 %v5596_v61  ;;  %v1151_v56 = vld [vmem:[%s5858_s28 + $0x10] sm:$0xff]  ;;  %v1114_v61 = vrot.slane %v1113_v53, 2  ;;  %v1171_v46 = vadd.f32 %v1170_v34, %v1169_v58  ;;  %s6644_s28 = scalar_lea.vmem [#allocation8], %s4441_s3  ;;  %s3761_s3 = sshra.s32 %s4413_s24, 3 }
 0x2a1   :  { %v1160_v60 = vsel %vm1155_vm5, %v1151_v56, 0.0  ;;  %v1164_v62 = vrot.slane %v1163_v54, 2  ;;  %v1122_v56 = vrot.slane %v1121_v45, 1 }
 0x2a2   :  { %v1115_v36 = vadd.f32 %v1114_v61, %v1113_v53 }
 0x2a3   :  { %1512 = vmatpush1.bf16.msra.mxu0 %v5590_v59  ;;  %1553 = vmatpush1.bf16.msra.mxu1 %v5605_v63  ;;  %v1110_v59 = vsel %vm1105_vm4, %v1101_v55, 0.0  ;;  %v1102_v63 = vld [vmem:[%s5854_s27 + $0x18] sm:$0xff]  ;;  %v1165_v37 = vadd.f32 %v1164_v62, %v1163_v54  ;;  %v1123_v62 = vadd.f32 %v1122_v56, %v1121_v45  ;;  %s2557_s27 = sand.u32 7, %s4377_s23  ;;  %s4410_s23 = sld [smem:[#allocation7 + $0x7]] }
 0x2a4   :  { %1608 = vmatprep.subr.bf16.mxu0 %v5615_v5  ;;  %1649 = vmatprep.subr.bf16.mxu1 %v5619_v7  ;;  %v1124_v35 = vrot.slane %v1110_v59, 4  ;;  %v1111_v41 = vsel %vm1105_vm4, %v1102_v63, 0.0  ;;  %v1172_v7 = vrot.slane %v1171_v46, 1 }
 0x2a5   :  { %v1130_v50 = vrot.slane %v1111_v41, 4  ;;  %v1166_v55 = vrot.slane %v1165_v37, 1  ;;  %v1137_v33 = vsel %vm148_vm2, %v1123_v62, 0.0 }
 0x2a6   :  { %v1173_v63 = vadd.f32 %v1172_v7, %v1171_v46 }
 0x2a7   :  { %v1131_v53 = vadd.f32 %v1130_v50, %v1111_v41  ;;  %v1167_v30 = vadd.f32 %v1166_v55, %v1165_v37 }
 0x2a8   :  { %v1187_v34 = vsel %vm201_vm3, %v1173_v63, 0.0 }
 0x2a9   :  { %v1132_v57 = vrot.slane %v1131_v53, 2  ;;  %s3711_s1 = sshra.s32 %s4410_s23, 3  ;;  %s3719_s26 = sand.u32 7, %s4410_s23 }
 0x2ab   :  { %v1133_v7 = vadd.f32 %v1132_v57, %v1131_v53 }
 0x326   :  { %v5868_v39 = vpop.f32.mrf.mxu0  ;;  %v5870_v40 = vpop.f32.mrf.mxu1 }
 0x328   :  { %v5876_v43 = vpop.f32.mrf.mxu0  ;;  %v5878_v44 = vpop.f32.mrf.mxu1 }
 0x32a   :  { %v1050_v47 = vpop.f32.mrf.mxu0  ;;  %v1091_v48 = vpop.f32.mrf.mxu1 }
 0x32b   :  { %v1174_v47 = vrot.slane %v1160_v60, 4  ;;  %v1125_v48 = vadd.f32 %v1124_v35, %v1110_v59 }
 0x32c   :  { %v1051_v51 = vpop.f32.mrf.mxu0  ;;  %v1092_v52 = vpop.f32.mrf.mxu1 }
 0x32d   :  { %v1175_v49 = vadd.f32 %v1174_v47, %v1160_v60  ;;  %v1180_v51 = vrot.slane %v1161_v42, 4  ;;  %v1116_v52 = vrot.slane %v1115_v36, 1  ;;  %v1126_v5 = vrot.slane %v1125_v48, 2 }
 0x32e   :  { %v1186_v60 = vsel %vm201_vm3, %v1167_v30, 0.0 }
 0x32f   :  { %v1176_v16 = vrot.slane %v1175_v49, 2  ;;  %v1181_v54 = vadd.f32 %v1180_v51, %v1161_v42  ;;  %v1117_v61 = vadd.f32 %v1116_v52, %v1115_v36  ;;  %v1127_v31 = vadd.f32 %v1126_v5, %v1125_v48 }
 0x330   :  { %v1134_v48 = vrot.slane %v1133_v7, 1 }
 0x331   :  { %v1177_v32 = vadd.f32 %v1176_v16, %v1175_v49  ;;  %v1182_v58 = vrot.slane %v1181_v54, 2  ;;  %v1136_v59 = vsel %vm148_vm2, %v1117_v61, 0.0  ;;  %v1128_v35 = vrot.slane %v1127_v31, 1 }
 0x332   :  { %v1190_v36 = vadd.f32 %v1186_v60, %v1136_v59  ;;  %v1191_v16 = vadd.f32 %v1187_v34, %v1137_v33  ;;  %v1135_v62 = vadd.f32 %v1134_v48, %v1133_v7 }
 0x333   :  { %v1178_v47 = vrot.slane %v1177_v32, 1  ;;  %v1183_v5 = vadd.f32 %v1182_v58, %v1181_v54  ;;  %v1129_v41 = vadd.f32 %v1128_v35, %v1127_v31 }
 0x334   :  { %v1139_v58 = vsel %vm148_vm2, %v1135_v62, 0.0  ;;  %v7614_v62 = vld [vmem:[#allocation43_spill] sm:$0xff] }
 0x335   :  { %v1179_v42 = vadd.f32 %v1178_v47, %v1177_v32  ;;  %v1184_v49 = vrot.slane %v1183_v5, 1  ;;  %v1138_v61 = vsel %vm148_vm2, %v1129_v41, 0.0 }
 0x337   :  { %v1188_v53 = vsel %vm201_vm3, %v1179_v42, 0.0  ;;  %v1185_v63 = vadd.f32 %v1184_v49, %v1183_v5 }
 0x338   :  { %v1192_v57 = vadd.f32 %v1188_v53, %v1138_v61  ;;  %v7607_v61 = vld [vmem:[#allocation36_spill] sm:$0xff]  ;;  %v7608_v53 = vld [vmem:[#allocation37_spill] sm:$0xff] }
 0x339   :  { %v1189_v59 = vsel %vm201_vm3, %v1185_v63, 0.0  ;;  %v7615_v63 = vld [vmem:[#allocation44_spill] sm:$0xff] }
 0x33a   :  { %v1193_v33 = vadd.f32 %v1189_v59, %v1139_v58  ;;  %v7619_v58 = vld [vmem:[#allocation48_spill] sm:$0xff]  ;;  %v7620_v59 = vld [vmem:[#allocation49_spill] sm:$0xff] }
 0x346   :  { %v1420_v37 = vpop.f32.mrf.mxu0  ;;  %v1461_v45 = vpop.f32.mrf.mxu1 }
 0x347   :  { %v1468_v46 = vadd.f32 %v1420_v37, %v1190_v36  ;;  %v1470_v60 = vadd.f32 %v1461_v45, %v1192_v57  ;;  %v7618_v57 = vld [vmem:[#allocation47_spill] sm:$0xff] }
 0x348   :  { %v1422_v50 = vpop.f32.mrf.mxu0  ;;  %v1463_v51 = vpop.f32.mrf.mxu1 }
 0x349   :  { %v4344_v52 = vmul.f32 -1.442695, %v1468_v46  ;;  %v1469_v55 = vadd.f32 %v1422_v50, %v1191_v16  ;;  %v4346_v34 = vmul.f32 -1.442695, %v1470_v60  ;;  %v1471_v35 = vadd.f32 %v1463_v51, %v1193_v33  ;;  %v7621_v60 = vld [vmem:[#allocation50_spill] sm:$0xff]  ;;  %v7622_v33 = vld [vmem:[#allocation51_spill] sm:$0xff] }
 0x34a   :  { %v1424_v56 = vpop.f32.mrf.mxu0  ;;  %v1465_v54 = vpop.f32.mrf.mxu1 }
 0x34b   :  { %4716 = vpow2.f32 %v4344_v52  ;;  %v4345_v30 = vmul.f32 -1.442695, %v1469_v55  ;;  %v7602_v56 = vld [vmem:[#allocation30_spill] sm:$0xff]  ;;  %v7612_v54 = vld [vmem:[#allocation41_spill] sm:$0xff] }
 0x34c   :  { %v1425_v31 = vpop.f32.mrf.mxu0  ;;  %v1466_v32 = vpop.f32.mrf.mxu1 }
 0x34d   :  { %4718 = vpow2.f32 %v4345_v30  ;;  %v7613_v30 = vld [vmem:[#allocation42_spill] sm:$0xff]  ;;  %v7616_v31 = vld [vmem:[#allocation45_spill] sm:$0xff] }
 0x34e   :  { %4720 = vpow2.f32 %v4346_v34  ;;  %v7617_v32 = vld [vmem:[#allocation46_spill] sm:$0xff]  ;;  %v7623_v34 = vld [vmem:[#allocation52_spill] sm:$0xff] }
 0x34f   :  { %4722 = vtanh.f32 %v1471_v35  ;;  %v7624_v35 = vld [vmem:[#allocation53_spill] sm:$0xff] }
 0x358   :  { %v4717_v47 = vpop.eup %4716 }
 0x359   :  { %v1481_v36 = vadd.f32 1.0, %v4717_v47  ;;  %v7625_v47 = vld [vmem:[#allocation54_spill] sm:$0xff] }
 0x35a   :  { %v4719_v16 = vpop.eup %4718 }
 0x35b   :  { %4724 = vrcp.f32 %v1481_v36  ;;  %v1482_v7 = vadd.f32 1.0, %v4719_v16  ;;  %v4721_v5 = vpop.eup %4720 }
 0x35c   :  { %v4723_v37 = vpop.eup %4722  ;;  %v1483_v46 = vadd.f32 1.0, %v4721_v5 }
 0x35d   :  { %4726 = vrcp.f32 %v1482_v7 }
 0x35e   :  { %4728 = vrcp.f32 %v1483_v46 }
 0x368   :  { %v4725_v41 = vpop.eup %4724 }
 0x369   :  { %v1492_v49 = vmul.f32 %v4725_v41, %v4723_v37 }
 0x36a   :  { %v4727_v42 = vpop.eup %4726 }
 0x36b   :  { %v1491_v48 = vmul.f32 %v4727_v42, %v5504_v26  ;;  %v4729_v50 = vpop.eup %4728  ;;  %v7601_v26 = vld [vmem:[#allocation31_spill] sm:$0xff] }
 0x36d   :  { %v5909_v45 = vadd.f32 %v1492_v49, %v1491_v48 }
 0x36f   :  { %4730 = vtanh.f32 %v5909_v45 }
 0x37c   :  { %v4731_v51 = vpop.eup %4730 }
 0x37d   :  { %v1495_v52 = vmul.f32 %v4731_v51, %v4729_v50  ;;  %v7626_v50 = vld [vmem:[#allocation27_spill] sm:$0xff] }
 0x37f   :  { %v5912_v55 = vpack.c.bf16 %v1495_v52, %v1495_v52 }
 0x381   :  { %1530 = vmatmul.mubr.bf16.vlgmr.msra.gmra.mxu0 %v5912_v55  ;;  %1571 = vmatmul.mubr.bf16.vlgmr.msra.gmra.mxu1 %v5912_v55 }
 0x382   :  { %1609 = vmatpush1.bf16.msra.mxu0 %v5617_v6  ;;  %1650 = vmatpush1.bf16.msra.mxu1 %v5622_v8  ;;  %v7603_v6 = vld [vmem:[#allocation32_spill] sm:$0xff]  ;;  %v7604_v8 = vld [vmem:[#allocation33_spill] sm:$0xff] }
 0x383   :  { %1610 = vmatprep.subr.bf16.mxu0 %v5627_v9  ;;  %1651 = vmatprep.subr.bf16.mxu1 %v5631_v11  ;;  %v7605_v9 = vld [vmem:[#allocation35_spill] sm:$0xff]  ;;  %v7606_v11 = vld [vmem:[#allocation34_spill] sm:$0xff] }
 0x384   :  { %1640 = vmatprep.mubr.bf16.mxu0 %v7586_v24  ;;  %1681 = vmatprep.mubr.bf16.mxu1 %v7586_v24 }
 0x386   :  { %1611 = vmatpush1.bf16.msra.mxu0 %v5629_v10  ;;  %1652 = vmatpush1.bf16.msra.mxu1 %v5634_v12  ;;  %v7609_v10 = vld [vmem:[#allocation39_spill] sm:$0xff]  ;;  %v7610_v12 = vld [vmem:[#allocation38_spill] sm:$0xff] }
 0x387   :  { %1612 = vmatprep.subr.bf16.mxu0 %v5639_v13  ;;  %1653 = vmatprep.subr.bf16.mxu1 %v7601_v26  ;;  %v7611_v13 = vld [vmem:[#allocation40_spill] sm:$0xff] }
 0x38a   :  { %1613 = vmatpush1.bf16.msra.mxu0 %v7602_v56  ;;  %1654 = vmatpush1.bf16.msra.mxu1 %v7603_v6 }
 0x38b   :  { %1614 = vmatprep.subr.bf16.mxu0 %v7604_v8  ;;  %1655 = vmatprep.subr.bf16.mxu1 %v7605_v9 }
 0x38e   :  { %1615 = vmatpush1.bf16.msra.mxu0 %v7606_v11  ;;  %1656 = vmatpush1.bf16.msra.mxu1 %v7607_v61 }
 0x38f   :  { %1616 = vmatprep.subr.bf16.mxu0 %v7608_v53  ;;  %1657 = vmatprep.subr.bf16.mxu1 %v7609_v10 }
 0x392   :  { %1617 = vmatpush1.bf16.msra.mxu0 %v7610_v12  ;;  %1658 = vmatpush1.bf16.msra.mxu1 %v7611_v13 }
 0x393   :  { %1618 = vmatprep.subr.bf16.mxu0 %v7612_v54  ;;  %1659 = vmatprep.subr.bf16.mxu1 %v7613_v30 }
 0x396   :  { %1619 = vmatpush1.bf16.msra.mxu0 %v7614_v62  ;;  %1660 = vmatpush1.bf16.msra.mxu1 %v7615_v63 }
 0x397   :  { %1620 = vmatprep.subr.bf16.mxu0 %v7616_v31  ;;  %1661 = vmatprep.subr.bf16.mxu1 %v7617_v32 }
 0x39a   :  { %1621 = vmatpush1.bf16.msra.mxu0 %v7618_v57  ;;  %1662 = vmatpush1.bf16.msra.mxu1 %v7619_v58 }
 0x39b   :  { %1622 = vmatprep.subr.bf16.mxu0 %v7620_v59  ;;  %1663 = vmatprep.subr.bf16.mxu1 %v7621_v60  ;;  %v7628_v59 = vld [vmem:[#allocation56_spill] sm:$0xff]  ;;  %v7629_v60 = vld [vmem:[#allocation57_spill] sm:$0xff] }
 0x39e   :  { %1623 = vmatpush1.bf16.msra.mxu0 %v7622_v33  ;;  %1664 = vmatpush1.bf16.msra.mxu1 %v7623_v34  ;;  %v7634_v33 = vld [vmem:[#allocation62_spill] sm:$0xff]  ;;  %v7635_v34 = vld [vmem:[#allocation63_spill] sm:$0xff] }
 0x39f   :  { %1790 = vmatprep.subr.bf16.mxu0 %v7624_v35  ;;  %1831 = vmatprep.subr.bf16.mxu1 %v7625_v47  ;;  %v7638_v35 = vld [vmem:[#allocation66_spill] sm:$0xff]  ;;  %v7639_v47 = vld [vmem:[#allocation67_spill] sm:$0xff] }
 0x441   :  { %v1531_v36 = vpop.f32.mrf.mxu0  ;;  %v1572_v16 = vpop.f32.mrf.mxu1 }
 0x442   :  { %v1532_v7 = vadd.f32 %v1531_v36, %v5868_v39  ;;  %v1573_v6 = vadd.f32 %v1572_v16, %v5870_v40  ;;  %v7640_v36 = vld [vmem:[#allocation68_spill] sm:$0xff]  ;;  %v7641_v16 = vld [vmem:[#allocation69_spill] sm:$0xff] }
 0x443   :  { %v1533_v5 = vpop.f32.mrf.mxu0  ;;  %v1574_v37 = vpop.f32.mrf.mxu1 }
 0x444   :  { %v1579_v41 = vadd.f32 %v1532_v7, %v5447_v1  ;;  %v1534_v42 = vadd.f32 %v1533_v5, %v5876_v43  ;;  %v1581_v39 = vadd.f32 %v1573_v6, %v5451_v3  ;;  %v1575_v8 = vadd.f32 %v1574_v37, %v5878_v44  ;;  %v7642_v7 = vld [vmem:[#allocation70_spill] sm:$0xff]  ;;  %v5994_v5 = vld [vmem:[#allocation2 + $0xe4] ss:$16 sps:$4 sm:$0xff]   ;;  %v6028_v37 = vld [vmem:[#allocation2 + $0xa0] ss:$16 sps:$4 sm:$0xff]  }
 0x445   :  { %v1535_v46 = vpop.f32.mrf.mxu0  ;;  %v1576_v48 = vpop.f32.mrf.mxu1  ;;  %v6058_v6 = vld [vmem:[#allocation2 + $0x44] ss:$16 sps:$4 sm:$0xff]  }
 0x446   :  { %v4347_v49 = vmul.f32 -1.442695, %v1579_v41  ;;  %v1580_v51 = vadd.f32 %v1534_v42, %v7626_v50  ;;  %v4349_v9 = vmul.f32 -1.442695, %v1581_v39  ;;  %v1582_v43 = vadd.f32 %v1575_v8, %v5453_v4  ;;  %v6031_v41 = vld [vmem:[#allocation2 + $0xa8] ss:$16 sps:$4 sm:$0xff]  }
 0x447   :  { %v1536_v52 = vpop.f32.mrf.mxu0  ;;  %v1577_v26 = vpop.f32.mrf.mxu1  ;;  %v6034_v42 = vld [vmem:[#allocation2 + $0x84] ss:$16 sps:$4 sm:$0xff]   ;;  %v6037_v46 = vld [vmem:[#allocation2 + $0x8c] ss:$16 sps:$4 sm:$0xff]   ;;  %v6040_v48 = vld [vmem:[#allocation2 + $0x80] ss:$16 sps:$4 sm:$0xff]  }
 0x448   :  { %4732 = vpow2.f32 %v4347_v49  ;;  %v4348_v56 = vmul.f32 -1.442695, %v1580_v51  ;;  %v6043_v49 = vld [vmem:[#allocation2 + $0x88] ss:$16 sps:$4 sm:$0xff]   ;;  %v6046_v51 = vld [vmem:[#allocation2 + $0x64] ss:$16 sps:$4 sm:$0xff]  }
 0x449   :  { %v6049_v52 = vld [vmem:[#allocation2 + $0x6c] ss:$16 sps:$4 sm:$0xff]   ;;  %v6052_v26 = vld [vmem:[#allocation2 + $0x60] ss:$16 sps:$4 sm:$0xff]   ;;  %7643 = vst [vmem:[#allocation31_spill] sm:$0xff] %v6058_v6 }
 0x44a   :  { %4734 = vpow2.f32 %v4348_v56  ;;  %v6055_v56 = vld [vmem:[#allocation2 + $0x68] ss:$16 sps:$4 sm:$0xff]   ;;  %v6061_v39 = vld [vmem:[#allocation2 + $0x4c] ss:$16 sps:$4 sm:$0xff]   ;;  %v6064_v8 = vld [vmem:[#allocation2 + $0x40] ss:$16 sps:$4 sm:$0xff]  }
 0x44b   :  { %4736 = vpow2.f32 %v4349_v9  ;;  %7644 = vst [vmem:[#allocation30_spill] sm:$0xff] %v6061_v39  ;;  %7645 = vst [vmem:[#allocation32_spill] sm:$0xff] %v6064_v8  ;;  %v6067_v9 = vld [vmem:[#allocation2 + $0x48] ss:$16 sps:$4 sm:$0xff]  }
 0x44c   :  { %7646 = vst [vmem:[#allocation33_spill] sm:$0xff] %v6067_v9 }
 0x455   :  { %v4733_v11 = vpop.eup %4732 }
 0x456   :  { %v1592_v61 = vadd.f32 1.0, %v4733_v11  ;;  %v6070_v11 = vld [vmem:[#allocation2 + $0x24] ss:$16 sps:$4 sm:$0xff]  }
 0x457   :  { %v4735_v53 = vpop.eup %4734  ;;  %7647 = vst [vmem:[#allocation35_spill] sm:$0xff] %v6070_v11 }
 0x458   :  { %4738 = vrcp.f32 %v1592_v61  ;;  %v1593_v10 = vadd.f32 1.0, %v4735_v53  ;;  %v4737_v12 = vpop.eup %4736  ;;  %v6076_v61 = vld [vmem:[#allocation2 + $0x20] ss:$16 sps:$4 sm:$0xff]   ;;  %v6079_v53 = vld [vmem:[#allocation2 + $0x28] ss:$16 sps:$4 sm:$0xff]  }
 0x459   :  { %4740 = vtanh.f32 %v1582_v43  ;;  %v1594_v40 = vadd.f32 1.0, %v4737_v12  ;;  %v6073_v43 = vld [vmem:[#allocation2 + $0x2c] ss:$16 sps:$4 sm:$0xff]   ;;  %7649 = vst [vmem:[#allocation36_spill] sm:$0xff] %v6076_v61  ;;  %7650 = vst [vmem:[#allocation37_spill] sm:$0xff] %v6079_v53 }
 0x45a   :  { %4742 = vrcp.f32 %v1593_v10  ;;  %7648 = vst [vmem:[#allocation34_spill] sm:$0xff] %v6073_v43  ;;  %v6082_v10 = vld [vmem:[#allocation2 + $0x4] ss:$16 sps:$4 sm:$0xff]   ;;  %v6085_v12 = vld [vmem:[#allocation2 + $0xc] ss:$16 sps:$4 sm:$0xff]  }
 0x45b   :  { %4744 = vrcp.f32 %v1594_v40  ;;  %7651 = vst [vmem:[#allocation39_spill] sm:$0xff] %v6082_v10  ;;  %7652 = vst [vmem:[#allocation38_spill] sm:$0xff] %v6085_v12  ;;  %v7656_v40 = vld [vmem:[#allocation29_spill] sm:$0xff] }
 0x465   :  { %v4739_v13 = vpop.eup %4738 }
 0x466   :  { %v4741_v54 = vpop.eup %4740 }
 0x467   :  { %v4743_v30 = vpop.eup %4742  ;;  %v1603_v63 = vmul.f32 %v4741_v54, %v4739_v13  ;;  %v6088_v13 = vld [vmem:[#allocation2] ss:$16 sps:$4 sm:$0xff]   ;;  %v6091_v54 = vld [vmem:[#allocation2 + $0x8] ss:$16 sps:$4 sm:$0xff]  }
 0x468   :  { %v1602_v62 = vmul.f32 %v4743_v30, %v5721_v19  ;;  %v4745_v31 = vpop.eup %4744  ;;  %v7627_v19 = vld [vmem:[#allocation55_spill] sm:$0xff]  ;;  %7653 = vst [vmem:[#allocation40_spill] sm:$0xff] %v6088_v13  ;;  %7654 = vst [vmem:[#allocation41_spill] sm:$0xff] %v6091_v54  ;;  %v7655_v30 = vld [vmem:[#allocation28_spill] sm:$0xff] }
 0x46a   :  { %v5959_v44 = vadd.f32 %v1603_v63, %v1602_v62  ;;  %v1700_v62 = vstv %s1699_s12  ;;  %v1750_v63 = vstv %s1749_s5  ;;  %s4443_s12 = sshll.u32 %s2903_s10, 5  ;;  %s4444_s5 = sshll.u32 %s2953_s11, 5 }
 0x46b   :  { %vm1701_vm6 = vcmp.eq.s32.totalorder %v5466_v38, %v1700_v62  ;;  %vm1751_vm7 = vcmp.eq.s32.totalorder %v5466_v38, %v1750_v63  ;;  %s6954_s15 = scalar_lea.vmem [#allocation8], %s4444_s5 }
 0x46c   :  { %4746 = vtanh.f32 %v5959_v44 }
 0x479   :  { %v4747_v32 = vpop.eup %4746 }
 0x47a   :  { %v1606_v57 = vmul.f32 %v4747_v32, %v4745_v31  ;;  %v1695_v31 = vld [vmem:[%s6096_s14] sm:$0xff] }
 0x47b   :  { %v1745_v32 = vld [vmem:[%s6100_s0] sm:$0xff] }
 0x47c   :  { %v1607_v58 = vpack.c.bf16 %v1606_v57, %v1606_v57  ;;  %v1696_v57 = vld [vmem:[%s6096_s14 + $0x8] sm:$0xff] }
 0x47e   :  { %1641 = vmatmul.mubr.bf16.vlgmr.msra.gmra.mxu0 %v1607_v58  ;;  %1682 = vmatmul.mubr.bf16.vlgmr.msra.gmra.mxu1 %v1607_v58  ;;  %v1746_v58 = vld [vmem:[%s6100_s0 + $0x8] sm:$0xff] }
 0x47f   :  { %1791 = vmatpush1.bf16.msra.mxu0 %v5724_v28  ;;  %1832 = vmatpush1.bf16.msra.mxu1 %v5726_v21  ;;  %v7630_v28 = vld [vmem:[#allocation58_spill] sm:$0xff]  ;;  %v7631_v21 = vld [vmem:[#allocation59_spill] sm:$0xff] }
 0x480   :  { %1792 = vmatprep.subr.bf16.mxu0 %v5728_v20  ;;  %1833 = vmatprep.subr.bf16.mxu1 %v5730_v22  ;;  %v7632_v20 = vld [vmem:[#allocation60_spill] sm:$0xff]  ;;  %v7633_v22 = vld [vmem:[#allocation61_spill] sm:$0xff] }
 0x481   :  { %1822 = vmatprep.mubr.bf16.mxu0 %v7586_v24  ;;  %1863 = vmatprep.mubr.bf16.mxu1 %v7586_v24 }
 0x483   :  { %1793 = vmatpush1.bf16.msra.mxu0 %v5733_v2  ;;  %1834 = vmatpush1.bf16.msra.mxu1 %v5736_v18  ;;  %v7636_v2 = vld [vmem:[#allocation64_spill] sm:$0xff]  ;;  %v7637_v18 = vld [vmem:[#allocation65_spill] sm:$0xff] }
 0x484   :  { %1794 = vmatprep.subr.bf16.mxu0 %v7627_v19  ;;  %1835 = vmatprep.subr.bf16.mxu1 %v7628_v59  ;;  %v1704_v19 = vsel %vm1701_vm6, %v1695_v31, 0.0  ;;  %v1754_v59 = vsel %vm1751_vm7, %v1745_v32, 0.0  ;;  %v1697_v31 = vld [vmem:[%s6096_s14 + $0x10] sm:$0xff] }
 0x485   :  { %v1747_v32 = vld [vmem:[%s6100_s0 + $0x10] sm:$0xff] }
 0x487   :  { %1795 = vmatpush1.bf16.msra.mxu0 %v7629_v60  ;;  %1836 = vmatpush1.bf16.msra.mxu1 %v7630_v28 }
 0x488   :  { %1796 = vmatprep.subr.bf16.mxu0 %v7631_v21  ;;  %1837 = vmatprep.subr.bf16.mxu1 %v7632_v20  ;;  %v1705_v21 = vsel %vm1701_vm6, %v1696_v57, 0.0  ;;  %v1755_v20 = vsel %vm1751_vm7, %v1746_v58, 0.0 }
 0x48b   :  { %1797 = vmatpush1.bf16.msra.mxu0 %v7633_v22  ;;  %1838 = vmatpush1.bf16.msra.mxu1 %v7634_v33 }
 0x48c   :  { %1798 = vmatprep.subr.bf16.mxu0 %v7635_v34  ;;  %1839 = vmatprep.subr.bf16.mxu1 %v7636_v2  ;;  %v1708_v34 = vrot.slane %v1704_v19, 4  ;;  %v1758_v2 = vrot.slane %v1754_v59, 4 }
 0x48f   :  { %1799 = vmatpush1.bf16.msra.mxu0 %v7637_v18  ;;  %1840 = vmatpush1.bf16.msra.mxu1 %v7638_v35 }
 0x490   :  { %1800 = vmatprep.subr.bf16.mxu0 %v7639_v47  ;;  %1841 = vmatprep.subr.bf16.mxu1 %v7640_v36  ;;  %v1714_v47 = vrot.slane %v1705_v21, 4  ;;  %v1764_v36 = vrot.slane %v1755_v20, 4 }
 0x492   :  { %v1715_v57 = vadd.f32 %v1714_v47, %v1705_v21  ;;  %v1765_v58 = vadd.f32 %v1764_v36, %v1755_v20 }
 0x493   :  { %1801 = vmatpush1.bf16.msra.mxu0 %v7641_v16  ;;  %1842 = vmatpush1.bf16.msra.mxu1 %v5786_v15  ;;  %v5997_v15 = vld [vmem:[#allocation2 + $0xec] ss:$16 sps:$4 sm:$0xff]  }
 0x494   :  { %1802 = vmatprep.subr.bf16.mxu0 %v5789_v14  ;;  %1843 = vmatprep.subr.bf16.mxu1 %v5792_v29  ;;  %v6019_v14 = vld [vmem:[#allocation2 + $0xc8] ss:$16 sps:$4 sm:$0xff]   ;;  %v6022_v29 = vld [vmem:[#allocation2 + $0xa4] ss:$16 sps:$4 sm:$0xff]  }
 0x497   :  { %1803 = vmatpush1.bf16.msra.mxu0 %v5795_v0  ;;  %1844 = vmatpush1.bf16.msra.mxu1 %v5798_v23  ;;  %v6002_v0 = vld [vmem:[#allocation2 + $0xe0] ss:$16 sps:$4 sm:$0xff]   ;;  %v6005_v23 = vld [vmem:[#allocation2 + $0xe8] ss:$16 sps:$4 sm:$0xff]  }
 0x498   :  { %1804 = vmatprep.subr.bf16.mxu0 %v5801_v25  ;;  %1845 = vmatprep.subr.bf16.mxu1 %v5804_v27  ;;  %v6008_v25 = vld [vmem:[#allocation2 + $0xc4] ss:$16 sps:$4 sm:$0xff]   ;;  %v6011_v27 = vld [vmem:[#allocation2 + $0xcc] ss:$16 sps:$4 sm:$0xff]  }
 0x49b   :  { %1805 = vmatpush1.bf16.msra.mxu0 %v5807_v17  ;;  %1846 = vmatpush1.bf16.msra.mxu1 %v7642_v7  ;;  %v6016_v17 = vld [vmem:[#allocation2 + $0xc0] ss:$16 sps:$4 sm:$0xff]  }
 0x49c   :  { %1901 = vmatprep.subr.bf16.mxu0 %v5994_v5  ;;  %1942 = vmatprep.subr.bf16.mxu1 %v5997_v15 }
 0x49e   :  { %1823 = vmatmul.mubr.bf16.vlgmr.msra.gmra.mxu0 %v5912_v55  ;;  %1864 = vmatmul.mubr.bf16.vlgmr.msra.gmra.mxu1 %v5912_v55  ;;  %v6025_v55 = vld [vmem:[#allocation2 + $0xac] ss:$16 sps:$4 sm:$0xff]  }
 0x49f   :  { %1902 = vmatpush1.bf16.msra.mxu0 %v6002_v0  ;;  %1943 = vmatpush1.bf16.msra.mxu1 %v6005_v23 }
 0x4a0   :  { %1903 = vmatprep.subr.bf16.mxu0 %v6008_v25  ;;  %1944 = vmatprep.subr.bf16.mxu1 %v6011_v27 }
 0x4a1   :  { %1933 = vmatprep.mubr.bf16.mxu0 %v7586_v24  ;;  %1974 = vmatprep.mubr.bf16.mxu1 %v7586_v24 }
 0x4a3   :  { %1904 = vmatpush1.bf16.msra.mxu0 %v6016_v17  ;;  %1945 = vmatpush1.bf16.msra.mxu1 %v6019_v14 }
 0x4a4   :  { %1905 = vmatprep.subr.bf16.mxu0 %v6022_v29  ;;  %1946 = vmatprep.subr.bf16.mxu1 %v6025_v55 }
 0x4a7   :  { %1906 = vmatpush1.bf16.msra.mxu0 %v6028_v37  ;;  %1947 = vmatpush1.bf16.msra.mxu1 %v6031_v41 }
 0x4a8   :  { %1907 = vmatprep.subr.bf16.mxu0 %v6034_v42  ;;  %1948 = vmatprep.subr.bf16.mxu1 %v6037_v46 }
 0x4ab   :  { %1908 = vmatpush1.bf16.msra.mxu0 %v6040_v48  ;;  %1949 = vmatpush1.bf16.msra.mxu1 %v6043_v49 }
 0x4ac   :  { %1909 = vmatprep.subr.bf16.mxu0 %v6046_v51  ;;  %1950 = vmatprep.subr.bf16.mxu1 %v6049_v52 }
 0x4af   :  { %1910 = vmatpush1.bf16.msra.mxu0 %v6052_v26  ;;  %1951 = vmatpush1.bf16.msra.mxu1 %v6055_v56 }
 0x4b0   :  { %1911 = vmatprep.subr.bf16.mxu0 %v6058_v6  ;;  %1952 = vmatprep.subr.bf16.mxu1 %v6061_v39 }
 0x4b3   :  { %1912 = vmatpush1.bf16.msra.mxu0 %v6064_v8  ;;  %1953 = vmatpush1.bf16.msra.mxu1 %v6067_v9 }
 0x4b4   :  { %1913 = vmatprep.subr.bf16.mxu0 %v6070_v11  ;;  %1954 = vmatprep.subr.bf16.mxu1 %v6073_v43 }
 0x4b7   :  { %1914 = vmatpush1.bf16.msra.mxu0 %v6076_v61  ;;  %1955 = vmatpush1.bf16.msra.mxu1 %v6079_v53  ;;  %v1748_v61 = vld [vmem:[%s6100_s0 + $0x18] sm:$0xff]  ;;  %s6950_s0 = scalar_lea.vmem [#allocation8], %s4443_s12 }
 0x4b8   :  { %1915 = vmatprep.subr.bf16.mxu0 %v6082_v10  ;;  %1956 = vmatprep.subr.bf16.mxu1 %v6085_v12  ;;  %v1706_v12 = vsel %vm1701_vm6, %v1697_v31, 0.0  ;;  %v1766_v10 = vrot.slane %v1765_v58, 2  ;;  %v1757_v20 = vsel %vm1751_vm7, %v1748_v61, 0.0 }
 0x4b9   :  { %v1776_v11 = vrot.slane %v1757_v20, 4 }
 0x4bb   :  { %1916 = vmatpush1.bf16.msra.mxu0 %v6088_v13  ;;  %1957 = vmatpush1.bf16.msra.mxu1 %v6091_v54 }
 0x4bc   :  { %2012 = vmatprep.subr.bf16.mxu0 %v7655_v30  ;;  %2053 = vmatprep.subr.bf16.mxu1 %v7656_v40  ;;  %v1709_v30 = vadd.f32 %v1708_v34, %v1704_v19  ;;  %v1759_v40 = vadd.f32 %v1758_v2, %v1754_v59  ;;  %v1767_v2 = vadd.f32 %v1766_v10, %v1765_v58 }
 0x4bd   :  { %v1777_v10 = vadd.f32 %v1776_v11, %v1757_v20 }
 0x4be   :  { %v1710_v54 = vrot.slane %v1709_v30, 2  ;;  %v1760_v13 = vrot.slane %v1759_v40, 2  ;;  %v1768_v8 = vrot.slane %v1767_v2, 1 }
 0x4bf   :  { %v1778_v63 = vrot.slane %v1777_v10, 2 }
 0x4c0   :  { %v1711_v19 = vadd.f32 %v1710_v54, %v1709_v30  ;;  %v1761_v59 = vadd.f32 %v1760_v13, %v1759_v40  ;;  %v1769_v62 = vadd.f32 %v1768_v8, %v1767_v2 }
 0x4c2   :  { %v1712_v31 = vrot.slane %v1711_v19, 1 }
 0x4c4   :  { %v1713_v54 = vadd.f32 %v1712_v31, %v1711_v19 }
 0x4c6   :  { %v1732_v61 = vsel %vm148_vm2, %v1713_v54, 0.0 }
 0x53e   :  { %v6110_v60 = vpop.f32.mrf.mxu0  ;;  %v6112_v28 = vpop.f32.mrf.mxu1 }
 0x540   :  { %v6118_v22 = vpop.f32.mrf.mxu0  ;;  %v6120_v33 = vpop.f32.mrf.mxu1 }
 0x542   :  { %v1646_v18 = vpop.f32.mrf.mxu0  ;;  %v1687_v35 = vpop.f32.mrf.mxu1 }
 0x543   :  { %v1756_v18 = vsel %vm1751_vm7, %v1747_v32, 0.0  ;;  %v1716_v35 = vrot.slane %v1715_v57, 2  ;;  %v1762_v32 = vrot.slane %v1761_v59, 1 }
 0x544   :  { %v1647_v16 = vpop.f32.mrf.mxu0  ;;  %v1688_v7 = vpop.f32.mrf.mxu1  ;;  %v1770_v53 = vrot.slane %v1756_v18, 4 }
 0x545   :  { %v1720_v16 = vrot.slane %v1706_v12, 4  ;;  %v1698_v7 = vld [vmem:[%s6096_s14 + $0x18] sm:$0xff]  ;;  %v1717_v34 = vadd.f32 %v1716_v35, %v1715_v57  ;;  %v1763_v13 = vadd.f32 %v1762_v32, %v1761_v59  ;;  %v1783_v35 = vsel %vm201_vm3, %v1769_v62, 0.0  ;;  %s2961_s14 = sand.u32 7, %s4389_s9 }
 0x546   :  { %v1707_v21 = vsel %vm1701_vm6, %v1698_v7, 0.0  ;;  %v1771_v36 = vadd.f32 %v1770_v53, %v1756_v18 }
 0x547   :  { %v1721_v47 = vadd.f32 %v1720_v16, %v1706_v12  ;;  %v1726_v43 = vrot.slane %v1707_v21, 4  ;;  %v1718_v9 = vrot.slane %v1717_v34, 1  ;;  %v1782_v53 = vsel %vm201_vm3, %v1763_v13, 0.0 }
 0x548   :  { %v1772_v6 = vrot.slane %v1771_v36, 2 }
 0x549   :  { %v1722_v39 = vrot.slane %v1721_v47, 2  ;;  %v1727_v30 = vadd.f32 %v1726_v43, %v1707_v21  ;;  %v1719_v40 = vadd.f32 %v1718_v9, %v1717_v34  ;;  %v1786_v43 = vadd.f32 %v1782_v53, %v1732_v61 }
 0x54a   :  { %v1773_v58 = vadd.f32 %v1772_v6, %v1771_v36  ;;  %v1779_v6 = vadd.f32 %v1778_v63, %v1777_v10 }
 0x54b   :  { %v1723_v57 = vadd.f32 %v1722_v39, %v1721_v47  ;;  %v1728_v12 = vrot.slane %v1727_v30, 2  ;;  %v1733_v18 = vsel %vm148_vm2, %v1719_v40, 0.0 }
 0x54c   :  { %v1774_v9 = vrot.slane %v1773_v58, 1  ;;  %v1787_v8 = vadd.f32 %v1783_v35, %v1733_v18  ;;  %v1780_v31 = vrot.slane %v1779_v6, 1 }
 0x54d   :  { %v1724_v11 = vrot.slane %v1723_v57, 1  ;;  %v1729_v39 = vadd.f32 %v1728_v12, %v1727_v30 }
 0x54e   :  { %v1775_v34 = vadd.f32 %v1774_v9, %v1773_v58  ;;  %v1781_v58 = vadd.f32 %v1780_v31, %v1779_v6 }
 0x54f   :  { %v1725_v59 = vadd.f32 %v1724_v11, %v1723_v57  ;;  %v1730_v36 = vrot.slane %v1729_v39, 1 }
 0x550   :  { %v1784_v30 = vsel %vm201_vm3, %v1775_v34, 0.0  ;;  %v1785_v12 = vsel %vm201_vm3, %v1781_v58, 0.0  ;;  %v6187_v58 = vld [vmem:[#allocation3 + $0xa8] ss:$16 sps:$4 sm:$0xff]  }
 0x551   :  { %v1734_v13 = vsel %vm148_vm2, %v1725_v59, 0.0  ;;  %v1731_v57 = vadd.f32 %v1730_v36, %v1729_v39 }
 0x552   :  { %v1788_v61 = vadd.f32 %v1784_v30, %v1734_v13  ;;  %v6167_v13 = vld [vmem:[#allocation3 + $0xcc] ss:$16 sps:$4 sm:$0xff]   ;;  %v6172_v30 = vld [vmem:[#allocation3 + $0xc0] ss:$16 sps:$4 sm:$0xff]  }
 0x553   :  { %v1735_v53 = vsel %vm148_vm2, %v1731_v57, 0.0  ;;  %v6184_v57 = vld [vmem:[#allocation3 + $0xa0] ss:$16 sps:$4 sm:$0xff]  }
 0x554   :  { %v1789_v18 = vadd.f32 %v1785_v12, %v1735_v53  ;;  %v6193_v53 = vld [vmem:[#allocation3 + $0x8c] ss:$16 sps:$4 sm:$0xff]   ;;  %v6196_v12 = vld [vmem:[#allocation3 + $0x80] ss:$16 sps:$4 sm:$0xff]  }
 0x55e   :  { %v1824_v16 = vpop.f32.mrf.mxu0  ;;  %v1865_v7 = vpop.f32.mrf.mxu1 }
 0x55f   :  { %v1872_v19 = vadd.f32 %v1824_v16, %v1786_v43  ;;  %v1874_v63 = vadd.f32 %v1865_v7, %v1788_v61  ;;  %v6190_v61 = vld [vmem:[#allocation3 + $0x84] ss:$16 sps:$4 sm:$0xff]  }
 0x560   :  { %v1826_v2 = vpop.f32.mrf.mxu0  ;;  %v1867_v21 = vpop.f32.mrf.mxu1 }
 0x561   :  { %v4356_v20 = vmul.f32 -1.442695, %v1872_v19  ;;  %v1873_v47 = vadd.f32 %v1826_v2, %v1787_v8  ;;  %v4358_v35 = vmul.f32 -1.442695, %v1874_v63  ;;  %v1875_v11 = vadd.f32 %v1867_v21, %v1789_v18  ;;  %v6199_v63 = vld [vmem:[#allocation3 + $0x88] ss:$16 sps:$4 sm:$0xff]  }
 0x562   :  { %v1828_v32 = vpop.f32.mrf.mxu0  ;;  %v1869_v54 = vpop.f32.mrf.mxu1  ;;  %v6202_v18 = vld [vmem:[#allocation3 + $0x64] ss:$16 sps:$4 sm:$0xff]  }
 0x563   :  { %4748 = vpow2.f32 %v4356_v20  ;;  %v4357_v10 = vmul.f32 -1.442695, %v1873_v47  ;;  %v6158_v32 = vld [vmem:[#allocation3 + $0xe0] ss:$16 sps:$4 sm:$0xff]   ;;  %v6164_v54 = vld [vmem:[#allocation3 + $0xc4] ss:$16 sps:$4 sm:$0xff]  }
 0x564   :  { %v1829_v40 = vpop.f32.mrf.mxu0  ;;  %v1870_v62 = vpop.f32.mrf.mxu1 }
 0x565   :  { %4750 = vpow2.f32 %v4357_v10  ;;  %v6175_v10 = vld [vmem:[#allocation3 + $0xc8] ss:$16 sps:$4 sm:$0xff]   ;;  %v6178_v40 = vld [vmem:[#allocation3 + $0xa4] ss:$16 sps:$4 sm:$0xff]   ;;  %v6181_v62 = vld [vmem:[#allocation3 + $0xac] ss:$16 sps:$4 sm:$0xff]  }
 0x566   :  { %4752 = vpow2.f32 %v4358_v35  ;;  %v6205_v35 = vld [vmem:[#allocation3 + $0x6c] ss:$16 sps:$4 sm:$0xff]  }
 0x567   :  { %7657 = vst [vmem:[#allocation42_spill] sm:$0xff] %v6205_v35 }
 0x570   :  { %v4749_v43 = vpop.eup %4748 }
 0x571   :  { %v1885_v9 = vadd.f32 1.0, %v4749_v43  ;;  %v6208_v43 = vld [vmem:[#allocation3 + $0x60] ss:$16 sps:$4 sm:$0xff]  }
 0x572   :  { %v4751_v8 = vpop.eup %4750  ;;  %7658 = vst [vmem:[#allocation43_spill] sm:$0xff] %v6208_v43 }
 0x573   :  { %4754 = vrcp.f32 %v1885_v9  ;;  %v1886_v16 = vadd.f32 1.0, %v4751_v8  ;;  %v4753_v39 = vpop.eup %4752  ;;  %v6214_v9 = vld [vmem:[#allocation3 + $0x44] ss:$16 sps:$4 sm:$0xff]   ;;  %v6217_v8 = vld [vmem:[#allocation3 + $0x4c] ss:$16 sps:$4 sm:$0xff]  }
 0x574   :  { %4756 = vtanh.f32 %v1875_v11  ;;  %v1887_v34 = vadd.f32 1.0, %v4753_v39  ;;  %v6211_v11 = vld [vmem:[#allocation3 + $0x68] ss:$16 sps:$4 sm:$0xff]   ;;  %7660 = vst [vmem:[#allocation45_spill] sm:$0xff] %v6214_v9  ;;  %7661 = vst [vmem:[#allocation46_spill] sm:$0xff] %v6217_v8 }
 0x575   :  { %4758 = vrcp.f32 %v1886_v16  ;;  %7659 = vst [vmem:[#allocation44_spill] sm:$0xff] %v6211_v11  ;;  %v6220_v16 = vld [vmem:[#allocation3 + $0x40] ss:$16 sps:$4 sm:$0xff]   ;;  %v6223_v39 = vld [vmem:[#allocation3 + $0x48] ss:$16 sps:$4 sm:$0xff]  }
 0x576   :  { %4760 = vrcp.f32 %v1887_v34  ;;  %7662 = vst [vmem:[#allocation47_spill] sm:$0xff] %v6220_v16  ;;  %7663 = vst [vmem:[#allocation48_spill] sm:$0xff] %v6223_v39  ;;  %v6235_v34 = vld [vmem:[#allocation3 + $0x28] ss:$16 sps:$4 sm:$0xff]  }
 0x577   :  { %7667 = vst [vmem:[#allocation52_spill] sm:$0xff] %v6235_v34 }
 0x580   :  { %v4755_v6 = vpop.eup %4754 }
 0x581   :  { %v4757_v19 = vpop.eup %4756 }
 0x582   :  { %v4759_v59 = vpop.eup %4758  ;;  %v1896_v20 = vmul.f32 %v4757_v19, %v4755_v6  ;;  %v6226_v6 = vld [vmem:[#allocation3 + $0x24] ss:$16 sps:$4 sm:$0xff]   ;;  %v6229_v19 = vld [vmem:[#allocation3 + $0x2c] ss:$16 sps:$4 sm:$0xff]  }
 0x583   :  { %v1895_v2 = vmul.f32 %v4759_v59, %v5909_v45  ;;  %v4761_v21 = vpop.eup %4760  ;;  %v6161_v45 = vld [vmem:[#allocation3 + $0xe8] ss:$16 sps:$4 sm:$0xff]   ;;  %7664 = vst [vmem:[#allocation49_spill] sm:$0xff] %v6226_v6  ;;  %7665 = vst [vmem:[#allocation50_spill] sm:$0xff] %v6229_v19  ;;  %v6232_v59 = vld [vmem:[#allocation3 + $0x20] ss:$16 sps:$4 sm:$0xff]  }
 0x584   :  { %7666 = vst [vmem:[#allocation51_spill] sm:$0xff] %v6232_v59 }
 0x585   :  { %v6151_v7 = vadd.f32 %v1896_v20, %v1895_v2  ;;  %v6238_v2 = vld [vmem:[#allocation3 + $0x4] ss:$16 sps:$4 sm:$0xff]   ;;  %v6241_v20 = vld [vmem:[#allocation3 + $0xc] ss:$16 sps:$4 sm:$0xff]  }
 0x586   :  { %7668 = vst [vmem:[#allocation53_spill] sm:$0xff] %v6238_v2  ;;  %7669 = vst [vmem:[#allocation54_spill] sm:$0xff] %v6241_v20 }
 0x587   :  { %4762 = vtanh.f32 %v6151_v7 }
 0x594   :  { %v4763_v47 = vpop.eup %4762 }
 0x595   :  { %v1899_v36 = vmul.f32 %v4763_v47, %v4761_v21  ;;  %v6244_v21 = vld [vmem:[#allocation3] ss:$16 sps:$4 sm:$0xff]   ;;  %v6247_v47 = vld [vmem:[#allocation3 + $0x8] ss:$16 sps:$4 sm:$0xff]  }
 0x596   :  { %7670 = vst [vmem:[#allocation27_spill] sm:$0xff] %v6244_v21  ;;  %7671 = vst [vmem:[#allocation55_spill] sm:$0xff] %v6247_v47 }
 0x597   :  { %v6154_v31 = vpack.c.bf16 %v1899_v36, %v1899_v36  ;;  %v6250_v36 = vld [vmem:[#allocation10 + $0xe4] ss:$16 sps:$4 sm:$0xff]  }
 0x598   :  { %7672 = vst [vmem:[#allocation56_spill] sm:$0xff] %v6250_v36 }
 0x599   :  { %1934 = vmatmul.mubr.bf16.vlgmr.msra.gmra.mxu0 %v6154_v31  ;;  %1975 = vmatmul.mubr.bf16.vlgmr.msra.gmra.mxu1 %v6154_v31 }
 0x59a   :  { %2013 = vmatpush1.bf16.msra.mxu0 %v6158_v32  ;;  %2054 = vmatpush1.bf16.msra.mxu1 %v6161_v45 }
 0x59b   :  { %2014 = vmatprep.subr.bf16.mxu0 %v6164_v54  ;;  %2055 = vmatprep.subr.bf16.mxu1 %v6167_v13 }
 0x59c   :  { %2044 = vmatprep.mubr.bf16.mxu0 %v7586_v24  ;;  %2085 = vmatprep.mubr.bf16.mxu1 %v7586_v24 }
 0x59e   :  { %2015 = vmatpush1.bf16.msra.mxu0 %v6172_v30  ;;  %2056 = vmatpush1.bf16.msra.mxu1 %v6175_v10 }
 0x59f   :  { %2016 = vmatprep.subr.bf16.mxu0 %v6178_v40  ;;  %2057 = vmatprep.subr.bf16.mxu1 %v6181_v62 }
 0x5a2   :  { %2017 = vmatpush1.bf16.msra.mxu0 %v6184_v57  ;;  %2058 = vmatpush1.bf16.msra.mxu1 %v6187_v58 }
 0x5a3   :  { %2018 = vmatprep.subr.bf16.mxu0 %v6190_v61  ;;  %2059 = vmatprep.subr.bf16.mxu1 %v6193_v53 }
 0x5a6   :  { %2019 = vmatpush1.bf16.msra.mxu0 %v6196_v12  ;;  %2060 = vmatpush1.bf16.msra.mxu1 %v6199_v63 }
 0x5a7   :  { %2020 = vmatprep.subr.bf16.mxu0 %v6202_v18  ;;  %2061 = vmatprep.subr.bf16.mxu1 %v6205_v35 }
 0x5aa   :  { %2021 = vmatpush1.bf16.msra.mxu0 %v6208_v43  ;;  %2062 = vmatpush1.bf16.msra.mxu1 %v6211_v11 }
 0x5ab   :  { %2022 = vmatprep.subr.bf16.mxu0 %v6214_v9  ;;  %2063 = vmatprep.subr.bf16.mxu1 %v6217_v8 }
 0x5ae   :  { %2023 = vmatpush1.bf16.msra.mxu0 %v6220_v16  ;;  %2064 = vmatpush1.bf16.msra.mxu1 %v6223_v39 }
 0x5af   :  { %2024 = vmatprep.subr.bf16.mxu0 %v6226_v6  ;;  %2065 = vmatprep.subr.bf16.mxu1 %v6229_v19 }
 0x5b2   :  { %2025 = vmatpush1.bf16.msra.mxu0 %v6232_v59  ;;  %2066 = vmatpush1.bf16.msra.mxu1 %v6235_v34  ;;  %v6253_v34 = vld [vmem:[#allocation10 + $0xec] ss:$16 sps:$4 sm:$0xff]  }
 0x5b3   :  { %2026 = vmatprep.subr.bf16.mxu0 %v6238_v2  ;;  %2067 = vmatprep.subr.bf16.mxu1 %v6241_v20  ;;  %7673 = vst [vmem:[#allocation57_spill] sm:$0xff] %v6253_v34 }
 0x5b6   :  { %2027 = vmatpush1.bf16.msra.mxu0 %v6244_v21  ;;  %2068 = vmatpush1.bf16.msra.mxu1 %v6247_v47 }
 0x5b7   :  { %2194 = vmatprep.subr.bf16.mxu0 %v6250_v36  ;;  %2235 = vmatprep.subr.bf16.mxu1 %v6253_v34 }
 0x659   :  { %v1935_v2 = vpop.f32.mrf.mxu0  ;;  %v1976_v59 = vpop.f32.mrf.mxu1 }
 0x65a   :  { %v1936_v20 = vadd.f32 %v1935_v2, %v6110_v60  ;;  %v1977_v34 = vadd.f32 %v1976_v59, %v6112_v28 }
 0x65b   :  { %v1937_v19 = vpop.f32.mrf.mxu0  ;;  %v1978_v6 = vpop.f32.mrf.mxu1 }
 0x65c   :  { %v1983_v21 = vadd.f32 %v1936_v20, %v5447_v1  ;;  %v1938_v39 = vadd.f32 %v1937_v19, %v6118_v22  ;;  %v1985_v60 = vadd.f32 %v1977_v34, %v5451_v3  ;;  %v1979_v2 = vadd.f32 %v1978_v6, %v6120_v33 }
 0x65d   :  { %v1939_v16 = vpop.f32.mrf.mxu0  ;;  %v1980_v47 = vpop.f32.mrf.mxu1 }
 0x65e   :  { %v4359_v8 = vmul.f32 -1.442695, %v1983_v21  ;;  %v1984_v9 = vadd.f32 %v1938_v39, %v7626_v50  ;;  %v4361_v35 = vmul.f32 -1.442695, %v1985_v60  ;;  %v1986_v22 = vadd.f32 %v1979_v2, %v5453_v4  ;;  %v6271_v60 = vld [vmem:[#allocation10 + $0xe8] ss:$16 sps:$4 sm:$0xff]  }
 0x65f   :  { %v1940_v36 = vpop.f32.mrf.mxu0  ;;  %v1981_v11 = vpop.f32.mrf.mxu1  ;;  %v6277_v2 = vld [vmem:[#allocation10 + $0xcc] ss:$16 sps:$4 sm:$0xff]  }
 0x660   :  { %4764 = vpow2.f32 %v4359_v8  ;;  %v4360_v43 = vmul.f32 -1.442695, %v1984_v9  ;;  %v6268_v36 = vld [vmem:[#allocation10 + $0xe0] ss:$16 sps:$4 sm:$0xff]  }
 0x662   :  { %4766 = vpow2.f32 %v4360_v43 }
 0x663   :  { %4768 = vpow2.f32 %v4361_v35 }
 0x66d   :  { %v4765_v20 = vpop.eup %4764 }
 0x66e   :  { %v1996_v16 = vadd.f32 1.0, %v4765_v20  ;;  %v6282_v20 = vld [vmem:[#allocation10 + $0xc0] ss:$16 sps:$4 sm:$0xff]  }
 0x66f   :  { %v4767_v19 = vpop.eup %4766 }
 0x670   :  { %4770 = vrcp.f32 %v1996_v16  ;;  %v1997_v39 = vadd.f32 1.0, %v4767_v19  ;;  %v4769_v11 = vpop.eup %4768  ;;  %v6288_v16 = vld [vmem:[#allocation10 + $0xa4] ss:$16 sps:$4 sm:$0xff]   ;;  %v6291_v19 = vld [vmem:[#allocation10 + $0xac] ss:$16 sps:$4 sm:$0xff]  }
 0x671   :  { %4772 = vtanh.f32 %v1986_v22  ;;  %v1998_v28 = vadd.f32 1.0, %v4769_v11  ;;  %v6285_v22 = vld [vmem:[#allocation10 + $0xc8] ss:$16 sps:$4 sm:$0xff]   ;;  %7675 = vst [vmem:[#allocation59_spill] sm:$0xff] %v6288_v16  ;;  %7676 = vst [vmem:[#allocation60_spill] sm:$0xff] %v6291_v19 }
 0x672   :  { %4774 = vrcp.f32 %v1997_v39  ;;  %7674 = vst [vmem:[#allocation58_spill] sm:$0xff] %v6285_v22  ;;  %v6294_v39 = vld [vmem:[#allocation10 + $0xa0] ss:$16 sps:$4 sm:$0xff]   ;;  %v6297_v11 = vld [vmem:[#allocation10 + $0xa8] ss:$16 sps:$4 sm:$0xff]  }
 0x673   :  { %4776 = vrcp.f32 %v1998_v28  ;;  %7677 = vst [vmem:[#allocation61_spill] sm:$0xff] %v6294_v39  ;;  %7678 = vst [vmem:[#allocation62_spill] sm:$0xff] %v6297_v11  ;;  %v6309_v28 = vld [vmem:[#allocation10 + $0x88] ss:$16 sps:$4 sm:$0xff]  }
 0x674   :  { %7682 = vst [vmem:[#allocation66_spill] sm:$0xff] %v6309_v28 }
 0x67d   :  { %v4771_v9 = vpop.eup %4770 }
 0x67e   :  { %v4773_v43 = vpop.eup %4772 }
 0x67f   :  { %v4775_v8 = vpop.eup %4774  ;;  %v2007_v34 = vmul.f32 %v4773_v43, %v4771_v9  ;;  %v6300_v9 = vld [vmem:[#allocation10 + $0x84] ss:$16 sps:$4 sm:$0xff]   ;;  %v6303_v43 = vld [vmem:[#allocation10 + $0x8c] ss:$16 sps:$4 sm:$0xff]  }
 0x680   :  { %v2006_v59 = vmul.f32 %v4775_v8, %v5959_v44  ;;  %v4777_v6 = vpop.eup %4776  ;;  %v6274_v44 = vld [vmem:[#allocation10 + $0xc4] ss:$16 sps:$4 sm:$0xff]   ;;  %7679 = vst [vmem:[#allocation63_spill] sm:$0xff] %v6300_v9  ;;  %7680 = vst [vmem:[#allocation64_spill] sm:$0xff] %v6303_v43  ;;  %v6306_v8 = vld [vmem:[#allocation10 + $0x80] ss:$16 sps:$4 sm:$0xff]  }
 0x681   :  { %7681 = vst [vmem:[#allocation65_spill] sm:$0xff] %v6306_v8 }
 0x682   :  { %v6265_v33 = vadd.f32 %v2007_v34, %v2006_v59  ;;  %v6312_v59 = vld [vmem:[#allocation10 + $0x64] ss:$16 sps:$4 sm:$0xff]   ;;  %v6315_v34 = vld [vmem:[#allocation10 + $0x6c] ss:$16 sps:$4 sm:$0xff]  }
 0x683   :  { %7683 = vst [vmem:[#allocation67_spill] sm:$0xff] %v6312_v59  ;;  %7684 = vst [vmem:[#allocation68_spill] sm:$0xff] %v6315_v34 }
 0x684   :  { %4778 = vtanh.f32 %v6265_v33 }
 0x691   :  { %v4779_v21 = vpop.eup %4778 }
 0x692   :  { %v2010_v35 = vmul.f32 %v4779_v21, %v4777_v6  ;;  %v6318_v6 = vld [vmem:[#allocation10 + $0x60] ss:$16 sps:$4 sm:$0xff]   ;;  %v6321_v21 = vld [vmem:[#allocation10 + $0x68] ss:$16 sps:$4 sm:$0xff]  }
 0x693   :  { %7685 = vst [vmem:[#allocation69_spill] sm:$0xff] %v6318_v6  ;;  %7686 = vst [vmem:[#allocation70_spill] sm:$0xff] %v6321_v21 }
 0x694   :  { %v2011_v47 = vpack.c.bf16 %v2010_v35, %v2010_v35  ;;  %v6324_v35 = vld [vmem:[#allocation10 + $0x44] ss:$16 sps:$4 sm:$0xff]  }
 0x695   :  { %7687 = vst [vmem:[#allocation28_spill] sm:$0xff] %v6324_v35 }
 0x696   :  { %2045 = vmatmul.mubr.bf16.vlgmr.msra.gmra.mxu0 %v2011_v47  ;;  %2086 = vmatmul.mubr.bf16.vlgmr.msra.gmra.mxu1 %v2011_v47  ;;  %v6327_v47 = vld [vmem:[#allocation10 + $0x4c] ss:$16 sps:$4 sm:$0xff]  }
 0x697   :  { %2195 = vmatpush1.bf16.msra.mxu0 %v6268_v36  ;;  %2236 = vmatpush1.bf16.msra.mxu1 %v6271_v60  ;;  %7688 = vst [vmem:[#allocation29_spill] sm:$0xff] %v6327_v47 }
 0x698   :  { %2196 = vmatprep.subr.bf16.mxu0 %v6274_v44  ;;  %2237 = vmatprep.subr.bf16.mxu1 %v6277_v2 }
 0x699   :  { %2226 = vmatprep.mubr.bf16.mxu0 %v7586_v24  ;;  %2267 = vmatprep.mubr.bf16.mxu1 %v7586_v24 }
 0x69b   :  { %2197 = vmatpush1.bf16.msra.mxu0 %v6282_v20  ;;  %2238 = vmatpush1.bf16.msra.mxu1 %v6285_v22 }
 0x69c   :  { %2198 = vmatprep.subr.bf16.mxu0 %v6288_v16  ;;  %2239 = vmatprep.subr.bf16.mxu1 %v6291_v19 }
 0x69f   :  { %2199 = vmatpush1.bf16.msra.mxu0 %v6294_v39  ;;  %2240 = vmatpush1.bf16.msra.mxu1 %v6297_v11 }
 0x6a0   :  { %2200 = vmatprep.subr.bf16.mxu0 %v6300_v9  ;;  %2241 = vmatprep.subr.bf16.mxu1 %v6303_v43  ;;  %v2152_v43 = vld [vmem:[%s6406_s7 + $0x18] sm:$0xff] }
 0x6a3   :  { %2201 = vmatpush1.bf16.msra.mxu0 %v6306_v8  ;;  %2242 = vmatpush1.bf16.msra.mxu1 %v6309_v28 }
 0x6a4   :  { %2202 = vmatprep.subr.bf16.mxu0 %v6312_v59  ;;  %2243 = vmatprep.subr.bf16.mxu1 %v6315_v34  ;;  %v6330_v59 = vld [vmem:[#allocation10 + $0x40] ss:$16 sps:$4 sm:$0xff]   ;;  %v6333_v34 = vld [vmem:[#allocation10 + $0x48] ss:$16 sps:$4 sm:$0xff]  }
 0x6a5   :  { %7689 = vst [vmem:[#allocation71_spill] sm:$0xff] %v6330_v59  ;;  %7690 = vst [vmem:[#allocation72_spill] sm:$0xff] %v6333_v34 }
 0x6a7   :  { %2203 = vmatpush1.bf16.msra.mxu0 %v6318_v6  ;;  %2244 = vmatpush1.bf16.msra.mxu1 %v6321_v21  ;;  %v6336_v6 = vld [vmem:[#allocation10 + $0x24] ss:$16 sps:$4 sm:$0xff]   ;;  %v6339_v21 = vld [vmem:[#allocation10 + $0x2c] ss:$16 sps:$4 sm:$0xff]  }
 0x6a8   :  { %2204 = vmatprep.subr.bf16.mxu0 %v6324_v35  ;;  %2245 = vmatprep.subr.bf16.mxu1 %v6327_v47  ;;  %7691 = vst [vmem:[#allocation73_spill] sm:$0xff] %v6336_v6  ;;  %7692 = vst [vmem:[#allocation74_spill] sm:$0xff] %v6339_v21  ;;  %v6342_v35 = vld [vmem:[#allocation10 + $0x20] ss:$16 sps:$4 sm:$0xff]   ;;  %v6345_v47 = vld [vmem:[#allocation10 + $0x28] ss:$16 sps:$4 sm:$0xff]  }
 0x6a9   :  { %7693 = vst [vmem:[#allocation75_spill] sm:$0xff] %v6342_v35  ;;  %7694 = vst [vmem:[#allocation76_spill] sm:$0xff] %v6345_v47 }
 0x6ab   :  { %2205 = vmatpush1.bf16.msra.mxu0 %v6330_v59  ;;  %2246 = vmatpush1.bf16.msra.mxu1 %v6333_v34  ;;  %v6348_v59 = vld [vmem:[#allocation10 + $0x4] ss:$16 sps:$4 sm:$0xff]   ;;  %v6351_v34 = vld [vmem:[#allocation10 + $0xc] ss:$16 sps:$4 sm:$0xff]  }
 0x6ac   :  { %2206 = vmatprep.subr.bf16.mxu0 %v6336_v6  ;;  %2247 = vmatprep.subr.bf16.mxu1 %v6339_v21  ;;  %7695 = vst [vmem:[#allocation77_spill] sm:$0xff] %v6348_v59  ;;  %7696 = vst [vmem:[#allocation78_spill] sm:$0xff] %v6351_v34  ;;  %v6354_v6 = vld [vmem:[#allocation10] ss:$16 sps:$4 sm:$0xff]   ;;  %v6357_v21 = vld [vmem:[#allocation10 + $0x8] ss:$16 sps:$4 sm:$0xff]  }
 0x6ad   :  { %7697 = vst [vmem:[#allocation79_spill] sm:$0xff] %v6354_v6  ;;  %7698 = vst [vmem:[#allocation80_spill] sm:$0xff] %v6357_v21 }
 0x6af   :  { %2207 = vmatpush1.bf16.msra.mxu0 %v6342_v35  ;;  %2248 = vmatpush1.bf16.msra.mxu1 %v6345_v47 }
 0x6b0   :  { %2208 = vmatprep.subr.bf16.mxu0 %v6348_v59  ;;  %2249 = vmatprep.subr.bf16.mxu1 %v6351_v34 }
 0x6b3   :  { %2209 = vmatpush1.bf16.msra.mxu0 %v6354_v6  ;;  %2250 = vmatpush1.bf16.msra.mxu1 %v6357_v21  ;;  %v2151_v6 = vld [vmem:[%s6406_s7 + $0x10] sm:$0xff] }
 0x6b4   :  { %2305 = vmatprep.subr.bf16.mxu0 %v5994_v5  ;;  %2346 = vmatprep.subr.bf16.mxu1 %v5997_v15  ;;  %v7699_v5 = vld [vmem:[#allocation31_spill] sm:$0xff]  ;;  %v7700_v15 = vld [vmem:[#allocation30_spill] sm:$0xff] }
 0x6b6   :  { %2227 = vmatmul.mubr.bf16.vlgmr.msra.gmra.mxu0 %v6154_v31  ;;  %2268 = vmatmul.mubr.bf16.vlgmr.msra.gmra.mxu1 %v6154_v31 }
 0x6b7   :  { %2306 = vmatpush1.bf16.msra.mxu0 %v6002_v0  ;;  %2347 = vmatpush1.bf16.msra.mxu1 %v6005_v23  ;;  %v7701_v0 = vld [vmem:[#allocation32_spill] sm:$0xff]  ;;  %v7702_v23 = vld [vmem:[#allocation33_spill] sm:$0xff] }
 0x6b8   :  { %2307 = vmatprep.subr.bf16.mxu0 %v6008_v25  ;;  %2348 = vmatprep.subr.bf16.mxu1 %v6011_v27  ;;  %v7703_v25 = vld [vmem:[#allocation35_spill] sm:$0xff]  ;;  %v7704_v27 = vld [vmem:[#allocation34_spill] sm:$0xff] }
 0x6b9   :  { %2337 = vmatprep.mubr.bf16.mxu0 %v7586_v24  ;;  %2378 = vmatprep.mubr.bf16.mxu1 %v7586_v24 }
 0x6bb   :  { %2308 = vmatpush1.bf16.msra.mxu0 %v6016_v17  ;;  %2349 = vmatpush1.bf16.msra.mxu1 %v6019_v14  ;;  %v7705_v17 = vld [vmem:[#allocation36_spill] sm:$0xff]  ;;  %v7706_v14 = vld [vmem:[#allocation37_spill] sm:$0xff] }
 0x6bc   :  { %2309 = vmatprep.subr.bf16.mxu0 %v6022_v29  ;;  %2350 = vmatprep.subr.bf16.mxu1 %v6025_v55  ;;  %v7707_v29 = vld [vmem:[#allocation39_spill] sm:$0xff]  ;;  %v7708_v55 = vld [vmem:[#allocation38_spill] sm:$0xff] }
 0x6bf   :  { %2310 = vmatpush1.bf16.msra.mxu0 %v6028_v37  ;;  %2351 = vmatpush1.bf16.msra.mxu1 %v6031_v41  ;;  %v7709_v37 = vld [vmem:[#allocation40_spill] sm:$0xff]  ;;  %v7710_v41 = vld [vmem:[#allocation41_spill] sm:$0xff] }
 0x6c0   :  { %2311 = vmatprep.subr.bf16.mxu0 %v6034_v42  ;;  %2352 = vmatprep.subr.bf16.mxu1 %v6037_v46  ;;  %v6396_v42 = vld [vmem:[#allocation3 + $0xe4] ss:$16 sps:$4 sm:$0xff]   ;;  %v6399_v46 = vld [vmem:[#allocation3 + $0xec] ss:$16 sps:$4 sm:$0xff]  }
 0x6c1   :  { %7711 = vst [vmem:[#allocation31_spill] sm:$0xff] %v6396_v42  ;;  %7712 = vst [vmem:[#allocation30_spill] sm:$0xff] %v6399_v46 }
 0x6c3   :  { %2312 = vmatpush1.bf16.msra.mxu0 %v6040_v48  ;;  %2353 = vmatpush1.bf16.msra.mxu1 %v6043_v49  ;;  %v2104_v48 = vstv %s2103_s19  ;;  %v2154_v49 = vstv %s2153_s21  ;;  %s4445_s19 = sshll.u32 %s3307_s6, 5  ;;  %s4446_s21 = sshll.u32 %s3357_s18, 5 }
 0x6c4   :  { %2313 = vmatprep.subr.bf16.mxu0 %v6046_v51  ;;  %2354 = vmatprep.subr.bf16.mxu1 %v6049_v52  ;;  %v2099_v51 = vld [vmem:[%s6402_s22] sm:$0xff]  ;;  %vm2105_vm8 = vcmp.eq.s32.totalorder %v5466_v38, %v2104_v48  ;;  %vm2155_vm9 = vcmp.eq.s32.totalorder %v5466_v38, %v2154_v49  ;;  %s7196_s2 = scalar_lea.vmem [#allocation8], %s4446_s21 }
 0x6c5   :  { %v2149_v52 = vld [vmem:[%s6406_s7] sm:$0xff]  ;;  %v2108_v31 = vsel %vm2105_vm8, %v2099_v51, 0.0 }
 0x6c7   :  { %2314 = vmatpush1.bf16.msra.mxu0 %v6052_v26  ;;  %2355 = vmatpush1.bf16.msra.mxu1 %v6055_v56  ;;  %v2100_v26 = vld [vmem:[%s6402_s22 + $0x8] sm:$0xff] }
 0x6c8   :  { %2315 = vmatprep.subr.bf16.mxu0 %v7699_v5  ;;  %2356 = vmatprep.subr.bf16.mxu1 %v7700_v15  ;;  %v2150_v56 = vld [vmem:[%s6406_s7 + $0x8] sm:$0xff]  ;;  %v2158_v5 = vsel %vm2155_vm9, %v2149_v52, 0.0  ;;  %s7192_s7 = scalar_lea.vmem [#allocation8], %s4445_s19 }
 0x6cb   :  { %2316 = vmatpush1.bf16.msra.mxu0 %v7701_v0  ;;  %2357 = vmatpush1.bf16.msra.mxu1 %v7702_v23  ;;  %v2109_v23 = vsel %vm2105_vm8, %v2100_v26, 0.0  ;;  %v2101_v26 = vld [vmem:[%s6402_s22 + $0x10] sm:$0xff] }
 0x6cc   :  { %2317 = vmatprep.subr.bf16.mxu0 %v7703_v25  ;;  %2358 = vmatprep.subr.bf16.mxu1 %v7704_v27  ;;  %v2159_v25 = vsel %vm2155_vm9, %v2150_v56, 0.0  ;;  %v2110_v35 = vsel %vm2105_vm8, %v2101_v26, 0.0 }
 0x6cd   :  { %v2168_v51 = vrot.slane %v2159_v25, 4 }
 0x6cf   :  { %2318 = vmatpush1.bf16.msra.mxu0 %v7705_v17  ;;  %2359 = vmatpush1.bf16.msra.mxu1 %v7706_v14  ;;  %v2112_v14 = vrot.slane %v2108_v31, 4  ;;  %v2169_v56 = vadd.f32 %v2168_v51, %v2159_v25  ;;  %v2161_v25 = vsel %vm2155_vm9, %v2152_v43, 0.0 }
 0x6d0   :  { %2319 = vmatprep.subr.bf16.mxu0 %v7707_v29  ;;  %2360 = vmatprep.subr.bf16.mxu1 %v7708_v55  ;;  %v2162_v29 = vrot.slane %v2158_v5, 4  ;;  %v2180_v11 = vrot.slane %v2161_v25, 4 }
 0x6d1   :  { %v2170_v28 = vrot.slane %v2169_v56, 2 }
 0x6d2   :  { %v2163_v21 = vadd.f32 %v2162_v29, %v2158_v5 }
 0x6d3   :  { %2320 = vmatpush1.bf16.msra.mxu0 %v7709_v37  ;;  %2361 = vmatpush1.bf16.msra.mxu1 %v7710_v41  ;;  %v2118_v41 = vrot.slane %v2109_v23, 4  ;;  %v2171_v29 = vadd.f32 %v2170_v28, %v2169_v56  ;;  %v2181_v28 = vadd.f32 %v2180_v11, %v2161_v25 }
 0x6d4   :  { %2416 = vmatprep.subr.bf16.mxu0 %v6396_v42  ;;  %2457 = vmatprep.subr.bf16.mxu1 %v6399_v46  ;;  %v2113_v42 = vadd.f32 %v2112_v14, %v2108_v31  ;;  %v2164_v47 = vrot.slane %v2163_v21, 2 }
 0x6d5   :  { %v2119_v34 = vadd.f32 %v2118_v41, %v2109_v23  ;;  %v2172_v19 = vrot.slane %v2171_v29, 1  ;;  %v2182_v49 = vrot.slane %v2181_v28, 2 }
 0x6d6   :  { %v2114_v59 = vrot.slane %v2113_v42, 2  ;;  %v2165_v5 = vadd.f32 %v2164_v47, %v2163_v21 }
 0x6d8   :  { %v2115_v31 = vadd.f32 %v2114_v59, %v2113_v42  ;;  %v2173_v42 = vadd.f32 %v2172_v19, %v2171_v29 }
 0x6da   :  { %v2116_v26 = vrot.slane %v2115_v31, 1 }
 0x6dc   :  { %v2117_v59 = vadd.f32 %v2116_v26, %v2115_v31 }
 0x6de   :  { %v2136_v43 = vsel %vm148_vm2, %v2117_v59, 0.0 }
 0x756   :  { %v6416_v15 = vpop.f32.mrf.mxu0  ;;  %v6418_v0 = vpop.f32.mrf.mxu1 }
 0x758   :  { %v6424_v27 = vpop.f32.mrf.mxu0  ;;  %v6426_v17 = vpop.f32.mrf.mxu1 }
 0x75a   :  { %v2050_v55 = vpop.f32.mrf.mxu0  ;;  %v2091_v37 = vpop.f32.mrf.mxu1 }
 0x75b   :  { %v2160_v55 = vsel %vm2155_vm9, %v2151_v6, 0.0  ;;  %v2120_v37 = vrot.slane %v2119_v34, 2  ;;  %v2166_v6 = vrot.slane %v2165_v5, 1 }
 0x75c   :  { %v2051_v52 = vpop.f32.mrf.mxu0  ;;  %v2092_v46 = vpop.f32.mrf.mxu1  ;;  %v2174_v8 = vrot.slane %v2160_v55, 4 }
 0x75d   :  { %v2124_v52 = vrot.slane %v2110_v35, 4  ;;  %v2102_v46 = vld [vmem:[%s6402_s22 + $0x18] sm:$0xff]  ;;  %v2121_v14 = vadd.f32 %v2120_v37, %v2119_v34  ;;  %v2167_v21 = vadd.f32 %v2166_v6, %v2165_v5  ;;  %v2187_v37 = vsel %vm201_vm3, %v2173_v42, 0.0  ;;  %s3365_s22 = sand.u32 7, %s4401_s17 }
 0x75e   :  { %v2111_v23 = vsel %vm2105_vm8, %v2102_v46, 0.0  ;;  %v2175_v51 = vadd.f32 %v2174_v8, %v2160_v55 }
 0x75f   :  { %v2125_v41 = vadd.f32 %v2124_v52, %v2110_v35  ;;  %v2130_v9 = vrot.slane %v2111_v23, 4  ;;  %v2122_v39 = vrot.slane %v2121_v14, 1  ;;  %v2186_v8 = vsel %vm201_vm3, %v2167_v21, 0.0 }
 0x760   :  { %v2176_v22 = vrot.slane %v2175_v51, 2 }
 0x761   :  { %v2126_v16 = vrot.slane %v2125_v41, 2  ;;  %v2131_v34 = vadd.f32 %v2130_v9, %v2111_v23  ;;  %v2123_v47 = vadd.f32 %v2122_v39, %v2121_v14  ;;  %v2190_v9 = vadd.f32 %v2186_v8, %v2136_v43 }
 0x762   :  { %v2177_v56 = vadd.f32 %v2176_v22, %v2175_v51  ;;  %v2183_v22 = vadd.f32 %v2182_v49, %v2181_v28 }
 0x763   :  { %v2127_v48 = vadd.f32 %v2126_v16, %v2125_v41  ;;  %v2132_v35 = vrot.slane %v2131_v34, 2  ;;  %v2137_v55 = vsel %vm148_vm2, %v2123_v47, 0.0 }
 0x764   :  { %v2178_v39 = vrot.slane %v2177_v56, 1  ;;  %v2191_v19 = vadd.f32 %v2187_v37, %v2137_v55  ;;  %v2184_v26 = vrot.slane %v2183_v22, 1 }
 0x765   :  { %v2128_v11 = vrot.slane %v2127_v48, 1  ;;  %v2133_v16 = vadd.f32 %v2132_v35, %v2131_v34 }
 0x766   :  { %v2179_v14 = vadd.f32 %v2178_v39, %v2177_v56  ;;  %v2185_v56 = vadd.f32 %v2184_v26, %v2183_v22 }
 0x767   :  { %v2129_v5 = vadd.f32 %v2128_v11, %v2127_v48  ;;  %v2134_v51 = vrot.slane %v2133_v16, 1 }
 0x768   :  { %v2188_v34 = vsel %vm201_vm3, %v2179_v14, 0.0  ;;  %v2189_v35 = vsel %vm201_vm3, %v2185_v56, 0.0 }
 0x769   :  { %v2138_v21 = vsel %vm148_vm2, %v2129_v5, 0.0  ;;  %v2135_v48 = vadd.f32 %v2134_v51, %v2133_v16 }
 0x76a   :  { %v2192_v43 = vadd.f32 %v2188_v34, %v2138_v21 }
 0x76b   :  { %v2139_v8 = vsel %vm148_vm2, %v2135_v48, 0.0 }
 0x76c   :  { %v2193_v55 = vadd.f32 %v2189_v35, %v2139_v8 }
 0x776   :  { %v2228_v52 = vpop.f32.mrf.mxu0  ;;  %v2269_v46 = vpop.f32.mrf.mxu1 }
 0x777   :  { %v2276_v31 = vadd.f32 %v2228_v52, %v2190_v9  ;;  %v2278_v49 = vadd.f32 %v2269_v46, %v2192_v43 }
 0x778   :  { %v2230_v29 = vpop.f32.mrf.mxu0  ;;  %v2271_v23 = vpop.f32.mrf.mxu1 }
 0x779   :  { %v4368_v25 = vmul.f32 -1.442695, %v2276_v31  ;;  %v2277_v41 = vadd.f32 %v2230_v29, %v2191_v19  ;;  %v4370_v37 = vmul.f32 -1.442695, %v2278_v49  ;;  %v2279_v11 = vadd.f32 %v2271_v23, %v2193_v55 }
 0x77a   :  { %v2232_v6 = vpop.f32.mrf.mxu0  ;;  %v2273_v59 = vpop.f32.mrf.mxu1 }
 0x77b   :  { %4780 = vpow2.f32 %v4368_v25  ;;  %v4369_v28 = vmul.f32 -1.442695, %v2277_v41  ;;  %v7729_v6 = vld [vmem:[#allocation57_spill] sm:$0xff] }
 0x77c   :  { %v2233_v47 = vpop.f32.mrf.mxu0  ;;  %v2274_v42 = vpop.f32.mrf.mxu1 }
 0x77d   :  { %4782 = vpow2.f32 %v4369_v28 }
 0x77e   :  { %4784 = vpow2.f32 %v4370_v37 }
 0x788   :  { %v4781_v9 = vpop.eup %4780 }
 0x789   :  { %v2289_v39 = vadd.f32 1.0, %v4781_v9 }
 0x78a   :  { %v4783_v19 = vpop.eup %4782 }
 0x78b   :  { %4786 = vrcp.f32 %v2289_v39  ;;  %v2290_v52 = vadd.f32 1.0, %v4783_v19  ;;  %v4785_v16 = vpop.eup %4784 }
 0x78c   :  { %4788 = vtanh.f32 %v2279_v11  ;;  %v2291_v14 = vadd.f32 1.0, %v4785_v16 }
 0x78d   :  { %4790 = vrcp.f32 %v2290_v52 }
 0x78e   :  { %4792 = vrcp.f32 %v2291_v14 }
 0x798   :  { %v4787_v22 = vpop.eup %4786 }
 0x799   :  { %v4789_v31 = vpop.eup %4788 }
 0x79a   :  { %v4791_v5 = vpop.eup %4790  ;;  %v2300_v25 = vmul.f32 %v4789_v31, %v4787_v22 }
 0x79b   :  { %v2299_v29 = vmul.f32 %v4791_v5, %v6151_v7  ;;  %v4793_v23 = vpop.eup %4792  ;;  %v7713_v7 = vld [vmem:[#allocation42_spill] sm:$0xff] }
 0x79d   :  { %v6457_v46 = vadd.f32 %v2300_v25, %v2299_v29 }
 0x79f   :  { %4794 = vtanh.f32 %v6457_v46 }
 0x7ac   :  { %v4795_v41 = vpop.eup %4794 }
 0x7ad   :  { %v2303_v51 = vmul.f32 %v4795_v41, %v4793_v23 }
 0x7af   :  { %v6460_v26 = vpack.c.bf16 %v2303_v51, %v2303_v51 }
 0x7b1   :  { %2338 = vmatmul.mubr.bf16.vlgmr.msra.gmra.mxu0 %v6460_v26  ;;  %2379 = vmatmul.mubr.bf16.vlgmr.msra.gmra.mxu1 %v6460_v26 }
 0x7b2   :  { %2417 = vmatpush1.bf16.msra.mxu0 %v6158_v32  ;;  %2458 = vmatpush1.bf16.msra.mxu1 %v6161_v45  ;;  %v7714_v32 = vld [vmem:[#allocation43_spill] sm:$0xff]  ;;  %v7715_v45 = vld [vmem:[#allocation44_spill] sm:$0xff] }
 0x7b3   :  { %2418 = vmatprep.subr.bf16.mxu0 %v6164_v54  ;;  %2459 = vmatprep.subr.bf16.mxu1 %v6167_v13  ;;  %v7716_v54 = vld [vmem:[#allocation45_spill] sm:$0xff]  ;;  %v7717_v13 = vld [vmem:[#allocation46_spill] sm:$0xff] }
 0x7b4   :  { %2448 = vmatprep.mubr.bf16.mxu0 %v7586_v24  ;;  %2489 = vmatprep.mubr.bf16.mxu1 %v7586_v24 }
 0x7b6   :  { %2419 = vmatpush1.bf16.msra.mxu0 %v6172_v30  ;;  %2460 = vmatpush1.bf16.msra.mxu1 %v6175_v10  ;;  %v7718_v30 = vld [vmem:[#allocation47_spill] sm:$0xff]  ;;  %v7719_v10 = vld [vmem:[#allocation48_spill] sm:$0xff] }
 0x7b7   :  { %2420 = vmatprep.subr.bf16.mxu0 %v6178_v40  ;;  %2461 = vmatprep.subr.bf16.mxu1 %v6181_v62  ;;  %v7720_v40 = vld [vmem:[#allocation49_spill] sm:$0xff]  ;;  %v7721_v62 = vld [vmem:[#allocation50_spill] sm:$0xff] }
 0x7ba   :  { %2421 = vmatpush1.bf16.msra.mxu0 %v6184_v57  ;;  %2462 = vmatpush1.bf16.msra.mxu1 %v6187_v58  ;;  %v7722_v57 = vld [vmem:[#allocation51_spill] sm:$0xff]  ;;  %v7723_v58 = vld [vmem:[#allocation52_spill] sm:$0xff] }
 0x7bb   :  { %2422 = vmatprep.subr.bf16.mxu0 %v6190_v61  ;;  %2463 = vmatprep.subr.bf16.mxu1 %v6193_v53  ;;  %v7724_v61 = vld [vmem:[#allocation53_spill] sm:$0xff]  ;;  %v7725_v53 = vld [vmem:[#allocation54_spill] sm:$0xff] }
 0x7be   :  { %2423 = vmatpush1.bf16.msra.mxu0 %v6196_v12  ;;  %2464 = vmatpush1.bf16.msra.mxu1 %v6199_v63  ;;  %v7726_v12 = vld [vmem:[#allocation27_spill] sm:$0xff] }
 0x7bf   :  { %2424 = vmatprep.subr.bf16.mxu0 %v6202_v18  ;;  %2465 = vmatprep.subr.bf16.mxu1 %v7713_v7  ;;  %v7727_v63 = vld [vmem:[#allocation55_spill] sm:$0xff]  ;;  %v7728_v18 = vld [vmem:[#allocation56_spill] sm:$0xff] }
 0x7c2   :  { %2425 = vmatpush1.bf16.msra.mxu0 %v7714_v32  ;;  %2466 = vmatpush1.bf16.msra.mxu1 %v7715_v45  ;;  %v7731_v45 = vld [vmem:[#allocation59_spill] sm:$0xff] }
 0x7c3   :  { %2426 = vmatprep.subr.bf16.mxu0 %v7716_v54  ;;  %2467 = vmatprep.subr.bf16.mxu1 %v7717_v13  ;;  %v7732_v54 = vld [vmem:[#allocation60_spill] sm:$0xff]  ;;  %v7733_v13 = vld [vmem:[#allocation61_spill] sm:$0xff] }
 0x7c6   :  { %2427 = vmatpush1.bf16.msra.mxu0 %v7718_v30  ;;  %2468 = vmatpush1.bf16.msra.mxu1 %v7719_v10  ;;  %v7738_v30 = vld [vmem:[#allocation66_spill] sm:$0xff]  ;;  %v7739_v10 = vld [vmem:[#allocation67_spill] sm:$0xff] }
 0x7c7   :  { %2428 = vmatprep.subr.bf16.mxu0 %v7720_v40  ;;  %2469 = vmatprep.subr.bf16.mxu1 %v7721_v62  ;;  %v7741_v40 = vld [vmem:[#allocation69_spill] sm:$0xff]  ;;  %v7742_v62 = vld [vmem:[#allocation70_spill] sm:$0xff] }
 0x7ca   :  { %2429 = vmatpush1.bf16.msra.mxu0 %v7722_v57  ;;  %2470 = vmatpush1.bf16.msra.mxu1 %v7723_v58  ;;  %v7743_v57 = vld [vmem:[#allocation28_spill] sm:$0xff]  ;;  %v7744_v58 = vld [vmem:[#allocation29_spill] sm:$0xff] }
 0x7cb   :  { %2430 = vmatprep.subr.bf16.mxu0 %v7724_v61  ;;  %2471 = vmatprep.subr.bf16.mxu1 %v7725_v53  ;;  %v7745_v61 = vld [vmem:[#allocation71_spill] sm:$0xff]  ;;  %v7746_v53 = vld [vmem:[#allocation72_spill] sm:$0xff] }
 0x7ce   :  { %2431 = vmatpush1.bf16.msra.mxu0 %v7726_v12  ;;  %2472 = vmatpush1.bf16.msra.mxu1 %v7727_v63  ;;  %v7747_v12 = vld [vmem:[#allocation73_spill] sm:$0xff]  ;;  %v7748_v63 = vld [vmem:[#allocation74_spill] sm:$0xff] }
 0x7cf   :  { %2598 = vmatprep.subr.bf16.mxu0 %v7728_v18  ;;  %2639 = vmatprep.subr.bf16.mxu1 %v7729_v6  ;;  %v7749_v18 = vld [vmem:[#allocation75_spill] sm:$0xff]  ;;  %v7750_v6 = vld [vmem:[#allocation76_spill] sm:$0xff] }
 0x871   :  { %v2339_v59 = vpop.f32.mrf.mxu0  ;;  %v2380_v21 = vpop.f32.mrf.mxu1 }
 0x872   :  { %v2340_v34 = vadd.f32 %v2339_v59, %v6416_v15  ;;  %v2381_v9 = vadd.f32 %v2380_v21, %v6418_v0  ;;  %v7751_v59 = vld [vmem:[#allocation77_spill] sm:$0xff]  ;;  %v7752_v21 = vld [vmem:[#allocation78_spill] sm:$0xff] }
 0x873   :  { %v2341_v28 = vpop.f32.mrf.mxu0  ;;  %v2382_v47 = vpop.f32.mrf.mxu1 }
 0x874   :  { %v2387_v42 = vadd.f32 %v2340_v34, %v5447_v1  ;;  %v2342_v48 = vadd.f32 %v2341_v28, %v6424_v27  ;;  %v2389_v15 = vadd.f32 %v2381_v9, %v5451_v3  ;;  %v2383_v11 = vadd.f32 %v2382_v47, %v6426_v17  ;;  %v7753_v34 = vld [vmem:[#allocation79_spill] sm:$0xff]  ;;  %v7754_v28 = vld [vmem:[#allocation80_spill] sm:$0xff] }
 0x875   :  { %v2343_v56 = vpop.f32.mrf.mxu0  ;;  %v2384_v43 = vpop.f32.mrf.mxu1  ;;  %v6542_v47 = vld [vmem:[#allocation2 + $0xe4] ss:$16 sps:$4 sm:$0xff]   ;;  %v6579_v9 = vld [vmem:[#allocation2 + $0xa8] ss:$16 sps:$4 sm:$0xff]  }
 0x876   :  { %v4371_v8 = vmul.f32 -1.442695, %v2387_v42  ;;  %v2388_v35 = vadd.f32 %v2342_v48, %v7626_v50  ;;  %v4373_v39 = vmul.f32 -1.442695, %v2389_v15  ;;  %v2390_v27 = vadd.f32 %v2383_v11, %v5453_v4  ;;  %v6545_v42 = vld [vmem:[#allocation2 + $0xec] ss:$16 sps:$4 sm:$0xff]  }
 0x877   :  { %v2344_v49 = vpop.f32.mrf.mxu0  ;;  %v2385_v55 = vpop.f32.mrf.mxu1  ;;  %v6550_v48 = vld [vmem:[#allocation2 + $0xe0] ss:$16 sps:$4 sm:$0xff]   ;;  %v6553_v56 = vld [vmem:[#allocation2 + $0xe8] ss:$16 sps:$4 sm:$0xff]   ;;  %v6556_v43 = vld [vmem:[#allocation2 + $0xc4] ss:$16 sps:$4 sm:$0xff]  }
 0x878   :  { %4796 = vpow2.f32 %v4371_v8  ;;  %v4372_v37 = vmul.f32 -1.442695, %v2388_v35  ;;  %v6559_v8 = vld [vmem:[#allocation2 + $0xcc] ss:$16 sps:$4 sm:$0xff]   ;;  %v6567_v35 = vld [vmem:[#allocation2 + $0xc8] ss:$16 sps:$4 sm:$0xff]  }
 0x879   :  { %v6570_v49 = vld [vmem:[#allocation2 + $0xa4] ss:$16 sps:$4 sm:$0xff]   ;;  %v6573_v55 = vld [vmem:[#allocation2 + $0xac] ss:$16 sps:$4 sm:$0xff]  }
 0x87a   :  { %4798 = vpow2.f32 %v4372_v37  ;;  %v6576_v37 = vld [vmem:[#allocation2 + $0xa0] ss:$16 sps:$4 sm:$0xff]   ;;  %v6582_v15 = vld [vmem:[#allocation2 + $0x84] ss:$16 sps:$4 sm:$0xff]   ;;  %v6585_v11 = vld [vmem:[#allocation2 + $0x8c] ss:$16 sps:$4 sm:$0xff]  }
 0x87b   :  { %4800 = vpow2.f32 %v4373_v39  ;;  %v6588_v39 = vld [vmem:[#allocation2 + $0x80] ss:$16 sps:$4 sm:$0xff]  }
 0x885   :  { %v4797_v19 = vpop.eup %4796 }
 0x886   :  { %v2400_v52 = vadd.f32 1.0, %v4797_v19  ;;  %v6591_v19 = vld [vmem:[#allocation2 + $0x88] ss:$16 sps:$4 sm:$0xff]  }
 0x887   :  { %v4799_v16 = vpop.eup %4798 }
 0x888   :  { %4802 = vrcp.f32 %v2400_v52  ;;  %v2401_v22 = vadd.f32 1.0, %v4799_v16  ;;  %v4801_v31 = vpop.eup %4800  ;;  %v6597_v52 = vld [vmem:[#allocation2 + $0x6c] ss:$16 sps:$4 sm:$0xff]   ;;  %v6600_v16 = vld [vmem:[#allocation2 + $0x60] ss:$16 sps:$4 sm:$0xff]  }
 0x889   :  { %4804 = vtanh.f32 %v2390_v27  ;;  %v2402_v0 = vadd.f32 1.0, %v4801_v31  ;;  %v6594_v27 = vld [vmem:[#allocation2 + $0x64] ss:$16 sps:$4 sm:$0xff]  }
 0x88a   :  { %4806 = vrcp.f32 %v2401_v22  ;;  %v6603_v22 = vld [vmem:[#allocation2 + $0x68] ss:$16 sps:$4 sm:$0xff]   ;;  %v6606_v31 = vld [vmem:[#allocation2 + $0x44] ss:$16 sps:$4 sm:$0xff]  }
 0x88b   :  { %4808 = vrcp.f32 %v2402_v0  ;;  %7755 = vst [vmem:[#allocation32_spill] sm:$0xff] %v6606_v31  ;;  %v6618_v0 = vld [vmem:[#allocation2 + $0x24] ss:$16 sps:$4 sm:$0xff]  }
 0x88c   :  { %7759 = vst [vmem:[#allocation36_spill] sm:$0xff] %v6618_v0 }
 0x895   :  { %v4803_v5 = vpop.eup %4802 }
 0x896   :  { %v4805_v14 = vpop.eup %4804 }
 0x897   :  { %v4807_v29 = vpop.eup %4806  ;;  %v2411_v23 = vmul.f32 %v4805_v14, %v4803_v5  ;;  %v6609_v5 = vld [vmem:[#allocation2 + $0x4c] ss:$16 sps:$4 sm:$0xff]   ;;  %v6612_v14 = vld [vmem:[#allocation2 + $0x40] ss:$16 sps:$4 sm:$0xff]  }
 0x898   :  { %v2410_v25 = vmul.f32 %v4807_v29, %v6265_v33  ;;  %v4809_v41 = vpop.eup %4808  ;;  %v7730_v33 = vld [vmem:[#allocation58_spill] sm:$0xff]  ;;  %7756 = vst [vmem:[#allocation33_spill] sm:$0xff] %v6609_v5  ;;  %7757 = vst [vmem:[#allocation35_spill] sm:$0xff] %v6612_v14 }
 0x899   :  { %v6615_v29 = vld [vmem:[#allocation2 + $0x48] ss:$16 sps:$4 sm:$0xff]  }
 0x89a   :  { %v6507_v17 = vadd.f32 %v2411_v23, %v2410_v25  ;;  %7758 = vst [vmem:[#allocation34_spill] sm:$0xff] %v6615_v29  ;;  %v6621_v25 = vld [vmem:[#allocation2 + $0x2c] ss:$16 sps:$4 sm:$0xff]   ;;  %v6624_v23 = vld [vmem:[#allocation2 + $0x20] ss:$16 sps:$4 sm:$0xff]  }
 0x89b   :  { %7760 = vst [vmem:[#allocation37_spill] sm:$0xff] %v6621_v25  ;;  %7761 = vst [vmem:[#allocation39_spill] sm:$0xff] %v6624_v23 }
 0x89c   :  { %4810 = vtanh.f32 %v6507_v17 }
 0x8a9   :  { %v4811_v51 = vpop.eup %4810 }
 0x8aa   :  { %v2414_v7 = vmul.f32 %v4811_v51, %v4809_v41  ;;  %v6627_v41 = vld [vmem:[#allocation2 + $0x28] ss:$16 sps:$4 sm:$0xff]   ;;  %v6630_v51 = vld [vmem:[#allocation2 + $0x4] ss:$16 sps:$4 sm:$0xff]  }
 0x8ab   :  { %7762 = vst [vmem:[#allocation38_spill] sm:$0xff] %v6627_v41  ;;  %7763 = vst [vmem:[#allocation40_spill] sm:$0xff] %v6630_v51 }
 0x8ac   :  { %v2415_v32 = vpack.c.bf16 %v2414_v7, %v2414_v7  ;;  %v6633_v7 = vld [vmem:[#allocation2 + $0xc] ss:$16 sps:$4 sm:$0xff]  }
 0x8ad   :  { %7764 = vst [vmem:[#allocation41_spill] sm:$0xff] %v6633_v7 }
 0x8ae   :  { %2449 = vmatmul.mubr.bf16.vlgmr.msra.gmra.mxu0 %v2415_v32  ;;  %2490 = vmatmul.mubr.bf16.vlgmr.msra.gmra.mxu1 %v2415_v32  ;;  %v6636_v32 = vld [vmem:[#allocation2] ss:$16 sps:$4 sm:$0xff]  }
 0x8af   :  { %2599 = vmatpush1.bf16.msra.mxu0 %v6268_v36  ;;  %2640 = vmatpush1.bf16.msra.mxu1 %v6271_v60  ;;  %v7734_v36 = vld [vmem:[#allocation62_spill] sm:$0xff]  ;;  %v7735_v60 = vld [vmem:[#allocation63_spill] sm:$0xff]  ;;  %7765 = vst [vmem:[#allocation42_spill] sm:$0xff] %v6636_v32 }
 0x8b0   :  { %2600 = vmatprep.subr.bf16.mxu0 %v6274_v44  ;;  %2641 = vmatprep.subr.bf16.mxu1 %v6277_v2  ;;  %v7736_v44 = vld [vmem:[#allocation64_spill] sm:$0xff]  ;;  %v7737_v2 = vld [vmem:[#allocation65_spill] sm:$0xff] }
 0x8b1   :  { %2630 = vmatprep.mubr.bf16.mxu0 %v7586_v24  ;;  %2671 = vmatprep.mubr.bf16.mxu1 %v7586_v24 }
 0x8b3   :  { %2601 = vmatpush1.bf16.msra.mxu0 %v6282_v20  ;;  %2642 = vmatpush1.bf16.msra.mxu1 %v7730_v33  ;;  %v7740_v20 = vld [vmem:[#allocation68_spill] sm:$0xff] }
 0x8b4   :  { %2602 = vmatprep.subr.bf16.mxu0 %v7731_v45  ;;  %2643 = vmatprep.subr.bf16.mxu1 %v7732_v54  ;;  %v6639_v33 = vld [vmem:[#allocation2 + $0x8] ss:$16 sps:$4 sm:$0xff]   ;;  %v7767_v45 = vld [vmem:[#allocation31_spill] sm:$0xff] }
 0x8b5   :  { %7766 = vst [vmem:[#allocation43_spill] sm:$0xff] %v6639_v33  ;;  %v7768_v54 = vld [vmem:[#allocation30_spill] sm:$0xff] }
 0x8b7   :  { %2603 = vmatpush1.bf16.msra.mxu0 %v7733_v13  ;;  %2644 = vmatpush1.bf16.msra.mxu1 %v7734_v36  ;;  %v2508_v13 = vstv %s2507_s25  ;;  %v2558_v36 = vstv %s2557_s27  ;;  %s4447_s25 = sshll.u32 %s3711_s1, 5  ;;  %s4448_s27 = sshll.u32 %s3761_s3, 5 }
 0x8b8   :  { %2604 = vmatprep.subr.bf16.mxu0 %v7735_v60  ;;  %2645 = vmatprep.subr.bf16.mxu1 %v7736_v44  ;;  %v2503_v60 = vld [vmem:[%s6644_s28] sm:$0xff]  ;;  %vm2509_vm10 = vcmp.eq.s32.totalorder %v5466_v38, %v2508_v13  ;;  %vm2559_vm11 = vcmp.eq.s32.totalorder %v5466_v38, %v2558_v36  ;;  %s7310_s30 = scalar_lea.vmem [#allocation8], %s4448_s27 }
 0x8b9   :  { %v2553_v44 = vld [vmem:[%s6648_s29] sm:$0xff] }
 0x8bb   :  { %2605 = vmatpush1.bf16.msra.mxu0 %v7737_v2  ;;  %2646 = vmatpush1.bf16.msra.mxu1 %v7738_v30  ;;  %v2504_v2 = vld [vmem:[%s6644_s28 + $0x8] sm:$0xff] }
 0x8bc   :  { %2606 = vmatprep.subr.bf16.mxu0 %v7739_v10  ;;  %2647 = vmatprep.subr.bf16.mxu1 %v7740_v20  ;;  %v2554_v30 = vld [vmem:[%s6648_s29 + $0x8] sm:$0xff]  ;;  %v2512_v10 = vsel %vm2509_vm10, %v2503_v60, 0.0  ;;  %v2562_v20 = vsel %vm2559_vm11, %v2553_v44, 0.0  ;;  %v2505_v60 = vld [vmem:[%s6644_s28 + $0x10] sm:$0xff] }
 0x8bd   :  { %v2555_v44 = vld [vmem:[%s6648_s29 + $0x10] sm:$0xff] }
 0x8bf   :  { %2607 = vmatpush1.bf16.msra.mxu0 %v7741_v40  ;;  %2648 = vmatpush1.bf16.msra.mxu1 %v7742_v62 }
 0x8c0   :  { %2608 = vmatprep.subr.bf16.mxu0 %v7743_v57  ;;  %2649 = vmatprep.subr.bf16.mxu1 %v7744_v58  ;;  %v2513_v57 = vsel %vm2509_vm10, %v2504_v2, 0.0  ;;  %v2563_v58 = vsel %vm2559_vm11, %v2554_v30, 0.0 }
 0x8c3   :  { %2609 = vmatpush1.bf16.msra.mxu0 %v7745_v61  ;;  %2650 = vmatpush1.bf16.msra.mxu1 %v7746_v53 }
 0x8c4   :  { %2610 = vmatprep.subr.bf16.mxu0 %v7747_v12  ;;  %2651 = vmatprep.subr.bf16.mxu1 %v7748_v63  ;;  %v2516_v12 = vrot.slane %v2512_v10, 4  ;;  %v2566_v63 = vrot.slane %v2562_v20, 4 }
 0x8c7   :  { %2611 = vmatpush1.bf16.msra.mxu0 %v7749_v18  ;;  %2652 = vmatpush1.bf16.msra.mxu1 %v7750_v6 }
 0x8c8   :  { %2612 = vmatprep.subr.bf16.mxu0 %v7751_v59  ;;  %2653 = vmatprep.subr.bf16.mxu1 %v7752_v21  ;;  %v2522_v59 = vrot.slane %v2513_v57, 4  ;;  %v2572_v21 = vrot.slane %v2563_v58, 4 }
 0x8ca   :  { %v2523_v2 = vadd.f32 %v2522_v59, %v2513_v57  ;;  %v2573_v30 = vadd.f32 %v2572_v21, %v2563_v58 }
 0x8cb   :  { %2613 = vmatpush1.bf16.msra.mxu0 %v7753_v34  ;;  %2654 = vmatpush1.bf16.msra.mxu1 %v7754_v28 }
 0x8cc   :  { %2709 = vmatprep.subr.bf16.mxu0 %v6542_v47  ;;  %2750 = vmatprep.subr.bf16.mxu1 %v6545_v42 }
 0x8ce   :  { %2631 = vmatmul.mubr.bf16.vlgmr.msra.gmra.mxu0 %v6460_v26  ;;  %2672 = vmatmul.mubr.bf16.vlgmr.msra.gmra.mxu1 %v6460_v26  ;;  %v6564_v26 = vld [vmem:[#allocation2 + $0xc0] ss:$16 sps:$4 sm:$0xff]  }
 0x8cf   :  { %2710 = vmatpush1.bf16.msra.mxu0 %v6550_v48  ;;  %2751 = vmatpush1.bf16.msra.mxu1 %v6553_v56 }
 0x8d0   :  { %2711 = vmatprep.subr.bf16.mxu0 %v6556_v43  ;;  %2752 = vmatprep.subr.bf16.mxu1 %v6559_v8 }
 0x8d1   :  { %2741 = vmatprep.mubr.bf16.mxu0 %v7586_v24  ;;  %2782 = vmatprep.mubr.bf16.mxu1 %v7586_v24 }
 0x8d3   :  { %2712 = vmatpush1.bf16.msra.mxu0 %v6564_v26  ;;  %2753 = vmatpush1.bf16.msra.mxu1 %v6567_v35 }
 0x8d4   :  { %2713 = vmatprep.subr.bf16.mxu0 %v6570_v49  ;;  %2754 = vmatprep.subr.bf16.mxu1 %v6573_v55 }
 0x8d7   :  { %2714 = vmatpush1.bf16.msra.mxu0 %v6576_v37  ;;  %2755 = vmatpush1.bf16.msra.mxu1 %v6579_v9 }
 0x8d8   :  { %2715 = vmatprep.subr.bf16.mxu0 %v6582_v15  ;;  %2756 = vmatprep.subr.bf16.mxu1 %v6585_v11 }
 0x8db   :  { %2716 = vmatpush1.bf16.msra.mxu0 %v6588_v39  ;;  %2757 = vmatpush1.bf16.msra.mxu1 %v6591_v19 }
 0x8dc   :  { %2717 = vmatprep.subr.bf16.mxu0 %v6594_v27  ;;  %2758 = vmatprep.subr.bf16.mxu1 %v6597_v52 }
 0x8df   :  { %2718 = vmatpush1.bf16.msra.mxu0 %v6600_v16  ;;  %2759 = vmatpush1.bf16.msra.mxu1 %v6603_v22 }
 0x8e0   :  { %2719 = vmatprep.subr.bf16.mxu0 %v6606_v31  ;;  %2760 = vmatprep.subr.bf16.mxu1 %v6609_v5 }
 0x8e3   :  { %2720 = vmatpush1.bf16.msra.mxu0 %v6612_v14  ;;  %2761 = vmatpush1.bf16.msra.mxu1 %v6615_v29 }
 0x8e4   :  { %2721 = vmatprep.subr.bf16.mxu0 %v6618_v0  ;;  %2762 = vmatprep.subr.bf16.mxu1 %v6621_v25 }
 0x8e7   :  { %2722 = vmatpush1.bf16.msra.mxu0 %v6624_v23  ;;  %2763 = vmatpush1.bf16.msra.mxu1 %v6627_v41  ;;  %v2556_v23 = vld [vmem:[%s6648_s29 + $0x18] sm:$0xff]  ;;  %s7306_s29 = scalar_lea.vmem [#allocation8], %s4447_s25 }
 0x8e8   :  { %2723 = vmatprep.subr.bf16.mxu0 %v6630_v51  ;;  %2764 = vmatprep.subr.bf16.mxu1 %v6633_v7  ;;  %v2514_v7 = vsel %vm2509_vm10, %v2505_v60, 0.0  ;;  %v2574_v51 = vrot.slane %v2573_v30, 2  ;;  %v2565_v58 = vsel %vm2559_vm11, %v2556_v23, 0.0 }
 0x8e9   :  { %v2584_v0 = vrot.slane %v2565_v58, 4 }
 0x8eb   :  { %2724 = vmatpush1.bf16.msra.mxu0 %v6636_v32  ;;  %2765 = vmatpush1.bf16.msra.mxu1 %v6639_v33 }
 0x8ec   :  { %2820 = vmatprep.subr.bf16.mxu0 %v7767_v45  ;;  %2861 = vmatprep.subr.bf16.mxu1 %v7768_v54  ;;  %v2517_v45 = vadd.f32 %v2516_v12, %v2512_v10  ;;  %v2567_v54 = vadd.f32 %v2566_v63, %v2562_v20  ;;  %v2575_v63 = vadd.f32 %v2574_v51, %v2573_v30 }
 0x8ed   :  { %v2585_v51 = vadd.f32 %v2584_v0, %v2565_v58 }
 0x8ee   :  { %v2518_v33 = vrot.slane %v2517_v45, 2  ;;  %v2568_v32 = vrot.slane %v2567_v54, 2  ;;  %v2576_v14 = vrot.slane %v2575_v63, 1 }
 0x8ef   :  { %v2586_v36 = vrot.slane %v2585_v51, 2 }
 0x8f0   :  { %v2519_v10 = vadd.f32 %v2518_v33, %v2517_v45  ;;  %v2569_v20 = vadd.f32 %v2568_v32, %v2567_v54  ;;  %v2577_v13 = vadd.f32 %v2576_v14, %v2575_v63 }
 0x8f2   :  { %v2520_v60 = vrot.slane %v2519_v10, 1 }
 0x8f4   :  { %v2521_v33 = vadd.f32 %v2520_v60, %v2519_v10 }
 0x8f6   :  { %v2540_v23 = vsel %vm148_vm2, %v2521_v33, 0.0 }
 0x96e   :  { %v6658_v40 = vpop.f32.mrf.mxu0  ;;  %v6660_v62 = vpop.f32.mrf.mxu1 }
 0x970   :  { %v6666_v61 = vpop.f32.mrf.mxu0  ;;  %v6668_v53 = vpop.f32.mrf.mxu1 }
 0x972   :  { %v2454_v18 = vpop.f32.mrf.mxu0  ;;  %v2495_v6 = vpop.f32.mrf.mxu1 }
 0x973   :  { %v2564_v18 = vsel %vm2559_vm11, %v2555_v44, 0.0  ;;  %v2524_v6 = vrot.slane %v2523_v2, 2  ;;  %v2570_v44 = vrot.slane %v2569_v20, 1 }
 0x974   :  { %v2455_v34 = vpop.f32.mrf.mxu0  ;;  %v2496_v28 = vpop.f32.mrf.mxu1  ;;  %v2578_v41 = vrot.slane %v2564_v18, 4 }
 0x975   :  { %v2528_v34 = vrot.slane %v2514_v7, 4  ;;  %v2506_v28 = vld [vmem:[%s6644_s28 + $0x18] sm:$0xff]  ;;  %v2525_v12 = vadd.f32 %v2524_v6, %v2523_v2  ;;  %v2571_v32 = vadd.f32 %v2570_v44, %v2569_v20  ;;  %v2591_v6 = vsel %vm201_vm3, %v2577_v13, 0.0  ;;  %s3769_s28 = sand.u32 7, %s4413_s24 }
 0x976   :  { %v2515_v57 = vsel %vm2509_vm10, %v2506_v28, 0.0  ;;  %v2579_v21 = vadd.f32 %v2578_v41, %v2564_v18 }
 0x977   :  { %v2529_v59 = vadd.f32 %v2528_v34, %v2514_v7  ;;  %v2534_v25 = vrot.slane %v2515_v57, 4  ;;  %v2526_v29 = vrot.slane %v2525_v12, 1  ;;  %v2590_v41 = vsel %vm201_vm3, %v2571_v32, 0.0 }
 0x978   :  { %v2580_v31 = vrot.slane %v2579_v21, 2 }
 0x979   :  { %v2530_v5 = vrot.slane %v2529_v59, 2  ;;  %v2535_v45 = vadd.f32 %v2534_v25, %v2515_v57  ;;  %v2527_v54 = vadd.f32 %v2526_v29, %v2525_v12  ;;  %v2594_v25 = vadd.f32 %v2590_v41, %v2540_v23 }
 0x97a   :  { %v2581_v30 = vadd.f32 %v2580_v31, %v2579_v21  ;;  %v2587_v31 = vadd.f32 %v2586_v36, %v2585_v51 }
 0x97b   :  { %v2531_v2 = vadd.f32 %v2530_v5, %v2529_v59  ;;  %v2536_v7 = vrot.slane %v2535_v45, 2  ;;  %v2541_v18 = vsel %vm148_vm2, %v2527_v54, 0.0 }
 0x97c   :  { %v2582_v29 = vrot.slane %v2581_v30, 1  ;;  %v2595_v14 = vadd.f32 %v2591_v6, %v2541_v18  ;;  %v2588_v60 = vrot.slane %v2587_v31, 1 }
 0x97d   :  { %v2532_v0 = vrot.slane %v2531_v2, 1  ;;  %v2537_v5 = vadd.f32 %v2536_v7, %v2535_v45 }
 0x97e   :  { %v2583_v12 = vadd.f32 %v2582_v29, %v2581_v30  ;;  %v2589_v30 = vadd.f32 %v2588_v60, %v2587_v31 }
 0x97f   :  { %v2533_v20 = vadd.f32 %v2532_v0, %v2531_v2  ;;  %v2538_v21 = vrot.slane %v2537_v5, 1 }
 0x980   :  { %v2592_v45 = vsel %vm201_vm3, %v2583_v12, 0.0  ;;  %v2593_v7 = vsel %vm201_vm3, %v2589_v30, 0.0  ;;  %v6735_v30 = vld [vmem:[#allocation3 + $0xa8] ss:$16 sps:$4 sm:$0xff]  }
 0x981   :  { %v2542_v32 = vsel %vm148_vm2, %v2533_v20, 0.0  ;;  %v2539_v2 = vadd.f32 %v2538_v21, %v2537_v5 }
 0x982   :  { %v2596_v23 = vadd.f32 %v2592_v45, %v2542_v32  ;;  %v6715_v32 = vld [vmem:[#allocation3 + $0xcc] ss:$16 sps:$4 sm:$0xff]   ;;  %v6720_v45 = vld [vmem:[#allocation3 + $0xc0] ss:$16 sps:$4 sm:$0xff]  }
 0x983   :  { %v2543_v41 = vsel %vm148_vm2, %v2539_v2, 0.0  ;;  %v6732_v2 = vld [vmem:[#allocation3 + $0xa0] ss:$16 sps:$4 sm:$0xff]  }
 0x984   :  { %v2597_v18 = vadd.f32 %v2593_v7, %v2543_v41  ;;  %v6741_v41 = vld [vmem:[#allocation3 + $0x8c] ss:$16 sps:$4 sm:$0xff]   ;;  %v6744_v7 = vld [vmem:[#allocation3 + $0x80] ss:$16 sps:$4 sm:$0xff]  }
 0x98e   :  { %v2632_v34 = vpop.f32.mrf.mxu0  ;;  %v2673_v28 = vpop.f32.mrf.mxu1 }
 0x98f   :  { %v2680_v10 = vadd.f32 %v2632_v34, %v2594_v25  ;;  %v2682_v36 = vadd.f32 %v2673_v28, %v2596_v23  ;;  %v6738_v23 = vld [vmem:[#allocation3 + $0x84] ss:$16 sps:$4 sm:$0xff]  }
 0x990   :  { %v2634_v63 = vpop.f32.mrf.mxu0  ;;  %v2675_v57 = vpop.f32.mrf.mxu1 }
 0x991   :  { %v4380_v58 = vmul.f32 -1.442695, %v2680_v10  ;;  %v2681_v59 = vadd.f32 %v2634_v63, %v2595_v14  ;;  %v4382_v6 = vmul.f32 -1.442695, %v2682_v36  ;;  %v2683_v0 = vadd.f32 %v2675_v57, %v2597_v18  ;;  %v6747_v36 = vld [vmem:[#allocation3 + $0x88] ss:$16 sps:$4 sm:$0xff]  }
 0x992   :  { %v2636_v44 = vpop.f32.mrf.mxu0  ;;  %v2677_v33 = vpop.f32.mrf.mxu1  ;;  %v6750_v18 = vld [vmem:[#allocation3 + $0x64] ss:$16 sps:$4 sm:$0xff]  }
 0x993   :  { %4812 = vpow2.f32 %v4380_v58  ;;  %v4381_v51 = vmul.f32 -1.442695, %v2681_v59  ;;  %v6706_v44 = vld [vmem:[#allocation3 + $0xe0] ss:$16 sps:$4 sm:$0xff]   ;;  %v6712_v33 = vld [vmem:[#allocation3 + $0xc4] ss:$16 sps:$4 sm:$0xff]  }
 0x994   :  { %v2637_v54 = vpop.f32.mrf.mxu0  ;;  %v2678_v13 = vpop.f32.mrf.mxu1 }
 0x995   :  { %4814 = vpow2.f32 %v4381_v51  ;;  %v6723_v51 = vld [vmem:[#allocation3 + $0xc8] ss:$16 sps:$4 sm:$0xff]   ;;  %v6726_v54 = vld [vmem:[#allocation3 + $0xa4] ss:$16 sps:$4 sm:$0xff]   ;;  %v6729_v13 = vld [vmem:[#allocation3 + $0xac] ss:$16 sps:$4 sm:$0xff]  }
 0x996   :  { %4816 = vpow2.f32 %v4382_v6  ;;  %v6753_v6 = vld [vmem:[#allocation3 + $0x6c] ss:$16 sps:$4 sm:$0xff]  }
 0x997   :  { %7769 = vst [vmem:[#allocation44_spill] sm:$0xff] %v6753_v6 }
 0x9a0   :  { %v4813_v25 = vpop.eup %4812 }
 0x9a1   :  { %v2693_v29 = vadd.f32 1.0, %v4813_v25  ;;  %v6756_v25 = vld [vmem:[#allocation3 + $0x60] ss:$16 sps:$4 sm:$0xff]  }
 0x9a2   :  { %v4815_v14 = vpop.eup %4814  ;;  %7770 = vst [vmem:[#allocation45_spill] sm:$0xff] %v6756_v25 }
 0x9a3   :  { %4818 = vrcp.f32 %v2693_v29  ;;  %v2694_v34 = vadd.f32 1.0, %v4815_v14  ;;  %v4817_v5 = vpop.eup %4816  ;;  %v6762_v29 = vld [vmem:[#allocation3 + $0x44] ss:$16 sps:$4 sm:$0xff]   ;;  %v6765_v14 = vld [vmem:[#allocation3 + $0x4c] ss:$16 sps:$4 sm:$0xff]  }
 0x9a4   :  { %4820 = vtanh.f32 %v2683_v0  ;;  %v2695_v12 = vadd.f32 1.0, %v4817_v5  ;;  %v6759_v0 = vld [vmem:[#allocation3 + $0x68] ss:$16 sps:$4 sm:$0xff]   ;;  %7772 = vst [vmem:[#allocation47_spill] sm:$0xff] %v6762_v29  ;;  %7773 = vst [vmem:[#allocation48_spill] sm:$0xff] %v6765_v14 }
 0x9a5   :  { %4822 = vrcp.f32 %v2694_v34  ;;  %7771 = vst [vmem:[#allocation46_spill] sm:$0xff] %v6759_v0  ;;  %v6768_v34 = vld [vmem:[#allocation3 + $0x40] ss:$16 sps:$4 sm:$0xff]   ;;  %v6771_v5 = vld [vmem:[#allocation3 + $0x48] ss:$16 sps:$4 sm:$0xff]  }
 0x9a6   :  { %4824 = vrcp.f32 %v2695_v12  ;;  %7774 = vst [vmem:[#allocation49_spill] sm:$0xff] %v6768_v34  ;;  %7775 = vst [vmem:[#allocation50_spill] sm:$0xff] %v6771_v5  ;;  %v6783_v12 = vld [vmem:[#allocation3 + $0x28] ss:$16 sps:$4 sm:$0xff]  }
 0x9a7   :  { %7779 = vst [vmem:[#allocation54_spill] sm:$0xff] %v6783_v12 }
 0x9b0   :  { %v4819_v31 = vpop.eup %4818 }
 0x9b1   :  { %v4821_v10 = vpop.eup %4820 }
 0x9b2   :  { %v4823_v20 = vpop.eup %4822  ;;  %v2704_v58 = vmul.f32 %v4821_v10, %v4819_v31  ;;  %v6774_v31 = vld [vmem:[#allocation3 + $0x24] ss:$16 sps:$4 sm:$0xff]   ;;  %v6777_v10 = vld [vmem:[#allocation3 + $0x2c] ss:$16 sps:$4 sm:$0xff]  }
 0x9b3   :  { %v2703_v63 = vmul.f32 %v4823_v20, %v6457_v46  ;;  %v4825_v57 = vpop.eup %4824  ;;  %v6709_v46 = vld [vmem:[#allocation3 + $0xe8] ss:$16 sps:$4 sm:$0xff]   ;;  %7776 = vst [vmem:[#allocation51_spill] sm:$0xff] %v6774_v31  ;;  %7777 = vst [vmem:[#allocation52_spill] sm:$0xff] %v6777_v10  ;;  %v6780_v20 = vld [vmem:[#allocation3 + $0x20] ss:$16 sps:$4 sm:$0xff]  }
 0x9b4   :  { %7778 = vst [vmem:[#allocation53_spill] sm:$0xff] %v6780_v20 }
 0x9b5   :  { %v6699_v28 = vadd.f32 %v2704_v58, %v2703_v63  ;;  %v6786_v63 = vld [vmem:[#allocation3 + $0x4] ss:$16 sps:$4 sm:$0xff]   ;;  %v6789_v58 = vld [vmem:[#allocation3 + $0xc] ss:$16 sps:$4 sm:$0xff]  }
 0x9b6   :  { %7780 = vst [vmem:[#allocation27_spill] sm:$0xff] %v6786_v63  ;;  %7781 = vst [vmem:[#allocation55_spill] sm:$0xff] %v6789_v58 }
 0x9b7   :  { %4826 = vtanh.f32 %v6699_v28 }
 0x9c4   :  { %v4827_v59 = vpop.eup %4826 }
 0x9c5   :  { %v2707_v21 = vmul.f32 %v4827_v59, %v4825_v57  ;;  %v6792_v57 = vld [vmem:[#allocation3] ss:$16 sps:$4 sm:$0xff]   ;;  %v6795_v59 = vld [vmem:[#allocation3 + $0x8] ss:$16 sps:$4 sm:$0xff]  }
 0x9c6   :  { %7782 = vst [vmem:[#allocation56_spill] sm:$0xff] %v6792_v57  ;;  %7783 = vst [vmem:[#allocation57_spill] sm:$0xff] %v6795_v59 }
 0x9c7   :  { %v6702_v60 = vpack.c.bf16 %v2707_v21, %v2707_v21  ;;  %v6798_v21 = vld [vmem:[#allocation10 + $0xe4] ss:$16 sps:$4 sm:$0xff]  }
 0x9c8   :  { %7784 = vst [vmem:[#allocation58_spill] sm:$0xff] %v6798_v21 }
 0x9c9   :  { %2742 = vmatmul.mubr.bf16.vlgmr.msra.gmra.mxu0 %v6702_v60  ;;  %2783 = vmatmul.mubr.bf16.vlgmr.msra.gmra.mxu1 %v6702_v60 }
 0x9ca   :  { %2821 = vmatpush1.bf16.msra.mxu0 %v6706_v44  ;;  %2862 = vmatpush1.bf16.msra.mxu1 %v6709_v46 }
 0x9cb   :  { %2822 = vmatprep.subr.bf16.mxu0 %v6712_v33  ;;  %2863 = vmatprep.subr.bf16.mxu1 %v6715_v32 }
 0x9cc   :  { %2852 = vmatprep.mubr.bf16.mxu0 %v7586_v24  ;;  %2893 = vmatprep.mubr.bf16.mxu1 %v7586_v24 }
 0x9ce   :  { %2823 = vmatpush1.bf16.msra.mxu0 %v6720_v45  ;;  %2864 = vmatpush1.bf16.msra.mxu1 %v6723_v51 }
 0x9cf   :  { %2824 = vmatprep.subr.bf16.mxu0 %v6726_v54  ;;  %2865 = vmatprep.subr.bf16.mxu1 %v6729_v13 }
 0x9d2   :  { %2825 = vmatpush1.bf16.msra.mxu0 %v6732_v2  ;;  %2866 = vmatpush1.bf16.msra.mxu1 %v6735_v30 }
 0x9d3   :  { %2826 = vmatprep.subr.bf16.mxu0 %v6738_v23  ;;  %2867 = vmatprep.subr.bf16.mxu1 %v6741_v41 }
 0x9d6   :  { %2827 = vmatpush1.bf16.msra.mxu0 %v6744_v7  ;;  %2868 = vmatpush1.bf16.msra.mxu1 %v6747_v36 }
 0x9d7   :  { %2828 = vmatprep.subr.bf16.mxu0 %v6750_v18  ;;  %2869 = vmatprep.subr.bf16.mxu1 %v6753_v6 }
 0x9da   :  { %2829 = vmatpush1.bf16.msra.mxu0 %v6756_v25  ;;  %2870 = vmatpush1.bf16.msra.mxu1 %v6759_v0 }
 0x9db   :  { %2830 = vmatprep.subr.bf16.mxu0 %v6762_v29  ;;  %2871 = vmatprep.subr.bf16.mxu1 %v6765_v14 }
 0x9de   :  { %2831 = vmatpush1.bf16.msra.mxu0 %v6768_v34  ;;  %2872 = vmatpush1.bf16.msra.mxu1 %v6771_v5 }
 0x9df   :  { %2832 = vmatprep.subr.bf16.mxu0 %v6774_v31  ;;  %2873 = vmatprep.subr.bf16.mxu1 %v6777_v10 }
 0x9e2   :  { %2833 = vmatpush1.bf16.msra.mxu0 %v6780_v20  ;;  %2874 = vmatpush1.bf16.msra.mxu1 %v6783_v12  ;;  %v6801_v12 = vld [vmem:[#allocation10 + $0xec] ss:$16 sps:$4 sm:$0xff]  }
 0x9e3   :  { %2834 = vmatprep.subr.bf16.mxu0 %v6786_v63  ;;  %2875 = vmatprep.subr.bf16.mxu1 %v6789_v58  ;;  %7785 = vst [vmem:[#allocation59_spill] sm:$0xff] %v6801_v12 }
 0x9e6   :  { %2835 = vmatpush1.bf16.msra.mxu0 %v6792_v57  ;;  %2876 = vmatpush1.bf16.msra.mxu1 %v6795_v59 }
 0x9e7   :  { %3002 = vmatprep.subr.bf16.mxu0 %v6798_v21  ;;  %3043 = vmatprep.subr.bf16.mxu1 %v6801_v12 }
 0xa89   :  { %v2743_v63 = vpop.f32.mrf.mxu0  ;;  %v2784_v20 = vpop.f32.mrf.mxu1 }
 0xa8a   :  { %v2744_v58 = vadd.f32 %v2743_v63, %v6658_v40  ;;  %v2785_v12 = vadd.f32 %v2784_v20, %v6660_v62 }
 0xa8b   :  { %v2745_v10 = vpop.f32.mrf.mxu0  ;;  %v2786_v31 = vpop.f32.mrf.mxu1 }
 0xa8c   :  { %v2791_v57 = vadd.f32 %v2744_v58, %v5447_v1  ;;  %v2746_v5 = vadd.f32 %v2745_v10, %v6666_v61  ;;  %v2793_v40 = vadd.f32 %v2785_v12, %v5451_v3  ;;  %v2787_v63 = vadd.f32 %v2786_v31, %v6668_v53 }
 0xa8d   :  { %v2747_v34 = vpop.f32.mrf.mxu0  ;;  %v2788_v59 = vpop.f32.mrf.mxu1 }
 0xa8e   :  { %v4383_v14 = vmul.f32 -1.442695, %v2791_v57  ;;  %v2792_v29 = vadd.f32 %v2746_v5, %v7626_v50  ;;  %v4385_v6 = vmul.f32 -1.442695, %v2793_v40  ;;  %v2794_v61 = vadd.f32 %v2787_v63, %v5453_v4  ;;  %v6819_v40 = vld [vmem:[#allocation10 + $0xe8] ss:$16 sps:$4 sm:$0xff]  }
 0xa8f   :  { %v2748_v21 = vpop.f32.mrf.mxu0  ;;  %v2789_v0 = vpop.f32.mrf.mxu1  ;;  %v6825_v63 = vld [vmem:[#allocation10 + $0xcc] ss:$16 sps:$4 sm:$0xff]  }
 0xa90   :  { %4828 = vpow2.f32 %v4383_v14  ;;  %v4384_v25 = vmul.f32 -1.442695, %v2792_v29  ;;  %v6816_v21 = vld [vmem:[#allocation10 + $0xe0] ss:$16 sps:$4 sm:$0xff]  }
 0xa92   :  { %4830 = vpow2.f32 %v4384_v25 }
 0xa93   :  { %4832 = vpow2.f32 %v4385_v6 }
 0xa9d   :  { %v4829_v58 = vpop.eup %4828 }
 0xa9e   :  { %v2804_v34 = vadd.f32 1.0, %v4829_v58  ;;  %v6830_v58 = vld [vmem:[#allocation10 + $0xc0] ss:$16 sps:$4 sm:$0xff]  }
 0xa9f   :  { %v4831_v10 = vpop.eup %4830 }
 0xaa0   :  { %4834 = vrcp.f32 %v2804_v34  ;;  %v2805_v5 = vadd.f32 1.0, %v4831_v10  ;;  %v4833_v0 = vpop.eup %4832  ;;  %v6836_v34 = vld [vmem:[#allocation10 + $0xa4] ss:$16 sps:$4 sm:$0xff]   ;;  %v6839_v10 = vld [vmem:[#allocation10 + $0xac] ss:$16 sps:$4 sm:$0xff]  }
 0xaa1   :  { %4836 = vtanh.f32 %v2794_v61  ;;  %v2806_v62 = vadd.f32 1.0, %v4833_v0  ;;  %v6833_v61 = vld [vmem:[#allocation10 + $0xc8] ss:$16 sps:$4 sm:$0xff]   ;;  %7787 = vst [vmem:[#allocation61_spill] sm:$0xff] %v6836_v34  ;;  %7788 = vst [vmem:[#allocation62_spill] sm:$0xff] %v6839_v10 }
 0xaa2   :  { %4838 = vrcp.f32 %v2805_v5  ;;  %7786 = vst [vmem:[#allocation60_spill] sm:$0xff] %v6833_v61  ;;  %v6842_v5 = vld [vmem:[#allocation10 + $0xa0] ss:$16 sps:$4 sm:$0xff]   ;;  %v6845_v0 = vld [vmem:[#allocation10 + $0xa8] ss:$16 sps:$4 sm:$0xff]  }
 0xaa3   :  { %4840 = vrcp.f32 %v2806_v62  ;;  %7789 = vst [vmem:[#allocation63_spill] sm:$0xff] %v6842_v5  ;;  %7790 = vst [vmem:[#allocation64_spill] sm:$0xff] %v6845_v0  ;;  %v6857_v62 = vld [vmem:[#allocation10 + $0x88] ss:$16 sps:$4 sm:$0xff]  }
 0xaa4   :  { %7794 = vst [vmem:[#allocation68_spill] sm:$0xff] %v6857_v62 }
 0xaad   :  { %v4835_v29 = vpop.eup %4834 }
 0xaae   :  { %v4837_v25 = vpop.eup %4836 }
 0xaaf   :  { %v4839_v14 = vpop.eup %4838  ;;  %v2815_v12 = vmul.f32 %v4837_v25, %v4835_v29  ;;  %v6848_v29 = vld [vmem:[#allocation10 + $0x84] ss:$16 sps:$4 sm:$0xff]   ;;  %v6851_v25 = vld [vmem:[#allocation10 + $0x8c] ss:$16 sps:$4 sm:$0xff]  }
 0xab0   :  { %v2814_v20 = vmul.f32 %v4839_v14, %v6507_v17  ;;  %v4841_v31 = vpop.eup %4840  ;;  %v6822_v17 = vld [vmem:[#allocation10 + $0xc4] ss:$16 sps:$4 sm:$0xff]   ;;  %7791 = vst [vmem:[#allocation65_spill] sm:$0xff] %v6848_v29  ;;  %7792 = vst [vmem:[#allocation66_spill] sm:$0xff] %v6851_v25  ;;  %v6854_v14 = vld [vmem:[#allocation10 + $0x80] ss:$16 sps:$4 sm:$0xff]  }
 0xab1   :  { %7793 = vst [vmem:[#allocation67_spill] sm:$0xff] %v6854_v14 }
 0xab2   :  { %v6813_v53 = vadd.f32 %v2815_v12, %v2814_v20  ;;  %v6860_v20 = vld [vmem:[#allocation10 + $0x64] ss:$16 sps:$4 sm:$0xff]   ;;  %v6863_v12 = vld [vmem:[#allocation10 + $0x6c] ss:$16 sps:$4 sm:$0xff]  }
 0xab3   :  { %7795 = vst [vmem:[#allocation69_spill] sm:$0xff] %v6860_v20  ;;  %7796 = vst [vmem:[#allocation70_spill] sm:$0xff] %v6863_v12 }
 0xab4   :  { %4842 = vtanh.f32 %v6813_v53 }
 0xac1   :  { %v4843_v57 = vpop.eup %4842 }
 0xac2   :  { %v2818_v6 = vmul.f32 %v4843_v57, %v4841_v31  ;;  %v6866_v31 = vld [vmem:[#allocation10 + $0x60] ss:$16 sps:$4 sm:$0xff]   ;;  %v6869_v57 = vld [vmem:[#allocation10 + $0x68] ss:$16 sps:$4 sm:$0xff]  }
 0xac3   :  { %7797 = vst [vmem:[#allocation28_spill] sm:$0xff] %v6866_v31  ;;  %7798 = vst [vmem:[#allocation29_spill] sm:$0xff] %v6869_v57 }
 0xac4   :  { %v2819_v59 = vpack.c.bf16 %v2818_v6, %v2818_v6  ;;  %v6872_v6 = vld [vmem:[#allocation10 + $0x44] ss:$16 sps:$4 sm:$0xff]  }
 0xac5   :  { %7799 = vst [vmem:[#allocation71_spill] sm:$0xff] %v6872_v6 }
 0xac6   :  { %2853 = vmatmul.mubr.bf16.vlgmr.msra.gmra.mxu0 %v2819_v59  ;;  %2894 = vmatmul.mubr.bf16.vlgmr.msra.gmra.mxu1 %v2819_v59  ;;  %v6875_v59 = vld [vmem:[#allocation10 + $0x4c] ss:$16 sps:$4 sm:$0xff]  }
 0xac7   :  { %3003 = vmatpush1.bf16.msra.mxu0 %v6816_v21  ;;  %3044 = vmatpush1.bf16.msra.mxu1 %v6819_v40  ;;  %7800 = vst [vmem:[#allocation72_spill] sm:$0xff] %v6875_v59 }
 0xac8   :  { %3004 = vmatprep.subr.bf16.mxu0 %v6822_v17  ;;  %3045 = vmatprep.subr.bf16.mxu1 %v6825_v63 }
 0xac9   :  { %3034 = vmatprep.mubr.bf16.mxu0 %v7586_v24  ;;  %3075 = vmatprep.mubr.bf16.mxu1 %v7586_v24 }
 0xacb   :  { %3005 = vmatpush1.bf16.msra.mxu0 %v6830_v58  ;;  %3046 = vmatpush1.bf16.msra.mxu1 %v6833_v61 }
 0xacc   :  { %3006 = vmatprep.subr.bf16.mxu0 %v6836_v34  ;;  %3047 = vmatprep.subr.bf16.mxu1 %v6839_v10 }
 0xacf   :  { %3007 = vmatpush1.bf16.msra.mxu0 %v6842_v5  ;;  %3048 = vmatpush1.bf16.msra.mxu1 %v6845_v0 }
 0xad0   :  { %3008 = vmatprep.subr.bf16.mxu0 %v6848_v29  ;;  %3049 = vmatprep.subr.bf16.mxu1 %v6851_v25  ;;  %v2960_v25 = vld [vmem:[%s6954_s15 + $0x18] sm:$0xff] }
 0xad3   :  { %3009 = vmatpush1.bf16.msra.mxu0 %v6854_v14  ;;  %3050 = vmatpush1.bf16.msra.mxu1 %v6857_v62 }
 0xad4   :  { %3010 = vmatprep.subr.bf16.mxu0 %v6860_v20  ;;  %3051 = vmatprep.subr.bf16.mxu1 %v6863_v12  ;;  %v6878_v20 = vld [vmem:[#allocation10 + $0x40] ss:$16 sps:$4 sm:$0xff]   ;;  %v6881_v12 = vld [vmem:[#allocation10 + $0x48] ss:$16 sps:$4 sm:$0xff]  }
 0xad5   :  { %7801 = vst [vmem:[#allocation73_spill] sm:$0xff] %v6878_v20  ;;  %7802 = vst [vmem:[#allocation74_spill] sm:$0xff] %v6881_v12 }
 0xad7   :  { %3011 = vmatpush1.bf16.msra.mxu0 %v6866_v31  ;;  %3052 = vmatpush1.bf16.msra.mxu1 %v6869_v57  ;;  %v6884_v31 = vld [vmem:[#allocation10 + $0x24] ss:$16 sps:$4 sm:$0xff]   ;;  %v6887_v57 = vld [vmem:[#allocation10 + $0x2c] ss:$16 sps:$4 sm:$0xff]  }
 0xad8   :  { %3012 = vmatprep.subr.bf16.mxu0 %v6872_v6  ;;  %3053 = vmatprep.subr.bf16.mxu1 %v6875_v59  ;;  %7803 = vst [vmem:[#allocation75_spill] sm:$0xff] %v6884_v31  ;;  %7804 = vst [vmem:[#allocation76_spill] sm:$0xff] %v6887_v57  ;;  %v6890_v6 = vld [vmem:[#allocation10 + $0x20] ss:$16 sps:$4 sm:$0xff]   ;;  %v6893_v59 = vld [vmem:[#allocation10 + $0x28] ss:$16 sps:$4 sm:$0xff]  }
 0xad9   :  { %7805 = vst [vmem:[#allocation77_spill] sm:$0xff] %v6890_v6  ;;  %7806 = vst [vmem:[#allocation78_spill] sm:$0xff] %v6893_v59 }
 0xadb   :  { %3013 = vmatpush1.bf16.msra.mxu0 %v6878_v20  ;;  %3054 = vmatpush1.bf16.msra.mxu1 %v6881_v12  ;;  %v6896_v20 = vld [vmem:[#allocation10 + $0x4] ss:$16 sps:$4 sm:$0xff]   ;;  %v6899_v12 = vld [vmem:[#allocation10 + $0xc] ss:$16 sps:$4 sm:$0xff]  }
 0xadc   :  { %3014 = vmatprep.subr.bf16.mxu0 %v6884_v31  ;;  %3055 = vmatprep.subr.bf16.mxu1 %v6887_v57  ;;  %7807 = vst [vmem:[#allocation79_spill] sm:$0xff] %v6896_v20  ;;  %7808 = vst [vmem:[#allocation80_spill] sm:$0xff] %v6899_v12  ;;  %v6902_v31 = vld [vmem:[#allocation10] ss:$16 sps:$4 sm:$0xff]   ;;  %v6905_v57 = vld [vmem:[#allocation10 + $0x8] ss:$16 sps:$4 sm:$0xff]  }
 0xadd   :  { %7809 = vst [vmem:[#allocation31_spill] sm:$0xff] %v6902_v31  ;;  %7810 = vst [vmem:[#allocation30_spill] sm:$0xff] %v6905_v57 }
 0xadf   :  { %3015 = vmatpush1.bf16.msra.mxu0 %v6890_v6  ;;  %3056 = vmatpush1.bf16.msra.mxu1 %v6893_v59 }
 0xae0   :  { %3016 = vmatprep.subr.bf16.mxu0 %v6896_v20  ;;  %3057 = vmatprep.subr.bf16.mxu1 %v6899_v12 }
 0xae3   :  { %3017 = vmatpush1.bf16.msra.mxu0 %v6902_v31  ;;  %3058 = vmatpush1.bf16.msra.mxu1 %v6905_v57  ;;  %v2959_v31 = vld [vmem:[%s6954_s15 + $0x10] sm:$0xff] }
 0xae4   :  { %3113 = vmatprep.subr.bf16.mxu0 %v6542_v47  ;;  %3154 = vmatprep.subr.bf16.mxu1 %v6545_v42  ;;  %v7811_v47 = vld [vmem:[#allocation32_spill] sm:$0xff]  ;;  %v7812_v42 = vld [vmem:[#allocation33_spill] sm:$0xff] }
 0xae6   :  { %3035 = vmatmul.mubr.bf16.vlgmr.msra.gmra.mxu0 %v6702_v60  ;;  %3076 = vmatmul.mubr.bf16.vlgmr.msra.gmra.mxu1 %v6702_v60 }
 0xae7   :  { %3114 = vmatpush1.bf16.msra.mxu0 %v6550_v48  ;;  %3155 = vmatpush1.bf16.msra.mxu1 %v6553_v56  ;;  %v7813_v48 = vld [vmem:[#allocation35_spill] sm:$0xff]  ;;  %v7814_v56 = vld [vmem:[#allocation34_spill] sm:$0xff] }
 0xae8   :  { %3115 = vmatprep.subr.bf16.mxu0 %v6556_v43  ;;  %3156 = vmatprep.subr.bf16.mxu1 %v6559_v8  ;;  %v7815_v43 = vld [vmem:[#allocation36_spill] sm:$0xff]  ;;  %v7816_v8 = vld [vmem:[#allocation37_spill] sm:$0xff] }
 0xae9   :  { %3145 = vmatprep.mubr.bf16.mxu0 %v7586_v24  ;;  %3186 = vmatprep.mubr.bf16.mxu1 %v7586_v24 }
 0xaeb   :  { %3116 = vmatpush1.bf16.msra.mxu0 %v6564_v26  ;;  %3157 = vmatpush1.bf16.msra.mxu1 %v6567_v35  ;;  %v7817_v26 = vld [vmem:[#allocation39_spill] sm:$0xff]  ;;  %v7818_v35 = vld [vmem:[#allocation38_spill] sm:$0xff] }
 0xaec   :  { %3117 = vmatprep.subr.bf16.mxu0 %v6570_v49  ;;  %3158 = vmatprep.subr.bf16.mxu1 %v6573_v55  ;;  %v7819_v49 = vld [vmem:[#allocation40_spill] sm:$0xff]  ;;  %v7820_v55 = vld [vmem:[#allocation41_spill] sm:$0xff] }
 0xaef   :  { %3118 = vmatpush1.bf16.msra.mxu0 %v6576_v37  ;;  %3159 = vmatpush1.bf16.msra.mxu1 %v6579_v9  ;;  %v7821_v37 = vld [vmem:[#allocation42_spill] sm:$0xff]  ;;  %v7822_v9 = vld [vmem:[#allocation43_spill] sm:$0xff] }
 0xaf0   :  { %3119 = vmatprep.subr.bf16.mxu0 %v6582_v15  ;;  %3160 = vmatprep.subr.bf16.mxu1 %v6585_v11  ;;  %v6944_v15 = vld [vmem:[#allocation3 + $0xe4] ss:$16 sps:$4 sm:$0xff]   ;;  %v6947_v11 = vld [vmem:[#allocation3 + $0xec] ss:$16 sps:$4 sm:$0xff]  }
 0xaf1   :  { %7823 = vst [vmem:[#allocation32_spill] sm:$0xff] %v6944_v15  ;;  %7824 = vst [vmem:[#allocation33_spill] sm:$0xff] %v6947_v11 }
 0xaf3   :  { %3120 = vmatpush1.bf16.msra.mxu0 %v6588_v39  ;;  %3161 = vmatpush1.bf16.msra.mxu1 %v6591_v19  ;;  %v2912_v39 = vstv %s2911_s13  ;;  %v2962_v19 = vstv %s2961_s14 }
 0xaf4   :  { %3121 = vmatprep.subr.bf16.mxu0 %v6594_v27  ;;  %3162 = vmatprep.subr.bf16.mxu1 %v6597_v52  ;;  %v2907_v27 = vld [vmem:[%s6950_s0] sm:$0xff]  ;;  %vm2913_vm12 = vcmp.eq.s32.totalorder %v5466_v38, %v2912_v39  ;;  %vm2963_vm13 = vcmp.eq.s32.totalorder %v5466_v38, %v2962_v19 }
 0xaf5   :  { %v2957_v52 = vld [vmem:[%s6954_s15] sm:$0xff]  ;;  %v2916_v60 = vsel %vm2913_vm12, %v2907_v27, 0.0 }
 0xaf7   :  { %3122 = vmatpush1.bf16.msra.mxu0 %v6600_v16  ;;  %3163 = vmatpush1.bf16.msra.mxu1 %v6603_v22  ;;  %v2908_v16 = vld [vmem:[%s6950_s0 + $0x8] sm:$0xff] }
 0xaf8   :  { %3123 = vmatprep.subr.bf16.mxu0 %v7811_v47  ;;  %3164 = vmatprep.subr.bf16.mxu1 %v7812_v42  ;;  %v2958_v22 = vld [vmem:[%s6954_s15 + $0x8] sm:$0xff]  ;;  %v2966_v47 = vsel %vm2963_vm13, %v2957_v52, 0.0 }
 0xafb   :  { %3124 = vmatpush1.bf16.msra.mxu0 %v7813_v48  ;;  %3165 = vmatpush1.bf16.msra.mxu1 %v7814_v56  ;;  %v2917_v56 = vsel %vm2913_vm12, %v2908_v16, 0.0  ;;  %v2909_v16 = vld [vmem:[%s6950_s0 + $0x10] sm:$0xff] }
 0xafc   :  { %3125 = vmatprep.subr.bf16.mxu0 %v7815_v43  ;;  %3166 = vmatprep.subr.bf16.mxu1 %v7816_v8  ;;  %v2967_v43 = vsel %vm2963_vm13, %v2958_v22, 0.0  ;;  %v2918_v6 = vsel %vm2913_vm12, %v2909_v16, 0.0 }
 0xafd   :  { %v2976_v27 = vrot.slane %v2967_v43, 4 }
 0xaff   :  { %3126 = vmatpush1.bf16.msra.mxu0 %v7817_v26  ;;  %3167 = vmatpush1.bf16.msra.mxu1 %v7818_v35  ;;  %v2920_v35 = vrot.slane %v2916_v60, 4  ;;  %v2977_v22 = vadd.f32 %v2976_v27, %v2967_v43  ;;  %v2969_v43 = vsel %vm2963_vm13, %v2960_v25, 0.0 }
 0xb00   :  { %3127 = vmatprep.subr.bf16.mxu0 %v7819_v49  ;;  %3168 = vmatprep.subr.bf16.mxu1 %v7820_v55  ;;  %v2970_v49 = vrot.slane %v2966_v47, 4  ;;  %v2988_v0 = vrot.slane %v2969_v43, 4 }
 0xb01   :  { %v2978_v62 = vrot.slane %v2977_v22, 2 }
 0xb02   :  { %v2971_v57 = vadd.f32 %v2970_v49, %v2966_v47 }
 0xb03   :  { %3128 = vmatpush1.bf16.msra.mxu0 %v7821_v37  ;;  %3169 = vmatpush1.bf16.msra.mxu1 %v7822_v9  ;;  %v2926_v9 = vrot.slane %v2917_v56, 4  ;;  %v2979_v49 = vadd.f32 %v2978_v62, %v2977_v22  ;;  %v2989_v62 = vadd.f32 %v2988_v0, %v2969_v43 }
 0xb04   :  { %3224 = vmatprep.subr.bf16.mxu0 %v6944_v15  ;;  %3265 = vmatprep.subr.bf16.mxu1 %v6947_v11  ;;  %v2921_v15 = vadd.f32 %v2920_v35, %v2916_v60  ;;  %v2972_v59 = vrot.slane %v2971_v57, 2 }
 0xb05   :  { %v2927_v12 = vadd.f32 %v2926_v9, %v2917_v56  ;;  %v2980_v10 = vrot.slane %v2979_v49, 1  ;;  %v2990_v19 = vrot.slane %v2989_v62, 2 }
 0xb06   :  { %v2922_v20 = vrot.slane %v2921_v15, 2  ;;  %v2973_v47 = vadd.f32 %v2972_v59, %v2971_v57 }
 0xb08   :  { %v2923_v60 = vadd.f32 %v2922_v20, %v2921_v15  ;;  %v2981_v15 = vadd.f32 %v2980_v10, %v2979_v49 }
 0xb0a   :  { %v2924_v16 = vrot.slane %v2923_v60, 1 }
 0xb0c   :  { %v2925_v20 = vadd.f32 %v2924_v16, %v2923_v60 }
 0xb0e   :  { %v2944_v25 = vsel %vm148_vm2, %v2925_v20, 0.0 }
 0xb86   :  { %v6964_v42 = vpop.f32.mrf.mxu0  ;;  %v6966_v48 = vpop.f32.mrf.mxu1 }
 0xb88   :  { %v6972_v8 = vpop.f32.mrf.mxu0  ;;  %v6974_v26 = vpop.f32.mrf.mxu1 }
 0xb8a   :  { %v2858_v55 = vpop.f32.mrf.mxu0  ;;  %v2899_v37 = vpop.f32.mrf.mxu1 }
 0xb8b   :  { %v2968_v55 = vsel %vm2963_vm13, %v2959_v31, 0.0  ;;  %v2928_v37 = vrot.slane %v2927_v12, 2  ;;  %v2974_v31 = vrot.slane %v2973_v47, 1 }
 0xb8c   :  { %v2859_v52 = vpop.f32.mrf.mxu0  ;;  %v2900_v11 = vpop.f32.mrf.mxu1  ;;  %v2982_v14 = vrot.slane %v2968_v55, 4 }
 0xb8d   :  { %v2932_v52 = vrot.slane %v2918_v6, 4  ;;  %v2910_v11 = vld [vmem:[%s6950_s0 + $0x18] sm:$0xff]  ;;  %v2929_v35 = vadd.f32 %v2928_v37, %v2927_v12  ;;  %v2975_v57 = vadd.f32 %v2974_v31, %v2973_v47  ;;  %v2995_v37 = vsel %vm201_vm3, %v2981_v15, 0.0 }
 0xb8e   :  { %v2919_v56 = vsel %vm2913_vm12, %v2910_v11, 0.0  ;;  %v2983_v27 = vadd.f32 %v2982_v14, %v2968_v55 }
 0xb8f   :  { %v2933_v9 = vadd.f32 %v2932_v52, %v2918_v6  ;;  %v2938_v29 = vrot.slane %v2919_v56, 4  ;;  %v2930_v5 = vrot.slane %v2929_v35, 1  ;;  %v2994_v14 = vsel %vm201_vm3, %v2975_v57, 0.0 }
 0xb90   :  { %v2984_v61 = vrot.slane %v2983_v27, 2 }
 0xb91   :  { %v2934_v34 = vrot.slane %v2933_v9, 2  ;;  %v2939_v12 = vadd.f32 %v2938_v29, %v2919_v56  ;;  %v2931_v59 = vadd.f32 %v2930_v5, %v2929_v35  ;;  %v2998_v29 = vadd.f32 %v2994_v14, %v2944_v25 }
 0xb92   :  { %v2985_v22 = vadd.f32 %v2984_v61, %v2983_v27  ;;  %v2991_v61 = vadd.f32 %v2990_v19, %v2989_v62 }
 0xb93   :  { %v2935_v39 = vadd.f32 %v2934_v34, %v2933_v9  ;;  %v2940_v6 = vrot.slane %v2939_v12, 2  ;;  %v2945_v55 = vsel %vm148_vm2, %v2931_v59, 0.0 }
 0xb94   :  { %v2986_v5 = vrot.slane %v2985_v22, 1  ;;  %v2999_v10 = vadd.f32 %v2995_v37, %v2945_v55  ;;  %v2992_v16 = vrot.slane %v2991_v61, 1 }
 0xb95   :  { %v2936_v0 = vrot.slane %v2935_v39, 1  ;;  %v2941_v34 = vadd.f32 %v2940_v6, %v2939_v12 }
 0xb96   :  { %v2987_v35 = vadd.f32 %v2986_v5, %v2985_v22  ;;  %v2993_v22 = vadd.f32 %v2992_v16, %v2991_v61 }
 0xb97   :  { %v2937_v47 = vadd.f32 %v2936_v0, %v2935_v39  ;;  %v2942_v27 = vrot.slane %v2941_v34, 1 }
 0xb98   :  { %v2996_v12 = vsel %vm201_vm3, %v2987_v35, 0.0  ;;  %v2997_v6 = vsel %vm201_vm3, %v2993_v22, 0.0 }
 0xb99   :  { %v2946_v57 = vsel %vm148_vm2, %v2937_v47, 0.0  ;;  %v2943_v39 = vadd.f32 %v2942_v27, %v2941_v34 }
 0xb9a   :  { %v3000_v25 = vadd.f32 %v2996_v12, %v2946_v57 }
 0xb9b   :  { %v2947_v14 = vsel %vm148_vm2, %v2943_v39, 0.0 }
 0xb9c   :  { %v3001_v55 = vadd.f32 %v2997_v6, %v2947_v14 }
 0xba6   :  { %v3036_v52 = vpop.f32.mrf.mxu0  ;;  %v3077_v11 = vpop.f32.mrf.mxu1 }
 0xba7   :  { %v3084_v60 = vadd.f32 %v3036_v52, %v2998_v29  ;;  %v3086_v19 = vadd.f32 %v3077_v11, %v3000_v25 }
 0xba8   :  { %v3038_v49 = vpop.f32.mrf.mxu0  ;;  %v3079_v56 = vpop.f32.mrf.mxu1 }
 0xba9   :  { %v4392_v43 = vmul.f32 -1.442695, %v3084_v60  ;;  %v3085_v9 = vadd.f32 %v3038_v49, %v2999_v10  ;;  %v4394_v37 = vmul.f32 -1.442695, %v3086_v19  ;;  %v3087_v0 = vadd.f32 %v3079_v56, %v3001_v55 }
 0xbaa   :  { %v3040_v31 = vpop.f32.mrf.mxu0  ;;  %v3081_v20 = vpop.f32.mrf.mxu1 }
 0xbab   :  { %4844 = vpow2.f32 %v4392_v43  ;;  %v4393_v62 = vmul.f32 -1.442695, %v3085_v9  ;;  %v7841_v31 = vld [vmem:[#allocation59_spill] sm:$0xff] }
 0xbac   :  { %v3041_v59 = vpop.f32.mrf.mxu0  ;;  %v3082_v15 = vpop.f32.mrf.mxu1 }
 0xbad   :  { %4846 = vpow2.f32 %v4393_v62 }
 0xbae   :  { %4848 = vpow2.f32 %v4394_v37 }
 0xbb8   :  { %v4845_v29 = vpop.eup %4844 }
 0xbb9   :  { %v3097_v5 = vadd.f32 1.0, %v4845_v29 }
 0xbba   :  { %v4847_v10 = vpop.eup %4846 }
 0xbbb   :  { %4850 = vrcp.f32 %v3097_v5  ;;  %v3098_v52 = vadd.f32 1.0, %v4847_v10  ;;  %v4849_v34 = vpop.eup %4848 }
 0xbbc   :  { %4852 = vtanh.f32 %v3087_v0  ;;  %v3099_v35 = vadd.f32 1.0, %v4849_v34 }
 0xbbd   :  { %4854 = vrcp.f32 %v3098_v52 }
 0xbbe   :  { %4856 = vrcp.f32 %v3099_v35 }
 0xbc8   :  { %v4851_v61 = vpop.eup %4850 }
 0xbc9   :  { %v4853_v60 = vpop.eup %4852 }
 0xbca   :  { %v4855_v47 = vpop.eup %4854  ;;  %v3108_v43 = vmul.f32 %v4853_v60, %v4851_v61 }
 0xbcb   :  { %v3107_v49 = vmul.f32 %v4855_v47, %v6699_v28  ;;  %v4857_v56 = vpop.eup %4856  ;;  %v7825_v28 = vld [vmem:[#allocation44_spill] sm:$0xff] }
 0xbcd   :  { %v7005_v11 = vadd.f32 %v3108_v43, %v3107_v49 }
 0xbcf   :  { %4858 = vtanh.f32 %v7005_v11 }
 0xbdc   :  { %v4859_v9 = vpop.eup %4858 }
 0xbdd   :  { %v3111_v27 = vmul.f32 %v4859_v9, %v4857_v56 }
 0xbdf   :  { %v7008_v16 = vpack.c.bf16 %v3111_v27, %v3111_v27 }
 0xbe1   :  { %3146 = vmatmul.mubr.bf16.vlgmr.msra.gmra.mxu0 %v7008_v16  ;;  %3187 = vmatmul.mubr.bf16.vlgmr.msra.gmra.mxu1 %v7008_v16 }
 0xbe2   :  { %3225 = vmatpush1.bf16.msra.mxu0 %v6706_v44  ;;  %3266 = vmatpush1.bf16.msra.mxu1 %v6709_v46  ;;  %v7826_v44 = vld [vmem:[#allocation45_spill] sm:$0xff]  ;;  %v7827_v46 = vld [vmem:[#allocation46_spill] sm:$0xff] }
 0xbe3   :  { %3226 = vmatprep.subr.bf16.mxu0 %v6712_v33  ;;  %3267 = vmatprep.subr.bf16.mxu1 %v6715_v32  ;;  %v7828_v33 = vld [vmem:[#allocation47_spill] sm:$0xff]  ;;  %v7829_v32 = vld [vmem:[#allocation48_spill] sm:$0xff] }
 0xbe4   :  { %3256 = vmatprep.mubr.bf16.mxu0 %v7586_v24  ;;  %3297 = vmatprep.mubr.bf16.mxu1 %v7586_v24 }
 0xbe6   :  { %3227 = vmatpush1.bf16.msra.mxu0 %v6720_v45  ;;  %3268 = vmatpush1.bf16.msra.mxu1 %v6723_v51  ;;  %v7830_v45 = vld [vmem:[#allocation49_spill] sm:$0xff]  ;;  %v7831_v51 = vld [vmem:[#allocation50_spill] sm:$0xff] }
 0xbe7   :  { %3228 = vmatprep.subr.bf16.mxu0 %v6726_v54  ;;  %3269 = vmatprep.subr.bf16.mxu1 %v6729_v13  ;;  %v7832_v54 = vld [vmem:[#allocation51_spill] sm:$0xff]  ;;  %v7833_v13 = vld [vmem:[#allocation52_spill] sm:$0xff] }
 0xbea   :  { %3229 = vmatpush1.bf16.msra.mxu0 %v6732_v2  ;;  %3270 = vmatpush1.bf16.msra.mxu1 %v6735_v30  ;;  %v7834_v2 = vld [vmem:[#allocation53_spill] sm:$0xff]  ;;  %v7835_v30 = vld [vmem:[#allocation54_spill] sm:$0xff] }
 0xbeb   :  { %3230 = vmatprep.subr.bf16.mxu0 %v6738_v23  ;;  %3271 = vmatprep.subr.bf16.mxu1 %v6741_v41  ;;  %v7836_v23 = vld [vmem:[#allocation27_spill] sm:$0xff] }
 0xbec   :  { %v7837_v41 = vld [vmem:[#allocation55_spill] sm:$0xff] }
 0xbee   :  { %3231 = vmatpush1.bf16.msra.mxu0 %v6744_v7  ;;  %3272 = vmatpush1.bf16.msra.mxu1 %v6747_v36  ;;  %v7838_v7 = vld [vmem:[#allocation56_spill] sm:$0xff]  ;;  %v7839_v36 = vld [vmem:[#allocation57_spill] sm:$0xff] }
 0xbef   :  { %3232 = vmatprep.subr.bf16.mxu0 %v6750_v18  ;;  %3273 = vmatprep.subr.bf16.mxu1 %v7825_v28  ;;  %v7840_v18 = vld [vmem:[#allocation58_spill] sm:$0xff] }
 0xbf2   :  { %3233 = vmatpush1.bf16.msra.mxu0 %v7826_v44  ;;  %3274 = vmatpush1.bf16.msra.mxu1 %v7827_v46  ;;  %v7843_v46 = vld [vmem:[#allocation61_spill] sm:$0xff] }
 0xbf3   :  { %3234 = vmatprep.subr.bf16.mxu0 %v7828_v33  ;;  %3275 = vmatprep.subr.bf16.mxu1 %v7829_v32  ;;  %v7844_v33 = vld [vmem:[#allocation62_spill] sm:$0xff]  ;;  %v7845_v32 = vld [vmem:[#allocation63_spill] sm:$0xff] }
 0xbf6   :  { %3235 = vmatpush1.bf16.msra.mxu0 %v7830_v45  ;;  %3276 = vmatpush1.bf16.msra.mxu1 %v7831_v51  ;;  %v7850_v45 = vld [vmem:[#allocation68_spill] sm:$0xff]  ;;  %v7851_v51 = vld [vmem:[#allocation69_spill] sm:$0xff] }
 0xbf7   :  { %3236 = vmatprep.subr.bf16.mxu0 %v7832_v54  ;;  %3277 = vmatprep.subr.bf16.mxu1 %v7833_v13  ;;  %v7853_v54 = vld [vmem:[#allocation28_spill] sm:$0xff]  ;;  %v7854_v13 = vld [vmem:[#allocation29_spill] sm:$0xff] }
 0xbfa   :  { %3237 = vmatpush1.bf16.msra.mxu0 %v7834_v2  ;;  %3278 = vmatpush1.bf16.msra.mxu1 %v7835_v30  ;;  %v7855_v2 = vld [vmem:[#allocation71_spill] sm:$0xff]  ;;  %v7856_v30 = vld [vmem:[#allocation72_spill] sm:$0xff] }
 0xbfb   :  { %3238 = vmatprep.subr.bf16.mxu0 %v7836_v23  ;;  %3279 = vmatprep.subr.bf16.mxu1 %v7837_v41  ;;  %v7857_v23 = vld [vmem:[#allocation73_spill] sm:$0xff]  ;;  %v7858_v41 = vld [vmem:[#allocation74_spill] sm:$0xff] }
 0xbfe   :  { %3239 = vmatpush1.bf16.msra.mxu0 %v7838_v7  ;;  %3280 = vmatpush1.bf16.msra.mxu1 %v7839_v36  ;;  %v7859_v7 = vld [vmem:[#allocation75_spill] sm:$0xff]  ;;  %v7860_v36 = vld [vmem:[#allocation76_spill] sm:$0xff] }
 0xbff   :  { %3406 = vmatprep.subr.bf16.mxu0 %v7840_v18  ;;  %3447 = vmatprep.subr.bf16.mxu1 %v7841_v31  ;;  %v7861_v18 = vld [vmem:[#allocation77_spill] sm:$0xff]  ;;  %v7862_v31 = vld [vmem:[#allocation78_spill] sm:$0xff] }
 0xca1   :  { %v3147_v20 = vpop.f32.mrf.mxu0  ;;  %v3188_v57 = vpop.f32.mrf.mxu1 }
 0xca2   :  { %v3148_v12 = vadd.f32 %v3147_v20, %v6964_v42  ;;  %v3189_v29 = vadd.f32 %v3188_v57, %v6966_v48  ;;  %v7863_v20 = vld [vmem:[#allocation79_spill] sm:$0xff]  ;;  %v7864_v57 = vld [vmem:[#allocation80_spill] sm:$0xff] }
 0xca3   :  { %v3149_v62 = vpop.f32.mrf.mxu0  ;;  %v3190_v59 = vpop.f32.mrf.mxu1 }
 0xca4   :  { %v3195_v15 = vadd.f32 %v3148_v12, %v5447_v1  ;;  %v3150_v39 = vadd.f32 %v3149_v62, %v6972_v8  ;;  %v3197_v42 = vadd.f32 %v3189_v29, %v5451_v3  ;;  %v3191_v0 = vadd.f32 %v3190_v59, %v6974_v26  ;;  %v7865_v12 = vld [vmem:[#allocation31_spill] sm:$0xff]  ;;  %v7866_v62 = vld [vmem:[#allocation30_spill] sm:$0xff] }
 0xca5   :  { %v3151_v22 = vpop.f32.mrf.mxu0  ;;  %v3192_v25 = vpop.f32.mrf.mxu1  ;;  %v7090_v59 = vld [vmem:[#allocation2 + $0xe4] ss:$16 sps:$4 sm:$0xff]   ;;  %v7127_v29 = vld [vmem:[#allocation2 + $0xa8] ss:$16 sps:$4 sm:$0xff]  }
 0xca6   :  { %v4395_v14 = vmul.f32 -1.442695, %v3195_v15  ;;  %v3196_v6 = vadd.f32 %v3150_v39, %v7626_v50  ;;  %v4397_v5 = vmul.f32 -1.442695, %v3197_v42  ;;  %v3198_v8 = vadd.f32 %v3191_v0, %v5453_v4  ;;  %v7093_v15 = vld [vmem:[#allocation2 + $0xec] ss:$16 sps:$4 sm:$0xff]  }
 0xca7   :  { %v3152_v19 = vpop.f32.mrf.mxu0  ;;  %v3193_v55 = vpop.f32.mrf.mxu1  ;;  %v7098_v39 = vld [vmem:[#allocation2 + $0xe0] ss:$16 sps:$4 sm:$0xff]   ;;  %v7101_v22 = vld [vmem:[#allocation2 + $0xe8] ss:$16 sps:$4 sm:$0xff]   ;;  %v7104_v25 = vld [vmem:[#allocation2 + $0xc4] ss:$16 sps:$4 sm:$0xff]  }
 0xca8   :  { %4860 = vpow2.f32 %v4395_v14  ;;  %v4396_v37 = vmul.f32 -1.442695, %v3196_v6  ;;  %v7107_v14 = vld [vmem:[#allocation2 + $0xcc] ss:$16 sps:$4 sm:$0xff]   ;;  %v7115_v6 = vld [vmem:[#allocation2 + $0xc8] ss:$16 sps:$4 sm:$0xff]  }
 0xca9   :  { %v7118_v19 = vld [vmem:[#allocation2 + $0xa4] ss:$16 sps:$4 sm:$0xff]   ;;  %v7121_v55 = vld [vmem:[#allocation2 + $0xac] ss:$16 sps:$4 sm:$0xff]  }
 0xcaa   :  { %4862 = vpow2.f32 %v4396_v37  ;;  %v7124_v37 = vld [vmem:[#allocation2 + $0xa0] ss:$16 sps:$4 sm:$0xff]   ;;  %v7130_v42 = vld [vmem:[#allocation2 + $0x84] ss:$16 sps:$4 sm:$0xff]   ;;  %v7133_v0 = vld [vmem:[#allocation2 + $0x8c] ss:$16 sps:$4 sm:$0xff]  }
 0xcab   :  { %4864 = vpow2.f32 %v4397_v5  ;;  %v7136_v5 = vld [vmem:[#allocation2 + $0x80] ss:$16 sps:$4 sm:$0xff]  }
 0xcb5   :  { %v4861_v10 = vpop.eup %4860 }
 0xcb6   :  { %v3208_v52 = vadd.f32 1.0, %v4861_v10  ;;  %v7139_v10 = vld [vmem:[#allocation2 + $0x88] ss:$16 sps:$4 sm:$0xff]  }
 0xcb7   :  { %v4863_v34 = vpop.eup %4862 }
 0xcb8   :  { %4866 = vrcp.f32 %v3208_v52  ;;  %v3209_v61 = vadd.f32 1.0, %v4863_v34  ;;  %v4865_v60 = vpop.eup %4864  ;;  %v7145_v52 = vld [vmem:[#allocation2 + $0x6c] ss:$16 sps:$4 sm:$0xff]   ;;  %v7148_v34 = vld [vmem:[#allocation2 + $0x60] ss:$16 sps:$4 sm:$0xff]  }
 0xcb9   :  { %4868 = vtanh.f32 %v3198_v8  ;;  %v3210_v48 = vadd.f32 1.0, %v4865_v60  ;;  %v7142_v8 = vld [vmem:[#allocation2 + $0x64] ss:$16 sps:$4 sm:$0xff]  }
 0xcba   :  { %4870 = vrcp.f32 %v3209_v61  ;;  %v7151_v61 = vld [vmem:[#allocation2 + $0x68] ss:$16 sps:$4 sm:$0xff]   ;;  %v7154_v60 = vld [vmem:[#allocation2 + $0x44] ss:$16 sps:$4 sm:$0xff]  }
 0xcbb   :  { %4872 = vrcp.f32 %v3210_v48  ;;  %7867 = vst [vmem:[#allocation35_spill] sm:$0xff] %v7154_v60  ;;  %v7166_v48 = vld [vmem:[#allocation2 + $0x24] ss:$16 sps:$4 sm:$0xff]  }
 0xcbc   :  { %7871 = vst [vmem:[#allocation39_spill] sm:$0xff] %v7166_v48 }
 0xcc5   :  { %v4867_v47 = vpop.eup %4866 }
 0xcc6   :  { %v4869_v35 = vpop.eup %4868 }
 0xcc7   :  { %v4871_v49 = vpop.eup %4870  ;;  %v3219_v56 = vmul.f32 %v4869_v35, %v4867_v47  ;;  %v7157_v47 = vld [vmem:[#allocation2 + $0x4c] ss:$16 sps:$4 sm:$0xff]   ;;  %v7160_v35 = vld [vmem:[#allocation2 + $0x40] ss:$16 sps:$4 sm:$0xff]  }
 0xcc8   :  { %v3218_v43 = vmul.f32 %v4871_v49, %v6813_v53  ;;  %v4873_v9 = vpop.eup %4872  ;;  %v7842_v53 = vld [vmem:[#allocation60_spill] sm:$0xff]  ;;  %7868 = vst [vmem:[#allocation34_spill] sm:$0xff] %v7157_v47  ;;  %7869 = vst [vmem:[#allocation36_spill] sm:$0xff] %v7160_v35 }
 0xcc9   :  { %v7163_v49 = vld [vmem:[#allocation2 + $0x48] ss:$16 sps:$4 sm:$0xff]  }
 0xcca   :  { %v7055_v26 = vadd.f32 %v3219_v56, %v3218_v43  ;;  %7870 = vst [vmem:[#allocation37_spill] sm:$0xff] %v7163_v49  ;;  %v7169_v43 = vld [vmem:[#allocation2 + $0x2c] ss:$16 sps:$4 sm:$0xff]   ;;  %v7172_v56 = vld [vmem:[#allocation2 + $0x20] ss:$16 sps:$4 sm:$0xff]  }
 0xccb   :  { %7872 = vst [vmem:[#allocation38_spill] sm:$0xff] %v7169_v43  ;;  %7873 = vst [vmem:[#allocation40_spill] sm:$0xff] %v7172_v56 }
 0xccc   :  { %4874 = vtanh.f32 %v7055_v26 }
 0xcd9   :  { %v4875_v27 = vpop.eup %4874 }
 0xcda   :  { %v3222_v28 = vmul.f32 %v4875_v27, %v4873_v9  ;;  %v7175_v9 = vld [vmem:[#allocation2 + $0x28] ss:$16 sps:$4 sm:$0xff]   ;;  %v7178_v27 = vld [vmem:[#allocation2 + $0x4] ss:$16 sps:$4 sm:$0xff]  }
 0xcdb   :  { %7874 = vst [vmem:[#allocation41_spill] sm:$0xff] %v7175_v9  ;;  %7875 = vst [vmem:[#allocation42_spill] sm:$0xff] %v7178_v27 }
 0xcdc   :  { %v3223_v44 = vpack.c.bf16 %v3222_v28, %v3222_v28  ;;  %v7181_v28 = vld [vmem:[#allocation2 + $0xc] ss:$16 sps:$4 sm:$0xff]  }
 0xcdd   :  { %7876 = vst [vmem:[#allocation43_spill] sm:$0xff] %v7181_v28 }
 0xcde   :  { %3257 = vmatmul.mubr.bf16.vlgmr.msra.gmra.mxu0 %v3223_v44  ;;  %3298 = vmatmul.mubr.bf16.vlgmr.msra.gmra.mxu1 %v3223_v44  ;;  %v7184_v44 = vld [vmem:[#allocation2] ss:$16 sps:$4 sm:$0xff]  }
 0xcdf   :  { %3407 = vmatpush1.bf16.msra.mxu0 %v6816_v21  ;;  %3448 = vmatpush1.bf16.msra.mxu1 %v6819_v40  ;;  %v7846_v21 = vld [vmem:[#allocation64_spill] sm:$0xff]  ;;  %v7847_v40 = vld [vmem:[#allocation65_spill] sm:$0xff]  ;;  %7877 = vst [vmem:[#allocation44_spill] sm:$0xff] %v7184_v44 }
 0xce0   :  { %3408 = vmatprep.subr.bf16.mxu0 %v6822_v17  ;;  %3449 = vmatprep.subr.bf16.mxu1 %v6825_v63  ;;  %v7848_v17 = vld [vmem:[#allocation66_spill] sm:$0xff]  ;;  %v7849_v63 = vld [vmem:[#allocation67_spill] sm:$0xff] }
 0xce1   :  { %3438 = vmatprep.mubr.bf16.mxu0 %v7586_v24  ;;  %3479 = vmatprep.mubr.bf16.mxu1 %v7586_v24 }
 0xce3   :  { %3409 = vmatpush1.bf16.msra.mxu0 %v6830_v58  ;;  %3450 = vmatpush1.bf16.msra.mxu1 %v7842_v53  ;;  %v7852_v58 = vld [vmem:[#allocation70_spill] sm:$0xff] }
 0xce4   :  { %3410 = vmatprep.subr.bf16.mxu0 %v7843_v46  ;;  %3451 = vmatprep.subr.bf16.mxu1 %v7844_v33  ;;  %v7187_v53 = vld [vmem:[#allocation2 + $0x8] ss:$16 sps:$4 sm:$0xff]   ;;  %v7880_v33 = vld [vmem:[#allocation33_spill] sm:$0xff] }
 0xce5   :  { %7878 = vst [vmem:[#allocation45_spill] sm:$0xff] %v7187_v53  ;;  %v7879_v46 = vld [vmem:[#allocation32_spill] sm:$0xff] }
 0xce7   :  { %3411 = vmatpush1.bf16.msra.mxu0 %v7845_v32  ;;  %3452 = vmatpush1.bf16.msra.mxu1 %v7846_v21  ;;  %v3316_v32 = vstv %s3315_s20  ;;  %v3366_v21 = vstv %s3365_s22 }
 0xce8   :  { %3412 = vmatprep.subr.bf16.mxu0 %v7847_v40  ;;  %3453 = vmatprep.subr.bf16.mxu1 %v7848_v17  ;;  %v3311_v40 = vld [vmem:[%s7192_s7] sm:$0xff]  ;;  %vm3317_vm14 = vcmp.eq.s32.totalorder %v5466_v38, %v3316_v32  ;;  %vm3367_vm15 = vcmp.eq.s32.totalorder %v5466_v38, %v3366_v21 }
 0xce9   :  { %v3361_v17 = vld [vmem:[%s7196_s2] sm:$0xff] }
 0xceb   :  { %3413 = vmatpush1.bf16.msra.mxu0 %v7849_v63  ;;  %3454 = vmatpush1.bf16.msra.mxu1 %v7850_v45  ;;  %v3312_v63 = vld [vmem:[%s7192_s7 + $0x8] sm:$0xff] }
 0xcec   :  { %3414 = vmatprep.subr.bf16.mxu0 %v7851_v51  ;;  %3455 = vmatprep.subr.bf16.mxu1 %v7852_v58  ;;  %v3362_v45 = vld [vmem:[%s7196_s2 + $0x8] sm:$0xff]  ;;  %v3320_v51 = vsel %vm3317_vm14, %v3311_v40, 0.0  ;;  %v3370_v58 = vsel %vm3367_vm15, %v3361_v17, 0.0  ;;  %v3313_v40 = vld [vmem:[%s7192_s7 + $0x10] sm:$0xff] }
 0xced   :  { %v3363_v17 = vld [vmem:[%s7196_s2 + $0x10] sm:$0xff] }
 0xcef   :  { %3415 = vmatpush1.bf16.msra.mxu0 %v7853_v54  ;;  %3456 = vmatpush1.bf16.msra.mxu1 %v7854_v13 }
 0xcf0   :  { %3416 = vmatprep.subr.bf16.mxu0 %v7855_v2  ;;  %3457 = vmatprep.subr.bf16.mxu1 %v7856_v30  ;;  %v3321_v2 = vsel %vm3317_vm14, %v3312_v63, 0.0  ;;  %v3371_v30 = vsel %vm3367_vm15, %v3362_v45, 0.0 }
 0xcf3   :  { %3417 = vmatpush1.bf16.msra.mxu0 %v7857_v23  ;;  %3458 = vmatpush1.bf16.msra.mxu1 %v7858_v41 }
 0xcf4   :  { %3418 = vmatprep.subr.bf16.mxu0 %v7859_v7  ;;  %3459 = vmatprep.subr.bf16.mxu1 %v7860_v36  ;;  %v3324_v7 = vrot.slane %v3320_v51, 4  ;;  %v3374_v36 = vrot.slane %v3370_v58, 4 }
 0xcf7   :  { %3419 = vmatpush1.bf16.msra.mxu0 %v7861_v18  ;;  %3460 = vmatpush1.bf16.msra.mxu1 %v7862_v31 }
 0xcf8   :  { %3420 = vmatprep.subr.bf16.mxu0 %v7863_v20  ;;  %3461 = vmatprep.subr.bf16.mxu1 %v7864_v57  ;;  %v3330_v20 = vrot.slane %v3321_v2, 4  ;;  %v3380_v57 = vrot.slane %v3371_v30, 4 }
 0xcfa   :  { %v3331_v63 = vadd.f32 %v3330_v20, %v3321_v2  ;;  %v3381_v45 = vadd.f32 %v3380_v57, %v3371_v30 }
 0xcfb   :  { %3421 = vmatpush1.bf16.msra.mxu0 %v7865_v12  ;;  %3462 = vmatpush1.bf16.msra.mxu1 %v7866_v62 }
 0xcfc   :  { %3517 = vmatprep.subr.bf16.mxu0 %v7090_v59  ;;  %3558 = vmatprep.subr.bf16.mxu1 %v7093_v15 }
 0xcfe   :  { %3439 = vmatmul.mubr.bf16.vlgmr.msra.gmra.mxu0 %v7008_v16  ;;  %3480 = vmatmul.mubr.bf16.vlgmr.msra.gmra.mxu1 %v7008_v16  ;;  %v7112_v16 = vld [vmem:[#allocation2 + $0xc0] ss:$16 sps:$4 sm:$0xff]  }
 0xcff   :  { %3518 = vmatpush1.bf16.msra.mxu0 %v7098_v39  ;;  %3559 = vmatpush1.bf16.msra.mxu1 %v7101_v22 }
 0xd00   :  { %3519 = vmatprep.subr.bf16.mxu0 %v7104_v25  ;;  %3560 = vmatprep.subr.bf16.mxu1 %v7107_v14 }
 0xd01   :  { %3549 = vmatprep.mubr.bf16.mxu0 %v7586_v24  ;;  %3590 = vmatprep.mubr.bf16.mxu1 %v7586_v24 }
 0xd03   :  { %3520 = vmatpush1.bf16.msra.mxu0 %v7112_v16  ;;  %3561 = vmatpush1.bf16.msra.mxu1 %v7115_v6 }
 0xd04   :  { %3521 = vmatprep.subr.bf16.mxu0 %v7118_v19  ;;  %3562 = vmatprep.subr.bf16.mxu1 %v7121_v55 }
 0xd07   :  { %3522 = vmatpush1.bf16.msra.mxu0 %v7124_v37  ;;  %3563 = vmatpush1.bf16.msra.mxu1 %v7127_v29 }
 0xd08   :  { %3523 = vmatprep.subr.bf16.mxu0 %v7130_v42  ;;  %3564 = vmatprep.subr.bf16.mxu1 %v7133_v0 }
 0xd0b   :  { %3524 = vmatpush1.bf16.msra.mxu0 %v7136_v5  ;;  %3565 = vmatpush1.bf16.msra.mxu1 %v7139_v10 }
 0xd0c   :  { %3525 = vmatprep.subr.bf16.mxu0 %v7142_v8  ;;  %3566 = vmatprep.subr.bf16.mxu1 %v7145_v52 }
 0xd0f   :  { %3526 = vmatpush1.bf16.msra.mxu0 %v7148_v34  ;;  %3567 = vmatpush1.bf16.msra.mxu1 %v7151_v61 }
 0xd10   :  { %3527 = vmatprep.subr.bf16.mxu0 %v7154_v60  ;;  %3568 = vmatprep.subr.bf16.mxu1 %v7157_v47 }
 0xd13   :  { %3528 = vmatpush1.bf16.msra.mxu0 %v7160_v35  ;;  %3569 = vmatpush1.bf16.msra.mxu1 %v7163_v49 }
 0xd14   :  { %3529 = vmatprep.subr.bf16.mxu0 %v7166_v48  ;;  %3570 = vmatprep.subr.bf16.mxu1 %v7169_v43 }
 0xd17   :  { %3530 = vmatpush1.bf16.msra.mxu0 %v7172_v56  ;;  %3571 = vmatpush1.bf16.msra.mxu1 %v7175_v9  ;;  %v3364_v56 = vld [vmem:[%s7196_s2 + $0x18] sm:$0xff] }
 0xd18   :  { %3531 = vmatprep.subr.bf16.mxu0 %v7178_v27  ;;  %3572 = vmatprep.subr.bf16.mxu1 %v7181_v28  ;;  %v3322_v28 = vsel %vm3317_vm14, %v3313_v40, 0.0  ;;  %v3382_v27 = vrot.slane %v3381_v45, 2  ;;  %v3373_v30 = vsel %vm3367_vm15, %v3364_v56, 0.0 }
 0xd19   :  { %v3392_v48 = vrot.slane %v3373_v30, 4 }
 0xd1b   :  { %3532 = vmatpush1.bf16.msra.mxu0 %v7184_v44  ;;  %3573 = vmatpush1.bf16.msra.mxu1 %v7187_v53 }
 0xd1c   :  { %3628 = vmatprep.subr.bf16.mxu0 %v7879_v46  ;;  %3669 = vmatprep.subr.bf16.mxu1 %v7880_v33  ;;  %v3325_v46 = vadd.f32 %v3324_v7, %v3320_v51  ;;  %v3375_v33 = vadd.f32 %v3374_v36, %v3370_v58  ;;  %v3383_v36 = vadd.f32 %v3382_v27, %v3381_v45 }
 0xd1d   :  { %v3393_v27 = vadd.f32 %v3392_v48, %v3373_v30 }
 0xd1e   :  { %v3326_v53 = vrot.slane %v3325_v46, 2  ;;  %v3376_v44 = vrot.slane %v3375_v33, 2  ;;  %v3384_v35 = vrot.slane %v3383_v36, 1 }
 0xd1f   :  { %v3394_v21 = vrot.slane %v3393_v27, 2 }
 0xd20   :  { %v3327_v51 = vadd.f32 %v3326_v53, %v3325_v46  ;;  %v3377_v58 = vadd.f32 %v3376_v44, %v3375_v33  ;;  %v3385_v32 = vadd.f32 %v3384_v35, %v3383_v36 }
 0xd22   :  { %v3328_v40 = vrot.slane %v3327_v51, 1 }
 0xd24   :  { %v3329_v53 = vadd.f32 %v3328_v40, %v3327_v51 }
 0xd26   :  { %v3348_v56 = vsel %vm148_vm2, %v3329_v53, 0.0 }
 0xd9e   :  { %v7206_v54 = vpop.f32.mrf.mxu0  ;;  %v7208_v13 = vpop.f32.mrf.mxu1 }
 0xda0   :  { %v7214_v23 = vpop.f32.mrf.mxu0  ;;  %v7216_v41 = vpop.f32.mrf.mxu1 }
 0xda2   :  { %v3262_v18 = vpop.f32.mrf.mxu0  ;;  %v3303_v31 = vpop.f32.mrf.mxu1 }
 0xda3   :  { %v3372_v18 = vsel %vm3367_vm15, %v3363_v17, 0.0  ;;  %v3332_v31 = vrot.slane %v3331_v63, 2  ;;  %v3378_v17 = vrot.slane %v3377_v58, 1 }
 0xda4   :  { %v3263_v12 = vpop.f32.mrf.mxu0  ;;  %v3304_v62 = vpop.f32.mrf.mxu1  ;;  %v3386_v9 = vrot.slane %v3372_v18, 4 }
 0xda5   :  { %v3336_v12 = vrot.slane %v3322_v28, 4  ;;  %v3314_v62 = vld [vmem:[%s7192_s7 + $0x18] sm:$0xff]  ;;  %v3333_v7 = vadd.f32 %v3332_v31, %v3331_v63  ;;  %v3379_v44 = vadd.f32 %v3378_v17, %v3377_v58  ;;  %v3399_v31 = vsel %vm201_vm3, %v3385_v32, 0.0 }
 0xda6   :  { %v3323_v2 = vsel %vm3317_vm14, %v3314_v62, 0.0  ;;  %v3387_v57 = vadd.f32 %v3386_v9, %v3372_v18 }
 0xda7   :  { %v3337_v20 = vadd.f32 %v3336_v12, %v3322_v28  ;;  %v3342_v43 = vrot.slane %v3323_v2, 4  ;;  %v3334_v49 = vrot.slane %v3333_v7, 1  ;;  %v3398_v9 = vsel %vm201_vm3, %v3379_v44, 0.0 }
 0xda8   :  { %v3388_v60 = vrot.slane %v3387_v57, 2 }
 0xda9   :  { %v3338_v47 = vrot.slane %v3337_v20, 2  ;;  %v3343_v46 = vadd.f32 %v3342_v43, %v3323_v2  ;;  %v3335_v33 = vadd.f32 %v3334_v49, %v3333_v7  ;;  %v3402_v43 = vadd.f32 %v3398_v9, %v3348_v56 }
 0xdaa   :  { %v3389_v45 = vadd.f32 %v3388_v60, %v3387_v57  ;;  %v3395_v60 = vadd.f32 %v3394_v21, %v3393_v27 }
 0xdab   :  { %v3339_v63 = vadd.f32 %v3338_v47, %v3337_v20  ;;  %v3344_v28 = vrot.slane %v3343_v46, 2  ;;  %v3349_v18 = vsel %vm148_vm2, %v3335_v33, 0.0 }
 0xdac   :  { %v3390_v49 = vrot.slane %v3389_v45, 1  ;;  %v3403_v35 = vadd.f32 %v3399_v31, %v3349_v18  ;;  %v3396_v40 = vrot.slane %v3395_v60, 1 }
 0xdad   :  { %v3340_v48 = vrot.slane %v3339_v63, 1  ;;  %v3345_v47 = vadd.f32 %v3344_v28, %v3343_v46 }
 0xdae   :  { %v3391_v7 = vadd.f32 %v3390_v49, %v3389_v45  ;;  %v3397_v45 = vadd.f32 %v3396_v40, %v3395_v60 }
 0xdaf   :  { %v3341_v58 = vadd.f32 %v3340_v48, %v3339_v63  ;;  %v3346_v57 = vrot.slane %v3345_v47, 1 }
 0xdb0   :  { %v3400_v46 = vsel %vm201_vm3, %v3391_v7, 0.0  ;;  %v3401_v28 = vsel %vm201_vm3, %v3397_v45, 0.0  ;;  %v5173_v45 = vld [vmem:[#allocation3 + $0xa8] ss:$16 sps:$4 sm:$0xff]  }
 0xdb1   :  { %v3350_v44 = vsel %vm148_vm2, %v3341_v58, 0.0  ;;  %v3347_v63 = vadd.f32 %v3346_v57, %v3345_v47 }
 0xdb2   :  { %v3404_v56 = vadd.f32 %v3400_v46, %v3350_v44  ;;  %v5167_v44 = vld [vmem:[#allocation3 + $0xcc] ss:$16 sps:$4 sm:$0xff]   ;;  %v5168_v46 = vld [vmem:[#allocation3 + $0xc0] ss:$16 sps:$4 sm:$0xff]  }
 0xdb3   :  { %v3351_v9 = vsel %vm148_vm2, %v3347_v63, 0.0  ;;  %v5172_v63 = vld [vmem:[#allocation3 + $0xa0] ss:$16 sps:$4 sm:$0xff]  }
 0xdb4   :  { %v3405_v18 = vadd.f32 %v3401_v28, %v3351_v9  ;;  %v5175_v9 = vld [vmem:[#allocation3 + $0x8c] ss:$16 sps:$4 sm:$0xff]   ;;  %v5176_v28 = vld [vmem:[#allocation3 + $0x80] ss:$16 sps:$4 sm:$0xff]  }
 0xdbe   :  { %v3440_v12 = vpop.f32.mrf.mxu0  ;;  %v3481_v62 = vpop.f32.mrf.mxu1 }
 0xdbf   :  { %v3488_v51 = vadd.f32 %v3440_v12, %v3402_v43  ;;  %v3490_v21 = vadd.f32 %v3481_v62, %v3404_v56  ;;  %v5174_v56 = vld [vmem:[#allocation3 + $0x84] ss:$16 sps:$4 sm:$0xff]  }
 0xdc0   :  { %v3442_v36 = vpop.f32.mrf.mxu0  ;;  %v3483_v2 = vpop.f32.mrf.mxu1 }
 0xdc1   :  { %v4404_v30 = vmul.f32 -1.442695, %v3488_v51  ;;  %v3489_v20 = vadd.f32 %v3442_v36, %v3403_v35  ;;  %v4406_v31 = vmul.f32 -1.442695, %v3490_v21  ;;  %v3491_v48 = vadd.f32 %v3483_v2, %v3405_v18  ;;  %v5177_v21 = vld [vmem:[#allocation3 + $0x88] ss:$16 sps:$4 sm:$0xff]  }
 0xdc2   :  { %v3444_v17 = vpop.f32.mrf.mxu0  ;;  %v3485_v53 = vpop.f32.mrf.mxu1  ;;  %v5178_v18 = vld [vmem:[#allocation3 + $0x64] ss:$16 sps:$4 sm:$0xff]  }
 0xdc3   :  { %4876 = vpow2.f32 %v4404_v30  ;;  %v4405_v27 = vmul.f32 -1.442695, %v3489_v20  ;;  %v5164_v17 = vld [vmem:[#allocation3 + $0xe0] ss:$16 sps:$4 sm:$0xff]   ;;  %v5165_v53 = vld [vmem:[#allocation3 + $0xe8] ss:$16 sps:$4 sm:$0xff]  }
 0xdc4   :  { %v3445_v33 = vpop.f32.mrf.mxu0  ;;  %v3486_v32 = vpop.f32.mrf.mxu1 }
 0xdc5   :  { %4878 = vpow2.f32 %v4405_v27  ;;  %v5169_v27 = vld [vmem:[#allocation3 + $0xc8] ss:$16 sps:$4 sm:$0xff]   ;;  %v5170_v33 = vld [vmem:[#allocation3 + $0xa4] ss:$16 sps:$4 sm:$0xff]   ;;  %v5171_v32 = vld [vmem:[#allocation3 + $0xac] ss:$16 sps:$4 sm:$0xff]  }
 0xdc6   :  { %4880 = vpow2.f32 %v4406_v31  ;;  %v5179_v31 = vld [vmem:[#allocation3 + $0x6c] ss:$16 sps:$4 sm:$0xff]  }
 0xdd0   :  { %v4877_v43 = vpop.eup %4876 }
 0xdd1   :  { %v3501_v49 = vadd.f32 1.0, %v4877_v43  ;;  %v5180_v43 = vld [vmem:[#allocation3 + $0x60] ss:$16 sps:$4 sm:$0xff]  }
 0xdd2   :  { %v4879_v35 = vpop.eup %4878 }
 0xdd3   :  { %4882 = vrcp.f32 %v3501_v49  ;;  %v3502_v12 = vadd.f32 1.0, %v4879_v35  ;;  %v4881_v47 = vpop.eup %4880  ;;  %v5182_v49 = vld [vmem:[#allocation3 + $0x44] ss:$16 sps:$4 sm:$0xff]   ;;  %v5183_v35 = vld [vmem:[#allocation3 + $0x4c] ss:$16 sps:$4 sm:$0xff]  }
 0xdd4   :  { %4884 = vtanh.f32 %v3491_v48  ;;  %v3503_v7 = vadd.f32 1.0, %v4881_v47  ;;  %v5181_v48 = vld [vmem:[#allocation3 + $0x68] ss:$16 sps:$4 sm:$0xff]  }
 0xdd5   :  { %4886 = vrcp.f32 %v3502_v12  ;;  %v5184_v12 = vld [vmem:[#allocation3 + $0x40] ss:$16 sps:$4 sm:$0xff]   ;;  %v5185_v47 = vld [vmem:[#allocation3 + $0x48] ss:$16 sps:$4 sm:$0xff]  }
 0xdd6   :  { %4888 = vrcp.f32 %v3503_v7  ;;  %v5189_v7 = vld [vmem:[#allocation3 + $0x28] ss:$16 sps:$4 sm:$0xff]  }
 0xde0   :  { %v4883_v60 = vpop.eup %4882 }
 0xde1   :  { %v4885_v51 = vpop.eup %4884 }
 0xde2   :  { %v4887_v58 = vpop.eup %4886  ;;  %v3512_v30 = vmul.f32 %v4885_v51, %v4883_v60  ;;  %v5186_v60 = vld [vmem:[#allocation3 + $0x24] ss:$16 sps:$4 sm:$0xff]   ;;  %v5187_v51 = vld [vmem:[#allocation3 + $0x2c] ss:$16 sps:$4 sm:$0xff]  }
 0xde3   :  { %v3511_v36 = vmul.f32 %v4887_v58, %v7005_v11  ;;  %v4889_v2 = vpop.eup %4888  ;;  %v5166_v11 = vld [vmem:[#allocation3 + $0xc4] ss:$16 sps:$4 sm:$0xff]   ;;  %v5188_v58 = vld [vmem:[#allocation3 + $0x20] ss:$16 sps:$4 sm:$0xff]  }
 0xde5   :  { %v7247_v62 = vadd.f32 %v3512_v30, %v3511_v36  ;;  %v5190_v36 = vld [vmem:[#allocation3 + $0x4] ss:$16 sps:$4 sm:$0xff]   ;;  %v5191_v30 = vld [vmem:[#allocation3 + $0xc] ss:$16 sps:$4 sm:$0xff]  }
 0xde7   :  { %4890 = vtanh.f32 %v7247_v62 }
 0xdf4   :  { %v4891_v20 = vpop.eup %4890 }
 0xdf5   :  { %v3515_v57 = vmul.f32 %v4891_v20, %v4889_v2  ;;  %v5192_v2 = vld [vmem:[#allocation3] ss:$16 sps:$4 sm:$0xff]   ;;  %v5193_v20 = vld [vmem:[#allocation3 + $0x8] ss:$16 sps:$4 sm:$0xff]  }
 0xdf7   :  { %v7250_v40 = vpack.c.bf16 %v3515_v57, %v3515_v57  ;;  %v5194_v57 = vld [vmem:[#allocation10 + $0xe4] ss:$16 sps:$4 sm:$0xff]  }
 0xdf9   :  { %3550 = vmatmul.mubr.bf16.vlgmr.msra.gmra.mxu0 %v7250_v40  ;;  %3591 = vmatmul.mubr.bf16.vlgmr.msra.gmra.mxu1 %v7250_v40 }
 0xdfa   :  { %3629 = vmatpush1.bf16.msra.mxu0 %v5164_v17  ;;  %3670 = vmatpush1.bf16.msra.mxu1 %v5165_v53  ;;  %v5195_v17 = vld [vmem:[#allocation10 + $0xec] ss:$16 sps:$4 sm:$0xff]  }
 0xdfb   :  { %3630 = vmatprep.subr.bf16.mxu0 %v5166_v11  ;;  %3671 = vmatprep.subr.bf16.mxu1 %v5167_v44 }
 0xdfc   :  { %3660 = vmatprep.mubr.bf16.mxu0 %v7586_v24  ;;  %3701 = vmatprep.mubr.bf16.mxu1 %v7586_v24 }
 0xdfe   :  { %3631 = vmatpush1.bf16.msra.mxu0 %v5168_v46  ;;  %3672 = vmatpush1.bf16.msra.mxu1 %v5169_v27 }
 0xdff   :  { %3632 = vmatprep.subr.bf16.mxu0 %v5170_v33  ;;  %3673 = vmatprep.subr.bf16.mxu1 %v5171_v32 }
 0xe02   :  { %3633 = vmatpush1.bf16.msra.mxu0 %v5172_v63  ;;  %3674 = vmatpush1.bf16.msra.mxu1 %v5173_v45 }
 0xe03   :  { %3634 = vmatprep.subr.bf16.mxu0 %v5174_v56  ;;  %3675 = vmatprep.subr.bf16.mxu1 %v5175_v9 }
 0xe06   :  { %3635 = vmatpush1.bf16.msra.mxu0 %v5176_v28  ;;  %3676 = vmatpush1.bf16.msra.mxu1 %v5177_v21 }
 0xe07   :  { %3636 = vmatprep.subr.bf16.mxu0 %v5178_v18  ;;  %3677 = vmatprep.subr.bf16.mxu1 %v5179_v31 }
 0xe0a   :  { %3637 = vmatpush1.bf16.msra.mxu0 %v5180_v43  ;;  %3678 = vmatpush1.bf16.msra.mxu1 %v5181_v48 }
 0xe0b   :  { %3638 = vmatprep.subr.bf16.mxu0 %v5182_v49  ;;  %3679 = vmatprep.subr.bf16.mxu1 %v5183_v35 }
 0xe0e   :  { %3639 = vmatpush1.bf16.msra.mxu0 %v5184_v12  ;;  %3680 = vmatpush1.bf16.msra.mxu1 %v5185_v47 }
 0xe0f   :  { %3640 = vmatprep.subr.bf16.mxu0 %v5186_v60  ;;  %3681 = vmatprep.subr.bf16.mxu1 %v5187_v51 }
 0xe12   :  { %3641 = vmatpush1.bf16.msra.mxu0 %v5188_v58  ;;  %3682 = vmatpush1.bf16.msra.mxu1 %v5189_v7 }
 0xe13   :  { %3642 = vmatprep.subr.bf16.mxu0 %v5190_v36  ;;  %3683 = vmatprep.subr.bf16.mxu1 %v5191_v30 }
 0xe16   :  { %3643 = vmatpush1.bf16.msra.mxu0 %v5192_v2  ;;  %3684 = vmatpush1.bf16.msra.mxu1 %v5193_v20 }
 0xe17   :  { %3810 = vmatprep.subr.bf16.mxu0 %v5194_v57  ;;  %3851 = vmatprep.subr.bf16.mxu1 %v5195_v17 }
 0xeb9   :  { %v3551_v53 = vpop.f32.mrf.mxu0  ;;  %v3592_v11 = vpop.f32.mrf.mxu1 }
 0xeba   :  { %v3552_v44 = vadd.f32 %v3551_v53, %v7206_v54  ;;  %v3593_v31 = vadd.f32 %v3592_v11, %v7208_v13  ;;  %v5196_v53 = vld [vmem:[#allocation10 + $0xe0] ss:$16 sps:$4 sm:$0xff]   ;;  %v5197_v11 = vld [vmem:[#allocation10 + $0xe8] ss:$16 sps:$4 sm:$0xff]  }
 0xebb   :  { %v3553_v46 = vpop.f32.mrf.mxu0  ;;  %v3594_v27 = vpop.f32.mrf.mxu1 }
 0xebc   :  { %v3599_v33 = vadd.f32 %v3552_v44, %v5447_v1  ;;  %v3554_v32 = vadd.f32 %v3553_v46, %v7214_v23  ;;  %v3601_v54 = vadd.f32 %v3593_v31, %v5451_v3  ;;  %v3595_v43 = vadd.f32 %v3594_v27, %v7216_v41  ;;  %v5198_v44 = vld [vmem:[#allocation10 + $0xc4] ss:$16 sps:$4 sm:$0xff]   ;;  %v5199_v46 = vld [vmem:[#allocation10 + $0xcc] ss:$16 sps:$4 sm:$0xff]   ;;  %v5201_v27 = vld [vmem:[#allocation10 + $0xc8] ss:$16 sps:$4 sm:$0xff]  }
 0xebd   :  { %v3555_v63 = vpop.f32.mrf.mxu0  ;;  %v3596_v45 = vpop.f32.mrf.mxu1  ;;  %v5211_v31 = vld [vmem:[#allocation10 + $0x6c] ss:$16 sps:$4 sm:$0xff]  }
 0xebe   :  { %v4407_v56 = vmul.f32 -1.442695, %v3599_v33  ;;  %v3600_v9 = vadd.f32 %v3554_v32, %v7626_v50  ;;  %v4409_v48 = vmul.f32 -1.442695, %v3601_v54  ;;  %v3602_v23 = vadd.f32 %v3595_v43, %v5453_v4  ;;  %v5202_v33 = vld [vmem:[#allocation10 + $0xa4] ss:$16 sps:$4 sm:$0xff]  }
 0xebf   :  { %v3556_v28 = vpop.f32.mrf.mxu0  ;;  %v3597_v21 = vpop.f32.mrf.mxu1  ;;  %v5203_v32 = vld [vmem:[#allocation10 + $0xac] ss:$16 sps:$4 sm:$0xff]   ;;  %v5204_v63 = vld [vmem:[#allocation10 + $0xa0] ss:$16 sps:$4 sm:$0xff]   ;;  %v5205_v45 = vld [vmem:[#allocation10 + $0xa8] ss:$16 sps:$4 sm:$0xff]  }
 0xec0   :  { %4892 = vpow2.f32 %v4407_v56  ;;  %v4408_v18 = vmul.f32 -1.442695, %v3600_v9  ;;  %v5206_v56 = vld [vmem:[#allocation10 + $0x84] ss:$16 sps:$4 sm:$0xff]   ;;  %v5207_v9 = vld [vmem:[#allocation10 + $0x8c] ss:$16 sps:$4 sm:$0xff]  }
 0xec1   :  { %v5208_v28 = vld [vmem:[#allocation10 + $0x80] ss:$16 sps:$4 sm:$0xff]   ;;  %v5209_v21 = vld [vmem:[#allocation10 + $0x88] ss:$16 sps:$4 sm:$0xff]  }
 0xec2   :  { %4894 = vpow2.f32 %v4408_v18  ;;  %v5210_v18 = vld [vmem:[#allocation10 + $0x64] ss:$16 sps:$4 sm:$0xff]   ;;  %v5212_v54 = vld [vmem:[#allocation10 + $0x60] ss:$16 sps:$4 sm:$0xff]   ;;  %v5213_v43 = vld [vmem:[#allocation10 + $0x68] ss:$16 sps:$4 sm:$0xff]  }
 0xec3   :  { %4896 = vpow2.f32 %v4409_v48  ;;  %v5214_v48 = vld [vmem:[#allocation10 + $0x44] ss:$16 sps:$4 sm:$0xff]  }
 0xecd   :  { %v4893_v49 = vpop.eup %4892 }
 0xece   :  { %v3612_v35 = vadd.f32 1.0, %v4893_v49  ;;  %v5215_v49 = vld [vmem:[#allocation10 + $0x4c] ss:$16 sps:$4 sm:$0xff]  }
 0xecf   :  { %v4895_v12 = vpop.eup %4894 }
 0xed0   :  { %4898 = vrcp.f32 %v3612_v35  ;;  %v3613_v47 = vadd.f32 1.0, %v4895_v12  ;;  %v4897_v60 = vpop.eup %4896  ;;  %v5217_v35 = vld [vmem:[#allocation10 + $0x48] ss:$16 sps:$4 sm:$0xff]   ;;  %v5218_v12 = vld [vmem:[#allocation10 + $0x24] ss:$16 sps:$4 sm:$0xff]  }
 0xed1   :  { %4900 = vtanh.f32 %v3602_v23  ;;  %v3614_v13 = vadd.f32 1.0, %v4897_v60  ;;  %v5216_v23 = vld [vmem:[#allocation10 + $0x40] ss:$16 sps:$4 sm:$0xff]  }
 0xed2   :  { %4902 = vrcp.f32 %v3613_v47  ;;  %v5219_v47 = vld [vmem:[#allocation10 + $0x2c] ss:$16 sps:$4 sm:$0xff]   ;;  %v5220_v60 = vld [vmem:[#allocation10 + $0x20] ss:$16 sps:$4 sm:$0xff]  }
 0xed3   :  { %4904 = vrcp.f32 %v3614_v13  ;;  %v5224_v13 = vld [vmem:[#allocation10] ss:$16 sps:$4 sm:$0xff]  }
 0xedd   :  { %v4899_v51 = vpop.eup %4898 }
 0xede   :  { %v4901_v58 = vpop.eup %4900 }
 0xedf   :  { %v4903_v7 = vpop.eup %4902  ;;  %v3623_v30 = vmul.f32 %v4901_v58, %v4899_v51  ;;  %v5221_v51 = vld [vmem:[#allocation10 + $0x28] ss:$16 sps:$4 sm:$0xff]   ;;  %v5222_v58 = vld [vmem:[#allocation10 + $0x4] ss:$16 sps:$4 sm:$0xff]  }
 0xee0   :  { %v3622_v36 = vmul.f32 %v4903_v7, %v7055_v26  ;;  %v4905_v2 = vpop.eup %4904  ;;  %v5200_v26 = vld [vmem:[#allocation10 + $0xc0] ss:$16 sps:$4 sm:$0xff]   ;;  %v5223_v7 = vld [vmem:[#allocation10 + $0xc] ss:$16 sps:$4 sm:$0xff]  }
 0xee2   :  { %v7265_v41 = vadd.f32 %v3623_v30, %v3622_v36  ;;  %v5225_v36 = vld [vmem:[#allocation10 + $0x8] ss:$16 sps:$4 sm:$0xff]  }
 0xee4   :  { %4906 = vtanh.f32 %v7265_v41 }
 0xef1   :  { %v4907_v20 = vpop.eup %4906 }
 0xef2   :  { %v3626_v57 = vmul.f32 %v4907_v20, %v4905_v2 }
 0xef4   :  { %v3627_v17 = vpack.c.bf16 %v3626_v57, %v3626_v57 }
 0xef6   :  { %3661 = vmatmul.mubr.bf16.vlgmr.msra.gmra.mxu0 %v3627_v17  ;;  %3702 = vmatmul.mubr.bf16.vlgmr.msra.gmra.mxu1 %v3627_v17 }
 0xef7   :  { %3811 = vmatpush1.bf16.msra.mxu0 %v5196_v53  ;;  %3852 = vmatpush1.bf16.msra.mxu1 %v5197_v11 }
 0xef8   :  { %3812 = vmatprep.subr.bf16.mxu0 %v5198_v44  ;;  %3853 = vmatprep.subr.bf16.mxu1 %v5199_v46 }
 0xef9   :  { %3842 = vmatprep.mubr.bf16.mxu0 %v7586_v24  ;;  %3883 = vmatprep.mubr.bf16.mxu1 %v7586_v24 }
 0xefb   :  { %3813 = vmatpush1.bf16.msra.mxu0 %v5200_v26  ;;  %3854 = vmatpush1.bf16.msra.mxu1 %v5201_v27 }
 0xefc   :  { %3814 = vmatprep.subr.bf16.mxu0 %v5202_v33  ;;  %3855 = vmatprep.subr.bf16.mxu1 %v5203_v32 }
 0xeff   :  { %3815 = vmatpush1.bf16.msra.mxu0 %v5204_v63  ;;  %3856 = vmatpush1.bf16.msra.mxu1 %v5205_v45  ;;  %v3717_v45 = vld [vmem:[%s7306_s29 + $0x10] sm:$0xff] }
 0xf00   :  { %3816 = vmatprep.subr.bf16.mxu0 %v5206_v56  ;;  %3857 = vmatprep.subr.bf16.mxu1 %v5207_v9  ;;  %v3767_v56 = vld [vmem:[%s7310_s30 + $0x10] sm:$0xff] }
 0xf03   :  { %3817 = vmatpush1.bf16.msra.mxu0 %v5208_v28  ;;  %3858 = vmatpush1.bf16.msra.mxu1 %v5209_v21 }
 0xf04   :  { %3818 = vmatprep.subr.bf16.mxu0 %v5210_v18  ;;  %3859 = vmatprep.subr.bf16.mxu1 %v5211_v31 }
 0xf07   :  { %3819 = vmatpush1.bf16.msra.mxu0 %v5212_v54  ;;  %3860 = vmatpush1.bf16.msra.mxu1 %v5213_v43 }
 0xf08   :  { %3820 = vmatprep.subr.bf16.mxu0 %v5214_v48  ;;  %3861 = vmatprep.subr.bf16.mxu1 %v5215_v49 }
 0xf0b   :  { %3821 = vmatpush1.bf16.msra.mxu0 %v5216_v23  ;;  %3862 = vmatpush1.bf16.msra.mxu1 %v5217_v35  ;;  %v3718_v35 = vld [vmem:[%s7306_s29 + $0x18] sm:$0xff] }
 0xf0c   :  { %3822 = vmatprep.subr.bf16.mxu0 %v5218_v12  ;;  %3863 = vmatprep.subr.bf16.mxu1 %v5219_v47  ;;  %v3768_v12 = vld [vmem:[%s7310_s30 + $0x18] sm:$0xff] }
 0xf0f   :  { %3823 = vmatpush1.bf16.msra.mxu0 %v5220_v60  ;;  %3864 = vmatpush1.bf16.msra.mxu1 %v5221_v51 }
 0xf10   :  { %3824 = vmatprep.subr.bf16.mxu0 %v5222_v58  ;;  %3865 = vmatprep.subr.bf16.mxu1 %v5223_v7 }
 0xf13   :  { %3825 = vmatpush1.bf16.msra.mxu0 %v5224_v13  ;;  %3866 = vmatpush1.bf16.msra.mxu1 %v5225_v36 }
 0xf14   :  { %3921 = vmatprep.subr.bf16.mxu0 %v7090_v59  ;;  %3962 = vmatprep.subr.bf16.mxu1 %v7093_v15  ;;  %v7882_v59 = vld [vmem:[#allocation34_spill] sm:$0xff]  ;;  %v7883_v15 = vld [vmem:[#allocation36_spill] sm:$0xff] }
 0xf16   :  { %3843 = vmatmul.mubr.bf16.vlgmr.msra.gmra.mxu0 %v7250_v40  ;;  %3884 = vmatmul.mubr.bf16.vlgmr.msra.gmra.mxu1 %v7250_v40 }
 0xf17   :  { %3922 = vmatpush1.bf16.msra.mxu0 %v7098_v39  ;;  %3963 = vmatpush1.bf16.msra.mxu1 %v7101_v22  ;;  %v7884_v39 = vld [vmem:[#allocation37_spill] sm:$0xff]  ;;  %v7885_v22 = vld [vmem:[#allocation39_spill] sm:$0xff] }
 0xf18   :  { %3923 = vmatprep.subr.bf16.mxu0 %v7104_v25  ;;  %3964 = vmatprep.subr.bf16.mxu1 %v7107_v14  ;;  %v7886_v25 = vld [vmem:[#allocation38_spill] sm:$0xff]  ;;  %v7887_v14 = vld [vmem:[#allocation40_spill] sm:$0xff] }
 0xf19   :  { %3953 = vmatprep.mubr.bf16.mxu0 %v7586_v24  ;;  %3994 = vmatprep.mubr.bf16.mxu1 %v7586_v24  ;;  %v7881_v24 = vld [vmem:[#allocation35_spill] sm:$0xff] }
 0xf1b   :  { %3924 = vmatpush1.bf16.msra.mxu0 %v7112_v16  ;;  %3965 = vmatpush1.bf16.msra.mxu1 %v7115_v6  ;;  %v7888_v16 = vld [vmem:[#allocation41_spill] sm:$0xff]  ;;  %v7889_v6 = vld [vmem:[#allocation42_spill] sm:$0xff] }
 0xf1c   :  { %3925 = vmatprep.subr.bf16.mxu0 %v7118_v19  ;;  %3966 = vmatprep.subr.bf16.mxu1 %v7121_v55  ;;  %v7890_v19 = vld [vmem:[#allocation43_spill] sm:$0xff]  ;;  %v7891_v55 = vld [vmem:[#allocation44_spill] sm:$0xff] }
 0xf1f   :  { %3926 = vmatpush1.bf16.msra.mxu0 %v7124_v37  ;;  %3967 = vmatpush1.bf16.msra.mxu1 %v7127_v29  ;;  %v7892_v37 = vld [vmem:[#allocation45_spill] sm:$0xff]  ;;  %v3720_v29 = vstv %s3719_s26 }
 0xf20   :  { %3927 = vmatprep.subr.bf16.mxu0 %v7130_v42  ;;  %3968 = vmatprep.subr.bf16.mxu1 %v7133_v0  ;;  %v3770_v42 = vstv %s3769_s28  ;;  %v3715_v0 = vld [vmem:[%s7306_s29] sm:$0xff]  ;;  %vm3721_vm0 = vcmp.eq.s32.totalorder %v5466_v38, %v3720_v29 }
 0xf21   :  { %vm3771_vm1 = vcmp.eq.s32.totalorder %v5466_v38, %v3770_v42  ;;  %v3726_v31 = vsel %vm3721_vm0, %v3717_v45, 0.0  ;;  %v3727_v7 = vsel %vm3721_vm0, %v3718_v35, 0.0 }
 0xf22   :  { %v3776_v54 = vsel %vm3771_vm1, %v3767_v56, 0.0  ;;  %v3740_v49 = vrot.slane %v3726_v31, 4  ;;  %v3777_v13 = vsel %vm3771_vm1, %v3768_v12, 0.0 }
 0xf23   :  { %3928 = vmatpush1.bf16.msra.mxu0 %v7136_v5  ;;  %3969 = vmatpush1.bf16.msra.mxu1 %v7139_v10  ;;  %v3765_v5 = vld [vmem:[%s7310_s30] sm:$0xff]  ;;  %v3716_v10 = vld [vmem:[%s7306_s29 + $0x8] sm:$0xff]  ;;  %v3790_v23 = vrot.slane %v3776_v54, 4 }
 0xf24   :  { %3929 = vmatprep.subr.bf16.mxu0 %v7142_v8  ;;  %3970 = vmatprep.subr.bf16.mxu1 %v7145_v52  ;;  %v3766_v8 = vld [vmem:[%s7310_s30 + $0x8] sm:$0xff]  ;;  %v3724_v52 = vsel %vm3721_vm0, %v3715_v0, 0.0  ;;  %v3725_v30 = vsel %vm3721_vm0, %v3716_v10, 0.0  ;;  %v3741_v36 = vadd.f32 %v3740_v49, %v3726_v31 }
 0xf25   :  { %v3775_v2 = vsel %vm3771_vm1, %v3766_v8, 0.0  ;;  %v3728_v17 = vrot.slane %v3724_v52, 4  ;;  %v3734_v46 = vrot.slane %v3725_v30, 4 }
 0xf26   :  { %v3784_v26 = vrot.slane %v3775_v2, 4 }
 0xf27   :  { %3930 = vmatpush1.bf16.msra.mxu0 %v7148_v34  ;;  %3971 = vmatpush1.bf16.msra.mxu1 %v7151_v61  ;;  %v3774_v34 = vsel %vm3771_vm1, %v3765_v5, 0.0  ;;  %v3729_v32 = vadd.f32 %v3728_v17, %v3724_v52  ;;  %v3735_v9 = vadd.f32 %v3734_v46, %v3725_v30 }
 0xf28   :  { %3931 = vmatprep.subr.bf16.mxu0 %v7881_v24  ;;  %3972 = vmatprep.subr.bf16.mxu1 %v7882_v59  ;;  %v3778_v53 = vrot.slane %v3774_v34, 4  ;;  %v3785_v28 = vadd.f32 %v3784_v26, %v3775_v2  ;;  %v3791_v24 = vadd.f32 %v3790_v23, %v3776_v54 }
 0xf29   :  { %v3730_v21 = vrot.slane %v3729_v32, 2  ;;  %v3736_v43 = vrot.slane %v3735_v9, 2 }
 0xf2a   :  { %v3779_v63 = vadd.f32 %v3778_v53, %v3774_v34  ;;  %v3786_v48 = vrot.slane %v3785_v28, 2 }
 0xf2b   :  { %3932 = vmatpush1.bf16.msra.mxu0 %v7883_v15  ;;  %3973 = vmatpush1.bf16.msra.mxu1 %v7884_v39  ;;  %v3731_v47 = vadd.f32 %v3730_v21, %v3729_v32  ;;  %v3737_v51 = vadd.f32 %v3736_v43, %v3735_v9  ;;  %v3746_v39 = vrot.slane %v3727_v7, 4 }
 0xf2c   :  { %3933 = vmatprep.subr.bf16.mxu0 %v7885_v22  ;;  %3974 = vmatprep.subr.bf16.mxu1 %v7886_v25  ;;  %v3780_v18 = vrot.slane %v3779_v63, 2  ;;  %v3787_v58 = vadd.f32 %v3786_v48, %v3785_v28  ;;  %v3796_v22 = vrot.slane %v3777_v13, 4 }
 0xf2d   :  { %v3732_v59 = vrot.slane %v3731_v47, 1  ;;  %v3738_v25 = vrot.slane %v3737_v51, 1 }
 0xf2e   :  { %v3781_v60 = vadd.f32 %v3780_v18, %v3779_v63  ;;  %v3797_v0 = vadd.f32 %v3796_v22, %v3777_v13 }
 0xf2f   :  { %3934 = vmatpush1.bf16.msra.mxu0 %v7887_v14  ;;  %3975 = vmatpush1.bf16.msra.mxu1 %v7888_v16  ;;  %v3788_v14 = vrot.slane %v3787_v58, 1  ;;  %v3742_v16 = vrot.slane %v3741_v36, 2  ;;  %v3739_v5 = vadd.f32 %v3738_v25, %v3737_v51 }
 0xf30   :  { %3935 = vmatprep.subr.bf16.mxu0 %v7889_v6  ;;  %3976 = vmatprep.subr.bf16.mxu1 %v7890_v19  ;;  %v3782_v15 = vrot.slane %v3781_v60, 1  ;;  %v3792_v6 = vrot.slane %v3791_v24, 2  ;;  %v3733_v19 = vadd.f32 %v3732_v59, %v3731_v47  ;;  %v3798_v30 = vrot.slane %v3797_v0, 2 }
 0xf31   :  { %v3789_v29 = vadd.f32 %v3788_v14, %v3787_v58  ;;  %v3743_v10 = vadd.f32 %v3742_v16, %v3741_v36  ;;  %v3753_v2 = vsel %vm148_vm2, %v3739_v5, 0.0 }
 0xf32   :  { %v3793_v8 = vadd.f32 %v3792_v6, %v3791_v24  ;;  %v3752_v42 = vsel %vm148_vm2, %v3733_v19, 0.0 }
 0xf33   :  { %3936 = vmatpush1.bf16.msra.mxu0 %v7891_v55  ;;  %3977 = vmatpush1.bf16.msra.mxu1 %v7892_v37  ;;  %v3783_v55 = vadd.f32 %v3782_v15, %v3781_v60  ;;  %v3747_v37 = vadd.f32 %v3746_v39, %v3727_v7  ;;  %v3803_v17 = vsel %vm201_vm3, %v3789_v29, 0.0 }
 0xf34   :  { %v3807_v46 = vadd.f32 %v3803_v17, %v3753_v2 }
 0xf35   :  { %v3802_v52 = vsel %vm201_vm3, %v3783_v55, 0.0  ;;  %v3748_v34 = vrot.slane %v3747_v37, 2 }
 0xf36   :  { %v3806_v53 = vadd.f32 %v3802_v52, %v3752_v42 }
 0xf37   :  { %v3749_v26 = vadd.f32 %v3748_v34, %v3747_v37 }
 0xf39   :  { %v3750_v31 = vrot.slane %v3749_v26, 1 }
 0xf3b   :  { %v3751_v60 = vadd.f32 %v3750_v31, %v3749_v26 }
 0xf3d   :  { %v3755_v7 = vsel %vm148_vm2, %v3751_v60, 0.0 }
 0xfb6   :  { %v7320_v61 = vpop.f32.mrf.mxu0  ;;  %v7322_v40 = vpop.f32.mrf.mxu1 }
 0xfb8   :  { %v7328_v20 = vpop.f32.mrf.mxu0  ;;  %v7330_v57 = vpop.f32.mrf.mxu1 }
 0xfba   :  { %v3666_v11 = vpop.f32.mrf.mxu0  ;;  %v3707_v44 = vpop.f32.mrf.mxu1 }
 0xfbb   :  { %v3744_v11 = vrot.slane %v3743_v10, 1  ;;  %v3794_v44 = vrot.slane %v3793_v8, 1 }
 0xfbc   :  { %v3667_v27 = vpop.f32.mrf.mxu0  ;;  %v3708_v33 = vpop.f32.mrf.mxu1 }
 0xfbd   :  { %v3799_v27 = vadd.f32 %v3798_v30, %v3797_v0  ;;  %v3745_v45 = vadd.f32 %v3744_v11, %v3743_v10  ;;  %v3795_v56 = vadd.f32 %v3794_v44, %v3793_v8 }
 0xfbf   :  { %v3800_v54 = vrot.slane %v3799_v27, 1  ;;  %v3754_v49 = vsel %vm148_vm2, %v3745_v45, 0.0  ;;  %v3804_v23 = vsel %vm201_vm3, %v3795_v56, 0.0 }
 0xfc0   :  { %v3808_v58 = vadd.f32 %v3804_v23, %v3754_v49 }
 0xfc1   :  { %v3801_v51 = vadd.f32 %v3800_v54, %v3799_v27 }
 0xfc3   :  { %v3805_v13 = vsel %vm201_vm3, %v3801_v51, 0.0 }
 0xfc4   :  { %v3809_v24 = vadd.f32 %v3805_v13, %v3755_v7 }
 0xfd6   :  { %v3844_v33 = vpop.f32.mrf.mxu0  ;;  %v3885_v32 = vpop.f32.mrf.mxu1 }
 0xfd7   :  { %v3892_v63 = vadd.f32 %v3844_v33, %v3806_v53  ;;  %v3894_v36 = vadd.f32 %v3885_v32, %v3808_v58 }
 0xfd8   :  { %v3846_v9 = vpop.f32.mrf.mxu0  ;;  %v3887_v28 = vpop.f32.mrf.mxu1 }
 0xfd9   :  { %v4416_v21 = vmul.f32 -1.442695, %v3892_v63  ;;  %v3893_v18 = vadd.f32 %v3846_v9, %v3807_v46  ;;  %v4418_v59 = vmul.f32 -1.442695, %v3894_v36  ;;  %v3895_v39 = vadd.f32 %v3887_v28, %v3809_v24 }
 0xfda   :  { %v3848_v43 = vpop.f32.mrf.mxu0  ;;  %v3889_v48 = vpop.f32.mrf.mxu1 }
 0xfdb   :  { %4908 = vpow2.f32 %v4416_v21  ;;  %v4417_v35 = vmul.f32 -1.442695, %v3893_v18 }
 0xfdc   :  { %v3849_v12 = vpop.f32.mrf.mxu0  ;;  %v3890_v47 = vpop.f32.mrf.mxu1 }
 0xfdd   :  { %4910 = vpow2.f32 %v4417_v35 }
 0xfde   :  { %4912 = vpow2.f32 %v4418_v59 }
 0xfe8   :  { %v4909_v15 = vpop.eup %4908 }
 0xfe9   :  { %v3905_v22 = vadd.f32 1.0, %v4909_v15 }
 0xfea   :  { %v4911_v25 = vpop.eup %4910 }
 0xfeb   :  { %4914 = vrcp.f32 %v3905_v22  ;;  %v3906_v14 = vadd.f32 1.0, %v4911_v25  ;;  %v4913_v16 = vpop.eup %4912 }
 0xfec   :  { %4916 = vtanh.f32 %v3895_v39  ;;  %v3907_v37 = vadd.f32 1.0, %v4913_v16 }
 0xfed   :  { %4918 = vrcp.f32 %v3906_v14 }
 0xfee   :  { %4920 = vrcp.f32 %v3907_v37 }
 0xff8   :  { %v4915_v6 = vpop.eup %4914 }
 0xff9   :  { %v4917_v19 = vpop.eup %4916 }
 0xffa   :  { %v4919_v55 = vpop.eup %4918  ;;  %v3916_v0 = vmul.f32 %v4917_v19, %v4915_v6 }
 0xffb   :  { %v3915_v38 = vmul.f32 %v4919_v55, %v7247_v62  ;;  %v4921_v29 = vpop.eup %4920 }
 0xffd   :  { %v3917_v5 = vadd.f32 %v3916_v0, %v3915_v38 }
 0xfff   :  { %4922 = vtanh.f32 %v3917_v5 }
0x100c   :  { %v4923_v10 = vpop.eup %4922 }
0x100d   :  { %v3919_v8 = vmul.f32 %v4923_v10, %v4921_v29 }
0x100f   :  { %v3920_v42 = vpack.c.bf16 %v3919_v8, %v3919_v8 }
0x1011   :  { %3954 = vmatmul.mubr.bf16.vlgmr.msra.gmra.mxu0 %v3920_v42  ;;  %3995 = vmatmul.mubr.bf16.vlgmr.msra.gmra.mxu1 %v3920_v42 }
0x10d1   :  { %v3955_v52 = vpop.f32.mrf.mxu0  ;;  %v3996_v34 = vpop.f32.mrf.mxu1 }
0x10d2   :  { %v3956_v30 = vadd.f32 %v3955_v52, %v7320_v61  ;;  %v3997_v63 = vadd.f32 %v3996_v34, %v7322_v40 }
0x10d3   :  { %v3957_v2 = vpop.f32.mrf.mxu0  ;;  %v3998_v17 = vpop.f32.mrf.mxu1 }
0x10d4   :  { %v4003_v53 = vadd.f32 %v3956_v30, %v5447_v1  ;;  %v3958_v62 = vadd.f32 %v3957_v2, %v7328_v20  ;;  %v4005_v61 = vadd.f32 %v3997_v63, %v5451_v3  ;;  %v3999_v45 = vadd.f32 %v3998_v17, %v7330_v57 }
0x10d5   :  { %v3959_v11 = vpop.f32.mrf.mxu0  ;;  %v4000_v44 = vpop.f32.mrf.mxu1 }
0x10d6   :  { %v4419_v46 = vmul.f32 -1.442695, %v4003_v53  ;;  %v4004_v26 = vadd.f32 %v3958_v62, %v7626_v50  ;;  %v4421_v56 = vmul.f32 -1.442695, %v4005_v61  ;;  %v4006_v20 = vadd.f32 %v3999_v45, %v5453_v4 }
0x10d7   :  { %v3960_v27 = vpop.f32.mrf.mxu0  ;;  %v4001_v33 = vpop.f32.mrf.mxu1 }
0x10d8   :  { %4924 = vpow2.f32 %v4419_v46  ;;  %v4420_v32 = vmul.f32 -1.442695, %v4004_v26 }
0x10da   :  { %4926 = vpow2.f32 %v4420_v32 }
0x10db   :  { %4928 = vpow2.f32 %v4421_v56 }
0x10e5   :  { %v4925_v1 = vpop.eup %4924 }
0x10e6   :  { %v4016_v9 = vadd.f32 1.0, %v4925_v1 }
0x10e7   :  { %v4927_v28 = vpop.eup %4926 }
0x10e8   :  { %4930 = vrcp.f32 %v4016_v9  ;;  %v4017_v50 = vadd.f32 1.0, %v4927_v28  ;;  %v4929_v21 = vpop.eup %4928 }
0x10e9   :  { %4932 = vtanh.f32 %v4006_v20  ;;  %v4018_v40 = vadd.f32 1.0, %v4929_v21 }
0x10ea   :  { %4934 = vrcp.f32 %v4017_v50 }
0x10eb   :  { %4936 = vrcp.f32 %v4018_v40 }
0x10f5   :  { %v4931_v18 = vpop.eup %4930 }
0x10f6   :  { %v4933_v31 = vpop.eup %4932 }
0x10f7   :  { %v4935_v54 = vpop.eup %4934  ;;  %v4027_v43 = vmul.f32 %v4933_v31, %v4931_v18 }
0x10f8   :  { %v4026_v3 = vmul.f32 %v4935_v54, %v7265_v41  ;;  %v4937_v48 = vpop.eup %4936 }
0x10fa   :  { %v4028_v57 = vadd.f32 %v4027_v43, %v4026_v3 }
0x10fc   :  { %4938 = vtanh.f32 %v4028_v57 }
0x1109   :  { %v4939_v4 = vpop.eup %4938 }
0x110a   :  { %v4030_v49 = vmul.f32 %v4939_v4, %v4937_v48 }
0x110b   :  { %5372 = dma.done.wait [#allocation5 + $0x2], 1024 }
0x110c   :  { %5373 = vsyncadd [#allocation5 + $0x2], 4294966272  ;;  %v5386_v23 = vmov 0.0   ;;  %vm5387_vm2 = vmmov 0   ;;  %v5226_v35 = vld [vmem:[#allocation4 + $0x38] sm:$0xff]   ;;  %v5227_v12 = vld [vmem:[#allocation4 + $0x30] sm:$0xff]   ;;  %v4034_v13 = vpack.c.bf16 %v4030_v49, %v4030_v49 }
0x110d   :  { %4458 = vmatprep.subr.bf16.mxu0 %v5386_v23  ;;  %4474 = vmatprep.mubr.msk.bf16.mxu0 %vm5387_vm2, %v5386_v23  ;;  %v5228_v47 = vld [vmem:[#allocation4 + $0x28] sm:$0xff]   ;;  %v5229_v41 = vld [vmem:[#allocation4 + $0x20] sm:$0xff]   ;;  %v5230_v60 = vld [vmem:[#allocation4 + $0x18] sm:$0xff]  }
0x110e   :  { %4459 = vmatpush3.bf16.msra.mxu0 %v5226_v35  ;;  %v5231_v51 = vld [vmem:[#allocation4 + $0x10] sm:$0xff]   ;;  %v5232_v58 = vld [vmem:[#allocation4 + $0x8] sm:$0xff]   ;;  %v5233_v7 = vld [vmem:[#allocation4] sm:$0xff]  }
0x110f   :  { %4460 = vmatprep.subr.bf16.mxu0 %v5386_v23  ;;  %v4051_v36 = vld [vmem:[%s7380_s4] sm:$0xff] }
0x1112   :  { %4461 = vmatpush3.bf16.msra.mxu0 %v5227_v12 }
0x1113   :  { %4462 = vmatprep.subr.bf16.mxu0 %v5386_v23 }
0x1116   :  { %4463 = vmatpush3.bf16.msra.mxu0 %v5228_v47 }
0x1117   :  { %4464 = vmatprep.subr.bf16.mxu0 %v5386_v23 }
0x111a   :  { %4465 = vmatpush3.bf16.msra.mxu0 %v5229_v41 }
0x111b   :  { %4466 = vmatprep.subr.bf16.mxu0 %v5386_v23 }
0x111e   :  { %4467 = vmatpush3.bf16.msra.mxu0 %v5230_v60 }
0x111f   :  { %4468 = vmatprep.subr.bf16.mxu0 %v5386_v23 }
0x1122   :  { %4469 = vmatpush3.bf16.msra.mxu0 %v5231_v51 }
0x1123   :  { %4470 = vmatprep.subr.bf16.mxu0 %v5386_v23 }
0x1126   :  { %4471 = vmatpush3.bf16.msra.mxu0 %v5232_v58 }
0x1127   :  { %4472 = vmatprep.subr.bf16.mxu0 %v5386_v23 }
0x112a   :  { %4473 = vmatpush3.bf16.msra.mxu0 %v5233_v7 }
0x112d   :  { %4475 = vmatmul.mubr.bf16.vlgmr.msra.gmra.mxu0 %v4034_v13 }
0x11ed   :  { %v4134_v24 = vpop.f32.mrf.mxu0 }
0x11ee   :  { %v4135_v59 = vadd.f32 %v4134_v24, %v4051_v36 }
0x11ef   :  { %v4476_v15 = vpop.f32.mrf.mxu0 }
0x11f0   :  { %4140 = vst [vmem:[%s7384_s8] sm:$0xff] %v4135_v59 }
0x11f1   :  { %v4137_v39 = vpop.f32.mrf.mxu0 }
0x11f3   :  { %v4477_v22 = vpop.f32.mrf.mxu0 }
0x11f4   :  { %4145 = vsyncpa [#allocation9], 1 }
0x11f5   :  { %4146 = vsyncpa [#allocation11], 1 }
0x11f6   :  { %4147 = vsyncmov [#allocation5] }
0x11f9   :  { %s4148_s13 = vpop.sfrf %4147 }
0x11fa   :  { %p4430_p2 = scmp.ne.s32.totalorder %s4148_s13, 0 }
0x11fc   :  { %4152 = shalt.err (%p4430_p2)  }
0x11fd   :  { %4154 = vsyncmov [#allocation5 + $0x1] }
0x1200   :  { %s4155_s5 = vpop.sfrf %4154 }
0x1201   :  { %p4431_p3 = scmp.ne.s32.totalorder %s4155_s5, 0 }
0x1203   :  { %4159 = shalt.err (%p4431_p3)  }
0x1204   :  { %4161 = vsyncmov [#allocation5 + $0x2] }
0x1207   :  { %s4162_s4 = vpop.sfrf %4161 }
0x1208   :  { %p4432_p4 = scmp.ne.s32.totalorder %s4162_s4, 0 }
0x120a   :  { %4166 = shalt.err (%p4432_p4)  }

</bundles_post_ra>
